<compile_context>
chip_gen: v5e
topology: v5e:2x2
jax: 0.10.0
libtpu: 0.0.40
codegen_flags: <defaults>
</compile_context>

<pallas_src>
import functools
import math

import numpy as np
import jax
import jax.numpy as jnp
from jax.experimental import pallas as pl
from jax.experimental.pallas import tpu as pltpu


# ------------------------------------------------------------------------------ Pallas kernel


def _sigmoid(z):
    return 1.0 / (1.0 + jnp.exp(-z))


def _attention_rings_kernel(x_ref, idx_ref, wq_ref, bq_ref, w1_ref, b1_ref,
                            wv_ref, bv_ref, ctx_ref, score_ref, s_scr, xs_scr,
                            *, ring):
    """Fused AttentionRings forward for one (batch, vertex-tile) grid point.

    x_ref    : [1, Vp, Cin]   full (padded) point cloud of the current batch (VMEM resident)
    idx_ref  : [Vt, ring]     ring-neighbour indices for this tile's vertices (int32)
    ctx_ref  : [1, Vt, Cin]   context vectors
    score_ref: [1, Vt, ring]  raw sigmoid attention scores
    s_scr    : [Vp, 1]        per-vertex score sigmoid(V(tanh(W1(Q(x)))))   (per-batch cache)
    xs_scr   : [Vp, Cin]      x * s (values pre-scaled by their score)      (per-batch cache)
    """
    vt = idx_ref.shape[0]
    vp = x_ref.shape[1]

    # ---- per-batch work: score MLP over all vertices, computed once (first vertex tile) ----
    @pl.when(pl.program_id(1) == 0)
    def _():
        x_b = x_ref[0]                                                         # [Vp, Cin]
        q = jnp.dot(x_b, wq_ref[...], preferred_element_type=jnp.float32) + bq_ref[...]
        h = jnp.tanh(jnp.dot(q, w1_ref[...], preferred_element_type=jnp.float32) + b1_ref[...])
        # V: Linear(out_v, 1) done as a lane reduction (avoids an N=1 MXU matmul).
        s = _sigmoid(jnp.sum(h * wv_ref[...], axis=-1, keepdims=True) + bv_ref[...])
        s_scr[...] = s                                                         # [Vp, 1]
        xs_scr[...] = x_b * s                                                  # [Vp, Cin]

    # ---- per-tile work: ring gather + normalisation + weighted aggregation -----------------
    idx_t = idx_ref[...]                                                       # [Vt, ring]
    s_col = s_scr[...]                                                         # [Vp, 1]
    lane_v = jax.lax.broadcasted_iota(jnp.int32, (vt, vp), 1)
    lane_r = jax.lax.broadcasted_iota(jnp.int32, (vt, ring), 1)

    msum = jnp.zeros((vt, vp), jnp.float32)       # multiplicity of each source vertex per row
    scores = jnp.zeros((vt, ring), jnp.float32)   # gathered raw scores (module output)
    denom = jnp.zeros((vt, 1), jnp.float32)
    for j in range(ring):                         # static unroll, ring == 7
        hit = (lane_v == idx_t[:, j:j + 1]).astype(jnp.float32)                # [Vt, Vp] one-hot
        msum = msum + hit
        s_j = jnp.dot(hit, s_col, preferred_element_type=jnp.float32)          # gathered score
        scores = scores + jnp.where(lane_r == j, s_j, 0.0)
        denom = denom + s_j

    inv = pl.reciprocal(denom, approx=True)                                    # EUP slot
    # sum_j w_j * x[n_j]  ==  (msum @ (x * s)) / denom
    ctx = jnp.dot(msum, xs_scr[...], preferred_element_type=jnp.float32) * inv
    ctx_ref[0] = ctx
    score_ref[0] = scores


# ------------------------------------------------------------------------------ wrappers


def _round_up(n, m):
    return ((n + m - 1) // m) * m


@functools.partial(jax.jit, static_argnames=("v_tile",))
def _attention_rings_padded(x_pad, idx_pad, wq, bq, w1, b1, wv, bv, *, v_tile):
    b, vp, cin = x_pad.shape
    q = wq.shape[1]
    h = w1.shape[1]
    ring = idx_pad.shape[1]
    grid = (b, vp // v_tile)

    kernel = functools.partial(_attention_rings_kernel, ring=ring)
    return pl.pallas_call(
        kernel,
        out_shape=(jax.ShapeDtypeStruct((b, vp, cin), jnp.float32),
                   jax.ShapeDtypeStruct((b, vp, ring), jnp.float32)),
        grid_spec=pltpu.PrefetchScalarGridSpec(
            num_scalar_prefetch=0,
            grid=grid,
            in_specs=[
                pl.BlockSpec((1, vp, cin), lambda bi, ti: (bi, 0, 0)),   # per-batch x slab
                pl.BlockSpec((v_tile, ring), lambda bi, ti: (ti, 0)),    # ring indices tile
                pl.BlockSpec((cin, q), lambda bi, ti: (0, 0)),           # Q weight
                pl.BlockSpec((1, q), lambda bi, ti: (0, 0)),             # Q bias
                pl.BlockSpec((q, h), lambda bi, ti: (0, 0)),             # W1 weight
                pl.BlockSpec((1, h), lambda bi, ti: (0, 0)),             # W1 bias
                pl.BlockSpec((1, h), lambda bi, ti: (0, 0)),             # V weight (row vec)
                pl.BlockSpec((1, 1), lambda bi, ti: (0, 0)),             # V bias
            ],
            out_specs=(
                pl.BlockSpec((1, v_tile, cin), lambda bi, ti: (bi, ti, 0)),
                pl.BlockSpec((1, v_tile, ring), lambda bi, ti: (bi, ti, 0)),
            ),
            scratch_shapes=[
                pltpu.VMEM((vp, 1), jnp.float32),      # per-vertex score cache
                pltpu.VMEM((vp, cin), jnp.float32),    # score-scaled values cache
            ],
        ),
        compiler_params=pltpu.CompilerParams(
            dimension_semantics=("parallel", "arbitrary"),
            vmem_limit_bytes=32 * 1024 * 1024,
        ),
    )(x_pad, idx_pad, wq, bq, w1, b1, wv, bv)


def pad_neigh_orders(neigh_orders):
    """Mirror AttentionRing.forward: 6-rings get their first neighbour repeated -> 7."""
    rows = []
    for data in neigh_orders:
        data = list(data)
        if len(data) == 6:
            data.append(data[0])
        assert len(data) == 7, "each ring must have 6 or 7 neighbours"
        rows.append(data)
    return np.asarray(rows, dtype=np.int32)


def attention_rings_forward(params, x, neigh_orders):
    """JAX/Pallas equivalent of AttentionRings.forward -> (context_vector, score)."""
    idx = pad_neigh_orders(neigh_orders)                        # [V, 7] static topology
    b, v, cin = x.shape
    ring = idx.shape[1]

    v_tile = min(128, _round_up(v, 8))
    vp = _round_up(v, v_tile)

    x_pad = jnp.zeros((b, vp, cin), jnp.float32).at[:, :v, :].set(x)
    idx_np = np.zeros((vp, ring), np.int32)
    idx_np[:v] = idx
    idx_pad = jnp.asarray(idx_np)

    ctx, score = _attention_rings_padded(
        x_pad, idx_pad, params["wq"], params["bq"], params["w1"], params["b1"],
        params["wv"], params["bv"], v_tile=v_tile)
    return ctx[:, :v, :], score[:, :v, :, None]                 # score: [B, V, 7, 1]


def init_attention_rings(key, in_units, out_v_units, out_q_units):
    # AttentionRing's SelfAttention applies W1 = Linear(in_units, out_v_units) to the query
    # produced by Q = Linear(in_units, out_q_units), so out_q_units must equal in_units for
    # the reference module to be well-typed.
    assert out_q_units == in_units

    def linear(k, fan_in, fan_out):
        kw, kb = jax.random.split(k)
        bound = 1.0 / math.sqrt(fan_in)
        w = jax.random.uniform(kw, (fan_in, fan_out), jnp.float32, -bound, bound)
        bias = jax.random.uniform(kb, (1, fan_out), jnp.float32, -bound, bound)
        return w, bias

    k1, k2, k3 = jax.random.split(key, 3)
    wq, bq = linear(k1, in_units, out_q_units)        # self.Q
    w1, b1 = linear(k2, in_units, out_v_units)        # SelfAttention.W1
    wv, bv = linear(k3, out_v_units, 1)               # SelfAttention.V
    return dict(wq=wq, bq=bq, w1=w1, b1=b1,
                wv=wv.T,                              # stored [1, out_v] for a lane reduction
                bv=bv)                                # [1, 1]


def attention_rings_reference(params, x, idx):
    """Pure-JAX transcription of the PyTorch forward (for the self-check)."""
    hp = jax.lax.Precision.HIGHEST
    query = jnp.einsum("bvc,cq->bvq", x, params["wq"], precision=hp) + params["bq"]
    q_g = jnp.take(query, idx, axis=1)                                   # [B, V, 7, Q]
    v_g = jnp.take(x, idx, axis=1)                                       # [B, V, 7, Cin]
    h = jnp.tanh(jnp.einsum("bvrq,qh->bvrh", q_g, params["w1"], precision=hp) + params["b1"])
    score = jax.nn.sigmoid(jnp.sum(h * params["wv"], axis=-1, keepdims=True)
                           + params["bv"][0, 0])                         # [B, V, 7, 1]
    w = score / jnp.sum(score, axis=2, keepdims=True)
    ctx = jnp.sum(w * v_g, axis=2)
    return ctx, score


# ------------------------------------------------------------------------------ main


if __name__ == "__main__":
    B, V, IN_UNITS = 2, 256, 32
    OUT_Q_UNITS = IN_UNITS        # required for the reference module to type-check
    OUT_V_UNITS = 16

    # Deterministic synthetic ring neighbourhoods: a mix of 6-rings and 7-rings (like an
    # icosphere); the 6-rings exercise the repeat-first-neighbour padding branch.
    neigh_orders = []
    for i in range(V):
        deltas = (0, 1, -1, 2, -2, 3) if i % 4 == 0 else (0, 1, -1, 2, -2, 3, -3)
        neigh_orders.append([(i + d) % V for d in deltas])

    key = jax.random.PRNGKey(0)
    kx, kp = jax.random.split(key)
    x = jax.random.normal(kx, (B, V, IN_UNITS), jnp.float32)
    params = init_attention_rings(kp, IN_UNITS, OUT_V_UNITS, OUT_Q_UNITS)

    ctx, score = attention_rings_forward(params, x, neigh_orders)
    ctx = jax.block_until_ready(ctx)
    score = jax.block_until_ready(score)

    assert ctx.shape == (B, V, IN_UNITS)
    assert score.shape == (B, V, 7, 1)
    assert bool(jnp.all(jnp.isfinite(ctx))) and bool(jnp.all(jnp.isfinite(score)))

    # Cross-check against the pure-JAX transcription of the PyTorch forward.
    idx_full = jnp.asarray(pad_neigh_orders(neigh_orders))
    ctx_ref, score_ref = attention_rings_reference(params, x, idx_full)
    assert bool(jnp.allclose(ctx, ctx_ref, rtol=2e-2, atol=2e-3)), \
        float(jnp.max(jnp.abs(ctx - ctx_ref)))
    assert bool(jnp.allclose(score, score_ref, rtol=2e-2, atol=2e-3)), \
        float(jnp.max(jnp.abs(score - score_ref)))

    print("KERNEL_OK")
</pallas_src>

<mosaic_0001>
module attributes {stable_mosaic.version = 11 : i64} {
  func.func @_attention_rings_kernel(%arg0: i32, %arg1: i32, %arg2: memref<1x256x32xf32, #tpu.memory_space<vmem>>, %arg3: memref<128x7xi32, #tpu.memory_space<vmem>>, %arg4: memref<32x32xf32, #tpu.memory_space<vmem>>, %arg5: memref<1x32xf32, #tpu.memory_space<vmem>>, %arg6: memref<32x16xf32, #tpu.memory_space<vmem>>, %arg7: memref<1x16xf32, #tpu.memory_space<vmem>>, %arg8: memref<1x16xf32, #tpu.memory_space<vmem>>, %arg9: memref<1x1xf32, #tpu.memory_space<vmem>>, %arg10: memref<1x128x32xf32, #tpu.memory_space<vmem>>, %arg11: memref<1x128x7xf32, #tpu.memory_space<vmem>>, %arg12: memref<256x1xf32, #tpu.memory_space<vmem>>, %arg13: memref<256x32xf32, #tpu.memory_space<vmem>>) attributes {dimension_semantics = [#tpu.dimension_semantics<parallel>, #tpu.dimension_semantics<arbitrary>], iteration_bounds = array<i64: 2, 2>, scalar_prefetch = 0 : i64, scratch_operands = 2 : i64, tpu.core_type = #tpu.core_type<tc>, window_params = [{transform_indices = @transform_0, window_bounds = array<i64: 1, 256, 32>}, {transform_indices = @transform_1, window_bounds = array<i64: 128, 7>}, {pipeline_mode = #tpu.pipeline_mode<synchronous>, transform_indices = @transform_2, window_bounds = array<i64: 32, 32>}, {pipeline_mode = #tpu.pipeline_mode<synchronous>, transform_indices = @transform_3, window_bounds = array<i64: 1, 32>}, {pipeline_mode = #tpu.pipeline_mode<synchronous>, transform_indices = @transform_4, window_bounds = array<i64: 32, 16>}, {pipeline_mode = #tpu.pipeline_mode<synchronous>, transform_indices = @transform_5, window_bounds = array<i64: 1, 16>}, {pipeline_mode = #tpu.pipeline_mode<synchronous>, transform_indices = @transform_6, window_bounds = array<i64: 1, 16>}, {pipeline_mode = #tpu.pipeline_mode<synchronous>, transform_indices = @transform_7, window_bounds = array<i64: 1, 1>}, {transform_indices = @transform_8, window_bounds = array<i64: 1, 128, 32>}, {transform_indices = @transform_9, window_bounds = array<i64: 1, 128, 7>}]} {
    %c0_i32 = arith.constant 0 : i32
    %0 = arith.cmpi eq, %arg1, %c0_i32 : i32
    %1 = arith.extui %0 : i1 to i32
    %c0_i32_0 = arith.constant 0 : i32
    %2 = arith.cmpi ne, %1, %c0_i32_0 : i32
    scf.if %2 {
      %c0_30 = arith.constant 0 : index
      %c0_31 = arith.constant 0 : index
      %c0_32 = arith.constant 0 : index
      %126 = vector.load %arg2[%c0_30, %c0_31, %c0_32] : memref<1x256x32xf32, #tpu.memory_space<vmem>>, vector<1x256x32xf32>
      %127 = vector.shape_cast %126 : vector<1x256x32xf32> to vector<256x32xf32>
      %c0_33 = arith.constant 0 : index
      %c0_34 = arith.constant 0 : index
      %128 = vector.load %arg4[%c0_33, %c0_34] : memref<32x32xf32, #tpu.memory_space<vmem>>, vector<32x32xf32>
      %cst_35 = arith.constant dense<0.000000e+00> : vector<256x32xf32>
      %129 = tpu.matmul %127, %128, %cst_35 {dimension_numbers = #tpu.dot_dimension_numbers<[1], [0], [0], [1], [0, 0, 1, 1], [], []>} : vector<256x32xf32>, vector<32x32xf32>, vector<256x32xf32> -> vector<256x32xf32>
      %c0_36 = arith.constant 0 : index
      %c0_37 = arith.constant 0 : index
      %130 = vector.load %arg5[%c0_36, %c0_37] : memref<1x32xf32, #tpu.memory_space<vmem>>, vector<1x32xf32>
      %131 = vector.broadcast %130 : vector<1x32xf32> to vector<256x32xf32>
      %132 = arith.addf %129, %131 : vector<256x32xf32>
      %c0_38 = arith.constant 0 : index
      %c0_39 = arith.constant 0 : index
      %133 = vector.load %arg6[%c0_38, %c0_39] : memref<32x16xf32, #tpu.memory_space<vmem>>, vector<32x16xf32>
      %cst_40 = arith.constant dense<0.000000e+00> : vector<256x16xf32>
      %134 = tpu.matmul %132, %133, %cst_40 {dimension_numbers = #tpu.dot_dimension_numbers<[1], [0], [0], [1], [0, 0, 1, 1], [], []>} : vector<256x32xf32>, vector<32x16xf32>, vector<256x16xf32> -> vector<256x16xf32>
      %c0_41 = arith.constant 0 : index
      %c0_42 = arith.constant 0 : index
      %135 = vector.load %arg7[%c0_41, %c0_42] : memref<1x16xf32, #tpu.memory_space<vmem>>, vector<1x16xf32>
      %136 = vector.broadcast %135 : vector<1x16xf32> to vector<256x16xf32>
      %137 = arith.addf %134, %136 : vector<256x16xf32>
      %138 = math.tanh %137 : vector<256x16xf32>
      %c0_43 = arith.constant 0 : index
      %c0_44 = arith.constant 0 : index
      %139 = vector.load %arg8[%c0_43, %c0_44] : memref<1x16xf32, #tpu.memory_space<vmem>>, vector<1x16xf32>
      %140 = vector.broadcast %139 : vector<1x16xf32> to vector<256x16xf32>
      %141 = arith.mulf %138, %140 : vector<256x16xf32>
      %cst_45 = arith.constant dense<0.000000e+00> : vector<256xf32>
      %142 = vector.multi_reduction <add>, %141, %cst_45 [1] : vector<256x16xf32> to vector<256xf32>
      %143 = vector.shape_cast %142 : vector<256xf32> to vector<256x1xf32>
      %c0_46 = arith.constant 0 : index
      %c0_47 = arith.constant 0 : index
      %144 = vector.load %arg9[%c0_46, %c0_47] : memref<1x1xf32, #tpu.memory_space<vmem>>, vector<1x1xf32>
      %145 = vector.broadcast %144 : vector<1x1xf32> to vector<256x1xf32>
      %146 = arith.addf %143, %145 : vector<256x1xf32>
      %cst_48 = arith.constant 0.000000e+00 : f32
      %147 = vector.broadcast %cst_48 : f32 to vector<256x1xf32>
      %148 = arith.subf %147, %146 : vector<256x1xf32>
      %149 = math.exp %148 : vector<256x1xf32>
      %cst_49 = arith.constant 1.000000e+00 : f32
      %150 = vector.broadcast %cst_49 : f32 to vector<256x1xf32>
      %151 = arith.addf %150, %149 : vector<256x1xf32>
      %cst_50 = arith.constant 1.000000e+00 : f32
      %152 = vector.broadcast %cst_50 : f32 to vector<256x1xf32>
      %153 = arith.divf %152, %151 : vector<256x1xf32>
      %c0_51 = arith.constant 0 : index
      %c0_52 = arith.constant 0 : index
      %154 = vector.load %arg12[%c0_51, %c0_52] : memref<256x1xf32, #tpu.memory_space<vmem>>, vector<256x1xf32>
      tpu.vector_store %arg12[%c0_51, %c0_52], %153 {strides = array<i32>} : memref<256x1xf32, #tpu.memory_space<vmem>>, vector<256x1xf32>,
      %155 = vector.broadcast %153 : vector<256x1xf32> to vector<256x32xf32>
      %156 = arith.mulf %127, %155 : vector<256x32xf32>
      %c0_53 = arith.constant 0 : index
      %c0_54 = arith.constant 0 : index
      %157 = vector.load %arg13[%c0_53, %c0_54] : memref<256x32xf32, #tpu.memory_space<vmem>>, vector<256x32xf32>
      tpu.vector_store %arg13[%c0_53, %c0_54], %156 {strides = array<i32>} : memref<256x32xf32, #tpu.memory_space<vmem>>, vector<256x32xf32>,
    } else {
    }
    %c0 = arith.constant 0 : index
    %c0_1 = arith.constant 0 : index
    %3 = vector.load %arg3[%c0, %c0_1] : memref<128x7xi32, #tpu.memory_space<vmem>>, vector<128x7xi32>
    %c0_2 = arith.constant 0 : index
    %c0_3 = arith.constant 0 : index
    %4 = vector.load %arg12[%c0_2, %c0_3] : memref<256x1xf32, #tpu.memory_space<vmem>>, vector<256x1xf32>
    %5 = tpu.iota {dimensions = array<i32: 1>} : vector<128x256xi32>
    %6 = tpu.iota {dimensions = array<i32: 1>} : vector<128x7xi32>
    %cst = arith.constant 0.000000e+00 : f32
    %7 = vector.broadcast %cst : f32 to vector<128x256xf32>
    %cst_4 = arith.constant 0.000000e+00 : f32
    %8 = vector.broadcast %cst_4 : f32 to vector<128x7xf32>
    %cst_5 = arith.constant 0.000000e+00 : f32
    %9 = vector.broadcast %cst_5 : f32 to vector<128x1xf32>
    %10 = vector.extract_strided_slice %3 {offsets = [0, 0], sizes = [128, 1], strides = [1, 1]} : vector<128x7xi32> to vector<128x1xi32>
    %11 = vector.broadcast %10 : vector<128x1xi32> to vector<128x256xi32>
    %12 = arith.cmpi eq, %5, %11 : vector<128x256xi32>
    %13 = arith.extui %12 : vector<128x256xi1> to vector<128x256xi32>
    %14 = arith.sitofp %13 : vector<128x256xi32> to vector<128x256xf32>
    %15 = arith.addf %7, %14 : vector<128x256xf32>
    %cst_6 = arith.constant dense<0.000000e+00> : vector<128x1xf32>
    %16 = tpu.matmul %14, %4, %cst_6 {dimension_numbers = #tpu.dot_dimension_numbers<[1], [0], [0], [1], [0, 0, 1, 1], [], []>} : vector<128x256xf32>, vector<256x1xf32>, vector<128x1xf32> -> vector<128x1xf32>
    %c0_i32_7 = arith.constant 0 : i32
    %17 = vector.broadcast %c0_i32_7 : i32 to vector<128x7xi32>
    %18 = arith.cmpi eq, %6, %17 : vector<128x7xi32>
    %cst_8 = arith.constant 0.000000e+00 : f32
    %19 = vector.shape_cast %16 : vector<128x1xf32> to vector<128x1xf32>
    %20 = vector.broadcast %19 : vector<128x1xf32> to vector<128x7xf32>
    %21 = vector.broadcast %cst_8 : f32 to vector<128x7xf32>
    %22 = arith.select %18, %20, %21 : vector<128x7xi1>, vector<128x7xf32>
    %23 = arith.addf %8, %22 : vector<128x7xf32>
    %24 = arith.addf %9, %16 : vector<128x1xf32>
    %25 = vector.extract_strided_slice %3 {offsets = [0, 1], sizes = [128, 1], strides = [1, 1]} : vector<128x7xi32> to vector<128x1xi32>
    %26 = vector.broadcast %25 : vector<128x1xi32> to vector<128x256xi32>
    %27 = arith.cmpi eq, %5, %26 : vector<128x256xi32>
    %28 = arith.extui %27 : vector<128x256xi1> to vector<128x256xi32>
    %29 = arith.sitofp %28 : vector<128x256xi32> to vector<128x256xf32>
    %30 = arith.addf %15, %29 : vector<128x256xf32>
    %cst_9 = arith.constant dense<0.000000e+00> : vector<128x1xf32>
    %31 = tpu.matmul %29, %4, %cst_9 {dimension_numbers = #tpu.dot_dimension_numbers<[1], [0], [0], [1], [0, 0, 1, 1], [], []>} : vector<128x256xf32>, vector<256x1xf32>, vector<128x1xf32> -> vector<128x1xf32>
    %c1_i32 = arith.constant 1 : i32
    %32 = vector.broadcast %c1_i32 : i32 to vector<128x7xi32>
    %33 = arith.cmpi eq, %6, %32 : vector<128x7xi32>
    %cst_10 = arith.constant 0.000000e+00 : f32
    %34 = vector.shape_cast %31 : vector<128x1xf32> to vector<128x1xf32>
    %35 = vector.broadcast %34 : vector<128x1xf32> to vector<128x7xf32>
    %36 = vector.broadcast %cst_10 : f32 to vector<128x7xf32>
    %37 = arith.select %33, %35, %36 : vector<128x7xi1>, vector<128x7xf32>
    %38 = arith.addf %23, %37 : vector<128x7xf32>
    %39 = arith.addf %24, %31 : vector<128x1xf32>
    %40 = vector.extract_strided_slice %3 {offsets = [0, 2], sizes = [128, 1], strides = [1, 1]} : vector<128x7xi32> to vector<128x1xi32>
    %41 = vector.broadcast %40 : vector<128x1xi32> to vector<128x256xi32>
    %42 = arith.cmpi eq, %5, %41 : vector<128x256xi32>
    %43 = arith.extui %42 : vector<128x256xi1> to vector<128x256xi32>
    %44 = arith.sitofp %43 : vector<128x256xi32> to vector<128x256xf32>
    %45 = arith.addf %30, %44 : vector<128x256xf32>
    %cst_11 = arith.constant dense<0.000000e+00> : vector<128x1xf32>
    %46 = tpu.matmul %44, %4, %cst_11 {dimension_numbers = #tpu.dot_dimension_numbers<[1], [0], [0], [1], [0, 0, 1, 1], [], []>} : vector<128x256xf32>, vector<256x1xf32>, vector<128x1xf32> -> vector<128x1xf32>
    %c2_i32 = arith.constant 2 : i32
    %47 = vector.broadcast %c2_i32 : i32 to vector<128x7xi32>
    %48 = arith.cmpi eq, %6, %47 : vector<128x7xi32>
    %cst_12 = arith.constant 0.000000e+00 : f32
    %49 = vector.shape_cast %46 : vector<128x1xf32> to vector<128x1xf32>
    %50 = vector.broadcast %49 : vector<128x1xf32> to vector<128x7xf32>
    %51 = vector.broadcast %cst_12 : f32 to vector<128x7xf32>
    %52 = arith.select %48, %50, %51 : vector<128x7xi1>, vector<128x7xf32>
    %53 = arith.addf %38, %52 : vector<128x7xf32>
    %54 = arith.addf %39, %46 : vector<128x1xf32>
    %55 = vector.extract_strided_slice %3 {offsets = [0, 3], sizes = [128, 1], strides = [1, 1]} : vector<128x7xi32> to vector<128x1xi32>
    %56 = vector.broadcast %55 : vector<128x1xi32> to vector<128x256xi32>
    %57 = arith.cmpi eq, %5, %56 : vector<128x256xi32>
    %58 = arith.extui %57 : vector<128x256xi1> to vector<128x256xi32>
    %59 = arith.sitofp %58 : vector<128x256xi32> to vector<128x256xf32>
    %60 = arith.addf %45, %59 : vector<128x256xf32>
    %cst_13 = arith.constant dense<0.000000e+00> : vector<128x1xf32>
    %61 = tpu.matmul %59, %4, %cst_13 {dimension_numbers = #tpu.dot_dimension_numbers<[1], [0], [0], [1], [0, 0, 1, 1], [], []>} : vector<128x256xf32>, vector<256x1xf32>, vector<128x1xf32> -> vector<128x1xf32>
    %c3_i32 = arith.constant 3 : i32
    %62 = vector.broadcast %c3_i32 : i32 to vector<128x7xi32>
    %63 = arith.cmpi eq, %6, %62 : vector<128x7xi32>
    %cst_14 = arith.constant 0.000000e+00 : f32
    %64 = vector.shape_cast %61 : vector<128x1xf32> to vector<128x1xf32>
    %65 = vector.broadcast %64 : vector<128x1xf32> to vector<128x7xf32>
    %66 = vector.broadcast %cst_14 : f32 to vector<128x7xf32>
    %67 = arith.select %63, %65, %66 : vector<128x7xi1>, vector<128x7xf32>
    %68 = arith.addf %53, %67 : vector<128x7xf32>
    %69 = arith.addf %54, %61 : vector<128x1xf32>
    %70 = vector.extract_strided_slice %3 {offsets = [0, 4], sizes = [128, 1], strides = [1, 1]} : vector<128x7xi32> to vector<128x1xi32>
    %71 = vector.broadcast %70 : vector<128x1xi32> to vector<128x256xi32>
    %72 = arith.cmpi eq, %5, %71 : vector<128x256xi32>
    %73 = arith.extui %72 : vector<128x256xi1> to vector<128x256xi32>
    %74 = arith.sitofp %73 : vector<128x256xi32> to vector<128x256xf32>
    %75 = arith.addf %60, %74 : vector<128x256xf32>
    %cst_15 = arith.constant dense<0.000000e+00> : vector<128x1xf32>
    %76 = tpu.matmul %74, %4, %cst_15 {dimension_numbers = #tpu.dot_dimension_numbers<[1], [0], [0], [1], [0, 0, 1, 1], [], []>} : vector<128x256xf32>, vector<256x1xf32>, vector<128x1xf32> -> vector<128x1xf32>
    %c4_i32 = arith.constant 4 : i32
    %77 = vector.broadcast %c4_i32 : i32 to vector<128x7xi32>
    %78 = arith.cmpi eq, %6, %77 : vector<128x7xi32>
    %cst_16 = arith.constant 0.000000e+00 : f32
    %79 = vector.shape_cast %76 : vector<128x1xf32> to vector<128x1xf32>
    %80 = vector.broadcast %79 : vector<128x1xf32> to vector<128x7xf32>
    %81 = vector.broadcast %cst_16 : f32 to vector<128x7xf32>
    %82 = arith.select %78, %80, %81 : vector<128x7xi1>, vector<128x7xf32>
    %83 = arith.addf %68, %82 : vector<128x7xf32>
    %84 = arith.addf %69, %76 : vector<128x1xf32>
    %85 = vector.extract_strided_slice %3 {offsets = [0, 5], sizes = [128, 1], strides = [1, 1]} : vector<128x7xi32> to vector<128x1xi32>
    %86 = vector.broadcast %85 : vector<128x1xi32> to vector<128x256xi32>
    %87 = arith.cmpi eq, %5, %86 : vector<128x256xi32>
    %88 = arith.extui %87 : vector<128x256xi1> to vector<128x256xi32>
    %89 = arith.sitofp %88 : vector<128x256xi32> to vector<128x256xf32>
    %90 = arith.addf %75, %89 : vector<128x256xf32>
    %cst_17 = arith.constant dense<0.000000e+00> : vector<128x1xf32>
    %91 = tpu.matmul %89, %4, %cst_17 {dimension_numbers = #tpu.dot_dimension_numbers<[1], [0], [0], [1], [0, 0, 1, 1], [], []>} : vector<128x256xf32>, vector<256x1xf32>, vector<128x1xf32> -> vector<128x1xf32>
    %c5_i32 = arith.constant 5 : i32
    %92 = vector.broadcast %c5_i32 : i32 to vector<128x7xi32>
    %93 = arith.cmpi eq, %6, %92 : vector<128x7xi32>
    %cst_18 = arith.constant 0.000000e+00 : f32
    %94 = vector.shape_cast %91 : vector<128x1xf32> to vector<128x1xf32>
    %95 = vector.broadcast %94 : vector<128x1xf32> to vector<128x7xf32>
    %96 = vector.broadcast %cst_18 : f32 to vector<128x7xf32>
    %97 = arith.select %93, %95, %96 : vector<128x7xi1>, vector<128x7xf32>
    %98 = arith.addf %83, %97 : vector<128x7xf32>
    %99 = arith.addf %84, %91 : vector<128x1xf32>
    %100 = vector.extract_strided_slice %3 {offsets = [0, 6], sizes = [128, 1], strides = [1, 1]} : vector<128x7xi32> to vector<128x1xi32>
    %101 = vector.broadcast %100 : vector<128x1xi32> to vector<128x256xi32>
    %102 = arith.cmpi eq, %5, %101 : vector<128x256xi32>
    %103 = arith.extui %102 : vector<128x256xi1> to vector<128x256xi32>
    %104 = arith.sitofp %103 : vector<128x256xi32> to vector<128x256xf32>
    %105 = arith.addf %90, %104 : vector<128x256xf32>
    %cst_19 = arith.constant dense<0.000000e+00> : vector<128x1xf32>
    %106 = tpu.matmul %104, %4, %cst_19 {dimension_numbers = #tpu.dot_dimension_numbers<[1], [0], [0], [1], [0, 0, 1, 1], [], []>} : vector<128x256xf32>, vector<256x1xf32>, vector<128x1xf32> -> vector<128x1xf32>
    %c6_i32 = arith.constant 6 : i32
    %107 = vector.broadcast %c6_i32 : i32 to vector<128x7xi32>
    %108 = arith.cmpi eq, %6, %107 : vector<128x7xi32>
    %cst_20 = arith.constant 0.000000e+00 : f32
    %109 = vector.shape_cast %106 : vector<128x1xf32> to vector<128x1xf32>
    %110 = vector.broadcast %109 : vector<128x1xf32> to vector<128x7xf32>
    %111 = vector.broadcast %cst_20 : f32 to vector<128x7xf32>
    %112 = arith.select %108, %110, %111 : vector<128x7xi1>, vector<128x7xf32>
    %113 = arith.addf %98, %112 : vector<128x7xf32>
    %114 = arith.addf %99, %106 : vector<128x1xf32>
    %115 = tpu.reciprocal %114 {approx = true} : vector<128x1xf32> -> vector<128x1xf32>
    %c0_21 = arith.constant 0 : index
    %c0_22 = arith.constant 0 : index
    %116 = vector.load %arg13[%c0_21, %c0_22] : memref<256x32xf32, #tpu.memory_space<vmem>>, vector<256x32xf32>
    %cst_23 = arith.constant dense<0.000000e+00> : vector<128x32xf32>
    %117 = tpu.matmul %105, %116, %cst_23 {dimension_numbers = #tpu.dot_dimension_numbers<[1], [0], [0], [1], [0, 0, 1, 1], [], []>} : vector<128x256xf32>, vector<256x32xf32>, vector<128x32xf32> -> vector<128x32xf32>
    %118 = vector.broadcast %115 : vector<128x1xf32> to vector<128x32xf32>
    %119 = arith.mulf %117, %118 : vector<128x32xf32>
    %c0_24 = arith.constant 0 : index
    %c0_25 = arith.constant 0 : index
    %c0_26 = arith.constant 0 : index
    %120 = vector.load %arg10[%c0_24, %c0_25, %c0_26] : memref<1x128x32xf32, #tpu.memory_space<vmem>>, vector<1x128x32xf32>
    %121 = vector.shape_cast %120 : vector<1x128x32xf32> to vector<128x32xf32>
    %122 = vector.shape_cast %119 : vector<128x32xf32> to vector<1x128x32xf32>
    tpu.vector_store %arg10[%c0_24, %c0_25, %c0_26], %122 {strides = array<i32>} : memref<1x128x32xf32, #tpu.memory_space<vmem>>, vector<1x128x32xf32>,
    %c0_27 = arith.constant 0 : index
    %c0_28 = arith.constant 0 : index
    %c0_29 = arith.constant 0 : index
    %123 = vector.load %arg11[%c0_27, %c0_28, %c0_29] : memref<1x128x7xf32, #tpu.memory_space<vmem>>, vector<1x128x7xf32>
    %124 = vector.shape_cast %123 : vector<1x128x7xf32> to vector<128x7xf32>
    %125 = vector.shape_cast %113 : vector<128x7xf32> to vector<1x128x7xf32>
    tpu.vector_store %arg11[%c0_27, %c0_28, %c0_29], %125 {strides = array<i32>} : memref<1x128x7xf32, #tpu.memory_space<vmem>>, vector<1x128x7xf32>,
    return
  }
  func.func @transform_0(%arg0: i32, %arg1: i32) -> (i32, i32, i32) {
    %c0_i32 = arith.constant 0 : i32
    %c0_i32_0 = arith.constant 0 : i32
    %c0_i32_1 = arith.constant 0 : i32
    return %arg0, %c0_i32, %c0_i32_0 : i32, i32, i32
  }
  func.func @transform_1(%arg0: i32, %arg1: i32) -> (i32, i32) {
    %c0_i32 = arith.constant 0 : i32
    %c0_i32_0 = arith.constant 0 : i32
    return %arg1, %c0_i32 : i32, i32
  }
  func.func @transform_2(%arg0: i32, %arg1: i32) -> (i32, i32) {
    %c0_i32 = arith.constant 0 : i32
    %c0_i32_0 = arith.constant 0 : i32
    %c0_i32_1 = arith.constant 0 : i32
    return %c0_i32, %c0_i32_0 : i32, i32
  }
  func.func @transform_3(%arg0: i32, %arg1: i32) -> (i32, i32) {
    %c0_i32 = arith.constant 0 : i32
    %c0_i32_0 = arith.constant 0 : i32
    %c0_i32_1 = arith.constant 0 : i32
    return %c0_i32, %c0_i32_0 : i32, i32
  }
  func.func @transform_4(%arg0: i32, %arg1: i32) -> (i32, i32) {
    %c0_i32 = arith.constant 0 : i32
    %c0_i32_0 = arith.constant 0 : i32
    %c0_i32_1 = arith.constant 0 : i32
    return %c0_i32, %c0_i32_0 : i32, i32
  }
  func.func @transform_5(%arg0: i32, %arg1: i32) -> (i32, i32) {
    %c0_i32 = arith.constant 0 : i32
    %c0_i32_0 = arith.constant 0 : i32
    %c0_i32_1 = arith.constant 0 : i32
    return %c0_i32, %c0_i32_0 : i32, i32
  }
  func.func @transform_6(%arg0: i32, %arg1: i32) -> (i32, i32) {
    %c0_i32 = arith.constant 0 : i32
    %c0_i32_0 = arith.constant 0 : i32
    %c0_i32_1 = arith.constant 0 : i32
    return %c0_i32, %c0_i32_0 : i32, i32
  }
  func.func @transform_7(%arg0: i32, %arg1: i32) -> (i32, i32) {
    %c0_i32 = arith.constant 0 : i32
    %c0_i32_0 = arith.constant 0 : i32
    %c0_i32_1 = arith.constant 0 : i32
    return %c0_i32, %c0_i32_0 : i32, i32
  }
  func.func @transform_8(%arg0: i32, %arg1: i32) -> (i32, i32, i32) {
    %c0_i32 = arith.constant 0 : i32
    %c0_i32_0 = arith.constant 0 : i32
    return %arg0, %arg1, %c0_i32 : i32, i32, i32
  }
  func.func @transform_9(%arg0: i32, %arg1: i32) -> (i32, i32, i32) {
    %c0_i32 = arith.constant 0 : i32
    %c0_i32_0 = arith.constant 0 : i32
    return %arg0, %arg1, %c0_i32 : i32, i32, i32
  }
}

</mosaic_0001>

<bundles_post_ra>
// kernel: _attention_rings_padded.1
= control target key start
LH: loop header
LB: loop body
LE: loop exit
PB: predicated region body
PF: predicated region fallthrough
CT: control target
= control target key end

     0   :  { %s6560_s11 = smov 0   ;;  %s6562_s12 = smov 0   ;;  %s11747_s0 = inlined_call_operand.vmem [shape: f32[2,256,32], index: 0, kind: input, shape index: {}]   ;;  %s11748_s1 = inlined_call_operand.vmem [shape: s32[256,7], index: 1, kind: input, shape index: {}]   ;;  %s11749_s2 = inlined_call_operand.vmem [shape: f32[32,32], index: 2, kind: input, shape index: {}]   ;;  %s11750_s3 = inlined_call_operand.vmem [shape: f32[1,32], index: 3, kind: input, shape index: {}]   ;;  %s11751_s4 = inlined_call_operand.vmem [shape: f32[32,16], index: 4, kind: input, shape index: {}]   ;;  %s11752_s5 = inlined_call_operand.vmem [shape: f32[1,16], index: 5, kind: input, shape index: {}]   ;;  %s11753_s6 = inlined_call_operand.vmem [shape: f32[1,16], index: 6, kind: input, shape index: {}]   ;;  %s11754_s7 = inlined_call_operand.<no memory space> [shape: f32[1,1], index: 7, kind: input, shape index: {}]   ;;  %s11755_s8 = inlined_call_operand.vmem [shape: f32[2,256,32], index: 8, kind: output, shape index: {0}]   ;;  %s11756_s9 = inlined_call_operand.vmem [shape: f32[2,256,7], index: 9, kind: output, shape index: {1}]  }
   0x1   :  { %v15_v0 = vstv %s11754_s7  ;;  %s6564_s13 = smov 0   ;;  %s6566_s14 = smov 0  }
   0x2   :  { %16 = vst [vmem:[#allocation4] sm:$0x1] %v15_v0  ;;  %s6568_s15 = smov 0  }
   0x3 LB: > { %s31_s7 = sadd.s32 1, %s6487_s13  ;;  %s34_s16 = sadd.s32 1, %s6491_s14  ;;  %s6495_s15 = sphi %s6568_s15, %s22_s15   ;;  %s6491_s14 = sphi %s6566_s14, %s12461_s14   ;;  %s6487_s13 = sphi %s6564_s13, %s12460_s13   ;;  %s6483_s12 = sphi %s6562_s12, %s12459_s12   ;;  %s6479_s11 = sphi %s6560_s11, %s12458_s11  }
   0x4   : > { %p32_p0 = scmp.ge.s32.totalorder %s31_s7, 2  ;;  %p5495_p1 = scmp.ge.s32.totalorder %s6495_s15, 1 }
   0x5   : > { %p319_p2 = scmp.lt.s32.totalorder %s6495_s15, 5 }
   0x6   : > { %s12463_s7 = smov (%p32_p0, %s31_s7), 0  ;;  %s12465_s16 = smov (!%p32_p0, %s34_s16), %s6491_s14 }
   0x7   : > { %12016 = sst [smem:[#allocation5_spill]] %s12463_s7  ;;  %p320_p3 = pnand %p5495_p1, %p319_p2 }
   0x8   : > { %p36_p4 = scmp.ge.s32.totalorder %s12465_s16, 2 }
   0x9   : > { %323 = sbr.rel (%p320_p3) target bundleno = 1656 (0x678), region = 52 }
   0xa   : > { %s12467_s16 = smov (%p36_p4, %s12465_s16), 0 }
   0xb   : > { %12017 = sst [smem:[#allocation6_spill]] %s12467_s16 }
   0xe   : > { %p373_p5 = scmp.lt.s32.totalorder %s6483_s12, 1  ;;  %s5498_s17 = sshll.u32 %s6479_s11, 4 }
   0xf   : > { %p379_p6 = scmp.lt.s32.totalorder %s5498_s17, 31  ;;  %p5506_p7 = scmp.ne.s32.totalorder %s6479_s11, 0 }
  0x10   : > { %s12469_s12 = smov (!%p373_p5, %s6483_s12), 1 }
  0x11   : > { %s12471_s17 = smov (!%p379_p6, %s5498_s17), 31  ;;  %s6021_s18 = sshll.u32 %s12469_s12, 8 }
  0x12   : > { %s5501_s19 = sshll.u32 %s12469_s12, 5  ;;  %s6596_s22 = scalar_lea.vmem %s11747_s0, %s6021_s18 }
  0x13   : > { %s5499_s23 = sshll.u32 %s12471_s17, 3  ;;  %s390_s27 = sadd.s32 %s5501_s19, %s12471_s17 }
  0x14   : > { %s6601_s26 = scalar_lea.vmem %s11748_s1, %s5499_s23  ;;  %s5502_s28 = sshll.u32 %s390_s27, 3 }
  0x15   : > { %s6606_s10 = scalar_lea.vmem %s11755_s8, %s5502_s28  ;;  %s6611_s7 = scalar_lea.vmem %s11756_s9, %s5502_s28 }
  0x16   : > { %407 = sbr.rel (%p5506_p7) target bundleno = 702 (0x2be), region = 56 }
  0x1b   : > { %v443_v1 = vld [vmem:[%s11749_s2 + $0x18] sm:$0xff]  ;;  %v442_v2 = vld [vmem:[%s11749_s2 + $0x10] sm:$0xff]  ;;  %v441_v3 = vld [vmem:[%s11749_s2 + $0x8] sm:$0xff]  ;;  %vm448_vm0 = vcmask 261120   ;;  %vm943_vm1 = vcmask 130048   ;;  %vm1684_vm6 = vcmask 7168  }
  0x1c   : > { %557 = vmatpush.msra.mxu0 %v443_v1  ;;  %6022 = vmatpush.msra.mxu2 %v443_v1  ;;  %v440_v4 = vld [vmem:[%s11749_s2] sm:$0xff]  ;;  %v409_v7 = vld [vmem:[%s6596_s22 + $0x8] sm:$0xff]  ;;  %v410_v9 = vld [vmem:[%s6596_s22 + $0x10] sm:$0xff] }
  0x1d   : > { %v408_v5 = vld [vmem:[%s6596_s22] sm:$0xff]  ;;  %v425_v8 = vld [vmem:[%s6596_s22 + $0x88] sm:$0xff]  ;;  %v426_v10 = vld [vmem:[%s6596_s22 + $0x90] sm:$0xff] }
  0x1e   : > { %558 = vmatpush.msra.mxu0 %v442_v2  ;;  %6023 = vmatpush.msra.mxu2 %v442_v2  ;;  %v424_v6 = vld [vmem:[%s6596_s22 + $0x80] sm:$0xff]  ;;  %v411_v11 = vld [vmem:[%s6596_s22 + $0x18] sm:$0xff]  ;;  %v413_v15 = vld [vmem:[%s6596_s22 + $0x28] sm:$0xff] }
  0x1f   : > { %v427_v12 = vld [vmem:[%s6596_s22 + $0x98] sm:$0xff]  ;;  %v412_v13 = vld [vmem:[%s6596_s22 + $0x20] sm:$0xff]  ;;  %v429_v16 = vld [vmem:[%s6596_s22 + $0xa8] sm:$0xff] }
  0x20   : > { %559 = vmatpush.msra.mxu0 %v441_v3  ;;  %6024 = vmatpush.msra.mxu2 %v441_v3  ;;  %v428_v14 = vld [vmem:[%s6596_s22 + $0xa0] sm:$0xff]  ;;  %v414_v17 = vld [vmem:[%s6596_s22 + $0x30] sm:$0xff]  ;;  %v415_v19 = vld [vmem:[%s6596_s22 + $0x38] sm:$0xff] }
  0x21   : > { %v430_v18 = vld [vmem:[%s6596_s22 + $0xb0] sm:$0xff]  ;;  %v431_v20 = vld [vmem:[%s6596_s22 + $0xb8] sm:$0xff]  ;;  %v416_v21 = vld [vmem:[%s6596_s22 + $0x40] sm:$0xff] }
  0x22   : > { %560 = vmatpush.msra.mxu0 %v440_v4  ;;  %6025 = vmatpush.msra.mxu2 %v440_v4  ;;  %v432_v22 = vld [vmem:[%s6596_s22 + $0xc0] sm:$0xff]  ;;  %v417_v23 = vld [vmem:[%s6596_s22 + $0x48] sm:$0xff]  ;;  %v418_v25 = vld [vmem:[%s6596_s22 + $0x50] sm:$0xff] }
  0x23   : > { %5507 = vmatmul.msk.f32.vlgmr.msra.gmra.mxu0 %vm448_vm0, %v408_v5  ;;  %5523 = vmatmul.msk.f32.vlgmr.msra.gmra.mxu2 %vm448_vm0, %v424_v6  ;;  %v433_v24 = vld [vmem:[%s6596_s22 + $0xc8] sm:$0xff]  ;;  %v434_v26 = vld [vmem:[%s6596_s22 + $0xd0] sm:$0xff]  ;;  %v419_v27 = vld [vmem:[%s6596_s22 + $0x58] sm:$0xff] }
  0x24   : > { %v435_v28 = vld [vmem:[%s6596_s22 + $0xd8] sm:$0xff]  ;;  %v660_v30 = vld [vmem:[%s11751_s4 + $0x10] sm:$0xff]  ;;  %v659_v31 = vld [vmem:[%s11751_s4 + $0x8] sm:$0xff] }
  0x25   : > { %v661_v29 = vld [vmem:[%s11751_s4 + $0x18] sm:$0xff]  ;;  %v420_v32 = vld [vmem:[%s6596_s22 + $0x60] sm:$0xff]  ;;  %v421_v35 = vld [vmem:[%s6596_s22 + $0x68] sm:$0xff] }
  0x26   : > { %774 = vmatpush.msra.mxu1 %v661_v29  ;;  %6026 = vmatpush.msra.mxu3 %v661_v29  ;;  %v436_v33 = vld [vmem:[%s6596_s22 + $0xe0] sm:$0xff]  ;;  %v437_v36 = vld [vmem:[%s6596_s22 + $0xe8] sm:$0xff]  ;;  %v422_v37 = vld [vmem:[%s6596_s22 + $0x70] sm:$0xff] }
  0x27   : > { %v658_v34 = vld [vmem:[%s11751_s4] sm:$0xff]  ;;  %v438_v38 = vld [vmem:[%s6596_s22 + $0xf0] sm:$0xff]  ;;  %v423_v39 = vld [vmem:[%s6596_s22 + $0x78] sm:$0xff] }
  0x28   : > { %775 = vmatpush.msra.mxu1 %v660_v30  ;;  %6027 = vmatpush.msra.mxu3 %v660_v30  ;;  %v439_v40 = vld [vmem:[%s6596_s22 + $0xf8] sm:$0xff]  ;;  %v6705_v41 = vld [vmem:[%s11750_s3] ss:$0 sm:$0xff] }
  0x2a   : > { %776 = vmatpush.msra.mxu1 %v659_v31  ;;  %6028 = vmatpush.msra.mxu3 %v659_v31 }
  0x2b   : > { %5508 = vmatmul.msk.f32.gmra.mxu0 %vm448_vm0, %v409_v7  ;;  %5524 = vmatmul.msk.f32.gmra.mxu2 %vm448_vm0, %v425_v8 }
  0x2c   : > { %777 = vmatpush.msra.mxu1 %v658_v34  ;;  %6029 = vmatpush.msra.mxu3 %v658_v34 }
  0x33   : > { %5509 = vmatmul.msk.f32.gmra.mxu0 %vm448_vm0, %v410_v9  ;;  %5525 = vmatmul.msk.f32.gmra.mxu2 %vm448_vm0, %v426_v10 }
  0x3b   : > { %5510 = vmatmul.msk.f32.gmra.mxu0 %vm448_vm0, %v411_v11  ;;  %5526 = vmatmul.msk.f32.gmra.mxu2 %vm448_vm0, %v427_v12 }
  0x43   : > { %5511 = vmatmul.msk.f32.gmra.mxu0 %vm448_vm0, %v412_v13  ;;  %5527 = vmatmul.msk.f32.gmra.mxu2 %vm448_vm0, %v428_v14 }
  0x4b   : > { %5512 = vmatmul.msk.f32.gmra.mxu0 %vm448_vm0, %v413_v15  ;;  %5528 = vmatmul.msk.f32.gmra.mxu2 %vm448_vm0, %v429_v16 }
  0x53   : > { %5513 = vmatmul.msk.f32.gmra.mxu0 %vm448_vm0, %v414_v17  ;;  %5529 = vmatmul.msk.f32.gmra.mxu2 %vm448_vm0, %v430_v18 }
  0x5b   : > { %5514 = vmatmul.msk.f32.gmra.mxu0 %vm448_vm0, %v415_v19  ;;  %5530 = vmatmul.msk.f32.gmra.mxu2 %vm448_vm0, %v431_v20 }
  0x63   : > { %5515 = vmatmul.msk.f32.gmra.mxu0 %vm448_vm0, %v416_v21  ;;  %5531 = vmatmul.msk.f32.gmra.mxu2 %vm448_vm0, %v432_v22 }
  0x6b   : > { %5516 = vmatmul.msk.f32.gmra.mxu0 %vm448_vm0, %v417_v23  ;;  %5532 = vmatmul.msk.f32.gmra.mxu2 %vm448_vm0, %v433_v24 }
  0x73   : > { %5517 = vmatmul.msk.f32.gmra.mxu0 %vm448_vm0, %v418_v25  ;;  %5533 = vmatmul.msk.f32.gmra.mxu2 %vm448_vm0, %v434_v26 }
  0x7b   : > { %5518 = vmatmul.msk.f32.gmra.mxu0 %vm448_vm0, %v419_v27  ;;  %5534 = vmatmul.msk.f32.gmra.mxu2 %vm448_vm0, %v435_v28 }
  0x83   : > { %5519 = vmatmul.msk.f32.gmra.mxu0 %vm448_vm0, %v420_v32  ;;  %5535 = vmatmul.msk.f32.gmra.mxu2 %vm448_vm0, %v436_v33 }
  0x8b   : > { %5520 = vmatmul.msk.f32.gmra.mxu0 %vm448_vm0, %v421_v35  ;;  %5536 = vmatmul.msk.f32.gmra.mxu2 %vm448_vm0, %v437_v36 }
  0x93   : > { %5521 = vmatmul.msk.f32.gmra.mxu0 %vm448_vm0, %v422_v37  ;;  %5537 = vmatmul.msk.f32.gmra.mxu2 %vm448_vm0, %v438_v38 }
  0x9b   : > { %5522 = vmatmul.msk.f32.gmra.mxu0 %vm448_vm0, %v423_v39  ;;  %5538 = vmatmul.msk.f32.gmra.mxu2 %vm448_vm0, %v439_v40  ;;  %v6772_v40 = vld [vmem:[%s11752_s5] ss:$0 sm:$0xff] }
  0xa0   : > { %v562_v42 = vpop.f32.mrf.mxu0 }
  0xa1   : > { %v563_v43 = vadd.f32 %v6705_v41, %v562_v42 }
  0xa3   : > { %5539 = vmatmul.msk.f32.vlgmr.msra.gmra.mxu1 %vm448_vm0, %v563_v43 }
  0xa6   : > { %v610_v44 = vpop.f32.mrf.mxu2 }
  0xa7   : > { %v611_v45 = vadd.f32 %v6705_v41, %v610_v44 }
  0xa8   : > { %v565_v46 = vpop.f32.mrf.mxu0 }
  0xa9   : > { %v566_v47 = vadd.f32 %v6705_v41, %v565_v46  ;;  %5555 = vmatmul.msk.f32.vlgmr.msra.gmra.mxu3 %vm448_vm0, %v611_v45  ;;  %v6780_v46 = vld [vmem:[%s11753_s6] ss:$0 sm:$0xff] }
  0xab   : > { %5540 = vmatmul.msk.f32.gmra.mxu1 %vm448_vm0, %v566_v47 }
  0xae   : > { %v613_v48 = vpop.f32.mrf.mxu2 }
  0xaf   : > { %v614_v49 = vadd.f32 %v6705_v41, %v613_v48 }
  0xb0   : > { %v568_v50 = vpop.f32.mrf.mxu0 }
  0xb1   : > { %v569_v51 = vadd.f32 %v6705_v41, %v568_v50  ;;  %5556 = vmatmul.msk.f32.gmra.mxu3 %vm448_vm0, %v614_v49 }
  0xb3   : > { %5541 = vmatmul.msk.f32.gmra.mxu1 %vm448_vm0, %v569_v51 }
  0xb6   : > { %v616_v52 = vpop.f32.mrf.mxu2 }
  0xb7   : > { %v617_v53 = vadd.f32 %v6705_v41, %v616_v52 }
  0xb8   : > { %v571_v54 = vpop.f32.mrf.mxu0 }
  0xb9   : > { %v572_v55 = vadd.f32 %v6705_v41, %v571_v54  ;;  %5557 = vmatmul.msk.f32.gmra.mxu3 %vm448_vm0, %v617_v53 }
  0xbb   : > { %5542 = vmatmul.msk.f32.gmra.mxu1 %vm448_vm0, %v572_v55 }
  0xbe   : > { %v619_v56 = vpop.f32.mrf.mxu2 }
  0xbf   : > { %v620_v57 = vadd.f32 %v6705_v41, %v619_v56 }
  0xc0   : > { %v574_v58 = vpop.f32.mrf.mxu0 }
  0xc1   : > { %v575_v59 = vadd.f32 %v6705_v41, %v574_v58  ;;  %5558 = vmatmul.msk.f32.gmra.mxu3 %vm448_vm0, %v620_v57 }
  0xc3   : > { %5543 = vmatmul.msk.f32.gmra.mxu1 %vm448_vm0, %v575_v59 }
  0xc6   : > { %v622_v60 = vpop.f32.mrf.mxu2 }
  0xc7   : > { %v623_v61 = vadd.f32 %v6705_v41, %v622_v60 }
  0xc8   : > { %v577_v62 = vpop.f32.mrf.mxu0 }
  0xc9   : > { %v578_v63 = vadd.f32 %v6705_v41, %v577_v62  ;;  %5559 = vmatmul.msk.f32.gmra.mxu3 %vm448_vm0, %v623_v61 }
  0xcb   : > { %5544 = vmatmul.msk.f32.gmra.mxu1 %vm448_vm0, %v578_v63 }
  0xce   : > { %v625_v0 = vpop.f32.mrf.mxu2 }
  0xcf   : > { %v626_v1 = vadd.f32 %v6705_v41, %v625_v0 }
  0xd0   : > { %v580_v2 = vpop.f32.mrf.mxu0 }
  0xd1   : > { %v581_v3 = vadd.f32 %v6705_v41, %v580_v2  ;;  %5560 = vmatmul.msk.f32.gmra.mxu3 %vm448_vm0, %v626_v1 }
  0xd3   : > { %5545 = vmatmul.msk.f32.gmra.mxu1 %vm448_vm0, %v581_v3 }
  0xd6   : > { %v628_v4 = vpop.f32.mrf.mxu2 }
  0xd7   : > { %v629_v5 = vadd.f32 %v6705_v41, %v628_v4 }
  0xd8   : > { %v583_v6 = vpop.f32.mrf.mxu0 }
  0xd9   : > { %v584_v7 = vadd.f32 %v6705_v41, %v583_v6  ;;  %5561 = vmatmul.msk.f32.gmra.mxu3 %vm448_vm0, %v629_v5 }
  0xdb   : > { %5546 = vmatmul.msk.f32.gmra.mxu1 %vm448_vm0, %v584_v7 }
  0xde   : > { %v631_v8 = vpop.f32.mrf.mxu2 }
  0xdf   : > { %v632_v9 = vadd.f32 %v6705_v41, %v631_v8 }
  0xe0   : > { %v586_v10 = vpop.f32.mrf.mxu0 }
  0xe1   : > { %v587_v11 = vadd.f32 %v6705_v41, %v586_v10  ;;  %5562 = vmatmul.msk.f32.gmra.mxu3 %vm448_vm0, %v632_v9 }
  0xe3   : > { %5547 = vmatmul.msk.f32.gmra.mxu1 %vm448_vm0, %v587_v11 }
  0xe6   : > { %v634_v12 = vpop.f32.mrf.mxu2 }
  0xe7   : > { %v635_v13 = vadd.f32 %v6705_v41, %v634_v12 }
  0xe8   : > { %v589_v14 = vpop.f32.mrf.mxu0 }
  0xe9   : > { %v590_v15 = vadd.f32 %v6705_v41, %v589_v14  ;;  %5563 = vmatmul.msk.f32.gmra.mxu3 %vm448_vm0, %v635_v13 }
  0xeb   : > { %5548 = vmatmul.msk.f32.gmra.mxu1 %vm448_vm0, %v590_v15 }
  0xee   : > { %v637_v16 = vpop.f32.mrf.mxu2 }
  0xef   : > { %v638_v17 = vadd.f32 %v6705_v41, %v637_v16 }
  0xf0   : > { %v592_v18 = vpop.f32.mrf.mxu0 }
  0xf1   : > { %v593_v19 = vadd.f32 %v6705_v41, %v592_v18  ;;  %5564 = vmatmul.msk.f32.gmra.mxu3 %vm448_vm0, %v638_v17 }
  0xf3   : > { %5549 = vmatmul.msk.f32.gmra.mxu1 %vm448_vm0, %v593_v19 }
  0xf6   : > { %v640_v20 = vpop.f32.mrf.mxu2 }
  0xf7   : > { %v641_v21 = vadd.f32 %v6705_v41, %v640_v20 }
  0xf8   : > { %v595_v22 = vpop.f32.mrf.mxu0 }
  0xf9   : > { %v596_v23 = vadd.f32 %v6705_v41, %v595_v22  ;;  %5565 = vmatmul.msk.f32.gmra.mxu3 %vm448_vm0, %v641_v21 }
  0xfb   : > { %5550 = vmatmul.msk.f32.gmra.mxu1 %vm448_vm0, %v596_v23 }
  0xfe   : > { %v643_v24 = vpop.f32.mrf.mxu2 }
  0xff   : > { %v644_v25 = vadd.f32 %v6705_v41, %v643_v24 }
 0x100   : > { %v598_v26 = vpop.f32.mrf.mxu0 }
 0x101   : > { %v599_v27 = vadd.f32 %v6705_v41, %v598_v26  ;;  %5566 = vmatmul.msk.f32.gmra.mxu3 %vm448_vm0, %v644_v25 }
 0x103   : > { %5551 = vmatmul.msk.f32.gmra.mxu1 %vm448_vm0, %v599_v27 }
 0x106   : > { %v646_v28 = vpop.f32.mrf.mxu2 }
 0x107   : > { %v647_v29 = vadd.f32 %v6705_v41, %v646_v28 }
 0x108   : > { %v601_v30 = vpop.f32.mrf.mxu0 }
 0x109   : > { %v602_v31 = vadd.f32 %v6705_v41, %v601_v30  ;;  %5567 = vmatmul.msk.f32.gmra.mxu3 %vm448_vm0, %v647_v29 }
 0x10b   : > { %5552 = vmatmul.msk.f32.gmra.mxu1 %vm448_vm0, %v602_v31 }
 0x10e   : > { %v649_v32 = vpop.f32.mrf.mxu2 }
 0x10f   : > { %v650_v33 = vadd.f32 %v6705_v41, %v649_v32 }
 0x110   : > { %v604_v34 = vpop.f32.mrf.mxu0 }
 0x111   : > { %v605_v35 = vadd.f32 %v6705_v41, %v604_v34  ;;  %5568 = vmatmul.msk.f32.gmra.mxu3 %vm448_vm0, %v650_v33 }
 0x113   : > { %5553 = vmatmul.msk.f32.gmra.mxu1 %vm448_vm0, %v605_v35 }
 0x116   : > { %v652_v36 = vpop.f32.mrf.mxu2 }
 0x117   : > { %v653_v37 = vadd.f32 %v6705_v41, %v652_v36 }
 0x118   : > { %v607_v38 = vpop.f32.mrf.mxu0 }
 0x119   : > { %v608_v39 = vadd.f32 %v6705_v41, %v607_v38  ;;  %5569 = vmatmul.msk.f32.gmra.mxu3 %vm448_vm0, %v653_v37 }
 0x11b   : > { %5554 = vmatmul.msk.f32.gmra.mxu1 %vm448_vm0, %v608_v39 }
 0x11e   : > { %v655_v42 = vpop.f32.mrf.mxu2 }
 0x11f   : > { %v656_v43 = vadd.f32 %v6705_v41, %v655_v42 }
 0x120   : > { %v779_v44 = vpop.f32.mrf.mxu1 }
 0x121   : > { %v780_v45 = vadd.f32 %v6772_v40, %v779_v44  ;;  %5570 = vmatmul.msk.f32.gmra.mxu3 %vm448_vm0, %v656_v43 }
 0x123   : > { %6087 = vtanh.f32 %v780_v45 }
 0x128   : > { %v782_v47 = vpop.f32.mrf.mxu1 }
 0x129   : > { %v6088_v48 = vpop.eup %6087  ;;  %v783_v49 = vadd.f32 %v6772_v40, %v782_v47 }
 0x12a   : > { %v911_v50 = vmul.f32 %v6088_v48, %v6780_v46 }
 0x12b   : > { %6089 = vtanh.f32 %v783_v49 }
 0x12c   : > { %v827_v41 = vpop.f32.mrf.mxu3  ;;  %v944_v51 = vsel %vm943_vm1, %v911_v50, 0.0 }
 0x12d   : > { %v828_v52 = vadd.f32 %v6772_v40, %v827_v41  ;;  %945 = vadd.xlane.f32.xlu0 %v944_v51 }
 0x12f   : > { %6091 = vtanh.f32 %v828_v52 }
 0x130   : > { %v785_v53 = vpop.f32.mrf.mxu1 }
 0x131   : > { %v6090_v54 = vpop.eup %6089  ;;  %v786_v55 = vadd.f32 %v6772_v40, %v785_v53 }
 0x132   : > { %v912_v56 = vmul.f32 %v6090_v54, %v6780_v46 }
 0x133   : > { %6093 = vtanh.f32 %v786_v55 }
 0x134   : > { %v830_v57 = vpop.f32.mrf.mxu3  ;;  %v947_v58 = vsel %vm943_vm1, %v912_v56, 0.0 }
 0x135   : > { %v6092_v59 = vpop.eup %6091  ;;  %v831_v60 = vadd.f32 %v6772_v40, %v830_v57  ;;  %948 = vadd.xlane.f32.xlu0 %v947_v58 }
 0x136   : > { %v927_v61 = vmul.f32 %v6092_v59, %v6780_v46 }
 0x137   : > { %6095 = vtanh.f32 %v831_v60 }
 0x138   : > { %v788_v62 = vpop.f32.mrf.mxu1  ;;  %v992_v63 = vsel %vm943_vm1, %v927_v61, 0.0 }
 0x139   : > { %v6094_v0 = vpop.eup %6093  ;;  %v789_v1 = vadd.f32 %v6772_v40, %v788_v62  ;;  %993 = vadd.xlane.f32.xlu1 %v992_v63 }
 0x13a   : > { %v913_v2 = vmul.f32 %v6094_v0, %v6780_v46 }
 0x13b   : > { %6097 = vtanh.f32 %v789_v1 }
 0x13c   : > { %v833_v3 = vpop.f32.mrf.mxu3  ;;  %v950_v7 = vsel %vm943_vm1, %v913_v2, 0.0 }
 0x13d   : > { %v6096_v4 = vpop.eup %6095  ;;  %v834_v5 = vadd.f32 %v6772_v40, %v833_v3 }
 0x13e   : > { %v928_v6 = vmul.f32 %v6096_v4, %v6780_v46 }
 0x13f   : > { %6099 = vtanh.f32 %v834_v5 }
 0x140   : > { %v791_v8 = vpop.f32.mrf.mxu1  ;;  %v995_v9 = vsel %vm943_vm1, %v928_v6, 0.0 }
 0x141   : > { %v6098_v10 = vpop.eup %6097  ;;  %v792_v11 = vadd.f32 %v6772_v40, %v791_v8  ;;  %996 = vadd.xlane.f32.xlu2 %v995_v9  ;;  %951 = vadd.xlane.f32.xlu1 %v950_v7 }
 0x142   : > { %v914_v12 = vmul.f32 %v6098_v10, %v6780_v46 }
 0x143   : > { %6101 = vtanh.f32 %v792_v11 }
 0x144   : > { %v836_v13 = vpop.f32.mrf.mxu3  ;;  %v953_v16 = vsel %vm943_vm1, %v914_v12, 0.0 }
 0x145   : > { %v6100_v14 = vpop.eup %6099  ;;  %v837_v15 = vadd.f32 %v6772_v40, %v836_v13 }
 0x146   : > { %v929_v17 = vmul.f32 %v6100_v14, %v6780_v46 }
 0x147   : > { %6103 = vtanh.f32 %v837_v15 }
 0x148   : > { %v794_v18 = vpop.f32.mrf.mxu1  ;;  %v998_v19 = vsel %vm943_vm1, %v929_v17, 0.0 }
 0x149   : > { %v6102_v20 = vpop.eup %6101  ;;  %v795_v21 = vadd.f32 %v6772_v40, %v794_v18  ;;  %954 = vadd.xlane.f32.xlu1 %v953_v16  ;;  %999 = vadd.xlane.f32.xlu0 %v998_v19 }
 0x14a   : > { %v915_v22 = vmul.f32 %v6102_v20, %v6780_v46 }
 0x14b   : > { %6105 = vtanh.f32 %v795_v21 }
 0x14c   : > { %v839_v23 = vpop.f32.mrf.mxu3  ;;  %v956_v24 = vsel %vm943_vm1, %v915_v22, 0.0 }
 0x14d   : > { %v6104_v25 = vpop.eup %6103  ;;  %v840_v26 = vadd.f32 %v6772_v40, %v839_v23  ;;  %957 = vadd.xlane.f32.xlu2 %v956_v24 }
 0x14e   : > { %v930_v27 = vmul.f32 %v6104_v25, %v6780_v46 }
 0x14f   : > { %6107 = vtanh.f32 %v840_v26 }
 0x150   : > { %v797_v28 = vpop.f32.mrf.mxu1  ;;  %v1001_v29 = vsel %vm943_vm1, %v930_v27, 0.0 }
 0x151   : > { %v6106_v30 = vpop.eup %6105  ;;  %v798_v31 = vadd.f32 %v6772_v40, %v797_v28  ;;  %1002 = vadd.xlane.f32.xlu1 %v1001_v29 }
 0x152   : > { %v916_v32 = vmul.f32 %v6106_v30, %v6780_v46 }
 0x153   : > { %6109 = vtanh.f32 %v798_v31 }
 0x154   : > { %v842_v33 = vpop.f32.mrf.mxu3  ;;  %v959_v34 = vsel %vm943_vm1, %v916_v32, 0.0 }
 0x155   : > { %v6108_v35 = vpop.eup %6107  ;;  %v843_v36 = vadd.f32 %v6772_v40, %v842_v33  ;;  %960 = vadd.xlane.f32.xlu2 %v959_v34 }
 0x156   : > { %v931_v38 = vmul.f32 %v6108_v35, %v6780_v46 }
 0x157   : > { %6111 = vtanh.f32 %v843_v36 }
 0x158   : > { %v800_v37 = vpop.f32.mrf.mxu1  ;;  %v1004_v45 = vsel %vm943_vm1, %v931_v38, 0.0 }
 0x159   : > { %v6110_v39 = vpop.eup %6109  ;;  %v801_v42 = vadd.f32 %v6772_v40, %v800_v37 }
 0x15a   : > { %v917_v43 = vmul.f32 %v6110_v39, %v6780_v46 }
 0x15b   : > { %6113 = vtanh.f32 %v801_v42 }
 0x15c   : > { %v845_v44 = vpop.f32.mrf.mxu3  ;;  %v962_v47 = vsel %vm943_vm1, %v917_v43, 0.0 }
 0x15d   : > { %v6112_v48 = vpop.eup %6111  ;;  %v846_v49 = vadd.f32 %v6772_v40, %v845_v44  ;;  %1005 = vadd.xlane.f32.xlu2 %v1004_v45  ;;  %963 = vadd.xlane.f32.xlu0 %v962_v47 }
 0x15e   : > { %v932_v41 = vmul.f32 %v6112_v48, %v6780_v46 }
 0x15f   : > { %6115 = vtanh.f32 %v846_v49 }
 0x160   : > { %v803_v50 = vpop.f32.mrf.mxu1  ;;  %v1007_v56 = vsel %vm943_vm1, %v932_v41, 0.0 }
 0x161   : > { %v6114_v51 = vpop.eup %6113  ;;  %v804_v52 = vadd.f32 %v6772_v40, %v803_v50 }
 0x162   : > { %v918_v53 = vmul.f32 %v6114_v51, %v6780_v46 }
 0x163   : > { %6117 = vtanh.f32 %v804_v52 }
 0x164   : > { %v848_v54 = vpop.f32.mrf.mxu3  ;;  %v965_v55 = vsel %vm943_vm1, %v918_v53, 0.0 }
 0x165   : > { %v6116_v57 = vpop.eup %6115  ;;  %v849_v58 = vadd.f32 %v6772_v40, %v848_v54  ;;  %966 = vadd.xlane.f32.xlu1 %v965_v55  ;;  %1008 = vadd.xlane.f32.xlu0 %v1007_v56 }
 0x166   : > { %v933_v60 = vmul.f32 %v6116_v57, %v6780_v46 }
 0x167   : > { %6119 = vtanh.f32 %v849_v58 }
 0x168   : > { %v806_v59 = vpop.f32.mrf.mxu1  ;;  %v1010_v2 = vsel %vm943_vm1, %v933_v60, 0.0 }
 0x169   : > { %v6118_v61 = vpop.eup %6117  ;;  %v807_v62 = vadd.f32 %v6772_v40, %v806_v59 }
 0x16a   : > { %v919_v63 = vmul.f32 %v6118_v61, %v6780_v46 }
 0x16b   : > { %6121 = vtanh.f32 %v807_v62 }
 0x16c   : > { %v851_v0 = vpop.f32.mrf.mxu3  ;;  %v968_v1 = vsel %vm943_vm1, %v919_v63, 0.0 }
 0x16d   : > { %v6120_v3 = vpop.eup %6119  ;;  %v852_v4 = vadd.f32 %v6772_v40, %v851_v0  ;;  %969 = vadd.xlane.f32.xlu2 %v968_v1  ;;  %1011 = vadd.xlane.f32.xlu1 %v1010_v2 }
 0x16e   : > { %v934_v6 = vmul.f32 %v6120_v3, %v6780_v46  ;;  %v6868_v3 = vld [vmem:[#allocation4] ss:$0 sm:$0xff] }
 0x16f   : > { %6123 = vtanh.f32 %v852_v4 }
 0x170   : > { %v809_v5 = vpop.f32.mrf.mxu1  ;;  %v1013_v11 = vsel %vm943_vm1, %v934_v6, 0.0 }
 0x171   : > { %v6122_v7 = vpop.eup %6121  ;;  %v810_v8 = vadd.f32 %v6772_v40, %v809_v5 }
 0x172   : > { %v920_v9 = vmul.f32 %v6122_v7, %v6780_v46 }
 0x173   : > { %6125 = vtanh.f32 %v810_v8 }
 0x174   : > { %v854_v10 = vpop.f32.mrf.mxu3  ;;  %v971_v12 = vsel %vm943_vm1, %v920_v9, 0.0  ;;  %v6497_v9 = vmov 0  }
 0x175   : > { %v6124_v13 = vpop.eup %6123  ;;  %v855_v14 = vadd.f32 %v6772_v40, %v854_v10  ;;  %1014 = vadd.xlane.f32.xlu2 %v1013_v11  ;;  %972 = vadd.xlane.f32.xlu0 %v971_v12 }
 0x176   : > { %v935_v16 = vmul.f32 %v6124_v13, %v6780_v46  ;;  %6080 = vset.pattern.permute.xlu2 %v6497_v9  ;;  %6081 = vset.pattern.permute.xlu0 %v6497_v9 }
 0x177   : > { %6127 = vtanh.f32 %v855_v14  ;;  %6082 = vset.pattern.permute.xlu1 %v6497_v9 }
 0x178   : > { %v812_v15 = vpop.f32.mrf.mxu1  ;;  %v1016_v22 = vsel %vm943_vm1, %v935_v16, 0.0 }
 0x179   : > { %v6126_v17 = vpop.eup %6125  ;;  %v813_v18 = vadd.f32 %v6772_v40, %v812_v15 }
 0x17a   : > { %v921_v19 = vmul.f32 %v6126_v17, %v6780_v46 }
 0x17b   : > { %6129 = vtanh.f32 %v813_v18 }
 0x17c   : > { %v857_v20 = vpop.f32.mrf.mxu3  ;;  %v974_v21 = vsel %vm943_vm1, %v921_v19, 0.0 }
 0x17d   : > { %v6128_v23 = vpop.eup %6127  ;;  %v858_v24 = vadd.f32 %v6772_v40, %v857_v20  ;;  %975 = vadd.xlane.f32.xlu1 %v974_v21  ;;  %1017 = vadd.xlane.f32.xlu0 %v1016_v22 }
 0x17e   : > { %v936_v26 = vmul.f32 %v6128_v23, %v6780_v46 }
 0x17f   : > { %6131 = vtanh.f32 %v858_v24 }
 0x180   : > { %v815_v25 = vpop.f32.mrf.mxu1  ;;  %v1019_v32 = vsel %vm943_vm1, %v936_v26, 0.0 }
 0x181   : > { %v6130_v27 = vpop.eup %6129  ;;  %v816_v28 = vadd.f32 %v6772_v40, %v815_v25 }
 0x182   : > { %v922_v29 = vmul.f32 %v6130_v27, %v6780_v46 }
 0x183   : > { %6133 = vtanh.f32 %v816_v28 }
 0x184   : > { %v860_v30 = vpop.f32.mrf.mxu3  ;;  %v977_v31 = vsel %vm943_vm1, %v922_v29, 0.0 }
 0x185   : > { %v6132_v33 = vpop.eup %6131  ;;  %v861_v34 = vadd.f32 %v6772_v40, %v860_v30  ;;  %978 = vadd.xlane.f32.xlu2 %v977_v31  ;;  %1020 = vadd.xlane.f32.xlu1 %v1019_v32 }
 0x186   : > { %v937_v36 = vmul.f32 %v6132_v33, %v6780_v46 }
 0x187   : > { %6135 = vtanh.f32 %v861_v34 }
 0x188   : > { %v818_v35 = vpop.f32.mrf.mxu1  ;;  %v1022_v43 = vsel %vm943_vm1, %v937_v36, 0.0 }
 0x189   : > { %v6134_v37 = vpop.eup %6133  ;;  %v819_v38 = vadd.f32 %v6772_v40, %v818_v35 }
 0x18a   : > { %v923_v39 = vmul.f32 %v6134_v37, %v6780_v46 }
 0x18b   : > { %6137 = vtanh.f32 %v819_v38 }
 0x18c   : > { %v863_v42 = vpop.f32.mrf.mxu3  ;;  %v980_v44 = vsel %vm943_vm1, %v923_v39, 0.0 }
 0x18d   : > { %v6136_v45 = vpop.eup %6135  ;;  %v864_v47 = vadd.f32 %v6772_v40, %v863_v42  ;;  %1023 = vadd.xlane.f32.xlu2 %v1022_v43  ;;  %981 = vadd.xlane.f32.xlu0 %v980_v44 }
 0x18e   : > { %v938_v49 = vmul.f32 %v6136_v45, %v6780_v46 }
 0x18f   : > { %6139 = vtanh.f32 %v864_v47 }
 0x190   : > { %v821_v48 = vpop.f32.mrf.mxu1  ;;  %v1025_v54 = vsel %vm943_vm1, %v938_v49, 0.0 }
 0x191   : > { %v6138_v50 = vpop.eup %6137  ;;  %v822_v41 = vadd.f32 %v6772_v40, %v821_v48 }
 0x192   : > { %v924_v51 = vmul.f32 %v6138_v50, %v6780_v46 }
 0x193   : > { %6141 = vtanh.f32 %v822_v41 }
 0x194   : > { %v866_v52 = vpop.f32.mrf.mxu3  ;;  %v983_v53 = vsel %vm943_vm1, %v924_v51, 0.0 }
 0x195   : > { %v6140_v55 = vpop.eup %6139  ;;  %v867_v56 = vadd.f32 %v6772_v40, %v866_v52  ;;  %984 = vadd.xlane.f32.xlu1 %v983_v53  ;;  %1026 = vadd.xlane.f32.xlu0 %v1025_v54 }
 0x196   : > { %v939_v58 = vmul.f32 %v6140_v55, %v6780_v46 }
 0x197   : > { %6143 = vtanh.f32 %v867_v56 }
 0x198   : > { %v824_v57 = vpop.f32.mrf.mxu1  ;;  %v1028_v0 = vsel %vm943_vm1, %v939_v58, 0.0 }
 0x199   : > { %v6142_v59 = vpop.eup %6141  ;;  %v825_v60 = vadd.f32 %v6772_v40, %v824_v57 }
 0x19a   : > { %v925_v61 = vmul.f32 %v6142_v59, %v6780_v46 }
 0x19b   : > { %6145 = vtanh.f32 %v825_v60 }
 0x19c   : > { %v869_v62 = vpop.f32.mrf.mxu3  ;;  %v986_v63 = vsel %vm943_vm1, %v925_v61, 0.0 }
 0x19d   : > { %v6144_v1 = vpop.eup %6143  ;;  %v870_v2 = vadd.f32 %v6772_v40, %v869_v62  ;;  %987 = vadd.xlane.f32.xlu2 %v986_v63  ;;  %1029 = vadd.xlane.f32.xlu1 %v1028_v0 }
 0x19e   : > { %v940_v5 = vmul.f32 %v6144_v1, %v6780_v46 }
 0x19f   : > { %6147 = vtanh.f32 %v870_v2 }
 0x1a0   : > { %v946_v4 = vpop.xlane.xlu0 %945  ;;  %v1031_v12 = vsel %vm943_vm1, %v940_v5, 0.0 }
 0x1a1   : > { %v6146_v6 = vpop.eup %6145  ;;  %v1044_v7 = vadd.f32 %v6868_v3, %v946_v4 }
 0x1a2   : > { %v926_v8 = vmul.f32 %v6146_v6, %v6780_v46 }
 0x1a3   : > { %v1076_v10 = vsub.f32 0.0, %v1044_v7 }
 0x1a4   : > { %v872_v11 = vpop.f32.mrf.mxu3  ;;  %v989_v13 = vsel %vm943_vm1, %v926_v8, 0.0 }
 0x1a5   : > { %v6148_v14 = vpop.eup %6147  ;;  %v1108_v15 = vmul.f32 1.442695, %v1076_v10  ;;  %v873_v16 = vadd.f32 %v6772_v40, %v872_v11  ;;  %1032 = vadd.xlane.f32.xlu2 %v1031_v12  ;;  %990 = vadd.xlane.f32.xlu0 %v989_v13 }
 0x1a6   : > { %v941_v18 = vmul.f32 %v6148_v14, %v6780_v46 }
 0x1a7   : > { %6149 = vpow2.f32 %v1108_v15 }
 0x1a8   : > { %6151 = vtanh.f32 %v873_v16  ;;  %v949_v17 = vpop.xlane.xlu0 %948  ;;  %v1034_v22 = vsel %vm943_vm1, %v941_v18, 0.0 }
 0x1a9   : > { %v1045_v19 = vadd.f32 %v6868_v3, %v949_v17 }
 0x1ab   : > { %v1077_v20 = vsub.f32 0.0, %v1045_v19 }
 0x1ac   : > { %v994_v21 = vpop.xlane.xlu1 %993 }
 0x1ad   : > { %v6150_v23 = vpop.eup %6149  ;;  %v1110_v24 = vmul.f32 1.442695, %v1077_v20  ;;  %v1060_v25 = vadd.f32 %v6868_v3, %v994_v21  ;;  %1035 = vadd.xlane.f32.xlu0 %v1034_v22 }
 0x1ae   : > { %v6152_v26 = vpop.eup %6151  ;;  %v1172_v40 = vadd.f32 1.0, %v6150_v23 }
 0x1af   : > { %6153 = vpow2.f32 %v1110_v24  ;;  %v1092_v27 = vsub.f32 0.0, %v1060_v25  ;;  %v942_v28 = vmul.f32 %v6152_v26, %v6780_v46 }
 0x1b0   : > { %6155 = vrcp.f32 %v1172_v40  ;;  %vm1209_vm2 = vweird.f32 %v1172_v40  ;;  %v1213_v46 = vand.u32 2147483647, %v1172_v40  ;;  %v1215_v43 = vand.u32 2147483648, %v1172_v40 }
 0x1b1   : > { %v1140_v29 = vmul.f32 1.442695, %v1092_v27  ;;  %v1037_v30 = vsel %vm943_vm1, %v942_v28, 0.0 }
 0x1b2   : > { %1038 = vadd.xlane.f32.xlu1 %v1037_v30  ;;  %vm1214_vm5 = vcmp.eq.f32.partialorder %v1213_v46, 8.507059e+37  ;;  %v1216_v53 = vor.u32 1.1754944e-38, %v1215_v43 }
 0x1b3   : > { %6157 = vpow2.f32 %v1140_v29 }
 0x1b4   : > { %v997_v31 = vpop.xlane.xlu2 %996  ;;  %v952_v32 = vpop.xlane.xlu1 %951 }
 0x1b5   : > { %v6154_v33 = vpop.eup %6153  ;;  %v1061_v34 = vadd.f32 %v6868_v3, %v997_v31  ;;  %v1046_v35 = vadd.f32 %v6868_v3, %v952_v32 }
 0x1b6   : > { %v6156_v36 = vpop.eup %6155  ;;  %v1173_v37 = vadd.f32 1.0, %v6154_v33 }
 0x1b7   : > { %v1093_v38 = vsub.f32 0.0, %v1061_v34  ;;  %v1078_v39 = vsub.f32 0.0, %v1046_v35  ;;  %v1205_v42 = vmul.f32 %v6156_v36, %v1172_v40  ;;  %vm1210_vm3 = vweird.f32 %v6156_v36 }
 0x1b8   : > { %6159 = vrcp.f32 %v1173_v37  ;;  %vm6887_vm4 = vmor %vm1209_vm2, %vm1210_vm3  ;;  %v1228_v58 = vand.u32 2147483647, %v1173_v37  ;;  %vm1224_vm7 = vweird.f32 %v1173_v37  ;;  %v1230_v1 = vand.u32 2147483648, %v1173_v37 }
 0x1b9   : > { %v6158_v44 = vpop.eup %6157  ;;  %v1142_v45 = vmul.f32 1.442695, %v1093_v38  ;;  %v1112_v47 = vmul.f32 1.442695, %v1078_v39  ;;  %v1206_v48 = vsub.f32 1.0, %v1205_v42 }
 0x1ba   : > { %v6884_v49 = vadd.f32 1.0, %v6158_v44  ;;  %vm6899_vm9 = vcmp.eq.f32.partialorder %v1228_v58, 8.507059e+37  ;;  %v1231_v19 = vor.u32 1.1754944e-38, %v1230_v1 }
 0x1bb   : > { %6161 = vpow2.f32 %v1142_v45  ;;  %v1207_v50 = vmul.f32 %v6156_v36, %v1206_v48 }
 0x1bc   : > { %6163 = vrcp.f32 %v6884_v49  ;;  %v955_v41 = vpop.xlane.xlu1 %954  ;;  %v1000_v51 = vpop.xlane.xlu0 %999  ;;  %v1453_v11 = vand.u32 2147483647, %v6884_v49  ;;  %v1455_v20 = vand.u32 2147483648, %v6884_v49  ;;  %vm1449_vm11 = vweird.f32 %v6884_v49 }
 0x1bd   : > { %6165 = vpow2.f32 %v1112_v47  ;;  %v1047_v54 = vadd.f32 %v6868_v3, %v955_v41  ;;  %v1062_v55 = vadd.f32 %v6868_v3, %v1000_v51  ;;  %v1208_v56 = vadd.f32 %v6156_v36, %v1207_v50 }
 0x1be   : > { %v6160_v57 = vpop.eup %6159  ;;  %vm6920_vm12 = vcmp.eq.f32.partialorder %v1453_v11, 8.507059e+37  ;;  %v1456_v30 = vor.u32 1.1754944e-38, %v1455_v20 }
 0x1bf   : > { %v1079_v59 = vsub.f32 0.0, %v1047_v54  ;;  %v1094_v60 = vsub.f32 0.0, %v1062_v55  ;;  %v1212_v61 = vsel %vm6887_vm4, %v6156_v36, %v1208_v56  ;;  %v1220_v62 = vmul.f32 %v6160_v57, %v1173_v37 }
 0x1c0   : > { %v958_v63 = vpop.xlane.xlu2 %957  ;;  %v1217_v0 = vsel %vm1214_vm5, %v1216_v53, %v1212_v61  ;;  %vm1225_vm8 = vweird.f32 %v6160_v57 }
 0x1c1   : > { %v6162_v2 = vpop.eup %6161  ;;  %v1114_v4 = vmul.f32 1.442695, %v1079_v59  ;;  %v1144_v5 = vmul.f32 1.442695, %v1094_v60  ;;  %v1048_v6 = vadd.f32 %v6868_v3, %v958_v63  ;;  %1719 = vperm.xlu2 %6080, %v1217_v0   ;;  %1685 = vst.msk [vmem:[#allocation2] sm:$0xff] %vm1684_vm6, %v1217_v0  ;;  %v1221_v7 = vsub.f32 1.0, %v1220_v62  ;;  %vm6910_vm10 = vmor %vm1224_vm7, %vm1225_vm8 }
 0x1c2   : > { %v6164_v8 = vpop.eup %6163  ;;  %v6897_v9 = vadd.f32 1.0, %v6162_v2 }
 0x1c3   : > { %v6166_v12 = vpop.eup %6165  ;;  %6167 = vpow2.f32 %v1114_v4  ;;  %v1080_v13 = vsub.f32 0.0, %v1048_v6  ;;  %v1222_v14 = vmul.f32 %v6160_v57, %v1221_v7  ;;  %v1445_v15 = vmul.f32 %v6164_v8, %v6884_v49 }
 0x1c4   : > { %6169 = vrcp.f32 %v6897_v9  ;;  %v6906_v16 = vadd.f32 1.0, %v6166_v12  ;;  %v1003_v17 = vpop.xlane.xlu1 %1002  ;;  %vm1450_vm13 = vweird.f32 %v6164_v8  ;;  %vm1464_vm14 = vweird.f32 %v6897_v9 }
 0x1c5   : > { %6171 = vpow2.f32 %v1144_v5  ;;  %v1116_v21 = vmul.f32 1.442695, %v1080_v13  ;;  %v1063_v22 = vadd.f32 %v6868_v3, %v1003_v17  ;;  %v1223_v23 = vadd.f32 %v6160_v57, %v1222_v14  ;;  %vm1451_vm15 = vmor %vm1449_vm11, %vm1450_vm13 }
 0x1c6   : > { %6173 = vrcp.f32 %v6906_v16  ;;  %v1446_v24 = vsub.f32 1.0, %v1445_v15  ;;  %v1243_v34 = vand.u32 2147483647, %v6906_v16  ;;  %v1245_v35 = vand.u32 2147483648, %v6906_v16 }
 0x1c7   : > { %6175 = vpow2.f32 %v1116_v21  ;;  %v1095_v25 = vsub.f32 0.0, %v1063_v22  ;;  %v1227_v26 = vsel %vm6910_vm10, %v6160_v57, %v1223_v23  ;;  %v1468_v39 = vand.u32 2147483647, %v6897_v9 }
 0x1c8   : > { %v961_v27 = vpop.xlane.xlu2 %960  ;;  %v1232_v28 = vsel %vm6899_vm9, %v1231_v19, %v1227_v26  ;;  %v1447_v29 = vmul.f32 %v6164_v8, %v1446_v24  ;;  %v1470_v44 = vand.u32 2147483648, %v6897_v9  ;;  %vm1239_vm1 = vweird.f32 %v6906_v16 }
 0x1c9   : > { %v6168_v31 = vpop.eup %6167  ;;  %v1146_v32 = vmul.f32 1.442695, %v1095_v25  ;;  %v1049_v33 = vadd.f32 %v6868_v3, %v961_v27  ;;  %1724 = vperm.xlu0 %6081, %v1232_v28   ;;  %1686 = vst.msk [vmem:[#allocation2 + $0x8] sm:$0xff] %vm1684_vm6, %v1232_v28  ;;  %vm6949_vm2 = vcmp.eq.f32.partialorder %v1243_v34, 8.507059e+37  ;;  %v1246_v53 = vor.u32 1.1754944e-38, %v1245_v35 }
 0x1ca   : > { %v6930_v36 = vpop.eup %6169  ;;  %v6932_v37 = vadd.f32 1.0, %v6168_v31  ;;  %v1448_v38 = vadd.f32 %v6164_v8, %v1447_v29  ;;  %vm6957_vm3 = vcmp.eq.f32.partialorder %v1468_v39, 8.507059e+37  ;;  %v1471_v58 = vor.u32 1.1754944e-38, %v1470_v44 }
 0x1cb   : > { %v6172_v42 = vpop.eup %6171  ;;  %6177 = vpow2.f32 %v1146_v32  ;;  %v1081_v46 = vsub.f32 0.0, %v1049_v33  ;;  %v1460_v43 = vmul.f32 %v6930_v36, %v6897_v9  ;;  %vm1465_vm4 = vweird.f32 %v6930_v36 }
 0x1cc   : > { %v6174_v45 = vpop.eup %6173  ;;  %6179 = vrcp.f32 %v6932_v37  ;;  %v6943_v47 = vadd.f32 1.0, %v6172_v42  ;;  %v1452_v48 = vsel %vm1451_vm15, %v6164_v8, %v1448_v38  ;;  %v1258_v62 = vand.u32 2147483647, %v6932_v37  ;;  %vm1466_vm8 = vmor %vm1464_vm14, %vm1465_vm4 }
 0x1cd   : > { %v6176_v50 = vpop.eup %6175  ;;  %v1118_v41 = vmul.f32 1.442695, %v1081_v46  ;;  %v1457_v51 = vsel %vm6920_vm12, %v1456_v30, %v1452_v48  ;;  %v1235_v49 = vmul.f32 %v6174_v45, %v6906_v16  ;;  %v1461_v55 = vsub.f32 1.0, %v1460_v43 }
 0x1ce   : > { %6181 = vrcp.f32 %v6943_v47  ;;  %v6954_v54 = vadd.f32 1.0, %v6176_v50  ;;  %1701 = vst.msk [vmem:[#allocation2 + $0x80] sm:$0xff] %vm1684_vm6, %v1457_v51  ;;  %1799 = vperm.xlu1 %6082, %v1457_v51   ;;  %vm1240_vm5 = vweird.f32 %v6174_v45  ;;  %v1260_v63 = vand.u32 2147483648, %v6932_v37 }
 0x1cf   : > { %6183 = vpow2.f32 %v1118_v41  ;;  %v1236_v57 = vsub.f32 1.0, %v1235_v49  ;;  %v1462_v61 = vmul.f32 %v6930_v36, %v1461_v55  ;;  %vm1254_vm7 = vweird.f32 %v6932_v37  ;;  %vm1241_vm9 = vmor %vm1239_vm1, %vm1240_vm5 }
 0x1d0   : > { %v1006_v59 = vpop.xlane.xlu2 %1005  ;;  %v964_v60 = vpop.xlane.xlu0 %963  ;;  %6185 = vrcp.f32 %v6954_v54  ;;  %v1483_v8 = vand.u32 2147483647, %v6943_v47  ;;  %vm6988_vm10 = vcmp.eq.f32.partialorder %v1258_v62, 8.507059e+37  ;;  %v1261_v18 = vor.u32 1.1754944e-38, %v1260_v63 }
 0x1d1   : > { %v6178_v0 = vpop.eup %6177  ;;  %v1064_v1 = vadd.f32 %v6868_v3, %v1006_v59  ;;  %v1050_v2 = vadd.f32 %v6868_v3, %v964_v60  ;;  %v1237_v4 = vmul.f32 %v6174_v45, %v1236_v57  ;;  %v1463_v7 = vadd.f32 %v6930_v36, %v1462_v61 }
 0x1d2   : > { %v6968_v5 = vpop.eup %6179  ;;  %v6971_v6 = vadd.f32 1.0, %v6178_v0  ;;  %vm1479_vm12 = vweird.f32 %v6943_v47  ;;  %v1485_v31 = vand.u32 2147483648, %v6943_v47  ;;  %vm7015_vm15 = vcmp.eq.f32.partialorder %v1483_v8, 8.507059e+37 }
 0x1d3   : > { %v1096_v10 = vsub.f32 0.0, %v1064_v1  ;;  %v1082_v11 = vsub.f32 0.0, %v1050_v2  ;;  %v1238_v12 = vadd.f32 %v6174_v45, %v1237_v4  ;;  %v1250_v13 = vmul.f32 %v6968_v5, %v6932_v37 }
 0x1d4   : > { %v6981_v14 = vpop.eup %6181  ;;  %6187 = vrcp.f32 %v6971_v6  ;;  %v1467_v15 = vsel %vm1466_vm8, %v6930_v36, %v1463_v7  ;;  %vm1255_vm11 = vweird.f32 %v6968_v5  ;;  %v1498_v25 = vand.u32 2147483647, %v6971_v6 }
 0x1d5   : > { %v6184_v9 = vpop.eup %6183  ;;  %v1148_v19 = vmul.f32 1.442695, %v1096_v10  ;;  %v1120_v20 = vmul.f32 1.442695, %v1082_v11  ;;  %v1242_v21 = vsel %vm1241_vm9, %v6174_v45, %v1238_v12  ;;  %v1472_v22 = vsel %vm6957_vm3, %v1471_v58, %v1467_v15 }
 0x1d6   : > { %v6994_v23 = vadd.f32 1.0, %v6184_v9  ;;  %v1247_v16 = vsel %vm6949_vm2, %v1246_v53, %v1242_v21  ;;  %1702 = vst.msk [vmem:[#allocation2 + $0x88] sm:$0xff] %vm1684_vm6, %v1472_v22  ;;  %1804 = vperm.xlu0 %6081, %v1472_v22   ;;  %v1251_v24 = vsub.f32 1.0, %v1250_v13  ;;  %v1500_v26 = vand.u32 2147483648, %v6971_v6  ;;  %v7006_v27 = vpop.eup %6185  ;;  %vm1256_vm2 = vmor %vm1254_vm7, %vm1255_vm11 }
 0x1d7   : > { %6189 = vpow2.f32 %v1148_v19  ;;  %1729 = vperm.xlu1 %6082, %v1247_v16   ;;  %1687 = vst.msk [vmem:[#allocation2 + $0x10] sm:$0xff] %vm1684_vm6, %v1247_v16  ;;  %v1475_v40 = vmul.f32 %v6981_v14, %v6943_v47  ;;  %vm1480_vm13 = vweird.f32 %v6981_v14  ;;  %vm1494_vm14 = vweird.f32 %v6971_v6 }
 0x1d8   : > { %6191 = vrcp.f32 %v6994_v23  ;;  %v967_v28 = vpop.xlane.xlu1 %966  ;;  %v1009_v29 = vpop.xlane.xlu0 %1008  ;;  %v1252_v30 = vmul.f32 %v6968_v5, %v1251_v24  ;;  %v1501_v34 = vor.u32 1.1754944e-38, %v1500_v26  ;;  %v1486_v42 = vor.u32 1.1754944e-38, %v1485_v31  ;;  %vm7050_vm7 = vmor %vm1479_vm12, %vm1480_vm13 }
 0x1d9   : > { %6193 = vpow2.f32 %v1120_v20  ;;  %v1051_v32 = vadd.f32 %v6868_v3, %v967_v28  ;;  %v1065_v33 = vadd.f32 %v6868_v3, %v1009_v29  ;;  %v1476_v39 = vsub.f32 1.0, %v1475_v40 }
 0x1da   : > { %v6188_v36 = vpop.eup %6187  ;;  %v1253_v38 = vadd.f32 %v6968_v5, %v1252_v30  ;;  %vm1284_vm1 = vweird.f32 %v6994_v23  ;;  %vm7026_vm4 = vcmp.eq.f32.partialorder %v1498_v25, 8.507059e+37  ;;  %v1288_v41 = vand.u32 2147483647, %v6994_v23 }
 0x1db   : > { %v1083_v46 = vsub.f32 0.0, %v1051_v32  ;;  %v1097_v43 = vsub.f32 0.0, %v1065_v33  ;;  %v1490_v44 = vmul.f32 %v6188_v36, %v6971_v6  ;;  %vm1495_vm3 = vweird.f32 %v6188_v36 }
 0x1dc   : > { %v1257_v48 = vsel %vm1256_vm2, %v6968_v5, %v1253_v38  ;;  %v1477_v50 = vmul.f32 %v6981_v14, %v1476_v39  ;;  %v1290_v51 = vand.u32 2147483648, %v6994_v23  ;;  %vm7042_vm5 = vcmp.eq.f32.partialorder %v1288_v41, 8.507059e+37  ;;  %vm1496_vm9 = vmor %vm1494_vm14, %vm1495_vm3 }
 0x1dd   : > { %v6190_v49 = vpop.eup %6189  ;;  %v1122_v52 = vmul.f32 1.442695, %v1083_v46  ;;  %v1150_v53 = vmul.f32 1.442695, %v1097_v43  ;;  %v1262_v37 = vsel %vm6988_vm10, %v1261_v18, %v1257_v48  ;;  %v1491_v55 = vsub.f32 1.0, %v1490_v44 }
 0x1de   : > { %v7036_v56 = vpop.eup %6191  ;;  %v7038_v57 = vadd.f32 1.0, %v6190_v49  ;;  %1688 = vst.msk [vmem:[#allocation2 + $0x18] sm:$0xff] %vm1684_vm6, %v1262_v37  ;;  %1734 = vperm.xlu2 %6080, %v1262_v37   ;;  %v1478_v58 = vadd.f32 %v6981_v14, %v1477_v50  ;;  %v1291_v60 = vor.u32 1.1754944e-38, %v1290_v51  ;;  %v1265_v47 = vmul.f32 %v7006_v27, %v6954_v54 }
 0x1df   : > { %v6194_v61 = vpop.eup %6193  ;;  %6195 = vpow2.f32 %v1122_v52  ;;  %v1492_v62 = vmul.f32 %v6188_v36, %v1491_v55  ;;  %v1280_v0 = vmul.f32 %v7036_v56, %v6994_v23  ;;  %vm1285_vm8 = vweird.f32 %v7036_v56 }
 0x1e0   : > { %6197 = vrcp.f32 %v7038_v57  ;;  %v7058_v1 = vadd.f32 1.0, %v6194_v61  ;;  %v970_v2 = vpop.xlane.xlu2 %969  ;;  %v1012_v4 = vpop.xlane.xlu1 %1011  ;;  %v1482_v5 = vsel %vm7050_vm7, %v6981_v14, %v1478_v58  ;;  %v1266_v13 = vsub.f32 1.0, %v1265_v47  ;;  %vm7082_vm11 = vmor %vm1284_vm1, %vm1285_vm8 }
 0x1e1   : > { %6199 = vpow2.f32 %v1150_v53  ;;  %v1052_v7 = vadd.f32 %v6868_v3, %v970_v2  ;;  %v1066_v8 = vadd.f32 %v6868_v3, %v1012_v4  ;;  %v1493_v10 = vadd.f32 %v6188_v36, %v1492_v62 }
 0x1e2   : > { %6201 = vrcp.f32 %v7058_v1  ;;  %v1487_v11 = vsel %vm7015_vm15, %v1486_v42, %v1482_v5  ;;  %v1281_v12 = vsub.f32 1.0, %v1280_v0  ;;  %vm1269_vm10 = vweird.f32 %v6954_v54 }
 0x1e3   : > { %v1084_v14 = vsub.f32 0.0, %v1052_v7  ;;  %v1098_v15 = vsub.f32 0.0, %v1066_v8  ;;  %v1497_v17 = vsel %vm1496_vm9, %v6188_v36, %v1493_v10  ;;  %1703 = vst.msk [vmem:[#allocation2 + $0x90] sm:$0xff] %vm1684_vm6, %v1487_v11  ;;  %v1267_v19 = vmul.f32 %v7006_v27, %v1266_v13 }
 0x1e4   : > { %v1502_v18 = vsel %vm7026_vm4, %v1501_v34, %v1497_v17  ;;  %v1282_v9 = vmul.f32 %v7036_v56, %v1281_v12  ;;  %vm1270_vm12 = vweird.f32 %v7006_v27  ;;  %v1275_v23 = vand.u32 2147483648, %v6954_v54 }
 0x1e5   : > { %v6196_v20 = vpop.eup %6195  ;;  %v1124_v21 = vmul.f32 1.442695, %v1084_v14  ;;  %v1152_v22 = vmul.f32 1.442695, %v1098_v15  ;;  %1814 = vperm.xlu1 %6082, %v1502_v18   ;;  %1704 = vst.msk [vmem:[#allocation2 + $0x98] sm:$0xff] %vm1684_vm6, %v1502_v18  ;;  %vm7089_vm13 = vmor %vm1269_vm10, %vm1270_vm12  ;;  %v1268_v40 = vadd.f32 %v7006_v27, %v1267_v19  ;;  %vm1509_vm14 = vweird.f32 %v7038_v57 }
 0x1e6   : > { %v7094_v24 = vpop.eup %6197  ;;  %v7096_v25 = vadd.f32 1.0, %v6196_v20  ;;  %1809 = vperm.xlu2 %6080, %v1487_v11   ;;  %v1283_v26 = vadd.f32 %v7036_v56, %v1282_v9  ;;  %v1273_v28 = vand.u32 2147483647, %v6954_v54  ;;  %v1276_v30 = vor.u32 1.1754944e-38, %v1275_v23 }
 0x1e7   : > { %v6200_v29 = vpop.eup %6199  ;;  %6203 = vpow2.f32 %v1124_v21  ;;  %v1505_v31 = vmul.f32 %v7094_v24, %v7038_v57  ;;  %vm1510_vm15 = vweird.f32 %v7094_v24  ;;  %v1272_v36 = vsel %vm7089_vm13, %v7006_v27, %v1268_v40 }
 0x1e8   : > { %v7105_v32 = vpop.eup %6201  ;;  %6205 = vrcp.f32 %v7096_v25  ;;  %v7108_v33 = vadd.f32 1.0, %v6200_v29  ;;  %v1015_v34 = vpop.xlane.xlu2 %1014  ;;  %v1287_v54 = vsel %vm7082_vm11, %v7036_v56, %v1283_v26  ;;  %vm1274_vm1 = vcmp.eq.f32.partialorder %v1273_v28, 8.507059e+37 }
 0x1e9   : > { %v973_v35 = vpop.xlane.xlu0 %972  ;;  %6207 = vpow2.f32 %v1152_v22  ;;  %v1067_v38 = vadd.f32 %v6868_v3, %v1015_v34  ;;  %v1292_v42 = vsel %vm7042_vm5, %v1291_v60, %v1287_v54  ;;  %v1506_v46 = vsub.f32 1.0, %v1505_v31  ;;  %vm1511_vm5 = vmor %vm1509_vm14, %vm1510_vm15 }
 0x1ea   : > { %v1053_v39 = vadd.f32 %v6868_v3, %v973_v35  ;;  %6209 = vrcp.f32 %v7108_v33  ;;  %1690 = vst.msk [vmem:[#allocation2 + $0x28] sm:$0xff] %vm1684_vm6, %v1292_v42  ;;  %v1513_v43 = vand.u32 2147483647, %v7038_v57  ;;  %v1277_v48 = vsel %vm1274_vm1, %v1276_v30, %v1272_v36 }
 0x1eb   : > { %v1099_v44 = vsub.f32 0.0, %v1067_v38  ;;  %v1515_v27 = vand.u32 2147483648, %v7038_v57  ;;  %1689 = vst.msk [vmem:[#allocation2 + $0x20] sm:$0xff] %vm1684_vm6, %v1277_v48  ;;  %v1507_v50 = vmul.f32 %v7094_v24, %v1506_v46  ;;  %v1295_v51 = vmul.f32 %v7105_v32, %v7058_v1 }
 0x1ec   : > { %v1085_v45 = vsub.f32 0.0, %v1053_v39  ;;  %vm7126_vm2 = vcmp.eq.f32.partialorder %v1513_v43, 8.507059e+37  ;;  %vm1299_vm3 = vweird.f32 %v7058_v1  ;;  %vm1300_vm4 = vweird.f32 %v7105_v32 }
 0x1ed   : > { %v6204_v49 = vpop.eup %6203  ;;  %v1154_v52 = vmul.f32 1.442695, %v1099_v44  ;;  %1744 = vperm.xlu1 %6082, %v1292_v42   ;;  %v1516_v37 = vor.u32 1.1754944e-38, %v1515_v27  ;;  %v1508_v58 = vadd.f32 %v7094_v24, %v1507_v50  ;;  %v1296_v59 = vsub.f32 1.0, %v1295_v51  ;;  %vm7163_vm8 = vmor %vm1299_vm3, %vm1300_vm4 }
 0x1ee   : > { %v1126_v53 = vmul.f32 1.442695, %v1085_v45  ;;  %v7134_v55 = vpop.eup %6205  ;;  %v7136_v56 = vadd.f32 1.0, %v6204_v49  ;;  %1739 = vperm.xlu2 %6080, %v1277_v48   ;;  %v1303_v60 = vand.u32 2147483647, %v7058_v1  ;;  %v1305_v62 = vand.u32 2147483648, %v7058_v1 }
 0x1ef   : > { %v6208_v61 = vpop.eup %6207  ;;  %6211 = vpow2.f32 %v1154_v52  ;;  %v1310_v63 = vmul.f32 %v7134_v55, %v7096_v25  ;;  %vm1314_vm7 = vweird.f32 %v7096_v25  ;;  %v1512_v47 = vsel %vm1511_vm5, %v7094_v24, %v1508_v58 }
 0x1f0   : > { %v7148_v0 = vpop.eup %6209  ;;  %6213 = vrcp.f32 %v7136_v56  ;;  %v7151_v2 = vadd.f32 1.0, %v6208_v61  ;;  %v976_v4 = vpop.xlane.xlu1 %975  ;;  %v1297_v57 = vmul.f32 %v7105_v32, %v1296_v59  ;;  %v1517_v10 = vsel %vm7126_vm2, %v1516_v37, %v1512_v47 }
 0x1f1   : > { %v1018_v5 = vpop.xlane.xlu0 %1017  ;;  %6215 = vpow2.f32 %v1126_v53  ;;  %v1054_v7 = vadd.f32 %v6868_v3, %v976_v4  ;;  %1705 = vst.msk [vmem:[#allocation2 + $0xa0] sm:$0xff] %vm1684_vm6, %v1517_v10  ;;  %1819 = vperm.xlu0 %6081, %v1517_v10   ;;  %vm1304_vm9 = vcmp.eq.f32.partialorder %v1303_v60, 8.507059e+37  ;;  %v1306_v13 = vor.u32 1.1754944e-38, %v1305_v62 }
 0x1f2   : > { %v1068_v8 = vadd.f32 %v6868_v3, %v1018_v5  ;;  %6217 = vrcp.f32 %v7151_v2  ;;  %v1298_v12 = vadd.f32 %v7105_v32, %v1297_v57  ;;  %v1311_v17 = vsub.f32 1.0, %v1310_v63 }
 0x1f3   : > { %v1086_v14 = vsub.f32 0.0, %v1054_v7  ;;  %vm1315_vm10 = vweird.f32 %v7134_v55  ;;  %v1318_v18 = vand.u32 2147483647, %v7096_v25  ;;  %v1320_v9 = vand.u32 2147483648, %v7096_v25 }
 0x1f4   : > { %v1100_v15 = vsub.f32 0.0, %v1068_v8  ;;  %v1302_v1 = vsel %vm7163_vm8, %v7105_v32, %v1298_v12  ;;  %v1520_v6 = vmul.f32 %v7148_v0, %v7108_v33  ;;  %v1312_v16 = vmul.f32 %v7134_v55, %v1311_v17  ;;  %vm7186_vm11 = vmor %vm1314_vm7, %vm1315_vm10 }
 0x1f5   : > { %v6212_v19 = vpop.eup %6211  ;;  %v1128_v20 = vmul.f32 1.442695, %v1086_v14  ;;  %v1307_v22 = vsel %vm1304_vm9, %v1306_v13, %v1302_v1  ;;  %vm7190_vm12 = vcmp.eq.f32.partialorder %v1318_v18, 8.507059e+37  ;;  %v1321_v28 = vor.u32 1.1754944e-38, %v1320_v9 }
 0x1f6   : > { %v1156_v21 = vmul.f32 1.442695, %v1100_v15  ;;  %v7179_v23 = vpop.eup %6213  ;;  %v7181_v24 = vadd.f32 1.0, %v6212_v19  ;;  %1749 = vperm.xlu2 %6080, %v1307_v22   ;;  %1691 = vst.msk [vmem:[#allocation2 + $0x30] sm:$0xff] %vm1684_vm6, %v1307_v22  ;;  %v1521_v29 = vsub.f32 1.0, %v1520_v6  ;;  %v1313_v31 = vadd.f32 %v7134_v55, %v1312_v16 }
 0x1f7   : > { %v6216_v30 = vpop.eup %6215  ;;  %6219 = vpow2.f32 %v1128_v20  ;;  %vm1524_vm13 = vweird.f32 %v7108_v33  ;;  %vm1525_vm14 = vweird.f32 %v7148_v0  ;;  %v1528_v36 = vand.u32 2147483647, %v7108_v33 }
 0x1f8   : > { %v7197_v32 = vpop.eup %6217  ;;  %6221 = vrcp.f32 %v7181_v24  ;;  %v7200_v25 = vadd.f32 1.0, %v6216_v30  ;;  %v979_v34 = vpop.xlane.xlu2 %978  ;;  %v1522_v54 = vmul.f32 %v7148_v0, %v1521_v29  ;;  %v1317_v42 = vsel %vm7186_vm11, %v7134_v55, %v1313_v31  ;;  %vm7222_vm1 = vmor %vm1524_vm13, %vm1525_vm14 }
 0x1f9   : > { %v1021_v35 = vpop.xlane.xlu1 %1020  ;;  %6223 = vpow2.f32 %v1156_v21  ;;  %v1055_v38 = vadd.f32 %v6868_v3, %v979_v34  ;;  %v1322_v46 = vsel %vm7190_vm12, %v1321_v28, %v1317_v42  ;;  %vm7213_vm15 = vcmp.eq.f32.partialorder %v1528_v36, 8.507059e+37 }
 0x1fa   : > { %v1069_v39 = vadd.f32 %v6868_v3, %v1021_v35  ;;  %6225 = vrcp.f32 %v7200_v25  ;;  %v1523_v43 = vadd.f32 %v7148_v0, %v1522_v54  ;;  %1754 = vperm.xlu1 %6082, %v1322_v46   ;;  %1692 = vst.msk [vmem:[#allocation2 + $0x38] sm:$0xff] %vm1684_vm6, %v1322_v46  ;;  %v1530_v50 = vand.u32 2147483648, %v7108_v33 }
 0x1fb   : > { %v1087_v45 = vsub.f32 0.0, %v1055_v38  ;;  %v1535_v41 = vmul.f32 %v7197_v32, %v7151_v2  ;;  %vm1539_vm2 = vweird.f32 %v7151_v2  ;;  %vm1540_vm3 = vweird.f32 %v7197_v32 }
 0x1fc   : > { %v1101_v48 = vsub.f32 0.0, %v1069_v39  ;;  %v1527_v51 = vsel %vm7222_vm1, %v7148_v0, %v1523_v43  ;;  %v1543_v49 = vand.u32 2147483647, %v7151_v2  ;;  %v1531_v55 = vor.u32 1.1754944e-38, %v1530_v50  ;;  %vm1541_vm7 = vmor %vm1539_vm2, %vm1540_vm3 }
 0x1fd   : > { %v6220_v52 = vpop.eup %6219  ;;  %v1130_v53 = vmul.f32 1.442695, %v1087_v45  ;;  %v1536_v58 = vsub.f32 1.0, %v1535_v41  ;;  %v1545_v61 = vand.u32 2147483648, %v7151_v2  ;;  %v1325_v62 = vmul.f32 %v7179_v23, %v7136_v56 }
 0x1fe   : > { %v1158_v37 = vmul.f32 1.442695, %v1101_v48  ;;  %v7235_v59 = vpop.eup %6221  ;;  %v7237_v33 = vadd.f32 1.0, %v6220_v52  ;;  %vm7239_vm4 = vcmp.eq.f32.partialorder %v1543_v49, 8.507059e+37  ;;  %v1532_v0 = vsel %vm7213_vm15, %v1531_v55, %v1527_v51 }
 0x1ff   : > { %v6224_v63 = vpop.eup %6223  ;;  %6227 = vpow2.f32 %v1130_v53  ;;  %v1537_v4 = vmul.f32 %v7197_v32, %v1536_v58  ;;  %vm1329_vm5 = vweird.f32 %v7136_v56  ;;  %1824 = vperm.xlu2 %6080, %v1532_v0   ;;  %1706 = vst.msk [vmem:[#allocation2 + $0xa8] sm:$0xff] %vm1684_vm6, %v1532_v0  ;;  %v1546_v8 = vor.u32 1.1754944e-38, %v1545_v61 }
 0x200   : > { %v7250_v5 = vpop.eup %6225  ;;  %6229 = vrcp.f32 %v7237_v33  ;;  %v7253_v47 = vadd.f32 1.0, %v6224_v63  ;;  %v1024_v57 = vpop.xlane.xlu2 %1023  ;;  %v1326_v10 = vsub.f32 1.0, %v1325_v62  ;;  %vm1330_vm8 = vweird.f32 %v7179_v23 }
 0x201   : > { %v982_v7 = vpop.xlane.xlu0 %981  ;;  %6231 = vpow2.f32 %v1158_v37  ;;  %v1070_v11 = vadd.f32 %v6868_v3, %v1024_v57  ;;  %v1538_v13 = vadd.f32 %v7197_v32, %v1537_v4  ;;  %v1333_v15 = vand.u32 2147483647, %v7136_v56  ;;  %vm7270_vm9 = vmor %vm1329_vm5, %vm1330_vm8 }
 0x202   : > { %v1056_v12 = vadd.f32 %v6868_v3, %v982_v7  ;;  %6233 = vrcp.f32 %v7253_v47  ;;  %v1327_v14 = vmul.f32 %v7179_v23, %v1326_v10  ;;  %v1335_v6 = vand.u32 2147483648, %v7136_v56 }
 0x203   : > { %v1102_v17 = vsub.f32 0.0, %v1070_v11  ;;  %v1542_v18 = vsel %vm1541_vm7, %v7197_v32, %v1538_v13  ;;  %vm7278_vm10 = vcmp.eq.f32.partialorder %v1333_v15, 8.507059e+37  ;;  %v1550_v21 = vmul.f32 %v7235_v59, %v7181_v24 }
 0x204   : > { %v1088_v1 = vsub.f32 0.0, %v1056_v12  ;;  %v1547_v2 = vsel %vm7239_vm4, %v1546_v8, %v1542_v18  ;;  %v1328_v19 = vadd.f32 %v7179_v23, %v1327_v14  ;;  %v1336_v40 = vor.u32 1.1754944e-38, %v1335_v6  ;;  %v7356_v14 = vld [vmem:[#allocation4] ss:$0 sm:$0xff] }
 0x205   : > { %v6228_v22 = vpop.eup %6227  ;;  %v1160_v16 = vmul.f32 1.442695, %v1102_v17  ;;  %1829 = vperm.xlu1 %6082, %v1547_v2   ;;  %1707 = vst.msk [vmem:[#allocation2 + $0xb0] sm:$0xff] %vm1684_vm6, %v1547_v2  ;;  %vm1554_vm11 = vweird.f32 %v7181_v24  ;;  %v1551_v30 = vsub.f32 1.0, %v1550_v21  ;;  %vm1555_vm12 = vweird.f32 %v7235_v59 }
 0x206   : > { %v1132_v26 = vmul.f32 1.442695, %v1088_v1  ;;  %v7286_v56 = vpop.eup %6229  ;;  %v7288_v28 = vadd.f32 1.0, %v6228_v22  ;;  %v1332_v29 = vsel %vm7270_vm9, %v7179_v23, %v1328_v19  ;;  %v1558_v34 = vand.u32 2147483647, %v7181_v24  ;;  %vm1556_vm14 = vmor %vm1554_vm11, %vm1555_vm12 }
 0x207   : > { %v6232_v31 = vpop.eup %6231  ;;  %6235 = vpow2.f32 %v1160_v16  ;;  %v1337_v32 = vsel %vm7278_vm10, %v1336_v40, %v1332_v29  ;;  %v1560_v35 = vand.u32 2147483648, %v7181_v24  ;;  %v1552_v39 = vmul.f32 %v7235_v59, %v1551_v30 }
 0x208   : > { %v7298_v54 = vpop.eup %6233  ;;  %6237 = vrcp.f32 %v7288_v28  ;;  %v7301_v36 = vadd.f32 1.0, %v6232_v31  ;;  %1693 = vst.msk [vmem:[#allocation2 + $0x40] sm:$0xff] %vm1684_vm6, %v1337_v32  ;;  %1759 = vperm.xlu0 %6081, %v1337_v32   ;;  %v985_v23 = vpop.xlane.xlu1 %984  ;;  %v1340_v42 = vmul.f32 %v7250_v5, %v7200_v25  ;;  %vm7309_vm13 = vcmp.eq.f32.partialorder %v1558_v34, 8.507059e+37 }
 0x209   : > { %v1027_v38 = vpop.xlane.xlu0 %1026  ;;  %6239 = vpow2.f32 %v1132_v26  ;;  %v1057_v46 = vadd.f32 %v6868_v3, %v985_v23  ;;  %v1553_v45 = vadd.f32 %v7235_v59, %v1552_v39  ;;  %v1561_v48 = vor.u32 1.1754944e-38, %v1560_v35 }
 0x20a   : > { %v1071_v43 = vadd.f32 %v6868_v3, %v1027_v38  ;;  %6241 = vrcp.f32 %v7301_v36  ;;  %v1341_v27 = vsub.f32 1.0, %v1340_v42  ;;  %vm1344_vm15 = vweird.f32 %v7200_v25 }
 0x20b   : > { %v1089_v50 = vsub.f32 0.0, %v1057_v46  ;;  %vm1345_vm1 = vweird.f32 %v7250_v5  ;;  %v1557_v3 = vsel %vm1556_vm14, %v7235_v59, %v1553_v45  ;;  %v1348_v49 = vand.u32 2147483647, %v7200_v25 }
 0x20c   : > { %v1103_v41 = vsub.f32 0.0, %v1071_v43  ;;  %v1342_v51 = vmul.f32 %v7250_v5, %v1341_v27  ;;  %v1350_v52 = vand.u32 2147483648, %v7200_v25  ;;  %v1562_v58 = vsel %vm7309_vm13, %v1561_v48, %v1557_v3  ;;  %vm7327_vm2 = vmor %vm1344_vm15, %vm1345_vm1 }
 0x20d   : > { %v6236_v53 = vpop.eup %6235  ;;  %v1134_v37 = vmul.f32 1.442695, %v1089_v50  ;;  %v1355_v60 = vmul.f32 %v7286_v56, %v7237_v33  ;;  %1708 = vst.msk [vmem:[#allocation2 + $0xb8] sm:$0xff] %vm1684_vm6, %v1562_v58  ;;  %vm7339_vm3 = vcmp.eq.f32.partialorder %v1348_v49, 8.507059e+37  ;;  %vm1359_vm4 = vweird.f32 %v7237_v33 }
 0x20e   : > { %v1162_v55 = vmul.f32 1.442695, %v1103_v41  ;;  %v7333_v59 = vpop.eup %6237  ;;  %v7335_v61 = vadd.f32 1.0, %v6236_v53  ;;  %v1343_v25 = vadd.f32 %v7250_v5, %v1342_v51  ;;  %v1351_v63 = vor.u32 1.1754944e-38, %v1350_v52 }
 0x20f   : > { %v6240_v0 = vpop.eup %6239  ;;  %6243 = vpow2.f32 %v1134_v37  ;;  %v1356_v4 = vsub.f32 1.0, %v1355_v60  ;;  %vm1360_vm5 = vweird.f32 %v7286_v56  ;;  %v1363_v12 = vand.u32 2147483647, %v7237_v33 }
 0x210   : > { %v7345_v57 = vpop.eup %6241  ;;  %6245 = vrcp.f32 %v7335_v61  ;;  %v7348_v7 = vadd.f32 1.0, %v6240_v0  ;;  %1834 = vperm.xlu0 %6081, %v1562_v58   ;;  %v1347_v8 = vsel %vm7327_vm2, %v7250_v5, %v1343_v25  ;;  %v988_v10 = vpop.xlane.xlu2 %987  ;;  %v1365_v18 = vand.u32 2147483648, %v7237_v33  ;;  %vm7372_vm8 = vmor %vm1359_vm4, %vm1360_vm5 }
 0x211   : > { %v1030_v11 = vpop.xlane.xlu1 %1029  ;;  %6247 = vpow2.f32 %v1162_v55  ;;  %v1352_v13 = vsel %vm7339_vm3, %v1351_v63, %v1347_v8  ;;  %v1058_v15 = vadd.f32 %v7356_v14, %v988_v10  ;;  %v1357_v5 = vmul.f32 %v7286_v56, %v1356_v4 }
 0x212   : > { %v1072_v17 = vadd.f32 %v7356_v14, %v1030_v11  ;;  %6249 = vrcp.f32 %v7348_v7  ;;  %1764 = vperm.xlu2 %6080, %v1352_v13   ;;  %1694 = vst.msk [vmem:[#allocation2 + $0x48] sm:$0xff] %vm1684_vm6, %v1352_v13  ;;  %vm7363_vm7 = vcmp.eq.f32.partialorder %v1363_v12, 8.507059e+37  ;;  %v1565_v19 = vmul.f32 %v7298_v54, %v7253_v47 }
 0x213   : > { %v1090_v9 = vsub.f32 0.0, %v1058_v15  ;;  %vm1569_vm9 = vweird.f32 %v7253_v47  ;;  %v1358_v20 = vadd.f32 %v7286_v56, %v1357_v5  ;;  %v1366_v21 = vor.u32 1.1754944e-38, %v1365_v18 }
 0x214   : > { %v1104_v6 = vsub.f32 0.0, %v1072_v17  ;;  %vm1570_vm10 = vweird.f32 %v7298_v54  ;;  %v1573_v22 = vand.u32 2147483647, %v7253_v47  ;;  %v1566_v33 = vsub.f32 1.0, %v1565_v19 }
 0x215   : > { %v6244_v16 = vpop.eup %6243  ;;  %v1136_v26 = vmul.f32 1.442695, %v1090_v9  ;;  %v1575_v29 = vand.u32 2147483648, %v7253_v47  ;;  %v1362_v32 = vsel %vm7372_vm8, %v7286_v56, %v1358_v20  ;;  %v1580_v35 = vmul.f32 %v7345_v57, %v7301_v36  ;;  %vm1571_vm13 = vmor %vm1569_vm9, %vm1570_vm10  ;;  %v6280_v9 = vld [vmem:[%s6596_s22] sm:$0xff] }
 0x216   : > { %v1164_v40 = vmul.f32 1.442695, %v1104_v6  ;;  %v7383_v30 = vpop.eup %6245  ;;  %v7385_v31 = vadd.f32 1.0, %v6244_v16  ;;  %vm7390_vm11 = vcmp.eq.f32.partialorder %v1573_v22, 8.507059e+37  ;;  %v1367_v38 = vsel %vm7363_vm7, %v1366_v21, %v1362_v32 }
 0x217   : > { %v6248_v23 = vpop.eup %6247  ;;  %6251 = vpow2.f32 %v1136_v26  ;;  %v1567_v39 = vmul.f32 %v7298_v54, %v1566_v33  ;;  %v1576_v42 = vor.u32 1.1754944e-38, %v1575_v29  ;;  %1769 = vperm.xlu1 %6082, %v1367_v38   ;;  %1695 = vst.msk [vmem:[#allocation2 + $0x50] sm:$0xff] %vm1684_vm6, %v1367_v38  ;;  %v1581_v45 = vsub.f32 1.0, %v1580_v35 }
 0x218   : > { %v7399_v46 = vpop.eup %6249  ;;  %6253 = vrcp.f32 %v7385_v31  ;;  %v7402_v56 = vadd.f32 1.0, %v6248_v23  ;;  %v1033_v43 = vpop.xlane.xlu2 %1032  ;;  %vm1584_vm12 = vweird.f32 %v7301_v36  ;;  %vm1585_vm14 = vweird.f32 %v7345_v57 }
 0x219   : > { %v991_v44 = vpop.xlane.xlu0 %990  ;;  %6255 = vpow2.f32 %v1164_v40  ;;  %v1568_v48 = vadd.f32 %v7298_v54, %v1567_v39  ;;  %v1073_v27 = vadd.f32 %v7356_v14, %v1033_v43  ;;  %v1582_v41 = vmul.f32 %v7345_v57, %v1581_v45  ;;  %vm1586_vm1 = vmor %vm1584_vm12, %vm1585_vm14 }
 0x21a   : > { %v1059_v50 = vadd.f32 %v7356_v14, %v991_v44  ;;  %6257 = vrcp.f32 %v7402_v56  ;;  %v1588_v3 = vand.u32 2147483647, %v7301_v36  ;;  %v1590_v53 = vand.u32 2147483648, %v7301_v36 }
 0x21b   : > { %v1572_v51 = vsel %vm1571_vm13, %v7298_v54, %v1568_v48  ;;  %v1105_v49 = vsub.f32 0.0, %v1073_v27  ;;  %v1583_v55 = vadd.f32 %v7345_v57, %v1582_v41  ;;  %v1370_v58 = vmul.f32 %v7333_v59, %v7288_v28 }
 0x21c   : > { %v1091_v52 = vsub.f32 0.0, %v1059_v50  ;;  %v1577_v37 = vsel %vm7390_vm11, %v1576_v42, %v1572_v51  ;;  %vm7422_vm15 = vcmp.eq.f32.partialorder %v1588_v3, 8.507059e+37  ;;  %v1591_v25 = vor.u32 1.1754944e-38, %v1590_v53 }
 0x21d   : > { %v6252_v24 = vpop.eup %6251  ;;  %1839 = vperm.xlu2 %6080, %v1577_v37   ;;  %1709 = vst.msk [vmem:[#allocation2 + $0xc0] sm:$0xff] %vm1684_vm6, %v1577_v37  ;;  %v1166_v54 = vmul.f32 1.442695, %v1105_v49  ;;  %vm1374_vm2 = vweird.f32 %v7288_v28  ;;  %v1587_v0 = vsel %vm1586_vm1, %v7345_v57, %v1583_v55  ;;  %v1371_v4 = vsub.f32 1.0, %v1370_v58 }
 0x21e   : > { %v1138_v60 = vmul.f32 1.442695, %v1091_v52  ;;  %v7434_v62 = vpop.eup %6253  ;;  %v7436_v63 = vadd.f32 1.0, %v6252_v24  ;;  %vm1375_vm3 = vweird.f32 %v7333_v59  ;;  %v1592_v10 = vsel %vm7422_vm15, %v1591_v25, %v1587_v0 }
 0x21f   : > { %v6256_v8 = vpop.eup %6255  ;;  %6259 = vpow2.f32 %v1166_v54  ;;  %v1378_v36 = vand.u32 2147483647, %v7288_v28  ;;  %v1380_v11 = vand.u32 2147483648, %v7288_v28  ;;  %1844 = vperm.xlu1 %6082, %v1592_v10   ;;  %1710 = vst.msk [vmem:[#allocation2 + $0xc8] sm:$0xff] %vm1684_vm6, %v1592_v10  ;;  %v1372_v57 = vmul.f32 %v7333_v59, %v1371_v4  ;;  %vm7457_vm4 = vmor %vm1374_vm2, %vm1375_vm3 }
 0x220   : > { %v7444_v12 = vpop.eup %6257  ;;  %6261 = vrcp.f32 %v7436_v63  ;;  %v7447_v13 = vadd.f32 1.0, %v6256_v8  ;;  %v1720_v15 = vpop.permute.xlu2 %1719  ;;  %v1595_v5 = vmul.f32 %v7383_v30, %v7335_v61  ;;  %vm1600_vm7 = vweird.f32 %v7383_v30 }
 0x221   : > { %v1036_v17 = vpop.xlane.xlu0 %1035  ;;  %6263 = vpow2.f32 %v1138_v60  ;;  %v1381_v18 = vor.u32 1.1754944e-38, %v1380_v11  ;;  %v1877_v6 = vmul.f32 %v6280_v9, %v1720_v15  ;;  %v1373_v2 = vadd.f32 %v7333_v59, %v1372_v57 }
 0x222   : > { %vm1379_vm5 = vcmp.eq.f32.partialorder %v1378_v36, 8.507059e+37  ;;  %v1074_v19 = vadd.f32 %v7356_v14, %v1036_v17  ;;  %v1596_v20 = vsub.f32 1.0, %v1595_v5  ;;  %6265 = vrcp.f32 %v7447_v13 }
 0x223   : > { %1909 = vst.msk [vmem:[#allocation3] sm:$0xff] %vm448_vm0, %v1877_v6  ;;  %v1603_v28 = vand.u32 2147483647, %v7335_v61  ;;  %v1605_v21 = vand.u32 2147483648, %v7335_v61  ;;  %v1377_v22 = vsel %vm7457_vm4, %v7333_v59, %v1373_v2  ;;  %v1385_v40 = vmul.f32 %v7399_v46, %v7348_v7 }
 0x224   : > { %v1106_v16 = vsub.f32 0.0, %v1074_v19  ;;  %v1597_v26 = vmul.f32 %v7383_v30, %v1596_v20  ;;  %v1382_v29 = vsel %vm1379_vm5, %v1381_v18, %v1377_v22  ;;  %vm1599_vm8 = vweird.f32 %v7335_v61 }
 0x225   : > { %v6260_v33 = vpop.eup %6259  ;;  %v1606_v32 = vor.u32 1.1754944e-38, %v1605_v21  ;;  %vm1389_vm9 = vweird.f32 %v7348_v7  ;;  %v1039_v34 = vpop.xlane.xlu1 %1038  ;;  %1696 = vst.msk [vmem:[#allocation2 + $0x58] sm:$0xff] %vm1684_vm6, %v1382_v29  ;;  %1774 = vperm.xlu0 %6081, %v1382_v29   ;;  %v1386_v39 = vsub.f32 1.0, %v1385_v40  ;;  %vm1601_vm10 = vmor %vm1599_vm8, %vm1600_vm7  ;;  %vm1390_vm11 = vweird.f32 %v7399_v46 }
 0x226   : > { %v7477_v35 = vpop.eup %6261  ;;  %v7479_v23 = vadd.f32 1.0, %v6260_v33  ;;  %v1168_v59 = vmul.f32 1.442695, %v1106_v16  ;;  %v1598_v38 = vadd.f32 %v7383_v30, %v1597_v26  ;;  %v1393_v61 = vand.u32 2147483647, %v7348_v7  ;;  %vm7498_vm13 = vmor %vm1389_vm9, %vm1390_vm11 }
 0x227   : > { %v6264_v42 = vpop.eup %6263  ;;  %v1395_v43 = vand.u32 2147483648, %v7348_v7  ;;  %v1075_v44 = vadd.f32 %v7356_v14, %v1039_v34  ;;  %vm1604_vm12 = vcmp.eq.f32.partialorder %v1603_v28, 8.507059e+37  ;;  %v1387_v48 = vmul.f32 %v7399_v46, %v1386_v39 }
 0x228   : > { %6267 = vrcp.f32 %v7479_v23  ;;  %v1602_v45 = vsel %vm1601_vm10, %v7383_v30, %v1598_v38  ;;  %v7492_v27 = vpop.eup %6265  ;;  %v7494_v50 = vadd.f32 1.0, %v6264_v42  ;;  %vm1394_vm14 = vcmp.eq.f32.partialorder %v1393_v61, 8.507059e+37 }
 0x229   : > { %6269 = vpow2.f32 %v1168_v59  ;;  %v1607_v41 = vsel %vm1604_vm12, %v1606_v32, %v1602_v45  ;;  %v1396_v14 = vor.u32 1.1754944e-38, %v1395_v43  ;;  %v1388_v30 = vadd.f32 %v7399_v46, %v1387_v48 }
 0x22a   : > { %1711 = vst.msk [vmem:[#allocation2 + $0xd0] sm:$0xff] %vm1684_vm6, %v1607_v41  ;;  %v1107_v51 = vsub.f32 0.0, %v1075_v44  ;;  %v1400_v49 = vmul.f32 %v7434_v62, %v7385_v31  ;;  %vm1404_vm15 = vweird.f32 %v7385_v31  ;;  %vm1405_vm1 = vweird.f32 %v7434_v62  ;;  %v6281_v44 = vld [vmem:[%s6596_s22 + $0x18] sm:$0xff] }
 0x22b   : > { %v1408_v7 = vand.u32 2147483647, %v7385_v31  ;;  %v1410_v52 = vand.u32 2147483648, %v7385_v31  ;;  %v1392_v53 = vsel %vm7498_vm13, %v7399_v46, %v1388_v30  ;;  %v1610_v47 = vmul.f32 %v7444_v12, %v7402_v56  ;;  %vm7528_vm3 = vmor %vm1404_vm15, %vm1405_vm1  ;;  %v6284_v31 = vld [vmem:[%s6596_s22 + $0x90] sm:$0xff] }
 0x22c   : > { %v1170_v37 = vmul.f32 1.442695, %v1107_v51  ;;  %v1401_v55 = vsub.f32 1.0, %v1400_v49  ;;  %6271 = vrcp.f32 %v7494_v50  ;;  %v1397_v58 = vsel %vm1394_vm14, %v1396_v14, %v1392_v53 }
 0x22d   : > { %vm7516_vm2 = vcmp.eq.f32.partialorder %v1408_v7, 8.507059e+37  ;;  %1849 = vperm.xlu0 %6081, %v1607_v41   ;;  %1779 = vperm.xlu2 %6080, %v1397_v58   ;;  %1697 = vst.msk [vmem:[#allocation2 + $0x60] sm:$0xff] %vm1684_vm6, %v1397_v58  ;;  %v1411_v60 = vor.u32 1.1754944e-38, %v1410_v52  ;;  %v1611_v25 = vsub.f32 1.0, %v1610_v47  ;;  %vm1614_vm4 = vweird.f32 %v7402_v56 }
 0x22e   : > { %v7520_v54 = vpop.eup %6267  ;;  %6273 = vpow2.f32 %v1170_v37  ;;  %v1402_v46 = vmul.f32 %v7434_v62, %v1401_v55  ;;  %v1618_v8 = vand.u32 2147483647, %v7402_v56  ;;  %v1620_v10 = vand.u32 2147483648, %v7402_v56  ;;  %v6282_v55 = vld [vmem:[%s6596_s22 + $0x8] sm:$0xff] }
 0x22f   : > { %v6270_v0 = vpop.eup %6269  ;;  %v1625_v36 = vmul.f32 %v7492_v27, %v7447_v13  ;;  %v1612_v15 = vmul.f32 %v7444_v12, %v1611_v25  ;;  %vm1615_vm5 = vweird.f32 %v7444_v12  ;;  %vm1629_vm8 = vweird.f32 %v7447_v13 }
 0x230   : > { %v7537_v11 = vadd.f32 1.0, %v6270_v0  ;;  %v1403_v57 = vadd.f32 %v7434_v62, %v1402_v46  ;;  %vm7542_vm7 = vcmp.eq.f32.partialorder %v1618_v8, 8.507059e+37  ;;  %vm1630_vm9 = vweird.f32 %v7492_v27  ;;  %vm1616_vm10 = vmor %vm1614_vm4, %vm1615_vm5 }
 0x231   : > { %v1626_v17 = vsub.f32 1.0, %v1625_v36  ;;  %v1613_v1 = vadd.f32 %v7444_v12, %v1612_v15  ;;  %v1621_v18 = vor.u32 1.1754944e-38, %v1620_v10  ;;  %v1635_v9 = vand.u32 2147483648, %v7447_v13  ;;  %vm1631_vm13 = vmor %vm1629_vm8, %vm1630_vm9 }
 0x232   : > { %v1407_v5 = vsel %vm7528_vm3, %v7434_v62, %v1403_v57  ;;  %v7553_v6 = vpop.eup %6271  ;;  %v1633_v20 = vand.u32 2147483647, %v7447_v13  ;;  %v1415_v62 = vmul.f32 %v7477_v35, %v7436_v63  ;;  %6275 = vrcp.f32 %v7537_v11  ;;  %v6283_v57 = vld [vmem:[%s6596_s22 + $0x80] sm:$0xff] }
 0x233   : > { %v1412_v2 = vsel %vm7516_vm2, %v1411_v60, %v1407_v5  ;;  %v1627_v19 = vmul.f32 %v7492_v27, %v1626_v17  ;;  %v1617_v21 = vsel %vm1616_vm10, %v7444_v12, %v1613_v1  ;;  %vm1419_vm11 = vweird.f32 %v7436_v63 }
 0x234   : > { %v6274_v28 = vpop.eup %6273  ;;  %1784 = vperm.xlu1 %6082, %v1412_v2   ;;  %1698 = vst.msk [vmem:[#allocation2 + $0x68] sm:$0xff] %vm1684_vm6, %v1412_v2  ;;  %vm1420_vm12 = vweird.f32 %v7477_v35  ;;  %v1622_v22 = vsel %vm7542_vm7, %v1621_v18, %v1617_v21  ;;  %v1416_v26 = vsub.f32 1.0, %v1415_v62  ;;  %v1636_v12 = vor.u32 1.1754944e-38, %v1635_v9 }
 0x235   : > { %v7568_v56 = vadd.f32 1.0, %v6274_v28  ;;  %v1628_v16 = vadd.f32 %v7492_v27, %v1627_v19  ;;  %1854 = vperm.xlu2 %6080, %v1622_v22   ;;  %1712 = vst.msk [vmem:[#allocation2 + $0xd8] sm:$0xff] %vm1684_vm6, %v1622_v22  ;;  %v1423_v40 = vand.u32 2147483647, %v7436_v63  ;;  %v1425_v33 = vand.u32 2147483648, %v7436_v63  ;;  %vm7589_vm15 = vmor %vm1419_vm11, %vm1420_vm12 }
 0x236   : > { %v1640_v29 = vmul.f32 %v7520_v54, %v7479_v23  ;;  %vm1634_vm14 = vcmp.eq.f32.partialorder %v1633_v20, 8.507059e+37  ;;  %v1417_v34 = vmul.f32 %v7477_v35, %v1416_v26  ;;  %vm1644_vm1 = vweird.f32 %v7479_v23 }
 0x237   : > { %6277 = vrcp.f32 %v7568_v56  ;;  %v1632_v32 = vsel %vm1631_vm13, %v7492_v27, %v1628_v16  ;;  %v1426_v38 = vor.u32 1.1754944e-38, %v1425_v33  ;;  %vm7596_vm2 = vcmp.eq.f32.partialorder %v1423_v40, 8.507059e+37 }
 0x238   : > { %v1637_v59 = vsel %vm1634_vm14, %v1636_v12, %v1632_v32  ;;  %v1735_v39 = vpop.permute.xlu2 %1734  ;;  %v1641_v42 = vsub.f32 1.0, %v1640_v29  ;;  %v1418_v61 = vadd.f32 %v7477_v35, %v1417_v34  ;;  %v1650_v63 = vand.u32 2147483648, %v7479_v23  ;;  %v7602_v48 = vpop.eup %6275  ;;  %v6285_v32 = vld [vmem:[%s6596_s22 + $0x20] sm:$0xff] }
 0x239   : > { %1713 = vst.msk [vmem:[#allocation2 + $0xe0] sm:$0xff] %vm1684_vm6, %v1637_v59  ;;  %v1880_v45 = vmul.f32 %v6281_v44, %v1735_v39  ;;  %vm1645_vm3 = vweird.f32 %v7520_v54  ;;  %v1648_v41 = vand.u32 2147483647, %v7479_v23  ;;  %v1430_v3 = vmul.f32 %v7553_v6, %v7494_v50  ;;  %v6289_v44 = vld [vmem:[%s6596_s22 + $0x98] sm:$0xff] }
 0x23a   : > { %v1642_v27 = vmul.f32 %v7520_v54, %v1641_v42  ;;  %v1422_v14 = vsel %vm7589_vm15, %v7477_v35, %v1418_v61  ;;  %vm1434_vm4 = vweird.f32 %v7494_v50  ;;  %vm1435_vm5 = vweird.f32 %v7553_v6  ;;  %vm1646_vm7 = vmor %vm1644_vm1, %vm1645_vm3  ;;  %v6288_v42 = vld [vmem:[%s6596_s22 + $0x30] sm:$0xff] }
 0x23b   : > { %1912 = vst.msk [vmem:[#allocation3 + $0x18] sm:$0xff] %vm448_vm0, %v1880_v45  ;;  %v1438_v30 = vand.u32 2147483647, %v7494_v50  ;;  %v1725_v51 = vpop.permute.xlu0 %1724  ;;  %v1427_v49 = vsel %vm7596_vm2, %v1426_v38, %v1422_v14  ;;  %v1431_v52 = vsub.f32 1.0, %v1430_v3  ;;  %v1440_v53 = vand.u32 2147483648, %v7494_v50  ;;  %vm7634_vm9 = vmor %vm1434_vm4, %vm1435_vm5  ;;  %v6291_v3 = vld [vmem:[%s6596_s22 + $0x28] sm:$0xff] }
 0x23c   : > { %1859 = vperm.xlu1 %6082, %v1637_v59   ;;  %v1643_v7 = vadd.f32 %v7520_v54, %v1642_v27  ;;  %1699 = vst.msk [vmem:[#allocation2 + $0x70] sm:$0xff] %vm1684_vm6, %v1427_v49  ;;  %1789 = vperm.xlu0 %6081, %v1427_v49   ;;  %v1651_v37 = vor.u32 1.1754944e-38, %v1650_v63  ;;  %v1878_v47 = vmul.f32 %v6282_v55, %v1725_v51  ;;  %vm1649_vm8 = vcmp.eq.f32.partialorder %v1648_v41, 8.507059e+37  ;;  %v6286_v59 = vld [vmem:[%s6596_s22 + $0x88] sm:$0xff]  ;;  %v6292_v51 = vld [vmem:[%s6596_s22 + $0xa0] sm:$0xff] }
 0x23d   : > { %v6278_v35 = vpop.eup %6277  ;;  %v1655_v58 = vmul.f32 %v7602_v48, %v7537_v11  ;;  %v1432_v46 = vmul.f32 %v7553_v6, %v1431_v52  ;;  %vm7638_vm10 = vcmp.eq.f32.partialorder %v1438_v30, 8.507059e+37  ;;  %v1441_v0 = vor.u32 1.1754944e-38, %v1440_v53  ;;  %v6293_v52 = vld [vmem:[%s6596_s22 + $0x48] sm:$0xff] }
 0x23e   : > { %v1647_v24 = vsel %vm1646_vm7, %v7520_v54, %v1643_v7  ;;  %1910 = vst.msk [vmem:[#allocation3 + $0x8] sm:$0xff] %vm448_vm0, %v1878_v47  ;;  %vm1660_vm11 = vweird.f32 %v7602_v48  ;;  %v1665_v50 = vand.u32 2147483648, %v7537_v11  ;;  %v1670_v36 = vmul.f32 %v6278_v35, %v7568_v56 }
 0x23f   : > { %v1652_v60 = vsel %vm1649_vm8, %v1651_v37, %v1647_v24  ;;  %v1656_v54 = vsub.f32 1.0, %v1655_v58  ;;  %v1433_v4 = vadd.f32 %v7553_v6, %v1432_v46  ;;  %v1663_v1 = vand.u32 2147483647, %v7537_v11  ;;  %v6294_v37 = vld [vmem:[%s6596_s22 + $0x38] sm:$0xff]  ;;  %v6295_v24 = vld [vmem:[%s6596_s22 + $0xc0] sm:$0xff] }
 0x240   : > { %1714 = vst.msk [vmem:[#allocation2 + $0xe8] sm:$0xff] %vm1684_vm6, %v1652_v60  ;;  %v1800_v8 = vpop.permute.xlu1 %1799  ;;  %v1810_v10 = vpop.permute.xlu2 %1809  ;;  %v1671_v9 = vsub.f32 1.0, %v1670_v36  ;;  %vm1659_vm12 = vweird.f32 %v7537_v11  ;;  %v1680_v20 = vand.u32 2147483648, %v7568_v56  ;;  %v1666_v62 = vor.u32 1.1754944e-38, %v1665_v50  ;;  %v6299_v36 = vld [vmem:[%s6596_s22 + $0x60] sm:$0xff] }
 0x241   : > { %v1893_v15 = vmul.f32 %v6283_v57, %v1800_v8  ;;  %v1895_v17 = vmul.f32 %v6284_v31, %v1810_v10  ;;  %v1657_v5 = vmul.f32 %v7602_v48, %v1656_v54  ;;  %v1437_v18 = vsel %vm7634_vm9, %v7553_v6, %v1433_v4  ;;  %vm1661_vm13 = vmor %vm1659_vm12, %vm1660_vm11  ;;  %v6298_v8 = vld [vmem:[%s6596_s22 + $0xb8] sm:$0xff]  ;;  %v6300_v31 = vld [vmem:[%s6596_s22 + $0x50] sm:$0xff] }
 0x242   : > { %v1442_v2 = vsel %vm7638_vm10, %v1441_v0, %v1437_v18  ;;  %v1672_v6 = vmul.f32 %v6278_v35, %v1671_v9  ;;  %vm1675_vm14 = vweird.f32 %v6278_v35  ;;  %v1678_v28 = vand.u32 2147483647, %v7568_v56  ;;  %v6297_v0 = vld [vmem:[%s6596_s22 + $0x40] sm:$0xff] }
 0x243   : > { %1925 = vst.msk [vmem:[#allocation3 + $0x80] sm:$0xff] %vm448_vm0, %v1893_v15  ;;  %v1658_v19 = vadd.f32 %v7602_v48, %v1657_v5  ;;  %1794 = vperm.xlu2 %6080, %v1442_v2   ;;  %vm1664_vm15 = vcmp.eq.f32.partialorder %v1663_v1, 8.507059e+37  ;;  %vm1674_vm1 = vweird.f32 %v7568_v56  ;;  %v1681_v16 = vor.u32 1.1754944e-38, %v1680_v20  ;;  %v6287_v56 = vld [vmem:[%s6596_s22 + $0x10] sm:$0xff]  ;;  %v6301_v1 = vld [vmem:[%s6596_s22 + $0xd8] sm:$0xff] }
 0x244   : > { %1700 = vst.msk [vmem:[#allocation2 + $0x78] sm:$0xff] %vm1684_vm6, %v1442_v2  ;;  %1864 = vperm.xlu0 %6081, %v1652_v60   ;;  %v1673_v22 = vadd.f32 %v6278_v35, %v1672_v6  ;;  %vm1676_vm2 = vmor %vm1674_vm1, %vm1675_vm14  ;;  %vm1679_vm3 = vcmp.eq.f32.partialorder %v1678_v28, 8.507059e+37  ;;  %v6296_v60 = vld [vmem:[%s6596_s22 + $0xb0] sm:$0xff]  ;;  %v6302_v2 = vld [vmem:[%s6596_s22 + $0xc8] sm:$0xff] }
 0x245   : > { %1927 = vst.msk [vmem:[#allocation3 + $0x90] sm:$0xff] %vm448_vm0, %v1895_v17  ;;  %v1662_v21 = vsel %vm1661_vm13, %v7602_v48, %v1658_v19  ;;  %v6290_v48 = vld [vmem:[%s6596_s22 + $0xa8] sm:$0xff] }
 0x246   : > { %v1667_v11 = vsel %vm1664_vm15, %v1666_v62, %v1662_v21  ;;  %v1677_v26 = vsel %vm1676_vm2, %v6278_v35, %v1673_v22  ;;  %v6303_v62 = vld [vmem:[%s6596_s22 + $0x58] sm:$0xff] }
 0x247   : > { %1715 = vst.msk [vmem:[#allocation2 + $0xf0] sm:$0xff] %vm1684_vm6, %v1667_v11  ;;  %v1682_v33 = vsel %vm1679_vm3, %v1681_v16, %v1677_v26  ;;  %v6304_v21 = vld [vmem:[%s6596_s22 + $0x78] sm:$0xff]  ;;  %v6305_v16 = vld [vmem:[%s6596_s22 + $0xd0] sm:$0xff] }
 0x248   : > { %v1740_v12 = vpop.permute.xlu2 %1739  ;;  %v1805_v40 = vpop.permute.xlu0 %1804  ;;  %1874 = vperm.xlu1 %6082, %v1682_v33   ;;  %1716 = vst.msk [vmem:[#allocation2 + $0xf8] sm:$0xff] %vm1684_vm6, %v1682_v33  ;;  %v6306_v33 = vld [vmem:[%s6596_s22 + $0x68] sm:$0xff] }
 0x249   : > { %v1730_v29 = vpop.permute.xlu1 %1729  ;;  %v1881_v34 = vmul.f32 %v6285_v32, %v1740_v12  ;;  %v1894_v13 = vmul.f32 %v6286_v59, %v1805_v40  ;;  %v6307_v32 = vld [vmem:[%s6596_s22 + $0xf0] sm:$0xff] }
 0x24a   : > { %v1879_v38 = vmul.f32 %v6287_v56, %v1730_v29 }
 0x24b   : > { %1913 = vst.msk [vmem:[#allocation3 + $0x20] sm:$0xff] %vm448_vm0, %v1881_v34  ;;  %1869 = vperm.xlu2 %6080, %v1667_v11  }
 0x24c   : > { %1911 = vst.msk [vmem:[#allocation3 + $0x10] sm:$0xff] %vm448_vm0, %v1879_v38 }
 0x24d   : > { %1926 = vst.msk [vmem:[#allocation3 + $0x88] sm:$0xff] %vm448_vm0, %v1894_v13  ;;  %v6308_v13 = vld [vmem:[%s6596_s22 + $0xe0] sm:$0xff] }
 0x250   : > { %v1750_v39 = vpop.permute.xlu2 %1749 }
 0x251   : > { %v1883_v61 = vmul.f32 %v6288_v42, %v1750_v39  ;;  %v6309_v39 = vld [vmem:[%s6596_s22 + $0x70] sm:$0xff] }
 0x253   : > { %1915 = vst.msk [vmem:[#allocation3 + $0x30] sm:$0xff] %vm448_vm0, %v1883_v61 }
 0x257   : > { %v1815_v43 = vpop.permute.xlu1 %1814 }
 0x258   : > { %v1896_v45 = vmul.f32 %v6289_v44, %v1815_v43  ;;  %v6310_v43 = vld [vmem:[%s6596_s22 + $0xe8] sm:$0xff] }
 0x259   : > { %v1825_v63 = vpop.permute.xlu2 %1824 }
 0x25a   : > { %1928 = vst.msk [vmem:[#allocation3 + $0x98] sm:$0xff] %vm448_vm0, %v1896_v45  ;;  %v1898_v27 = vmul.f32 %v6290_v48, %v1825_v63  ;;  %v6311_v63 = vld [vmem:[%s6596_s22 + $0xf8] sm:$0xff] }
 0x25c   : > { %1930 = vst.msk [vmem:[#allocation3 + $0xa8] sm:$0xff] %vm448_vm0, %v1898_v27 }
 0x25f   : > { %v1745_v41 = vpop.permute.xlu1 %1744 }
 0x260   : > { %v1882_v14 = vmul.f32 %v6291_v3, %v1745_v41 }
 0x262   : > { %1914 = vst.msk [vmem:[#allocation3 + $0x28] sm:$0xff] %vm448_vm0, %v1882_v14 }
 0x263   : > { %v1820_v30 = vpop.permute.xlu0 %1819 }
 0x264   : > { %v1897_v49 = vmul.f32 %v6292_v51, %v1820_v30 }
 0x266   : > { %1929 = vst.msk [vmem:[#allocation3 + $0xa0] sm:$0xff] %vm448_vm0, %v1897_v49 }
 0x26c   : > { %v1765_v7 = vpop.permute.xlu2 %1764  ;;  %v1755_v35 = vpop.permute.xlu1 %1754 }
 0x26d   : > { %v1886_v53 = vmul.f32 %v6293_v52, %v1765_v7  ;;  %v1884_v55 = vmul.f32 %v6294_v37, %v1755_v35 }
 0x26f   : > { %1918 = vst.msk [vmem:[#allocation3 + $0x48] sm:$0xff] %vm448_vm0, %v1886_v53 }
 0x270   : > { %1916 = vst.msk [vmem:[#allocation3 + $0x38] sm:$0xff] %vm448_vm0, %v1884_v55 }
 0x277   : > { %v1840_v47 = vpop.permute.xlu2 %1839  ;;  %v1830_v58 = vpop.permute.xlu1 %1829 }
 0x278   : > { %v1901_v46 = vmul.f32 %v6295_v24, %v1840_v47  ;;  %v1899_v23 = vmul.f32 %v6296_v60, %v1830_v58 }
 0x27a   : > { %1933 = vst.msk [vmem:[#allocation3 + $0xc0] sm:$0xff] %vm448_vm0, %v1901_v46  ;;  %v1760_v25 = vpop.permute.xlu0 %1759 }
 0x27b   : > { %1931 = vst.msk [vmem:[#allocation3 + $0xb0] sm:$0xff] %vm448_vm0, %v1899_v23  ;;  %v1885_v54 = vmul.f32 %v6297_v0, %v1760_v25 }
 0x27d   : > { %1917 = vst.msk [vmem:[#allocation3 + $0x40] sm:$0xff] %vm448_vm0, %v1885_v54 }
 0x282   : > { %v1835_v4 = vpop.permute.xlu0 %1834 }
 0x283   : > { %v1900_v10 = vmul.f32 %v6298_v8, %v1835_v4 }
 0x285   : > { %1932 = vst.msk [vmem:[#allocation3 + $0xb8] sm:$0xff] %vm448_vm0, %v1900_v10 }
 0x287   : > { %v1780_v50 = vpop.permute.xlu2 %1779 }
 0x288   : > { %v1889_v57 = vmul.f32 %v6299_v36, %v1780_v50 }
 0x289   : > { %v1770_v15 = vpop.permute.xlu1 %1769 }
 0x28a   : > { %1921 = vst.msk [vmem:[#allocation3 + $0x60] sm:$0xff] %vm448_vm0, %v1889_v57  ;;  %v1887_v17 = vmul.f32 %v6300_v31, %v1770_v15 }
 0x28c   : > { %1919 = vst.msk [vmem:[#allocation3 + $0x50] sm:$0xff] %vm448_vm0, %v1887_v17 }
 0x28f   : > { %v1855_v5 = vpop.permute.xlu2 %1854 }
 0x290   : > { %v1904_v18 = vmul.f32 %v6301_v1, %v1855_v5 }
 0x291   : > { %v1845_v9 = vpop.permute.xlu1 %1844 }
 0x292   : > { %1936 = vst.msk [vmem:[#allocation3 + $0xd8] sm:$0xff] %vm448_vm0, %v1904_v18  ;;  %v1902_v19 = vmul.f32 %v6302_v2, %v1845_v9 }
 0x294   : > { %1934 = vst.msk [vmem:[#allocation3 + $0xc8] sm:$0xff] %vm448_vm0, %v1902_v19 }
 0x297   : > { %v1775_v20 = vpop.permute.xlu0 %1774 }
 0x298   : > { %v1888_v6 = vmul.f32 %v6303_v62, %v1775_v20 }
 0x29a   : > { %1920 = vst.msk [vmem:[#allocation3 + $0x58] sm:$0xff] %vm448_vm0, %v1888_v6 }
 0x29d   : > { %v1795_v28 = vpop.permute.xlu2 %1794 }
 0x29e   : > { %v1892_v11 = vmul.f32 %v6304_v21, %v1795_v28 }
 0x29f   : > { %v1850_v22 = vpop.permute.xlu0 %1849 }
 0x2a0   : > { %1924 = vst.msk [vmem:[#allocation3 + $0x78] sm:$0xff] %vm448_vm0, %v1892_v11  ;;  %v1903_v26 = vmul.f32 %v6305_v16, %v1850_v22 }
 0x2a2   : > { %1935 = vst.msk [vmem:[#allocation3 + $0xd0] sm:$0xff] %vm448_vm0, %v1903_v26 }
 0x2a5   : > { %v1870_v40 = vpop.permute.xlu2 %1869 }
 0x2a6   : > { %v1785_v12 = vpop.permute.xlu1 %1784  ;;  %v1907_v34 = vmul.f32 %v6307_v32, %v1870_v40 }
 0x2a7   : > { %v1890_v29 = vmul.f32 %v6306_v33, %v1785_v12 }
 0x2a8   : > { %1939 = vst.msk [vmem:[#allocation3 + $0xf0] sm:$0xff] %vm448_vm0, %v1907_v34 }
 0x2a9   : > { %1922 = vst.msk [vmem:[#allocation3 + $0x68] sm:$0xff] %vm448_vm0, %v1890_v29 }
 0x2ae   : > { %v1860_v59 = vpop.permute.xlu1 %1859  ;;  %v1790_v38 = vpop.permute.xlu0 %1789 }
 0x2af   : > { %v1905_v56 = vmul.f32 %v6308_v13, %v1860_v59  ;;  %v1891_v42 = vmul.f32 %v6309_v39, %v1790_v38 }
 0x2b1   : > { %1937 = vst.msk [vmem:[#allocation3 + $0xe0] sm:$0xff] %vm448_vm0, %v1905_v56 }
 0x2b2   : > { %1923 = vst.msk [vmem:[#allocation3 + $0x70] sm:$0xff] %vm448_vm0, %v1891_v42 }
 0x2b6   : > { %v1865_v61 = vpop.permute.xlu0 %1864 }
 0x2b7   : > { %v1906_v44 = vmul.f32 %v6310_v43, %v1865_v61 }
 0x2b9   : > { %1938 = vst.msk [vmem:[#allocation3 + $0xe8] sm:$0xff] %vm448_vm0, %v1906_v44 }
 0x2ba   : > { %v1875_v45 = vpop.permute.xlu1 %1874 }
 0x2bb   : > { %v1908_v48 = vmul.f32 %v6311_v63, %v1875_v45 }
 0x2bd   : > { %1940 = vst.msk [vmem:[#allocation3 + $0xf8] sm:$0xff] %vm448_vm0, %v1908_v48 }
 0x2be PF: > { %v7725_v27 = vld [vmem:[%s6601_s26 + $0x20] sm:$0xff]  ;;  %v7728_v41 = vld [vmem:[%s6601_s26 + $0x10] sm:$0xff]  ;;  %v11757_v14 = vmov 0   ;;  %v7740_v30 = vld [vmem:[%s6601_s26 + $0x28] sm:$0xff]  ;;  %v6499_v60 = vmov 1   ;;  %v6500_v12 = vmov 2   ;;  %v1989_v13 = vlaneseq }
 0x2bf   : > { %12094 = vst [vmem:[#allocation7_spill] sm:$0xff] %v7725_v27  ;;  %v7731_v3 = vld [vmem:[%s6601_s26] sm:$0xff]  ;;  %6314 = vset.pattern.permute.xlu2 %v11757_v14  ;;  %6313 = vset.pattern.permute.xlu1 %v11757_v14  ;;  %v7743_v51 = vld [vmem:[%s6601_s26 + $0x18] sm:$0xff]  ;;  %v7746_v49 = vld [vmem:[%s6601_s26 + $0x8] sm:$0xff]  ;;  %v11759_v44 = vmov 1.0  }
 0x2c0   : > { %12095 = vst [vmem:[#allocation8_spill] sm:$0xff] %v7731_v3  ;;  %6312 = vset.pattern.permute.xlu0 %v11757_v14  ;;  %2005 = vperm.xlu2 %6314, %v7725_v27   ;;  %v7752_v7 = vld [vmem:[%s6601_s26 + $0x40] sm:$0xff]  ;;  %v7755_v52 = vld [vmem:[%s6601_s26 + $0x38] sm:$0xff]  ;;  %v7758_v53 = vld [vmem:[%s6601_s26 + $0x30] sm:$0xff]  ;;  %v7974_v38 = vand.u32 127, %v1989_v13 }
 0x2c1   : > { %1999 = vperm.xlu1 %6313, %v7728_v41   ;;  %1993 = vperm.xlu0 %6312, %v7731_v3   ;;  %12096 = vst [vmem:[#allocation9_spill] sm:$0xff] %v7743_v51  ;;  %v7764_v35 = vld [vmem:[%s6601_s26 + $0x58] sm:$0xff]  ;;  %v7767_v37 = vld [vmem:[%s6601_s26 + $0x50] sm:$0xff]  ;;  %v7770_v55 = vld [vmem:[%s6601_s26 + $0x48] sm:$0xff] }
 0x2c2   : > { %12097 = vst [vmem:[#allocation10_spill] sm:$0xff] %v7755_v52  ;;  %v7776_v47 = vld [vmem:[%s6601_s26 + $0x70] sm:$0xff]  ;;  %v7779_v58 = vld [vmem:[%s6601_s26 + $0x68] sm:$0xff]  ;;  %v7782_v24 = vld [vmem:[%s6601_s26 + $0x60] sm:$0xff]  ;;  %v7983_v39 = vadd.s32 128, %v7974_v38 }
 0x2c3   : > { %v7788_v46 = vld [vmem:[%s6601_s26 + $0x78] sm:$0xff]  ;;  %v7800_v0 = vld [vmem:[#allocation2 + $0x70] sm:$0xff]  ;;  %v7806_v4 = vld [vmem:[#allocation2 + $0x68] sm:$0xff] }
 0x2c4   : > { %v7796_v23 = vld [vmem:[#allocation2 + $0x78] sm:$0xff]  ;;  %v7804_v54 = vld [vmem:[#allocation2 + $0xf0] sm:$0xff]  ;;  %v7808_v8 = vld [vmem:[#allocation2 + $0xe8] sm:$0xff] }
 0x2c5   : > { %v7798_v25 = vld [vmem:[#allocation2 + $0xf8] sm:$0xff]  ;;  %2168 = vmatpush.msra.mxu0 %v7796_v23  ;;  %2603 = vmatpush.msra.mxu2 %v7796_v23  ;;  %v7823_v10 = vld [vmem:[#allocation2 + $0x60] sm:$0xff]  ;;  %v7833_v15 = vld [vmem:[#allocation2 + $0x50] sm:$0xff] }
 0x2c6   : > { %2233 = vmatpush.msra.mxu1 %v7798_v25  ;;  %2668 = vmatpush.msra.mxu3 %v7798_v25  ;;  %v7825_v50 = vld [vmem:[#allocation2 + $0xe0] sm:$0xff]  ;;  %v7827_v36 = vld [vmem:[#allocation2 + $0x58] sm:$0xff]  ;;  %v7835_v31 = vld [vmem:[#allocation2 + $0xd0] sm:$0xff] }
 0x2c7   : > { %2169 = vmatpush.msra.mxu0 %v7800_v0  ;;  %2604 = vmatpush.msra.mxu2 %v7800_v0  ;;  %v7831_v57 = vld [vmem:[#allocation2 + $0xd8] sm:$0xff]  ;;  %v7841_v17 = vld [vmem:[#allocation2 + $0x48] sm:$0xff]  ;;  %v7854_v1 = vld [vmem:[#allocation2 + $0x40] sm:$0xff] }
 0x2c8   : > { %2008 = vperm.xlu2 %6314, %v7740_v30   ;;  %2234 = vmatpush.msra.mxu1 %v7804_v54  ;;  %v7847_v5 = vld [vmem:[#allocation2 + $0xc8] sm:$0xff]  ;;  %v7856_v18 = vld [vmem:[#allocation2 + $0xc0] sm:$0xff]  ;;  %v7858_v9 = vld [vmem:[#allocation2 + $0x38] sm:$0xff] }
 0x2c9   : > { %2002 = vperm.xlu1 %6313, %v7743_v51   ;;  %1996 = vperm.xlu0 %6312, %v7746_v49   ;;  %v7862_v2 = vld [vmem:[#allocation2 + $0xb8] sm:$0xff]  ;;  %v7866_v19 = vld [vmem:[#allocation2 + $0x30] sm:$0xff]  ;;  %v7876_v62 = vld [vmem:[#allocation2 + $0x28] sm:$0xff] }
 0x2ca   : > { %2669 = vmatpush.msra.mxu3 %v7804_v54  ;;  %2170 = vmatpush.msra.mxu0 %v7806_v4  ;;  %v7872_v20 = vld [vmem:[#allocation2 + $0xb0] sm:$0xff]  ;;  %v7881_v6 = vld [vmem:[#allocation2 + $0xa8] sm:$0xff]  ;;  %v7886_v28 = vld [vmem:[#allocation2 + $0x20] sm:$0xff] }
 0x2cb   : > { %2235 = vmatpush.msra.mxu1 %v7808_v8  ;;  %2605 = vmatpush.msra.mxu2 %v7806_v4  ;;  %v7888_v21 = vld [vmem:[#allocation2 + $0xa0] sm:$0xff]  ;;  %v7892_v11 = vld [vmem:[#allocation2 + $0x18] sm:$0xff]  ;;  %v7904_v16 = vld [vmem:[#allocation2 + $0x10] sm:$0xff] }
 0x2cc   : > { %2670 = vmatpush.msra.mxu3 %v7808_v8  ;;  %2171 = vmatpush.msra.mxu0 %v7823_v10  ;;  %v7896_v22 = vld [vmem:[#allocation2 + $0x98] sm:$0xff]  ;;  %v7906_v26 = vld [vmem:[#allocation2 + $0x90] sm:$0xff]  ;;  %v7912_v40 = vld [vmem:[#allocation2 + $0x8] sm:$0xff] }
 0x2cd   : > { %2236 = vmatpush.msra.mxu1 %v7825_v50  ;;  %2606 = vmatpush.msra.mxu2 %v7823_v10  ;;  %v7914_v33 = vld [vmem:[#allocation2 + $0x88] sm:$0xff]  ;;  %v7918_v29 = vld [vmem:[#allocation2] sm:$0xff] }
 0x2ce   : > { %2671 = vmatpush.msra.mxu3 %v7825_v50  ;;  %2172 = vmatpush.msra.mxu0 %v7827_v36  ;;  %v7920_v32 = vld [vmem:[#allocation2 + $0x80] sm:$0xff] }
 0x2cf   : > { %2237 = vmatpush.msra.mxu1 %v7831_v57  ;;  %2607 = vmatpush.msra.mxu2 %v7827_v36 }
 0x2d0   : > { %2017 = vperm.xlu2 %6314, %v7752_v7   ;;  %2672 = vmatpush.msra.mxu3 %v7831_v57 }
 0x2d1   : > { %2014 = vperm.xlu1 %6313, %v7755_v52   ;;  %2011 = vperm.xlu0 %6312, %v7758_v53  }
 0x2d2   : > { %2173 = vmatpush.msra.mxu0 %v7833_v15  ;;  %2238 = vmatpush.msra.mxu1 %v7835_v31 }
 0x2d3   : > { %2608 = vmatpush.msra.mxu2 %v7833_v15  ;;  %2673 = vmatpush.msra.mxu3 %v7835_v31 }
 0x2d4   : > { %2174 = vmatpush.msra.mxu0 %v7841_v17  ;;  %2239 = vmatpush.msra.mxu1 %v7847_v5 }
 0x2d5   : > { %2609 = vmatpush.msra.mxu2 %v7841_v17  ;;  %2674 = vmatpush.msra.mxu3 %v7847_v5 }
 0x2d6   : > { %2175 = vmatpush.msra.mxu0 %v7854_v1  ;;  %2240 = vmatpush.msra.mxu1 %v7856_v18 }
 0x2d7   : > { %2610 = vmatpush.msra.mxu2 %v7854_v1  ;;  %2675 = vmatpush.msra.mxu3 %v7856_v18 }
 0x2d8   : > { %2026 = vperm.xlu2 %6314, %v7764_v35   ;;  %2176 = vmatpush.msra.mxu0 %v7858_v9 }
 0x2d9   : > { %2023 = vperm.xlu1 %6313, %v7767_v37   ;;  %2020 = vperm.xlu0 %6312, %v7770_v55  }
 0x2da   : > { %2241 = vmatpush.msra.mxu1 %v7862_v2  ;;  %2177 = vmatpush.msra.mxu0 %v7866_v19 }
 0x2db   : > { %2611 = vmatpush.msra.mxu2 %v7858_v9  ;;  %2676 = vmatpush.msra.mxu3 %v7862_v2 }
 0x2dc   : > { %2242 = vmatpush.msra.mxu1 %v7872_v20  ;;  %2178 = vmatpush.msra.mxu0 %v7876_v62 }
 0x2dd   : > { %2612 = vmatpush.msra.mxu2 %v7866_v19  ;;  %2677 = vmatpush.msra.mxu3 %v7872_v20 }
 0x2de   : > { %2243 = vmatpush.msra.mxu1 %v7881_v6  ;;  %2179 = vmatpush.msra.mxu0 %v7886_v28 }
 0x2df   : > { %2613 = vmatpush.msra.mxu2 %v7876_v62  ;;  %2678 = vmatpush.msra.mxu3 %v7881_v6 }
 0x2e0   : > { %2035 = vperm.xlu2 %6314, %v7776_v47   ;;  %2244 = vmatpush.msra.mxu1 %v7888_v21 }
 0x2e1   : > { %2032 = vperm.xlu1 %6313, %v7779_v58   ;;  %2029 = vperm.xlu0 %6312, %v7782_v24  }
 0x2e2   : > { %2180 = vmatpush.msra.mxu0 %v7892_v11  ;;  %2245 = vmatpush.msra.mxu1 %v7896_v22 }
 0x2e3   : > { %2614 = vmatpush.msra.mxu2 %v7886_v28  ;;  %2679 = vmatpush.msra.mxu3 %v7888_v21 }
 0x2e4   : > { %2181 = vmatpush.msra.mxu0 %v7904_v16  ;;  %2246 = vmatpush.msra.mxu1 %v7906_v26 }
 0x2e5   : > { %2615 = vmatpush.msra.mxu2 %v7892_v11  ;;  %2680 = vmatpush.msra.mxu3 %v7896_v22 }
 0x2e6   : > { %2182 = vmatpush.msra.mxu0 %v7912_v40  ;;  %2247 = vmatpush.msra.mxu1 %v7914_v33 }
 0x2e7   : > { %2616 = vmatpush.msra.mxu2 %v7904_v16  ;;  %2681 = vmatpush.msra.mxu3 %v7906_v26 }
 0x2e8   : > { %6315 = vset.pattern.permute.xlu2 %v6499_v60  ;;  %2183 = vmatpush.msra.mxu0 %v7918_v29 }
 0x2e9   : > { %6317 = vset.pattern.permute.xlu1 %v6499_v60  ;;  %2038 = vperm.xlu0 %6312, %v7788_v46  }
 0x2ea   : > { %2434 = vperm.xlu1 %6317, %v7728_v41   ;;  %2428 = vperm.xlu2 %6315, %v7731_v3  }
 0x2eb   : > { %2248 = vmatpush.msra.mxu1 %v7920_v32  ;;  %3038 = vmatpush.msrb.mxu0 %v7796_v23 }
 0x2ec   : > { %2617 = vmatpush.msra.mxu2 %v7912_v40  ;;  %2682 = vmatpush.msra.mxu3 %v7914_v33 }
 0x2ed   : > { %3103 = vmatpush.msrb.mxu1 %v7798_v25  ;;  %3039 = vmatpush.msrb.mxu0 %v7800_v0 }
 0x2ee   : > { %2618 = vmatpush.msra.mxu2 %v7918_v29  ;;  %2683 = vmatpush.msra.mxu3 %v7920_v32 }
 0x2ef   : > { %3104 = vmatpush.msrb.mxu1 %v7804_v54  ;;  %3040 = vmatpush.msrb.mxu0 %v7806_v4 }
 0x2f0   : > { %3473 = vmatpush.msrb.mxu2 %v7796_v23  ;;  %3538 = vmatpush.msrb.mxu3 %v7798_v25 }
 0x2f1   : > { %6316 = vset.pattern.permute.xlu0 %v6499_v60  ;;  %3105 = vmatpush.msrb.mxu1 %v7808_v8 }
 0x2f2   : > { %2440 = vperm.xlu1 %6317, %v7725_v27   ;;  %2437 = vperm.xlu2 %6315, %v7743_v51  }
 0x2f3   : > { %2431 = vperm.xlu0 %6316, %v7746_v49   ;;  %3474 = vmatpush.msrb.mxu2 %v7800_v0 }
 0x2f4   : > { %3539 = vmatpush.msrb.mxu3 %v7804_v54  ;;  %3041 = vmatpush.msrb.mxu0 %v7823_v10 }
 0x2f5   : > { %3475 = vmatpush.msrb.mxu2 %v7806_v4  ;;  %3106 = vmatpush.msrb.mxu1 %v7825_v50 }
 0x2f6   : > { %3540 = vmatpush.msrb.mxu3 %v7808_v8  ;;  %3042 = vmatpush.msrb.mxu0 %v7827_v36 }
 0x2f7   : > { %3476 = vmatpush.msrb.mxu2 %v7823_v10  ;;  %3107 = vmatpush.msrb.mxu1 %v7831_v57 }
 0x2f8   : > { %3541 = vmatpush.msrb.mxu3 %v7825_v50  ;;  %3043 = vmatpush.msrb.mxu0 %v7833_v15 }
 0x2f9   : > { %3477 = vmatpush.msrb.mxu2 %v7827_v36  ;;  %3108 = vmatpush.msrb.mxu1 %v7835_v31 }
 0x2fa   : > { %2449 = vperm.xlu1 %6317, %v7755_v52   ;;  %2443 = vperm.xlu2 %6315, %v7740_v30  }
 0x2fb   : > { %2446 = vperm.xlu0 %6316, %v7758_v53   ;;  %3542 = vmatpush.msrb.mxu3 %v7831_v57 }
 0x2fc   : > { %3478 = vmatpush.msrb.mxu2 %v7833_v15  ;;  %3044 = vmatpush.msrb.mxu0 %v7841_v17 }
 0x2fd   : > { %3543 = vmatpush.msrb.mxu3 %v7835_v31  ;;  %3109 = vmatpush.msrb.mxu1 %v7847_v5 }
 0x2fe   : > { %3479 = vmatpush.msrb.mxu2 %v7841_v17  ;;  %3045 = vmatpush.msrb.mxu0 %v7854_v1 }
 0x2ff   : > { %3544 = vmatpush.msrb.mxu3 %v7847_v5  ;;  %3110 = vmatpush.msrb.mxu1 %v7856_v18 }
 0x300   : > { %3480 = vmatpush.msrb.mxu2 %v7854_v1  ;;  %3046 = vmatpush.msrb.mxu0 %v7858_v9 }
 0x301   : > { %3545 = vmatpush.msrb.mxu3 %v7856_v18  ;;  %3111 = vmatpush.msrb.mxu1 %v7862_v2 }
 0x302   : > { %2458 = vperm.xlu1 %6317, %v7767_v37   ;;  %2452 = vperm.xlu2 %6315, %v7752_v7  }
 0x303   : > { %2455 = vperm.xlu0 %6316, %v7770_v55   ;;  %3481 = vmatpush.msrb.mxu2 %v7858_v9 }
 0x304   : > { %3546 = vmatpush.msrb.mxu3 %v7862_v2  ;;  %3047 = vmatpush.msrb.mxu0 %v7866_v19 }
 0x305   : > { %3112 = vmatpush.msrb.mxu1 %v7872_v20  ;;  %3482 = vmatpush.msrb.mxu2 %v7866_v19 }
 0x306   : > { %3547 = vmatpush.msrb.mxu3 %v7872_v20  ;;  %3048 = vmatpush.msrb.mxu0 %v7876_v62 }
 0x307   : > { %3113 = vmatpush.msrb.mxu1 %v7881_v6  ;;  %3483 = vmatpush.msrb.mxu2 %v7876_v62 }
 0x308   : > { %3548 = vmatpush.msrb.mxu3 %v7881_v6  ;;  %3049 = vmatpush.msrb.mxu0 %v7886_v28 }
 0x309   : > { %3114 = vmatpush.msrb.mxu1 %v7888_v21  ;;  %3484 = vmatpush.msrb.mxu2 %v7886_v28 }
 0x30a   : > { %2467 = vperm.xlu1 %6317, %v7779_v58   ;;  %2461 = vperm.xlu2 %6315, %v7764_v35  }
 0x30b   : > { %2464 = vperm.xlu0 %6316, %v7782_v24   ;;  %3050 = vmatpush.msrb.mxu0 %v7892_v11 }
 0x30c   : > { %3115 = vmatpush.msrb.mxu1 %v7896_v22  ;;  %3549 = vmatpush.msrb.mxu3 %v7888_v21 }
 0x30d   : > { %3485 = vmatpush.msrb.mxu2 %v7892_v11  ;;  %3051 = vmatpush.msrb.mxu0 %v7904_v16 }
 0x30e   : > { %3116 = vmatpush.msrb.mxu1 %v7906_v26  ;;  %3550 = vmatpush.msrb.mxu3 %v7896_v22 }
 0x30f   : > { %3486 = vmatpush.msrb.mxu2 %v7904_v16  ;;  %3052 = vmatpush.msrb.mxu0 %v7912_v40 }
 0x310   : > { %3117 = vmatpush.msrb.mxu1 %v7914_v33  ;;  %3551 = vmatpush.msrb.mxu3 %v7906_v26 }
 0x311   : > { %3053 = vmatpush.msrb.mxu0 %v7918_v29  ;;  %3487 = vmatpush.msrb.mxu2 %v7912_v40 }
 0x312   : > { %6319 = vset.pattern.permute.xlu1 %v6500_v12  ;;  %2470 = vperm.xlu2 %6315, %v7776_v47  }
 0x313   : > { %2473 = vperm.xlu0 %6316, %v7788_v46   ;;  %2866 = vperm.xlu1 %6319, %v7746_v49  }
 0x314   : > { %3118 = vmatpush.msrb.mxu1 %v7920_v32  ;;  %3552 = vmatpush.msrb.mxu3 %v7914_v33 }
 0x315   : > { %3488 = vmatpush.msrb.mxu2 %v7918_v29 }
 0x316   : > { %3553 = vmatpush.msrb.mxu3 %v7920_v32 }
 0x31a   : > { %6320 = vset.pattern.permute.xlu2 %v6500_v12  ;;  %v7932_v34 = vpop.permute.xlu2 %2005 }
 0x31b   : > { %6318 = vset.pattern.permute.xlu0 %v6500_v12  ;;  %2872 = vperm.xlu1 %6319, %v7743_v51   ;;  %v6502_v12 = vmov 3   ;;  %vm2048_vm2 = vcmp.eq.s32.totalorder %v7974_v38, %v7932_v34  ;;  %vm2049_vm3 = vcmp.eq.s32.totalorder %v7983_v39, %v7932_v34 }
 0x31c   : > { %2869 = vperm.xlu2 %6320, %v7728_v41   ;;  %2863 = vperm.xlu0 %6318, %v7731_v3  }
 0x322   : > { %v7948_v59 = vpop.permute.xlu2 %2008 }
 0x323   : > { %2881 = vperm.xlu1 %6319, %v7758_v53   ;;  %vm2050_vm15 = vcmp.eq.s32.totalorder %v7974_v38, %v7948_v59  ;;  %vm2051_vm1 = vcmp.eq.s32.totalorder %v7983_v39, %v7948_v59 }
 0x324   : > { %2875 = vperm.xlu2 %6320, %v7725_v27   ;;  %2878 = vperm.xlu0 %6318, %v7740_v30  }
 0x32a   : > { %v7966_v56 = vpop.permute.xlu2 %2017 }
 0x32b   : > { %12098 = vst [vmem:[#allocation11_spill] sm:$0xff] %v7966_v56  ;;  %2890 = vperm.xlu1 %6319, %v7770_v55  }
 0x32c   : > { %2884 = vperm.xlu2 %6320, %v7755_v52   ;;  %2887 = vperm.xlu0 %6318, %v7752_v7  }
 0x332   : > { %v7989_v42 = vpop.permute.xlu2 %2026 }
 0x333   : > { %12099 = vst [vmem:[#allocation12_spill] sm:$0xff] %v7989_v42  ;;  %v7993_v61 = vpop.permute.xlu1 %1999  ;;  %2899 = vperm.xlu1 %6319, %v7782_v24   ;;  %v1994_v43 = vpop.permute.xlu0 %1993  ;;  %v12101_v42 = vmov 1.0  }
 0x334   : > { %2893 = vperm.xlu2 %6320, %v7767_v37   ;;  %2896 = vperm.xlu0 %6318, %v7764_v35   ;;  %vm2040_vm0 = vcmp.eq.s32.totalorder %v7974_v38, %v1994_v43  ;;  %vm2041_vm6 = vcmp.eq.s32.totalorder %v7983_v39, %v1994_v43  ;;  %vm2044_vm7 = vcmp.eq.s32.totalorder %v7974_v38, %v7993_v61 }
 0x335   : > { %5603 = vmatmul.msk.f32.vlgmr.msra.gmra.mxu0 %vm2040_vm0, %v11759_v44  ;;  %5619 = vmatmul.msk.f32.vlgmr.msra.gmra.mxu1 %vm2041_vm6, %v11759_v44  ;;  %vm2045_vm8 = vcmp.eq.s32.totalorder %v7983_v39, %v7993_v61 }
 0x336   : > { %3908 = vmatpush.msra.mxu0 %v7796_v23  ;;  %3973 = vmatpush.msra.mxu1 %v7798_v25 }
 0x338   : > { %3909 = vmatpush.msra.mxu0 %v7800_v0  ;;  %3974 = vmatpush.msra.mxu1 %v7804_v54 }
 0x33a   : > { %v8015_v45 = vpop.permute.xlu2 %2035  ;;  %3910 = vmatpush.msra.mxu0 %v7806_v4  ;;  %3975 = vmatpush.msra.mxu1 %v7808_v8 }
 0x33b   : > { %12100 = vst [vmem:[#allocation13_spill] sm:$0xff] %v8015_v45  ;;  %v8019_v63 = vpop.permute.xlu1 %2002  ;;  %2908 = vperm.xlu1 %6319, %v7788_v46   ;;  %v8022_v48 = vpop.permute.xlu0 %1996 }
 0x33c   : > { %2902 = vperm.xlu2 %6320, %v7779_v58   ;;  %2905 = vperm.xlu0 %6318, %v7776_v47   ;;  %vm2042_vm4 = vcmp.eq.s32.totalorder %v7974_v38, %v8022_v48  ;;  %vm2043_vm5 = vcmp.eq.s32.totalorder %v7983_v39, %v8022_v48  ;;  %vm2046_vm11 = vcmp.eq.s32.totalorder %v7974_v38, %v8019_v63 }
 0x33d   : > { %5604 = vmatmul.msk.f32.gmra.mxu0 %vm2042_vm4, %v11759_v44  ;;  %5620 = vmatmul.msk.f32.gmra.mxu1 %vm2043_vm5, %v11759_v44  ;;  %v11765_v44 = vmov 0.0   ;;  %vm2047_vm12 = vcmp.eq.s32.totalorder %v7983_v39, %v8019_v63  ;;  %v12104_v63 = vmov 0.0  }
 0x33e   : > { %v5571_v45 = vsel %vm2040_vm0, 1.0, %v11765_v44  ;;  %3911 = vmatpush.msra.mxu0 %v7823_v10  ;;  %3976 = vmatpush.msra.mxu1 %v7825_v50  ;;  %v5573_v59 = vsel %vm2042_vm4, 1.0, %v12104_v63 }
 0x340   : > { %3912 = vmatpush.msra.mxu0 %v7827_v36  ;;  %3977 = vmatpush.msra.mxu1 %v7831_v57 }
 0x342   : > { %3913 = vmatpush.msra.mxu0 %v7833_v15  ;;  %3978 = vmatpush.msra.mxu1 %v7835_v31 }
 0x343   : > { %v8049_v60 = vpop.permute.xlu1 %2014  ;;  %6321 = vset.pattern.permute.xlu1 %v6502_v12  ;;  %v8051_v13 = vpop.permute.xlu0 %2011 }
 0x344   : > { %6322 = vset.pattern.permute.xlu2 %v6502_v12  ;;  %6323 = vset.pattern.permute.xlu0 %v6502_v12  ;;  %v2429_v14 = vpop.permute.xlu2 %2428  ;;  %v5572_v12 = vsel %vm2041_vm6, 1.0, %v11765_v44  ;;  %vm2053_vm4 = vcmp.eq.s32.totalorder %v7983_v39, %v8051_v13 }
 0x345   : > { %3298 = vperm.xlu1 %6321, %v7731_v3   ;;  %3301 = vperm.xlu2 %6322, %v7746_v49   ;;  %vm2475_vm9 = vcmp.eq.s32.totalorder %v7974_v38, %v2429_v14  ;;  %vm2476_vm10 = vcmp.eq.s32.totalorder %v7983_v39, %v2429_v14 }
 0x346   : > { %3304 = vperm.xlu0 %6323, %v7728_v41   ;;  %5605 = vmatmul.msk.f32.gmra.mxu0 %vm2044_vm7, %v12101_v42  ;;  %v5635_v3 = vsel %vm2475_vm9, 1.0, %v11765_v44  ;;  %v5636_v14 = vsel %vm2476_vm10, 1.0, %v11765_v44 }
 0x347   : > { %5621 = vmatmul.msk.f32.gmra.mxu1 %vm2045_vm8, %v12101_v42  ;;  %v8079_v56 = vadd.f32 %v5635_v3, %v5571_v45  ;;  %5667 = vmatmul.msk.f32.vlgmr.msra.gmra.mxu2 %vm2475_vm9, %v12101_v42  ;;  %v8082_v43 = vadd.f32 %v5636_v14, %v5572_v12  ;;  %v5577_v12 = vsel %vm2046_vm11, 1.0, %v12104_v63  ;;  %v5578_v14 = vsel %vm2047_vm12, 1.0, %v12104_v63 }
 0x348   : > { %5683 = vmatmul.msk.f32.vlgmr.msra.gmra.mxu3 %vm2476_vm10, %v12101_v42  ;;  %4343 = vmatpush.msra.mxu2 %v7796_v23 }
 0x349   : > { %12102 = vst [vmem:[#allocation14_spill] sm:$0xff] %v8079_v56  ;;  %4408 = vmatpush.msra.mxu3 %v7798_v25  ;;  %v5581_v25 = vsel %vm2050_vm15, 1.0, %v12104_v63  ;;  %3914 = vmatpush.msra.mxu0 %v7841_v17 }
 0x34a   : > { %12103 = vst [vmem:[#allocation15_spill] sm:$0xff] %v8082_v43  ;;  %4344 = vmatpush.msra.mxu2 %v7800_v0  ;;  %v5582_v0 = vsel %vm2051_vm1, 1.0, %v12104_v63  ;;  %3979 = vmatpush.msra.mxu1 %v7847_v5 }
 0x34b   : > { %v8090_v44 = vpop.permute.xlu1 %2023  ;;  %v8092_v3 = vpop.permute.xlu0 %2020  ;;  %4409 = vmatpush.msra.mxu3 %v7804_v54  ;;  %3915 = vmatpush.msra.mxu0 %v7854_v1 }
 0x34c   : > { %v8100_v45 = vpop.permute.xlu2 %2437  ;;  %4345 = vmatpush.msra.mxu2 %v7806_v4  ;;  %v5575_v4 = vsel %vm2044_vm7, 1.0, %v12104_v63  ;;  %3980 = vmatpush.msra.mxu1 %v7856_v18  ;;  %vm2052_vm7 = vcmp.eq.s32.totalorder %v7974_v38, %v8051_v13 }
 0x34d   : > { %3307 = vperm.xlu1 %6321, %v7743_v51   ;;  %3310 = vperm.xlu2 %6322, %v7725_v27   ;;  %vm2481_vm13 = vcmp.eq.s32.totalorder %v7974_v38, %v8100_v45  ;;  %vm2482_vm14 = vcmp.eq.s32.totalorder %v7983_v39, %v8100_v45  ;;  %v12125_v45 = vld [vmem:[#allocation7_spill] sm:$0xff] }
 0x34e   : > { %3319 = vperm.xlu0 %6323, %v7755_v52   ;;  %5606 = vmatmul.msk.f32.gmra.mxu0 %vm2046_vm11, %v12101_v42  ;;  %v5641_v43 = vsel %vm2481_vm13, 1.0, %v12104_v63  ;;  %v5642_v56 = vsel %vm2482_vm14, 1.0, %v12104_v63 }
 0x34f   : > { %5622 = vmatmul.msk.f32.gmra.mxu1 %vm2047_vm12, %v12101_v42  ;;  %v8122_v51 = vadd.f32 %v5641_v43, %v5577_v12  ;;  %v8124_v52 = vadd.f32 %v5642_v56, %v5578_v14  ;;  %4410 = vmatpush.msra.mxu3 %v7808_v8  ;;  %v5576_v8 = vsel %vm2045_vm8, 1.0, %v12104_v63 }
 0x350   : > { %4346 = vmatpush.msra.mxu2 %v7823_v10  ;;  %3916 = vmatpush.msra.mxu0 %v7858_v9 }
 0x351   : > { %12105 = vst [vmem:[#allocation16_spill] sm:$0xff] %v8124_v52  ;;  %4411 = vmatpush.msra.mxu3 %v7825_v50  ;;  %3981 = vmatpush.msra.mxu1 %v7862_v2 }
 0x352   : > { %4347 = vmatpush.msra.mxu2 %v7827_v36  ;;  %3917 = vmatpush.msra.mxu0 %v7866_v19 }
 0x353   : > { %v8133_v27 = vpop.permute.xlu1 %2032  ;;  %v8135_v43 = vpop.permute.xlu0 %2029  ;;  %4412 = vmatpush.msra.mxu3 %v7831_v57  ;;  %v5579_v57 = vsel %vm2048_vm2, 1.0, %v12104_v63  ;;  %3982 = vmatpush.msra.mxu1 %v7872_v20 }
 0x354   : > { %12106 = vst [vmem:[#allocation17_spill] sm:$0xff] %v8133_v27  ;;  %v8143_v23 = vpop.permute.xlu2 %2443  ;;  %4348 = vmatpush.msra.mxu2 %v7833_v15  ;;  %v5580_v15 = vsel %vm2049_vm3, 1.0, %v12104_v63  ;;  %3918 = vmatpush.msra.mxu0 %v7876_v62 }
 0x355   : > { %3313 = vperm.xlu1 %6321, %v7740_v30   ;;  %3316 = vperm.xlu2 %6322, %v7758_v53   ;;  %vm2485_vm0 = vcmp.eq.s32.totalorder %v7974_v38, %v8143_v23  ;;  %vm2486_vm6 = vcmp.eq.s32.totalorder %v7983_v39, %v8143_v23 }
 0x356   : > { %3328 = vperm.xlu0 %6323, %v7767_v37   ;;  %5607 = vmatmul.msk.f32.gmra.mxu0 %vm2048_vm2, %v12101_v42  ;;  %v5645_v54 = vsel %vm2485_vm0, 1.0, %v12104_v63  ;;  %v5646_v56 = vsel %vm2486_vm6, 1.0, %v12104_v63 }
 0x357   : > { %5623 = vmatmul.msk.f32.gmra.mxu1 %vm2049_vm3, %v12101_v42  ;;  %v8181_v12 = vadd.f32 %v5645_v54, %v5581_v25  ;;  %v8183_v14 = vadd.f32 %v5646_v56, %v5582_v0  ;;  %4413 = vmatpush.msra.mxu3 %v7835_v31 }
 0x358   : > { %4349 = vmatpush.msra.mxu2 %v7841_v17  ;;  %v5574_v17 = vsel %vm2043_vm5, 1.0, %v12104_v63  ;;  %3983 = vmatpush.msra.mxu1 %v7881_v6 }
 0x359   : > { %12107 = vst [vmem:[#allocation18_spill] sm:$0xff] %v8183_v14  ;;  %4414 = vmatpush.msra.mxu3 %v7847_v5  ;;  %v6504_v5 = vmov 4   ;;  %3919 = vmatpush.msra.mxu0 %v7886_v28 }
 0x35a   : > { %4350 = vmatpush.msra.mxu2 %v7854_v1  ;;  %3984 = vmatpush.msra.mxu1 %v7888_v21  ;;  %v5584_v1 = vsel %vm2053_vm4, 1.0, %v12104_v63 }
 0x35b   : > { %v8192_v52 = vpop.permute.xlu0 %2038  ;;  %4415 = vmatpush.msra.mxu3 %v7856_v18  ;;  %3920 = vmatpush.msra.mxu0 %v7892_v11 }
 0x35c   : > { %12108 = vst [vmem:[#allocation19_spill] sm:$0xff] %v8192_v52  ;;  %v8196_v25 = vpop.permute.xlu1 %2434  ;;  %v8198_v0 = vpop.permute.xlu2 %2452  ;;  %4351 = vmatpush.msra.mxu2 %v7858_v9  ;;  %3985 = vmatpush.msra.mxu1 %v7896_v22 }
 0x35d   : > { %12109 = vst [vmem:[#allocation20_spill] sm:$0xff] %v8198_v0  ;;  %3322 = vperm.xlu1 %6321, %v7752_v7   ;;  %3325 = vperm.xlu2 %6322, %v7770_v55   ;;  %vm2479_vm9 = vcmp.eq.s32.totalorder %v7974_v38, %v8196_v25  ;;  %vm2480_vm10 = vcmp.eq.s32.totalorder %v7983_v39, %v8196_v25 }
 0x35e   : > { %3337 = vperm.xlu0 %6323, %v7779_v58   ;;  %5608 = vmatmul.msk.f32.gmra.mxu0 %vm2050_vm15, %v12101_v42  ;;  %v5639_v10 = vsel %vm2479_vm9, 1.0, %v12104_v63  ;;  %v5640_v50 = vsel %vm2480_vm10, 1.0, %v12104_v63  ;;  %vm2054_vm15 = vcmp.eq.s32.totalorder %v7974_v38, %v8049_v60 }
 0x35f   : > { %5624 = vmatmul.msk.f32.gmra.mxu1 %vm2051_vm1, %v12101_v42  ;;  %v8233_v58 = vadd.f32 %v5639_v10, %v5575_v4  ;;  %v8235_v36 = vadd.f32 %v5640_v50, %v5576_v8  ;;  %vm2055_vm1 = vcmp.eq.s32.totalorder %v7983_v39, %v8049_v60  ;;  %4416 = vmatpush.msra.mxu3 %v7862_v2 }
 0x360   : > { %3986 = vmatpush.msra.mxu1 %v7906_v26  ;;  %4352 = vmatpush.msra.mxu2 %v7866_v19 }
 0x361   : > { %4417 = vmatpush.msra.mxu3 %v7872_v20  ;;  %3921 = vmatpush.msra.mxu0 %v7904_v16 }
 0x362   : > { %3987 = vmatpush.msra.mxu1 %v7914_v33  ;;  %4353 = vmatpush.msra.mxu2 %v7876_v62  ;;  %v12119_v62 = vld [vmem:[#allocation8_spill] sm:$0xff] }
 0x363   : > { %4418 = vmatpush.msra.mxu3 %v7881_v6  ;;  %3922 = vmatpush.msra.mxu0 %v7912_v40 }
 0x364   : > { %v8258_v31 = vpop.permute.xlu1 %2440  ;;  %v8270_v34 = vpop.permute.xlu2 %2461  ;;  %3988 = vmatpush.msra.mxu1 %v7920_v32  ;;  %4354 = vmatpush.msra.mxu2 %v7886_v28 }
 0x365   : > { %3331 = vperm.xlu1 %6321, %v7764_v35   ;;  %3334 = vperm.xlu2 %6322, %v7782_v24   ;;  %12110 = vst [vmem:[#allocation21_spill] sm:$0xff] %v8270_v34  ;;  %v2432_v61 = vpop.permute.xlu0 %2431  ;;  %vm2483_vm8 = vcmp.eq.s32.totalorder %v7974_v38, %v8258_v31  ;;  %vm2484_vm11 = vcmp.eq.s32.totalorder %v7983_v39, %v8258_v31  ;;  %v12136_v31 = vld [vmem:[#allocation14_spill] sm:$0xff] }
 0x366   : > { %6325 = vset.pattern.permute.xlu0 %v6504_v5  ;;  %5609 = vmatmul.msk.f32.gmra.mxu0 %vm2052_vm7, %v12101_v42  ;;  %vm2477_vm5 = vcmp.eq.s32.totalorder %v7974_v38, %v2432_v61  ;;  %vm2478_vm12 = vcmp.eq.s32.totalorder %v7983_v39, %v2432_v61  ;;  %v5643_v35 = vsel %vm2483_vm8, 1.0, %v12104_v63  ;;  %v5644_v48 = vsel %vm2484_vm11, 1.0, %v12104_v63 }
 0x367   : > { %3736 = vperm.xlu0 %6325, %v7746_v49   ;;  %5625 = vmatmul.msk.f32.gmra.mxu1 %vm2053_vm4, %v12101_v42  ;;  %v5637_v54 = vsel %vm2477_vm5, 1.0, %v12104_v63  ;;  %v5638_v56 = vsel %vm2478_vm12, 1.0, %v12104_v63  ;;  %v8300_v4 = vadd.f32 %v5643_v35, %v5579_v57  ;;  %v8302_v8 = vadd.f32 %v5644_v48, %v5580_v15  ;;  %v12118_v48 = vld [vmem:[#allocation11_spill] sm:$0xff] }
 0x368   : > { %v8304_v10 = vadd.f32 %v5637_v54, %v5573_v59  ;;  %5668 = vmatmul.msk.f32.gmra.mxu2 %vm2477_vm5, %v12101_v42  ;;  %v8307_v50 = vadd.f32 %v5638_v56, %v5574_v17  ;;  %5684 = vmatmul.msk.f32.gmra.mxu3 %vm2478_vm12, %v12101_v42  ;;  %v5583_v49 = vsel %vm2052_vm7, 1.0, %v12104_v63  ;;  %v5585_v57 = vsel %vm2054_vm15, 1.0, %v12104_v63 }
 0x369   : > { %12111 = vst [vmem:[#allocation22_spill] sm:$0xff] %v8300_v4  ;;  %vm2058_vm5 = vcmp.eq.s32.totalorder %v7974_v38, %v8092_v3  ;;  %vm2059_vm12 = vcmp.eq.s32.totalorder %v7983_v39, %v8092_v3  ;;  %3923 = vmatpush.msra.mxu0 %v7918_v29  ;;  %4419 = vmatpush.msra.mxu3 %v7888_v21 }
 0x36a   : > { %12112 = vst [vmem:[#allocation23_spill] sm:$0xff] %v8302_v8  ;;  %v5589_v54 = vsel %vm2058_vm5, 1.0, %v12104_v63  ;;  %v5590_v19 = vsel %vm2059_vm12, 1.0, %v12104_v63  ;;  %4355 = vmatpush.msra.mxu2 %v7892_v11  ;;  %v12129_v11 = vld [vmem:[#allocation10_spill] sm:$0xff]  ;;  %v6446_v8 = vld [vmem:[%s6601_s26 + $0x50] sm:$0xff] }
 0x36b   : > { %4420 = vmatpush.msra.mxu3 %v7896_v22 }
 0x36c   : > { %v8324_v59 = vpop.permute.xlu1 %2449  ;;  %v8361_v2 = vpop.permute.xlu2 %2470  ;;  %4356 = vmatpush.msra.mxu2 %v7904_v16 }
 0x36d   : > { %3340 = vperm.xlu1 %6321, %v7776_v47   ;;  %3343 = vperm.xlu2 %6322, %v7788_v46   ;;  %v8334_v18 = vpop.permute.xlu0 %2446  ;;  %vm11771_vm2 = vcmp.eq.s32.totalorder %v7974_v38, %v8324_v59  ;;  %vm11770_vm3 = vcmp.eq.s32.totalorder %v7983_v39, %v8324_v59  ;;  %v5586_v47 = vsel %vm2055_vm1, 1.0, %v12104_v63  ;;  %12113 = vst [vmem:[#allocation24_spill] sm:$0xff] %v8361_v2 }
 0x36e   : > { %5610 = vmatmul.msk.f32.gmra.mxu0 %vm2054_vm15, %v12101_v42  ;;  %vm11773_vm7 = vcmp.eq.s32.totalorder %v7974_v38, %v8334_v18  ;;  %vm11772_vm4 = vcmp.eq.s32.totalorder %v7983_v39, %v8334_v18  ;;  %v5649_v9 = vsel %vm11771_vm2, 1.0, %v12104_v63  ;;  %vm11799_vm15 = vcmp.eq.s32.totalorder %v7974_v38, %v12118_v48  ;;  %4421 = vmatpush.msra.mxu3 %v7906_v26 }
 0x36f   : > { %3751 = vperm.xlu0 %6325, %v7758_v53   ;;  %5626 = vmatmul.msk.f32.gmra.mxu1 %vm2055_vm1, %v12101_v42  ;;  %v5647_v13 = vsel %vm11773_vm7, 1.0, %v12104_v63  ;;  %v5648_v15 = vsel %vm11772_vm4, 1.0, %v12104_v63  ;;  %v8376_v17 = vadd.f32 %v5649_v9, %v5585_v57  ;;  %v5650_v53 = vsel %vm11770_vm3, 1.0, %v12104_v63 }
 0x370   : > { %5669 = vmatmul.msk.f32.gmra.mxu2 %vm2479_vm9, %v12101_v42  ;;  %5685 = vmatmul.msk.f32.gmra.mxu3 %vm2480_vm10, %v12101_v42  ;;  %v8390_v60 = vadd.f32 %v5647_v13, %v5583_v49  ;;  %v8392_v61 = vadd.f32 %v5648_v15, %v5584_v1  ;;  %v8394_v35 = vadd.f32 %v5650_v53, %v5586_v47 }
 0x371   : > { %12114 = vst [vmem:[#allocation25_spill] sm:$0xff] %v8376_v17  ;;  %vm2060_vm9 = vcmp.eq.s32.totalorder %v7974_v38, %v8090_v44  ;;  %vm2061_vm10 = vcmp.eq.s32.totalorder %v7983_v39, %v8090_v44  ;;  %vm11798_vm1 = vcmp.eq.s32.totalorder %v7983_v39, %v12118_v48  ;;  %4357 = vmatpush.msra.mxu2 %v7912_v40  ;;  %v11781_v44 = vmov 5   ;;  %v6425_v48 = vld [vmem:[#allocation2 + $0x48] sm:$0xff] }
 0x372   : > { %12115 = vst [vmem:[#allocation26_spill] sm:$0xff] %v8390_v60  ;;  %v5591_v56 = vsel %vm2060_vm9, 1.0, %v12104_v63  ;;  %v5592_v49 = vsel %vm2061_vm10, 1.0, %v12104_v63  ;;  %4422 = vmatpush.msra.mxu3 %v7914_v33  ;;  %v12133_v33 = vld [vmem:[#allocation12_spill] sm:$0xff] }
 0x373   : > { %12116 = vst [vmem:[#allocation27_spill] sm:$0xff] %v8392_v61  ;;  %4358 = vmatpush.msra.mxu2 %v7918_v29  ;;  %v6423_v61 = vld [vmem:[#allocation2 + $0x50] sm:$0xff] }
 0x374   : > { %12117 = vst [vmem:[#allocation28_spill] sm:$0xff] %v8394_v35  ;;  %v8410_v25 = vpop.permute.xlu1 %2458  ;;  %4423 = vmatpush.msra.mxu3 %v7920_v32 }
 0x375   : > { %6326 = vset.pattern.permute.xlu1 %v6504_v5  ;;  %6324 = vset.pattern.permute.xlu2 %v6504_v5  ;;  %v8428_v20 = vpop.permute.xlu0 %2455  ;;  %vm2495_vm3 = vcmp.eq.s32.totalorder %v7974_v38, %v8410_v25  ;;  %vm2496_vm2 = vcmp.eq.s32.totalorder %v7983_v39, %v8410_v25  ;;  %v12152_v25 = vmov 0  }
 0x376   : > { %3739 = vperm.xlu1 %6326, %v7728_v41   ;;  %3733 = vperm.xlu2 %6324, %v12119_v62   ;;  %vm2493_vm4 = vcmp.eq.s32.totalorder %v7974_v38, %v8428_v20  ;;  %vm2494_vm7 = vcmp.eq.s32.totalorder %v7983_v39, %v8428_v20  ;;  %v5655_v6 = vsel %vm2495_vm3, 1.0, %v12104_v63  ;;  %v5656_v5 = vsel %vm2496_vm2, 1.0, %v12104_v63  ;;  %v8485_v13 = vpop.permute.xlu2 %2869  ;;  %v6410_v20 = vld [vmem:[%s6601_s26 + $0x20] sm:$0xff] }
 0x377   : > { %3760 = vperm.xlu0 %6325, %v7770_v55   ;;  %5611 = vmatmul.msk.f32.gmra.mxu0 %vm11799_vm15, %v12101_v42  ;;  %v5653_v41 = vsel %vm2493_vm4, 1.0, %v12104_v63  ;;  %v5654_v1 = vsel %vm2494_vm7, 1.0, %v12104_v63  ;;  %v8469_v57 = vadd.f32 %v5655_v6, %v5591_v56  ;;  %v8471_v47 = vadd.f32 %v5656_v5, %v5592_v49  ;;  %v6402_v49 = vld [vmem:[%s6601_s26 + $0x58] sm:$0xff]  ;;  %v6403_v6 = vld [vmem:[%s6601_s26 + $0x28] sm:$0xff] }
 0x378   : > { %5627 = vmatmul.msk.f32.gmra.mxu1 %vm11798_vm1, %v12101_v42  ;;  %5670 = vmatmul.msk.f32.gmra.mxu2 %vm2481_vm13, %v12101_v42  ;;  %v8481_v55 = vadd.f32 %v5653_v41, %v5589_v54  ;;  %v8483_v9 = vadd.f32 %v5654_v1, %v5590_v19  ;;  %v12126_v54 = vld [vmem:[#allocation9_spill] sm:$0xff] }
 0x379   : > { %12120 = vst [vmem:[#allocation8_spill] sm:$0xff] %v8469_v57  ;;  %5686 = vmatmul.msk.f32.gmra.mxu3 %vm2482_vm14, %v12101_v42  ;;  %v8666_v41 = vld [vmem:[%s6601_s26 + $0x70] sm:$0xff] }
 0x37a   : > { %12121 = vst [vmem:[#allocation29_spill] sm:$0xff] %v8471_v47 }
 0x37b   : > { %12122 = vst [vmem:[#allocation30_spill] sm:$0xff] %v8481_v55  ;;  %v6415_v55 = vld [vmem:[#allocation2 + $0xf0] sm:$0xff] }
 0x37c   : > { %12123 = vst [vmem:[#allocation31_spill] sm:$0xff] %v8483_v9  ;;  %v8496_v15 = vpop.permute.xlu1 %2467 }
 0x37d   : > { %12124 = vst [vmem:[#allocation32_spill] sm:$0xff] %v8496_v15  ;;  %v8499_v53 = vpop.permute.xlu0 %2464  ;;  %vm11817_vm15 = vcmp.eq.s32.totalorder %v7974_v38, %v8496_v15 }
 0x37e   : > { %3745 = vperm.xlu1 %6326, %v12125_v45   ;;  %3742 = vperm.xlu2 %6324, %v12126_v54   ;;  %v8688_v45 = vld [vmem:[%s6601_s26 + $0x40] sm:$0xff]  ;;  %vm11800_vm1 = vcmp.eq.s32.totalorder %v7983_v39, %v8499_v53 }
 0x37f   : > { %3769 = vperm.xlu0 %6325, %v7782_v24   ;;  %5612 = vmatmul.msk.f32.gmra.mxu0 %vm2058_vm5, %v12101_v42  ;;  %v8523_v24 = vpop.permute.xlu2 %2875 }
 0x380   : > { %5628 = vmatmul.msk.f32.gmra.mxu1 %vm2059_vm12, %v12101_v42  ;;  %5671 = vmatmul.msk.f32.gmra.mxu2 %vm2483_vm8, %v12101_v42  ;;  %12127 = vst [vmem:[#allocation7_spill] sm:$0xff] %v8523_v24  ;;  %vm12134_vm12 = vcmp.eq.s32.totalorder %v7974_v38, %v8334_v18 }
 0x381   : > { %5687 = vmatmul.msk.f32.gmra.mxu3 %vm2484_vm11, %v12101_v42 }
 0x385   : > { %v8527_v28 = vpop.permute.xlu0 %2473  ;;  %v8529_v21 = vpop.permute.xlu1 %2866 }
 0x386   : > { %12128 = vst [vmem:[#allocation9_spill] sm:$0xff] %v8527_v28  ;;  %3754 = vperm.xlu1 %6326, %v12129_v11   ;;  %3748 = vperm.xlu2 %6324, %v7740_v30   ;;  %vm2912_vm13 = vcmp.eq.s32.totalorder %v7974_v38, %v8529_v21  ;;  %vm2913_vm14 = vcmp.eq.s32.totalorder %v7983_v39, %v8529_v21 }
 0x387   : > { %3778 = vperm.xlu0 %6325, %v7788_v46   ;;  %5613 = vmatmul.msk.f32.gmra.mxu0 %vm2060_vm9, %v12101_v42  ;;  %v5701_v22 = vsel %vm2912_vm13, 1.0, %v12104_v63  ;;  %v5702_v30 = vsel %vm2913_vm14, 1.0, %v12104_v63  ;;  %v8570_v26 = vpop.permute.xlu2 %2884  ;;  %vm12135_vm9 = vcmp.eq.s32.totalorder %v7983_v39, %v8334_v18 }
 0x388   : > { %5629 = vmatmul.msk.f32.gmra.mxu1 %vm2061_vm10, %v12101_v42  ;;  %5672 = vmatmul.msk.f32.gmra.mxu2 %vm2485_vm0, %v12101_v42  ;;  %v8560_v46 = vadd.f32 %v5701_v22, %v8304_v10  ;;  %v8563_v16 = vadd.f32 %v5702_v30, %v8307_v50  ;;  %12132 = vst [vmem:[#allocation34_spill] sm:$0xff] %v8570_v26  ;;  %v12137_v50 = vld [vmem:[#allocation15_spill] sm:$0xff]  ;;  %v12146_v22 = vld [vmem:[#allocation13_spill] sm:$0xff] }
 0x389   : > { %5688 = vmatmul.msk.f32.gmra.mxu3 %vm2486_vm6, %v12101_v42  ;;  %vm11775_vm0 = vcmp.eq.s32.totalorder %v7974_v38, %v12133_v33  ;;  %vm11774_vm6 = vcmp.eq.s32.totalorder %v7983_v39, %v12133_v33  ;;  %vm2064_vm10 = vcmp.eq.s32.totalorder %v7974_v38, %v8135_v43  ;;  %v6411_v33 = vld [vmem:[%s6601_s26 + $0x38] sm:$0xff] }
 0x38a   : > { %12130 = vst [vmem:[#allocation10_spill] sm:$0xff] %v8560_v46 }
 0x38b   : > { %12131 = vst [vmem:[#allocation33_spill] sm:$0xff] %v8563_v16 }
 0x38d   : > { %v8572_v40 = vpop.permute.xlu1 %2872 }
 0x38e   : > { %3763 = vperm.xlu1 %6326, %v7767_v37   ;;  %3757 = vperm.xlu2 %6324, %v7752_v7   ;;  %v8578_v29 = vpop.permute.xlu0 %2863  ;;  %vm2916_vm8 = vcmp.eq.s32.totalorder %v7974_v38, %v8572_v40  ;;  %v8602_v37 = vld [vmem:[%s6601_s26] sm:$0xff] }
 0x38f   : > { %6327 = vset.pattern.permute.xlu0 %v11781_v44  ;;  %5614 = vmatmul.msk.f32.gmra.mxu0 %vm11775_vm0, %v12101_v42  ;;  %vm2910_vm11 = vcmp.eq.s32.totalorder %v7974_v38, %v8578_v29  ;;  %vm2911_vm5 = vcmp.eq.s32.totalorder %v7983_v39, %v8578_v29  ;;  %v5705_v7 = vsel %vm2916_vm8, 1.0, %v12104_v63  ;;  %v8641_v62 = vpop.permute.xlu2 %2893  ;;  %vm11776_vm0 = vcmp.eq.s32.totalorder %v7974_v38, %v8133_v27 }
 0x390   : > { %5630 = vmatmul.msk.f32.gmra.mxu1 %vm11774_vm6, %v12101_v42  ;;  %4168 = vperm.xlu0 %6327, %v8602_v37   ;;  %v5699_v32 = vsel %vm2910_vm11, 1.0, %v12104_v63  ;;  %v5700_v3 = vsel %vm2911_vm5, 1.0, %v12104_v63  ;;  %v8614_v23 = vadd.f32 %v5705_v7, %v8122_v51  ;;  %v8633_v51 = vld [vmem:[%s6601_s26 + $0x68] sm:$0xff]  ;;  %12140 = vst [vmem:[#allocation35_spill] sm:$0xff] %v8641_v62  ;;  %vm12142_vm6 = vcmp.eq.s32.totalorder %v7983_v39, %v8324_v59  ;;  %v8719_v7 = vld [vmem:[%s6601_s26 + $0x18] sm:$0xff] }
 0x391   : > { %5673 = vmatmul.msk.f32.gmra.mxu2 %vm12134_vm12, %v12101_v42  ;;  %5689 = vmatmul.msk.f32.gmra.mxu3 %vm12135_vm9, %v12101_v42  ;;  %v8625_v10 = vadd.f32 %v5699_v32, %v12136_v31  ;;  %v8628_v19 = vadd.f32 %v5700_v3, %v12137_v50  ;;  %vm2065_vm12 = vcmp.eq.s32.totalorder %v7983_v39, %v8135_v43  ;;  %v8727_v32 = vld [vmem:[%s6601_s26 + $0x10] sm:$0xff] }
 0x392   : > { %vm12141_vm9 = vcmp.eq.s32.totalorder %v7974_v38, %v8324_v59  ;;  %v8680_v59 = vld [vmem:[%s6601_s26 + $0x8] sm:$0xff] }
 0x395   : > { %v8630_v56 = vpop.permute.xlu1 %2881 }
 0x396   : > { %12138 = vst [vmem:[#allocation14_spill] sm:$0xff] %v8630_v56  ;;  %3772 = vperm.xlu1 %6326, %v8633_v51   ;;  %3766 = vperm.xlu2 %6324, %v6402_v49   ;;  %v8639_v18 = vpop.permute.xlu0 %2878 }
 0x397   : > { %12139 = vst [vmem:[#allocation15_spill] sm:$0xff] %v8639_v18  ;;  %5615 = vmatmul.msk.f32.gmra.mxu0 %vm2064_vm10, %v12101_v42  ;;  %v8695_v54 = vpop.permute.xlu2 %2902 }
 0x398   : > { %5631 = vmatmul.msk.f32.gmra.mxu1 %vm2065_vm12, %v12101_v42  ;;  %4183 = vperm.xlu0 %6327, %v6403_v6   ;;  %12145 = vst [vmem:[#allocation38_spill] sm:$0xff] %v8695_v54 }
 0x399   : > { %5674 = vmatmul.msk.f32.gmra.mxu2 %vm12141_vm9, %v12101_v42  ;;  %5690 = vmatmul.msk.f32.gmra.mxu3 %vm12142_vm6, %v12101_v42  ;;  %vm11777_vm6 = vcmp.eq.s32.totalorder %v7983_v39, %v8133_v27  ;;  %vm11778_vm9 = vcmp.eq.s32.totalorder %v7974_v38, %v8198_v0 }
 0x39d   : > { %v8662_v5 = vpop.permute.xlu1 %2890 }
 0x39e   : > { %12143 = vst [vmem:[#allocation36_spill] sm:$0xff] %v8662_v5  ;;  %6328 = vset.pattern.permute.xlu1 %v11781_v44  ;;  %3775 = vperm.xlu2 %6324, %v8666_v41   ;;  %v8671_v1 = vpop.permute.xlu0 %2887 }
 0x39f   : > { %12144 = vst [vmem:[#allocation37_spill] sm:$0xff] %v8671_v1  ;;  %5616 = vmatmul.msk.f32.gmra.mxu0 %vm11776_vm0, %v12101_v42  ;;  %4171 = vperm.xlu1 %6328, %v8680_v59   ;;  %vm11791_vm0 = vcmp.eq.s32.totalorder %v7983_v39, %v8198_v0  ;;  %v8738_v3 = vpop.permute.xlu2 %3301 }
 0x3a0   : > { %5632 = vmatmul.msk.f32.gmra.mxu1 %vm11777_vm6, %v12101_v42  ;;  %4192 = vperm.xlu0 %6327, %v8688_v45   ;;  %vm11790_vm6 = vcmp.eq.s32.totalorder %v7974_v38, %v12146_v22  ;;  %12148 = vst [vmem:[#allocation40_spill] sm:$0xff] %v8738_v3 }
 0x3a1   : > { %5675 = vmatmul.msk.f32.gmra.mxu2 %vm11778_vm9, %v12101_v42  ;;  %5691 = vmatmul.msk.f32.gmra.mxu3 %vm11791_vm0, %v12101_v42  ;;  %vm11779_vm9 = vcmp.eq.s32.totalorder %v7983_v39, %v12146_v22 }
 0x3a5   : > { %v8705_v11 = vpop.permute.xlu1 %2899 }
 0x3a6   : > { %6329 = vset.pattern.permute.xlu2 %v11781_v44  ;;  %v8710_v30 = vpop.permute.xlu0 %2896 }
 0x3a7   : > { %12147 = vst [vmem:[#allocation39_spill] sm:$0xff] %v8710_v30  ;;  %5617 = vmatmul.msk.f32.gmra.mxu0 %vm11790_vm6, %v12101_v42  ;;  %4177 = vperm.xlu1 %6328, %v8719_v7  }
 0x3a8   : > { %5633 = vmatmul.msk.f32.gmra.mxu1 %vm11779_vm9, %v12101_v42  ;;  %4174 = vperm.xlu2 %6329, %v8727_v32   ;;  %vm11780_vm9 = vcmp.eq.s32.totalorder %v7974_v38, %v8192_v52 }
 0x3a9   : > { %4201 = vperm.xlu0 %6327, %v6402_v49   ;;  %5676 = vmatmul.msk.f32.gmra.mxu2 %vm2493_vm4, %v12101_v42  ;;  %vm11788_vm4 = vcmp.eq.s32.totalorder %v7983_v39, %v8192_v52  ;;  %v6409_v49 = vld [vmem:[%s6601_s26 + $0x30] sm:$0xff]  ;;  %v8779_v52 = vpop.permute.xlu2 %3310 }
 0x3aa   : > { %5692 = vmatmul.msk.f32.gmra.mxu3 %vm2494_vm7, %v12101_v42  ;;  %vm2914_vm7 = vcmp.eq.s32.totalorder %v7974_v38, %v8485_v13  ;;  %12151 = vst [vmem:[#allocation43_spill] sm:$0xff] %v8779_v52 }
 0x3ad   : > { %v8740_v31 = vpop.permute.xlu1 %2908 }
 0x3ae   : > { %12149 = vst [vmem:[#allocation41_spill] sm:$0xff] %v8740_v31  ;;  %v8744_v50 = vpop.permute.xlu0 %2905 }
 0x3af   : > { %12150 = vst [vmem:[#allocation42_spill] sm:$0xff] %v8744_v50  ;;  %5618 = vmatmul.msk.f32.gmra.mxu0 %vm11780_vm9, %v12101_v42  ;;  %4186 = vperm.xlu1 %6328, %v6409_v49   ;;  %vm2915_vm9 = vcmp.eq.s32.totalorder %v7983_v39, %v8485_v13 }
 0x3b0   : > { %5634 = vmatmul.msk.f32.gmra.mxu1 %vm11788_vm4, %v12101_v42  ;;  %4180 = vperm.xlu2 %6329, %v6410_v20   ;;  %v5703_v20 = vsel %vm2914_vm7, 1.0, %v12104_v63  ;;  %v5704_v44 = vsel %vm2915_vm9, 1.0, %v12104_v63  ;;  %vm2917_vm4 = vcmp.eq.s32.totalorder %v7983_v39, %v8572_v40 }
 0x3b1   : > { %4210 = vperm.xlu0 %6327, %v8666_v41   ;;  %5677 = vmatmul.msk.f32.gmra.mxu2 %vm2495_vm3, %v12101_v42  ;;  %vm11797_vm3 = vcmp.eq.s32.totalorder %v7974_v38, %v8270_v34  ;;  %v3010_v27 = vadd.f32 %v5703_v20, %v8233_v58  ;;  %v3011_v47 = vadd.f32 %v5704_v44, %v8235_v36  ;;  %v11792_v58 = vmov 6   ;;  %v8854_v35 = vpop.permute.xlu2 %3316 }
 0x3b2   : > { %5693 = vmatmul.msk.f32.gmra.mxu3 %vm2496_vm2, %v12101_v42  ;;  %v2185_v6 = vpop.f32.mrf.mxu0  ;;  %v2250_v49 = vpop.f32.mrf.mxu1  ;;  %vm11796_vm2 = vcmp.eq.s32.totalorder %v7983_v39, %v8270_v34  ;;  %12157 = vst [vmem:[#allocation48_spill] sm:$0xff] %v8854_v35 }
 0x3b3   : > { %v8796_v57 = vadd.f32 %v2250_v49, %v2185_v6 }
 0x3b7   : > { %5731 = vmatmul.msk.f32.vlgmr.msrb.gmra.mxu0 %vm2910_vm11, %v12101_v42  ;;  %6330 = vset.pattern.permute.xlu1 %v12152_v25  ;;  %v8790_v22 = vpop.permute.xlu1 %3298 }
 0x3b8   : > { %5747 = vmatmul.msk.f32.vlgmr.msrb.gmra.mxu1 %vm2911_vm5, %v12101_v42  ;;  %4189 = vperm.xlu2 %6329, %v6411_v33   ;;  %v8803_v9 = vpop.permute.xlu0 %3304  ;;  %vm3345_vm11 = vcmp.eq.s32.totalorder %v7974_v38, %v8790_v22  ;;  %vm3346_vm6 = vcmp.eq.s32.totalorder %v7983_v39, %v8790_v22 }
 0x3b9   : > { %6342 = vset.pattern.permute.xlu0 %v11792_v58  ;;  %5678 = vmatmul.msk.f32.gmra.mxu2 %vm11797_vm3, %v12101_v42  ;;  %v5763_v36 = vsel %vm3345_vm11, 1.0, %v12104_v63  ;;  %v5764_v33 = vsel %vm3346_vm6, 1.0, %v12104_v63  ;;  %vm3349_vm5 = vcmp.eq.s32.totalorder %v7974_v38, %v8803_v9  ;;  %vm3350_vm0 = vcmp.eq.s32.totalorder %v7983_v39, %v8803_v9 }
 0x3ba   : > { %5694 = vmatmul.msk.f32.gmra.mxu3 %vm11796_vm2, %v12101_v42  ;;  %4606 = vperm.xlu0 %6342, %v8680_v59   ;;  %v2188_v29 = vpop.f32.mrf.mxu0  ;;  %v2253_v44 = vpop.f32.mrf.mxu1  ;;  %v8832_v6 = vadd.f32 %v5763_v36, %v8625_v10  ;;  %v8835_v49 = vadd.f32 %v5764_v33, %v8628_v19  ;;  %v5767_v20 = vsel %vm3349_vm5, 1.0, %v12104_v63  ;;  %v5768_v58 = vsel %vm3350_vm0, 1.0, %v12104_v63  ;;  %v6412_v10 = vld [vmem:[#allocation2 + $0x78] sm:$0xff]  ;;  %v6414_v33 = vld [vmem:[#allocation2 + $0x70] sm:$0xff] }
 0x3bb   : > { %2301 = vperm.xlu1 %6330, %v8796_v57   ;;  %v8846_v59 = vadd.f32 %v5767_v20, %v3010_v27  ;;  %v8848_v34 = vadd.f32 %v5768_v58, %v3011_v47  ;;  %4778 = vmatpush.msrb.mxu0 %v6412_v10  ;;  %v6413_v19 = vld [vmem:[#allocation2 + $0xf8] sm:$0xff]  ;;  %v5706_v36 = vsel %vm2917_vm4, 1.0, %v12104_v63  ;;  %v8856_v17 = vadd.f32 %v2253_v44, %v2188_v29  ;;  %v12158_v47 = vld [vmem:[#allocation16_spill] sm:$0xff] }
 0x3bc   : > { %12153 = vst [vmem:[#allocation44_spill] sm:$0xff] %v8832_v6  ;;  %4843 = vmatpush.msrb.mxu1 %v6413_v19  ;;  %vm2499_vm2 = vcmp.eq.s32.totalorder %v7974_v38, %v8499_v53  ;;  %v6416_v10 = vld [vmem:[#allocation2 + $0x68] sm:$0xff] }
 0x3bd   : > { %12154 = vst [vmem:[#allocation45_spill] sm:$0xff] %v8835_v49  ;;  %4779 = vmatpush.msrb.mxu0 %v6414_v33  ;;  %v6417_v19 = vld [vmem:[#allocation2 + $0xe8] sm:$0xff]  ;;  %v6418_v33 = vld [vmem:[#allocation2 + $0x60] sm:$0xff] }
 0x3be   : > { %12155 = vst [vmem:[#allocation46_spill] sm:$0xff] %v8846_v59  ;;  %4844 = vmatpush.msrb.mxu1 %v6415_v55  ;;  %v3013_v55 = vadd.f32 %v5706_v36, %v12158_v47  ;;  %v6419_v47 = vld [vmem:[#allocation2 + $0xe0] sm:$0xff] }
 0x3bf   : > { %12156 = vst [vmem:[#allocation47_spill] sm:$0xff] %v8848_v34  ;;  %5732 = vmatmul.msk.f32.gmra.mxu0 %vm2912_vm13, %v12101_v42  ;;  %v8862_v27 = vpop.permute.xlu1 %3307 }
 0x3c0   : > { %5748 = vmatmul.msk.f32.gmra.mxu1 %vm2913_vm14, %v12101_v42  ;;  %6332 = vset.pattern.permute.xlu2 %v12152_v25  ;;  %vm3351_vm3 = vcmp.eq.s32.totalorder %v7974_v38, %v8862_v27  ;;  %vm3352_vm13 = vcmp.eq.s32.totalorder %v7983_v39, %v8862_v27  ;;  %vm2920_vm14 = vcmp.eq.s32.totalorder %v7974_v38, %v8639_v18 }
 0x3c1   : > { %5679 = vmatmul.msk.f32.gmra.mxu2 %vm2499_vm2, %v12101_v42  ;;  %2306 = vperm.xlu2 %6332, %v8856_v17   ;;  %v5769_v21 = vsel %vm3351_vm3, 1.0, %v12104_v63  ;;  %v5770_v58 = vsel %vm3352_vm13, 1.0, %v12104_v63 }
 0x3c2   : > { %5695 = vmatmul.msk.f32.gmra.mxu3 %vm11800_vm1, %v12101_v42  ;;  %4627 = vperm.xlu0 %6342, %v8688_v45   ;;  %v8899_v29 = vadd.f32 %v5769_v21, %v8614_v23  ;;  %v8901_v44 = vadd.f32 %v5770_v58, %v3013_v55  ;;  %v5709_v45 = vsel %vm2920_vm14, 1.0, %v12104_v63  ;;  %v6420_v55 = vld [vmem:[#allocation2 + $0xd8] sm:$0xff]  ;;  %v8926_v58 = vpop.permute.xlu2 %3325 }
 0x3c3   : > { %v8903_v20 = vpop.f32.mrf.mxu0  ;;  %4780 = vmatpush.msrb.mxu0 %v6416_v10  ;;  %4845 = vmatpush.msrb.mxu1 %v6417_v19  ;;  %v3016_v21 = vadd.f32 %v5709_v45, %v8181_v12  ;;  %12162 = vst [vmem:[#allocation51_spill] sm:$0xff] %v8926_v58  ;;  %v6421_v10 = vld [vmem:[#allocation2 + $0x58] sm:$0xff]  ;;  %v8938_v12 = vpop.permute.xlu0 %3319  ;;  %v8945_v19 = vld [vmem:[%s6601_s26 + $0x60] sm:$0xff] }
 0x3c4   : > { %12159 = vst [vmem:[#allocation16_spill] sm:$0xff] %v8899_v29  ;;  %v8905_v36 = vpop.f32.mrf.mxu1 }
 0x3c5   : > { %12160 = vst [vmem:[#allocation49_spill] sm:$0xff] %v8901_v44  ;;  %4781 = vmatpush.msrb.mxu0 %v6418_v33  ;;  %4846 = vmatpush.msrb.mxu1 %v6419_v47 }
 0x3c6   : > { %12163 = vst [vmem:[#allocation52_spill] sm:$0xff] %v8938_v12 }
 0x3c7   : > { %5733 = vmatmul.msk.f32.gmra.mxu0 %vm2914_vm7, %v12101_v42  ;;  %v8915_v23 = vpop.permute.xlu1 %3313  ;;  %4847 = vmatpush.msrb.mxu1 %v6420_v55  ;;  %vm11808_vm7 = vcmp.eq.s32.totalorder %v7983_v39, %v8496_v15  ;;  %v6426_v15 = vld [vmem:[#allocation2 + $0xc8] sm:$0xff] }
 0x3c8   : > { %12161 = vst [vmem:[#allocation50_spill] sm:$0xff] %v8915_v23  ;;  %5749 = vmatmul.msk.f32.gmra.mxu1 %vm2915_vm9, %v12101_v42  ;;  %vm3355_vm1 = vcmp.eq.s32.totalorder %v7974_v38, %v8915_v23  ;;  %4782 = vmatpush.msrb.mxu0 %v6421_v10  ;;  %v6424_v10 = vld [vmem:[#allocation2 + $0xd0] sm:$0xff]  ;;  %vm11807_vm9 = vcmp.eq.s32.totalorder %v7974_v38, %v8361_v2 }
 0x3c9   : > { %5680 = vmatmul.msk.f32.gmra.mxu2 %vm11817_vm15, %v12101_v42  ;;  %v5773_v13 = vsel %vm3355_vm1, 1.0, %v12104_v63  ;;  %4848 = vmatpush.msrb.mxu1 %v6424_v10  ;;  %v12166_v10 = vmov 5   ;;  %vm11846_vm15 = vcmp.eq.s32.totalorder %v7974_v38, %v8570_v26 }
 0x3ca   : > { %5696 = vmatmul.msk.f32.gmra.mxu3 %vm11808_vm7, %v12101_v42  ;;  %4639 = vperm.xlu0 %6342, %v8945_v19   ;;  %v2620_v45 = vpop.f32.mrf.mxu2  ;;  %v8948_v33 = vadd.f32 %v5773_v13, %v3016_v21  ;;  %v6427_v21 = vld [vmem:[#allocation2 + $0xc0] sm:$0xff]  ;;  %vm11811_vm7 = vcmp.eq.s32.totalorder %v7983_v39, %v8527_v28 }
 0x3cb   : > { %v2685_v47 = vpop.f32.mrf.mxu3  ;;  %v8950_v55 = vpop.f32.mrf.mxu0  ;;  %4783 = vmatpush.msrb.mxu0 %v6423_v61  ;;  %4849 = vmatpush.msrb.mxu1 %v6426_v15  ;;  %v6428_v61 = vld [vmem:[#allocation2 + $0x40] sm:$0xff]  ;;  %v6430_v15 = vld [vmem:[#allocation2 + $0x38] sm:$0xff] }
 0x3cc   : > { %12164 = vst [vmem:[#allocation53_spill] sm:$0xff] %v8948_v33  ;;  %v2686_v60 = vadd.f32 %v2685_v47, %v2620_v45  ;;  %v2259_v0 = vpop.f32.mrf.mxu1  ;;  %v8980_v40 = vpop.permute.xlu0 %3328  ;;  %v6431_v45 = vld [vmem:[#allocation2 + $0xb0] sm:$0xff] }
 0x3cd   : > { %4784 = vmatpush.msrb.mxu0 %v6425_v48  ;;  %4850 = vmatpush.msrb.mxu1 %v6427_v21  ;;  %v8976_v48 = vpop.permute.xlu2 %3334  ;;  %12165 = vst [vmem:[#allocation54_spill] sm:$0xff] %v8980_v40  ;;  %v6432_v47 = vld [vmem:[#allocation2 + $0x30] sm:$0xff]  ;;  %v6434_v21 = vld [vmem:[%s6601_s26 + $0x48] sm:$0xff] }
 0x3ce   : > { %v8953_v14 = vadd.f32 %v2686_v60, %v8796_v57  ;;  %2736 = vperm.xlu1 %6330, %v2686_v60   ;;  %v6429_v60 = vld [vmem:[#allocation2 + $0xb8] sm:$0xff] }
 0x3cf   : > { %5734 = vmatmul.msk.f32.gmra.mxu0 %vm2916_vm8, %v12101_v42  ;;  %vm11806_vm8 = vcmp.eq.s32.totalorder %v7983_v39, %v8361_v2  ;;  %4851 = vmatpush.msrb.mxu1 %v6429_v60  ;;  %v9002_v60 = vadd.f32 %v8905_v36, %v8903_v20  ;;  %v6437_v36 = vld [vmem:[#allocation2 + $0x20] sm:$0xff] }
 0x3d0   : > { %5750 = vmatmul.msk.f32.gmra.mxu1 %vm2917_vm4, %v12101_v42  ;;  %4785 = vmatpush.msrb.mxu0 %v6428_v61  ;;  %vm11900_vm4 = vcmp.eq.s32.totalorder %v7974_v38, %v8523_v24  ;;  %v6435_v61 = vld [vmem:[#allocation2 + $0x28] sm:$0xff] }
 0x3d1   : > { %5681 = vmatmul.msk.f32.gmra.mxu2 %vm11807_vm9, %v12101_v42  ;;  %4852 = vmatpush.msrb.mxu1 %v6431_v45  ;;  %vm11812_vm9 = vcmp.eq.s32.totalorder %v7974_v38, %v8527_v28  ;;  %v6440_v28 = vld [vmem:[#allocation2 + $0x90] sm:$0xff] }
 0x3d2   : > { %5697 = vmatmul.msk.f32.gmra.mxu3 %vm11806_vm8, %v12101_v42  ;;  %4645 = vperm.xlu0 %6342, %v8666_v41   ;;  %v6433_v41 = vld [vmem:[#allocation2 + $0xa8] sm:$0xff]  ;;  %vm11899_vm8 = vcmp.eq.s32.totalorder %v7983_v39, %v8523_v24 }
 0x3d3   : > { %v8978_v57 = vpop.f32.mrf.mxu0  ;;  %4786 = vmatpush.msrb.mxu0 %v6430_v15  ;;  %4853 = vmatpush.msrb.mxu1 %v6433_v41  ;;  %v6436_v15 = vld [vmem:[#allocation2 + $0xa0] sm:$0xff] }
 0x3d4   : > { %v8982_v13 = vpop.f32.mrf.mxu1 }
 0x3d5   : > { %4787 = vmatpush.msrb.mxu0 %v6432_v47  ;;  %4854 = vmatpush.msrb.mxu1 %v6436_v15  ;;  %v6438_v47 = vld [vmem:[#allocation2 + $0x98] sm:$0xff]  ;;  %v9016_v41 = vpop.permute.xlu2 %3343  ;;  %v9021_v15 = vpop.permute.xlu0 %3337  ;;  %v2263_v4 = vadd.f32 %v8982_v13, %v8978_v57 }
 0x3d6   : > { %6331 = vset.pattern.permute.xlu1 %v12166_v10  ;;  %12167 = vst [vmem:[#allocation55_spill] sm:$0xff] %v9016_v41 }
 0x3d7   : > { %4195 = vperm.xlu1 %6331, %v6434_v21   ;;  %5735 = vmatmul.msk.f32.gmra.mxu0 %vm11900_vm4, %v12101_v42  ;;  %v6439_v21 = vld [vmem:[#allocation2 + $0x18] sm:$0xff]  ;;  %12168 = vst [vmem:[#allocation56_spill] sm:$0xff] %v9021_v15  ;;  %vm11905_vm4 = vcmp.eq.s32.totalorder %v7974_v38, %v9021_v15 }
 0x3d8   : > { %5751 = vmatmul.msk.f32.gmra.mxu1 %vm11899_vm8, %v12101_v42  ;;  %4788 = vmatpush.msrb.mxu0 %v6435_v61  ;;  %v9019_v61 = vadd.f32 %v2259_v0, %v8950_v55  ;;  %v6442_v55 = vld [vmem:[#allocation2 + $0x88] sm:$0xff] }
 0x3d9   : > { %5682 = vmatmul.msk.f32.gmra.mxu2 %vm11812_vm9, %v12101_v42  ;;  %4855 = vmatpush.msrb.mxu1 %v6438_v47  ;;  %v6444_v47 = vld [vmem:[#allocation2 + $0x80] sm:$0xff]  ;;  %vm11943_vm9 = vcmp.eq.s32.totalorder %v7983_v39, %v8738_v3 }
 0x3da   : > { %5698 = vmatmul.msk.f32.gmra.mxu3 %vm11811_vm7, %v12101_v42  ;;  %6363 = vset.pattern.permute.xlu0 %v12152_v25  ;;  %vm11892_vm7 = vcmp.eq.s32.totalorder %v7983_v39, %v8639_v18 }
 0x3db   : > { %2311 = vperm.xlu0 %6363, %v9002_v60   ;;  %v2200_v20 = vpop.f32.mrf.mxu0  ;;  %4789 = vmatpush.msrb.mxu0 %v6437_v36 }
 0x3dc   : > { %v2265_v45 = vpop.f32.mrf.mxu1  ;;  %4856 = vmatpush.msrb.mxu1 %v6440_v28  ;;  %v6441_v28 = vld [vmem:[#allocation2 + $0x10] sm:$0xff] }
 0x3dd   : > { %4790 = vmatpush.msrb.mxu0 %v6439_v21  ;;  %v9035_v0 = vadd.f32 %v2265_v45, %v2200_v20  ;;  %v6443_v45 = vld [vmem:[#allocation2 + $0x8] sm:$0xff]  ;;  %v9050_v21 = vpop.permute.xlu1 %3322  ;;  %v9054_v22 = vpop.permute.xlu2 %3733 }
 0x3de   : > { %4857 = vmatpush.msrb.mxu1 %v6442_v55  ;;  %12169 = vst [vmem:[#allocation57_spill] sm:$0xff] %v9050_v21  ;;  %v9062_v55 = vpop.permute.xlu0 %3736 }
 0x3df   : > { %6334 = vset.pattern.permute.xlu1 %v12152_v25  ;;  %5736 = vmatmul.msk.f32.gmra.mxu0 %vm2920_vm14, %v12101_v42  ;;  %12170 = vst [vmem:[#allocation58_spill] sm:$0xff] %v9054_v22  ;;  %vm11968_vm14 = vcmp.eq.s32.totalorder %v7974_v38, %v8738_v3 }
 0x3e0   : > { %5752 = vmatmul.msk.f32.gmra.mxu1 %vm11892_vm7, %v12101_v42  ;;  %2316 = vperm.xlu1 %6334, %v9019_v61   ;;  %12171 = vst [vmem:[#allocation59_spill] sm:$0xff] %v9062_v55  ;;  %vm3369_vm7 = vcmp.eq.s32.totalorder %v7974_v38, %v8976_v48 }
 0x3e1   : > { %5795 = vmatmul.msk.f32.vlgmr.msrb.gmra.mxu2 %vm3345_vm11, %v12101_v42  ;;  %4791 = vmatpush.msrb.mxu0 %v6441_v28  ;;  %vm11855_vm11 = vcmp.eq.s32.totalorder %v7974_v38, %v8630_v56  ;;  %v6445_v28 = vld [vmem:[#allocation2] sm:$0xff] }
 0x3e2   : > { %5811 = vmatmul.msk.f32.vlgmr.msrb.gmra.mxu3 %vm3346_vm6, %v12101_v42  ;;  %4858 = vmatpush.msrb.mxu1 %v6444_v47  ;;  %vm11819_vm6 = vcmp.eq.s32.totalorder %v7983_v39, %v8630_v56 }
 0x3e3   : > { %2326 = vperm.xlu0 %6363, %v9035_v0   ;;  %v9046_v36 = vpop.f32.mrf.mxu0  ;;  %4792 = vmatpush.msrb.mxu0 %v6443_v45 }
 0x3e4   : > { %v9048_v20 = vpop.f32.mrf.mxu1 }
 0x3e5   : > { %4793 = vmatpush.msrb.mxu0 %v6445_v28  ;;  %v9089_v18 = vpop.permute.xlu1 %3331 }
 0x3e6   : > { %12172 = vst [vmem:[#allocation60_spill] sm:$0xff] %v9089_v18 }
 0x3e7   : > { %5737 = vmatmul.msk.f32.gmra.mxu0 %vm11855_vm11, %v12101_v42  ;;  %vm11865_vm11 = vcmp.eq.s32.totalorder %v7974_v38, %v9050_v21 }
 0x3e8   : > { %5753 = vmatmul.msk.f32.gmra.mxu1 %vm11819_vm6, %v12101_v42  ;;  %vm11832_vm6 = vcmp.eq.s32.totalorder %v7983_v39, %v8570_v26 }
 0x3e9   : > { %5796 = vmatmul.msk.f32.gmra.mxu2 %vm11968_vm14, %v12101_v42 }
 0x3ea   : > { %5812 = vmatmul.msk.f32.gmra.mxu3 %vm11943_vm9, %v12101_v42 }
 0x3eb   : > { %v2623_v45 = vpop.f32.mrf.mxu2  ;;  %v2688_v47 = vpop.f32.mrf.mxu3 }
 0x3ec   : > { %v2689_v28 = vadd.f32 %v2688_v47, %v2623_v45  ;;  %v9080_v2 = vpop.f32.mrf.mxu0  ;;  %v9082_v56 = vpop.f32.mrf.mxu1 }
 0x3ed   : > { %v9107_v45 = vpop.permute.xlu0 %3751  ;;  %v9136_v9 = vpop.permute.xlu1 %3340 }
 0x3ee   : > { %v9085_v33 = vadd.f32 %v2689_v28, %v8856_v17  ;;  %2741 = vperm.xlu2 %6332, %v2689_v28   ;;  %v9101_v17 = vpop.permute.xlu2 %3742  ;;  %12173 = vst [vmem:[#allocation61_spill] sm:$0xff] %v9107_v45 }
 0x3ef   : > { %5738 = vmatmul.msk.f32.gmra.mxu0 %vm11846_vm15, %v12101_v42  ;;  %12174 = vst [vmem:[#allocation62_spill] sm:$0xff] %v9136_v9  ;;  %vm2935_vm15 = vcmp.eq.s32.totalorder %v7983_v39, %v8705_v11 }
 0x3f0   : > { %5754 = vmatmul.msk.f32.gmra.mxu1 %vm11832_vm6, %v12101_v42  ;;  %vm11866_vm6 = vcmp.eq.s32.totalorder %v7983_v39, %v8915_v23 }
 0x3f1   : > { %5797 = vmatmul.msk.f32.gmra.mxu2 %vm3349_vm5, %v12101_v42  ;;  %vm11825_vm5 = vcmp.eq.s32.totalorder %v7974_v38, %v8671_v1 }
 0x3f2   : > { %5813 = vmatmul.msk.f32.gmra.mxu3 %vm3350_vm0, %v12101_v42  ;;  %vm11824_vm0 = vcmp.eq.s32.totalorder %v7983_v39, %v8671_v1 }
 0x3f3   : > { %v2626_v47 = vpop.f32.mrf.mxu2  ;;  %v2691_v28 = vpop.f32.mrf.mxu3 }
 0x3f4   : > { %v9113_v44 = vadd.f32 %v2691_v28, %v2626_v47  ;;  %v2209_v26 = vpop.f32.mrf.mxu0 }
 0x3f5   : > { %v2274_v29 = vpop.f32.mrf.mxu1  ;;  %v9150_v47 = vpop.permute.xlu0 %3760 }
 0x3f6   : > { %v9117_v34 = vadd.f32 %v9113_v44, %v9002_v60  ;;  %v9119_v59 = vadd.f32 %v2274_v29, %v2209_v26  ;;  %6333 = vset.pattern.permute.xlu2 %v12166_v10  ;;  %12176 = vst [vmem:[#allocation64_spill] sm:$0xff] %v9150_v47  ;;  %v9184_v57 = vpop.permute.xlu1 %3739 }
 0x3f7   : > { %4198 = vperm.xlu2 %6333, %v6446_v8   ;;  %5739 = vmatmul.msk.f32.gmra.mxu0 %vm11825_vm5, %v12101_v42  ;;  %v9146_v8 = vpop.permute.xlu2 %3748  ;;  %vm11893_vm5 = vcmp.eq.s32.totalorder %v7983_v39, %v8779_v52  ;;  %12177 = vst [vmem:[#allocation65_spill] sm:$0xff] %v9184_v57  ;;  %vm11906_vm8 = vcmp.eq.s32.totalorder %v7983_v39, %v9184_v57 }
 0x3f8   : > { %2341 = vperm.xlu0 %6363, %v9119_v59   ;;  %5755 = vmatmul.msk.f32.gmra.mxu1 %vm11824_vm0, %v12101_v42  ;;  %12175 = vst [vmem:[#allocation63_spill] sm:$0xff] %v9146_v8  ;;  %vm11831_vm0 = vcmp.eq.s32.totalorder %v7974_v38, %v8662_v5 }
 0x3f9   : > { %5798 = vmatmul.msk.f32.gmra.mxu2 %vm3351_vm3, %v12101_v42  ;;  %vm11830_vm3 = vcmp.eq.s32.totalorder %v7983_v39, %v8662_v5 }
 0x3fa   : > { %5814 = vmatmul.msk.f32.gmra.mxu3 %vm3352_vm13, %v12101_v42  ;;  %vm11897_vm13 = vcmp.eq.s32.totalorder %v7974_v38, %v8779_v52 }
 0x3fb   : > { %v2629_v26 = vpop.f32.mrf.mxu2 }
 0x3fc   : > { %v2694_v29 = vpop.f32.mrf.mxu3  ;;  %v9148_v60 = vpop.f32.mrf.mxu0 }
 0x3fd   : > { %v2695_v28 = vadd.f32 %v2694_v29, %v2629_v26  ;;  %v9152_v1 = vpop.f32.mrf.mxu1  ;;  %v9192_v24 = vpop.permute.xlu0 %3769 }
 0x3fe   : > { %12179 = vst [vmem:[#allocation67_spill] sm:$0xff] %v9192_v24  ;;  %v9218_v52 = vpop.permute.xlu1 %3745 }
 0x3ff   : > { %v9159_v27 = vadd.f32 %v2695_v28, %v9019_v61  ;;  %2751 = vperm.xlu1 %6334, %v2695_v28   ;;  %6335 = vset.pattern.permute.xlu2 %v12152_v25  ;;  %v9188_v29 = vpop.permute.xlu2 %3757  ;;  %12180 = vst [vmem:[#allocation68_spill] sm:$0xff] %v9218_v52 }
 0x400   : > { %5740 = vmatmul.msk.f32.gmra.mxu0 %vm11831_vm0, %v12101_v42  ;;  %5756 = vmatmul.msk.f32.gmra.mxu1 %vm11830_vm3, %v12101_v42  ;;  %12178 = vst [vmem:[#allocation66_spill] sm:$0xff] %v9188_v29  ;;  %vm11840_vm3 = vcmp.eq.s32.totalorder %v7974_v38, %v8641_v62  ;;  %vm11839_vm0 = vcmp.eq.s32.totalorder %v7983_v39, %v8641_v62 }
 0x401   : > { %2321 = vperm.xlu2 %6335, %v2263_v4   ;;  %5799 = vmatmul.msk.f32.gmra.mxu2 %vm11897_vm13, %v12101_v42  ;;  %vm11901_vm13 = vcmp.eq.s32.totalorder %v7974_v38, %v9184_v57 }
 0x402   : > { %5815 = vmatmul.msk.f32.gmra.mxu3 %vm11893_vm5, %v12101_v42  ;;  %vm3370_vm5 = vcmp.eq.s32.totalorder %v7983_v39, %v8976_v48 }
 0x403   : > { %v2632_v13 = vpop.f32.mrf.mxu2 }
 0x404   : > { %v2697_v61 = vpop.f32.mrf.mxu3  ;;  %v9186_v26 = vpop.f32.mrf.mxu0 }
 0x405   : > { %v2698_v28 = vadd.f32 %v2697_v61, %v2632_v13  ;;  %v9190_v5 = vpop.f32.mrf.mxu1 }
 0x406   : > { %v9260_v23 = vpop.permute.xlu1 %3754 }
 0x407   : > { %v9194_v16 = vadd.f32 %v2698_v28, %v2263_v4  ;;  %v9222_v3 = vpop.permute.xlu2 %3766  ;;  %12183 = vst [vmem:[#allocation71_spill] sm:$0xff] %v9260_v23 }
 0x408   : > { %5741 = vmatmul.msk.f32.gmra.mxu0 %vm11840_vm3, %v12101_v42  ;;  %5757 = vmatmul.msk.f32.gmra.mxu1 %vm11839_vm0, %v12101_v42  ;;  %12181 = vst [vmem:[#allocation69_spill] sm:$0xff] %v9222_v3  ;;  %vm11845_vm0 = vcmp.eq.s32.totalorder %v7983_v39, %v8710_v30  ;;  %vm11848_vm3 = vcmp.eq.s32.totalorder %v7974_v38, %v8854_v35 }
 0x409   : > { %2756 = vperm.xlu2 %6335, %v2698_v28   ;;  %5800 = vmatmul.msk.f32.gmra.mxu2 %vm3355_vm1, %v12101_v42  ;;  %vm11841_vm1 = vcmp.eq.s32.totalorder %v7974_v38, %v8710_v30 }
 0x40a   : > { %5816 = vmatmul.msk.f32.gmra.mxu3 %vm11866_vm6, %v12101_v42  ;;  %vm11875_vm6 = vcmp.eq.s32.totalorder %v7983_v39, %v8926_v58 }
 0x40b   : > { %v2635_v4 = vpop.f32.mrf.mxu2 }
 0x40c   : > { %v2700_v13 = vpop.f32.mrf.mxu3  ;;  %v2218_v61 = vpop.f32.mrf.mxu0 }
 0x40d   : > { %v2701_v62 = vadd.f32 %v2700_v13, %v2635_v4  ;;  %v2283_v28 = vpop.f32.mrf.mxu1  ;;  %v9238_v4 = vpop.permute.xlu0 %3778  ;;  %v2269_v13 = vadd.f32 %v9048_v20, %v9046_v36 }
 0x40e   : > { %v9220_v46 = vadd.f32 %v2283_v28, %v2218_v61  ;;  %12182 = vst [vmem:[#allocation70_spill] sm:$0xff] %v9238_v4 }
 0x40f   : > { %v9225_v49 = vadd.f32 %v2701_v62, %v9035_v0  ;;  %2761 = vperm.xlu1 %6334, %v2701_v62   ;;  %v9274_v36 = vpop.permute.xlu2 %3775 }
 0x410   : > { %2356 = vperm.xlu0 %6363, %v9220_v46   ;;  %5742 = vmatmul.msk.f32.gmra.mxu0 %vm11841_vm1, %v12101_v42  ;;  %vm11847_vm1 = vcmp.eq.s32.totalorder %v7983_v39, %v8854_v35  ;;  %12184 = vst [vmem:[#allocation72_spill] sm:$0xff] %v9274_v36 }
 0x411   : > { %5758 = vmatmul.msk.f32.gmra.mxu1 %vm11845_vm0, %v12101_v42  ;;  %5801 = vmatmul.msk.f32.gmra.mxu2 %vm11848_vm3, %v12101_v42  ;;  %vm2934_vm0 = vcmp.eq.s32.totalorder %v7974_v38, %v8705_v11  ;;  %vm11853_vm3 = vcmp.eq.s32.totalorder %v7983_v39, %v8938_v12 }
 0x412   : > { %5817 = vmatmul.msk.f32.gmra.mxu3 %vm11847_vm1, %v12101_v42  ;;  %vm11854_vm1 = vcmp.eq.s32.totalorder %v7974_v38, %v8938_v12 }
 0x414   : > { %v2638_v62 = vpop.f32.mrf.mxu2  ;;  %v2703_v0 = vpop.f32.mrf.mxu3 }
 0x415   : > { %v2704_v61 = vadd.f32 %v2703_v0, %v2638_v62  ;;  %v9256_v28 = vpop.f32.mrf.mxu0  ;;  %v9258_v30 = vpop.f32.mrf.mxu1 }
 0x416   : > { %v9290_v20 = vpop.permute.xlu0 %4168 }
 0x417   : > { %v9262_v6 = vadd.f32 %v2704_v61, %v2269_v13  ;;  %2331 = vperm.xlu1 %6334, %v2269_v13   ;;  %2766 = vperm.xlu2 %6335, %v2704_v61   ;;  %v2272_v13 = vadd.f32 %v9082_v56, %v9080_v2  ;;  %v9315_v2 = vpop.permute.xlu1 %3763  ;;  %v9331_v56 = vpop.permute.xlu2 %4174 }
 0x418   : > { %5743 = vmatmul.msk.f32.gmra.mxu0 %vm2934_vm0, %v12101_v42  ;;  %12185 = vst [vmem:[#allocation73_spill] sm:$0xff] %v9315_v2 }
 0x419   : > { %5759 = vmatmul.msk.f32.gmra.mxu1 %vm2935_vm15, %v12101_v42  ;;  %5802 = vmatmul.msk.f32.gmra.mxu2 %vm11854_vm1, %v12101_v42  ;;  %vm11863_vm1 = vcmp.eq.s32.totalorder %v7983_v39, %v8695_v54 }
 0x41a   : > { %5818 = vmatmul.msk.f32.gmra.mxu3 %vm11853_vm3, %v12101_v42  ;;  %vm11856_vm3 = vcmp.eq.s32.totalorder %v7974_v38, %v8695_v54 }
 0x41c   : > { %v2641_v62 = vpop.f32.mrf.mxu2  ;;  %v2706_v0 = vpop.f32.mrf.mxu3 }
 0x41d   : > { %v9294_v61 = vadd.f32 %v2706_v0, %v2641_v62  ;;  %v9296_v35 = vpop.f32.mrf.mxu0  ;;  %v9298_v4 = vpop.f32.mrf.mxu1 }
 0x41e   : > { %v9335_v3 = vpop.permute.xlu0 %4183 }
 0x41f   : > { %v9301_v36 = vadd.f32 %v9294_v61, %v2272_v13  ;;  %6336 = vset.pattern.permute.xlu1 %v12166_v10  ;;  %2336 = vperm.xlu2 %6335, %v2272_v13   ;;  %12186 = vst [vmem:[#allocation74_spill] sm:$0xff] %v9335_v3 }
 0x420   : > { %4204 = vperm.xlu1 %6336, %v8945_v19   ;;  %5744 = vmatmul.msk.f32.gmra.mxu0 %vm11856_vm3, %v12101_v42  ;;  %vm11864_vm3 = vcmp.eq.s32.totalorder %v7983_v39, %v9050_v21 }
 0x421   : > { %5760 = vmatmul.msk.f32.gmra.mxu1 %vm11863_vm1, %v12101_v42  ;;  %5803 = vmatmul.msk.f32.gmra.mxu2 %vm11865_vm11, %v12101_v42  ;;  %vm11874_vm1 = vcmp.eq.s32.totalorder %v7974_v38, %v8744_v50  ;;  %vm11885_vm11 = vcmp.eq.s32.totalorder %v7974_v38, %v8926_v58 }
 0x422   : > { %5819 = vmatmul.msk.f32.gmra.mxu3 %vm11864_vm3, %v12101_v42  ;;  %vm11871_vm3 = vcmp.eq.s32.totalorder %v7983_v39, %v8744_v50  ;;  %v9376_v50 = vpop.permute.xlu2 %4180 }
 0x423   : > { %12188 = vst [vmem:[#allocation76_spill] sm:$0xff] %v9376_v50 }
 0x424   : > { %v2644_v19 = vpop.f32.mrf.mxu2  ;;  %v2709_v62 = vpop.f32.mrf.mxu3 }
 0x425   : > { %v2710_v0 = vadd.f32 %v2709_v62, %v2644_v19  ;;  %v2227_v13 = vpop.f32.mrf.mxu0  ;;  %v2292_v54 = vpop.f32.mrf.mxu1  ;;  %v2278_v19 = vadd.f32 %v9152_v1, %v9148_v60 }
 0x426   : > { %v9333_v12 = vadd.f32 %v2292_v54, %v2227_v13  ;;  %v9383_v58 = vpop.permute.xlu0 %4192 }
 0x427   : > { %v9338_v24 = vadd.f32 %v2710_v0, %v9119_v59  ;;  %6337 = vset.pattern.permute.xlu2 %v12166_v10  ;;  %12189 = vst [vmem:[#allocation77_spill] sm:$0xff] %v9383_v58 }
 0x428   : > { %2371 = vperm.xlu0 %6363, %v9333_v12   ;;  %6338 = vset.pattern.permute.xlu1 %v12152_v25 }
 0x429   : > { %4207 = vperm.xlu2 %6337, %v8633_v51   ;;  %5745 = vmatmul.msk.f32.gmra.mxu0 %vm11874_vm1, %v12101_v42  ;;  %v9360_v51 = vpop.permute.xlu1 %3772  ;;  %vm11879_vm1 = vcmp.eq.s32.totalorder %v7983_v39, %v8740_v31 }
 0x42a   : > { %5761 = vmatmul.msk.f32.gmra.mxu1 %vm11871_vm3, %v12101_v42  ;;  %2776 = vperm.xlu1 %6338, %v2710_v0   ;;  %12187 = vst [vmem:[#allocation75_spill] sm:$0xff] %v9360_v51  ;;  %vm11876_vm3 = vcmp.eq.s32.totalorder %v7974_v38, %v8740_v31 }
 0x42b   : > { %5804 = vmatmul.msk.f32.gmra.mxu2 %vm11885_vm11, %v12101_v42  ;;  %5820 = vmatmul.msk.f32.gmra.mxu3 %vm11875_vm6, %v12101_v42  ;;  %vm11884_vm6 = vcmp.eq.s32.totalorder %v7974_v38, %v8980_v40  ;;  %vm11891_vm11 = vcmp.eq.s32.totalorder %v7983_v39, %v9089_v18 }
 0x42c   : > { %v2647_v54 = vpop.f32.mrf.mxu2 }
 0x42d   : > { %v2712_v59 = vpop.f32.mrf.mxu3  ;;  %v9372_v0 = vpop.f32.mrf.mxu0 }
 0x42e   : > { %v2713_v62 = vadd.f32 %v2712_v59, %v2647_v54  ;;  %v9374_v13 = vpop.f32.mrf.mxu1  ;;  %v2281_v54 = vadd.f32 %v9190_v5, %v9186_v26  ;;  %v9438_v26 = vpop.permute.xlu0 %4201 }
 0x42f   : > { %12190 = vst [vmem:[#allocation78_spill] sm:$0xff] %v9438_v26 }
 0x430   : > { %v9378_v21 = vadd.f32 %v2713_v62, %v2278_v19  ;;  %2746 = vperm.xlu0 %6363, %v9113_v44  }
 0x431   : > { %6340 = vset.pattern.permute.xlu2 %v12152_v25  ;;  %5746 = vmatmul.msk.f32.gmra.mxu0 %vm11876_vm3, %v12101_v42  ;;  %vm11881_vm3 = vcmp.eq.s32.totalorder %v7983_v39, %v8980_v40  ;;  %v9408_v44 = vpop.permute.xlu1 %4171  ;;  %v9421_v40 = vpop.permute.xlu2 %4189 }
 0x432   : > { %5762 = vmatmul.msk.f32.gmra.mxu1 %vm11879_vm1, %v12101_v42  ;;  %2346 = vperm.xlu1 %6338, %v2278_v19   ;;  %vm3780_vm1 = vcmp.eq.s32.totalorder %v7974_v38, %v9054_v22 }
 0x433   : > { %2781 = vperm.xlu2 %6340, %v2713_v62   ;;  %5805 = vmatmul.msk.f32.gmra.mxu2 %vm11884_vm6, %v12101_v42  ;;  %vm11888_vm6 = vcmp.eq.s32.totalorder %v7974_v38, %v9089_v18 }
 0x434   : > { %5821 = vmatmul.msk.f32.gmra.mxu3 %vm11881_vm3, %v12101_v42  ;;  %v2650_v1 = vpop.f32.mrf.mxu2  ;;  %vm3781_vm3 = vcmp.eq.s32.totalorder %v7983_v39, %v9054_v22 }
 0x435   : > { %v2715_v60 = vpop.f32.mrf.mxu3  ;;  %v3055_v19 = vpop.f32.mrf.mxu0 }
 0x436   : > { %v2716_v59 = vadd.f32 %v2715_v60, %v2650_v1  ;;  %v3120_v62 = vpop.f32.mrf.mxu1 }
 0x437   : > { %v9412_v31 = vadd.f32 %v3120_v62, %v3055_v19 }
 0x438   : > { %v9416_v58 = vadd.f32 %v2716_v59, %v2281_v54  ;;  %2771 = vperm.xlu0 %6363, %v9294_v61  }
 0x439   : > { %v9425_v5 = vadd.f32 %v9412_v31, %v8953_v14  ;;  %5859 = vmatmul.msk.f32.vlgmr.msra.gmra.mxu0 %vm3780_vm1, %v12101_v42  ;;  %v6447_v14 = vld [vmem:[%s6601_s26 + $0x78] sm:$0xff]  ;;  %v9453_v62 = vpop.permute.xlu1 %4177 }
 0x43a   : > { %5875 = vmatmul.msk.f32.vlgmr.msra.gmra.mxu1 %vm3781_vm3, %v12101_v42  ;;  %6339 = vset.pattern.permute.xlu1 %v12166_v10  ;;  %12191 = vst [vmem:[#allocation79_spill] sm:$0xff] %v9453_v62  ;;  %vm11948_vm9 = vcmp.eq.s32.totalorder %v7983_v39, %v9453_v62 }
 0x43b   : > { %2351 = vperm.xlu2 %6340, %v2281_v54   ;;  %5806 = vmatmul.msk.f32.gmra.mxu2 %vm11888_vm6, %v12101_v42  ;;  %vm11927_vm6 = vcmp.eq.s32.totalorder %v7974_v38, %v9062_v55 }
 0x43c   : > { %5822 = vmatmul.msk.f32.gmra.mxu3 %vm11891_vm11, %v12101_v42  ;;  %4213 = vperm.xlu1 %6339, %v6447_v14   ;;  %v2653_v10 = vpop.f32.mrf.mxu2  ;;  %vm11907_vm11 = vcmp.eq.s32.totalorder %v7983_v39, %v9062_v55  ;;  %v9490_v14 = vpop.permute.xlu0 %4210 }
 0x43d   : > { %v2718_v61 = vpop.f32.mrf.mxu3  ;;  %v3058_v60 = vpop.f32.mrf.mxu0  ;;  %12194 = vst [vmem:[#allocation81_spill] sm:$0xff] %v9490_v14 }
 0x43e   : > { %v2719_v1 = vadd.f32 %v2718_v61, %v2653_v10  ;;  %v3123_v54 = vpop.f32.mrf.mxu1  ;;  %v2287_v61 = vadd.f32 %v9258_v30, %v9256_v28 }
 0x43f   : > { %v9451_v19 = vadd.f32 %v3123_v54, %v3058_v60 }
 0x440   : > { %v9456_v22 = vadd.f32 %v2719_v1, %v9220_v46  ;;  %2786 = vperm.xlu0 %6363, %v2716_v59   ;;  %v9476_v46 = vpop.permute.xlu2 %2306 }
 0x441   : > { %v9462_v18 = vadd.f32 %v9451_v19, %v9085_v33  ;;  %5860 = vmatmul.msk.f32.gmra.mxu0 %vm11927_vm6, %v12101_v42  ;;  %12192 = vst [vmem:[#allocation80_spill] sm:$0xff] %v9476_v46  ;;  %v12193_v33 = vmov 6   ;;  %vm11933_vm6 = vcmp.eq.s32.totalorder %v7974_v38, %v9408_v44 }
 0x442   : > { %5876 = vmatmul.msk.f32.gmra.mxu1 %vm11907_vm11, %v12101_v42  ;;  %vm11908_vm11 = vcmp.eq.s32.totalorder %v7983_v39, %v9136_v9 }
 0x443   : > { %6341 = vset.pattern.permute.xlu2 %v12193_v33  ;;  %5807 = vmatmul.msk.f32.gmra.mxu2 %vm3369_vm7, %v12101_v42 }
 0x444   : > { %5823 = vmatmul.msk.f32.gmra.mxu3 %vm3370_vm5, %v12101_v42  ;;  %6343 = vset.pattern.permute.xlu1 %v12152_v25  ;;  %v2656_v59 = vpop.f32.mrf.mxu2 }
 0x445   : > { %4603 = vperm.xlu2 %6341, %v8602_v37   ;;  %2791 = vperm.xlu1 %6343, %v2719_v1   ;;  %v2721_v10 = vpop.f32.mrf.mxu3  ;;  %v3061_v54 = vpop.f32.mrf.mxu0  ;;  %v2290_v1 = vadd.f32 %v9298_v4, %v9296_v35 }
 0x446   : > { %v2722_v60 = vadd.f32 %v2721_v10, %v2656_v59  ;;  %v3126_v46 = vpop.f32.mrf.mxu1  ;;  %v9511_v37 = vpop.permute.xlu1 %4186 }
 0x447   : > { %v9495_v55 = vadd.f32 %v3126_v46, %v3061_v54  ;;  %12195 = vst [vmem:[#allocation82_spill] sm:$0xff] %v9511_v37  ;;  %v9534_v54 = vpop.permute.xlu0 %4606 }
 0x448   : > { %v9497_v26 = vadd.f32 %v2722_v60, %v2287_v61 }
 0x449   : > { %v9503_v14 = vadd.f32 %v9495_v55, %v9117_v34  ;;  %5861 = vmatmul.msk.f32.gmra.mxu0 %vm11901_vm13, %v12101_v42  ;;  %v9519_v34 = vpop.permute.xlu2 %2741  ;;  %vm11904_vm13 = vcmp.eq.s32.totalorder %v7983_v39, %v9021_v15 }
 0x44a   : > { %5877 = vmatmul.msk.f32.gmra.mxu1 %vm11906_vm8, %v12101_v42  ;;  %12196 = vst [vmem:[#allocation83_spill] sm:$0xff] %v9519_v34  ;;  %vm11911_vm8 = vcmp.eq.s32.totalorder %v7974_v38, %v9136_v9 }
 0x44b   : > { %5808 = vmatmul.msk.f32.gmra.mxu2 %vm11905_vm4, %v12101_v42  ;;  %vm11912_vm4 = vcmp.eq.s32.totalorder %v7983_v39, %v9101_v17 }
 0x44c   : > { %5824 = vmatmul.msk.f32.gmra.mxu3 %vm11904_vm13, %v12101_v42  ;;  %v2659_v30 = vpop.f32.mrf.mxu2  ;;  %vm11913_vm13 = vcmp.eq.s32.totalorder %v7974_v38, %v9101_v17 }
 0x44d   : > { %6344 = vset.pattern.permute.xlu2 %v12152_v25  ;;  %2361 = vperm.xlu1 %6343, %v2287_v61   ;;  %v2724_v28 = vpop.f32.mrf.mxu3  ;;  %v3064_v59 = vpop.f32.mrf.mxu0 }
 0x44e   : > { %2796 = vperm.xlu2 %6344, %v2722_v60   ;;  %v2725_v46 = vadd.f32 %v2724_v28, %v2659_v30  ;;  %v3129_v10 = vpop.f32.mrf.mxu1  ;;  %v9564_v35 = vpop.permute.xlu1 %2301 }
 0x44f   : > { %v9536_v57 = vadd.f32 %v3129_v10, %v3064_v59  ;;  %12197 = vst [vmem:[#allocation84_spill] sm:$0xff] %v9564_v35  ;;  %v9582_v9 = vpop.permute.xlu0 %4627 }
 0x450   : > { %v9538_v34 = vadd.f32 %v2725_v46, %v2290_v1  ;;  %2801 = vperm.xlu0 %6363, %v2725_v46   ;;  %12199 = vst [vmem:[#allocation86_spill] sm:$0xff] %v9582_v9 }
 0x451   : > { %v9544_v61 = vadd.f32 %v9536_v57, %v9159_v27  ;;  %5862 = vmatmul.msk.f32.gmra.mxu0 %vm11913_vm13, %v12101_v42  ;;  %v9570_v4 = vpop.permute.xlu2 %4198  ;;  %vm11918_vm13 = vcmp.eq.s32.totalorder %v7983_v39, %v9016_v41 }
 0x452   : > { %5878 = vmatmul.msk.f32.gmra.mxu1 %vm11912_vm4, %v12101_v42  ;;  %12198 = vst [vmem:[#allocation85_spill] sm:$0xff] %v9570_v4  ;;  %vm11919_vm4 = vcmp.eq.s32.totalorder %v7974_v38, %v9016_v41 }
 0x453   : > { %5809 = vmatmul.msk.f32.gmra.mxu2 %vm11911_vm8, %v12101_v42  ;;  %vm11920_vm8 = vcmp.eq.s32.totalorder %v7983_v39, %v9218_v52 }
 0x454   : > { %5825 = vmatmul.msk.f32.gmra.mxu3 %vm11908_vm11, %v12101_v42  ;;  %v2662_v27 = vpop.f32.mrf.mxu2  ;;  %vm11921_vm11 = vcmp.eq.s32.totalorder %v7974_v38, %v9218_v52 }
 0x455   : > { %6346 = vset.pattern.permute.xlu1 %v12193_v33  ;;  %v2727_v60 = vpop.f32.mrf.mxu3  ;;  %v3067_v28 = vpop.f32.mrf.mxu0 }
 0x456   : > { %2366 = vperm.xlu2 %6344, %v2290_v1   ;;  %4612 = vperm.xlu1 %6346, %v8719_v7   ;;  %v2728_v30 = vadd.f32 %v2727_v60, %v2662_v27  ;;  %v3132_v46 = vpop.f32.mrf.mxu1  ;;  %v9610_v7 = vpop.permute.xlu1 %2736 }
 0x457   : > { %v9574_v59 = vadd.f32 %v3132_v46, %v3067_v28  ;;  %12200 = vst [vmem:[#allocation87_spill] sm:$0xff] %v9610_v7 }
 0x458   : > { %v9577_v10 = vadd.f32 %v2728_v30, %v9333_v12  ;;  %3176 = vperm.xlu0 %6363, %v9451_v19   ;;  %v2296_v19 = vadd.f32 %v9374_v13, %v9372_v0 }
 0x459   : > { %v9586_v1 = vadd.f32 %v9574_v59, %v9194_v16  ;;  %5863 = vmatmul.msk.f32.gmra.mxu0 %vm11921_vm11, %v12101_v42  ;;  %vm4216_vm11 = vcmp.eq.s32.totalorder %v7983_v39, %v9290_v20 }
 0x45a   : > { %5879 = vmatmul.msk.f32.gmra.mxu1 %vm11920_vm8, %v12101_v42  ;;  %vm4215_vm8 = vcmp.eq.s32.totalorder %v7974_v38, %v9290_v20 }
 0x45b   : > { %5810 = vmatmul.msk.f32.gmra.mxu2 %vm11919_vm4, %v12101_v42  ;;  %v9616_v46 = vpop.permute.xlu2 %2321  ;;  %vm11923_vm4 = vcmp.eq.s32.totalorder %v7983_v39, %v9146_v8 }
 0x45c   : > { %5826 = vmatmul.msk.f32.gmra.mxu3 %vm11918_vm13, %v12101_v42  ;;  %v2665_v16 = vpop.f32.mrf.mxu2  ;;  %12201 = vst [vmem:[#allocation88_spill] sm:$0xff] %v9616_v46  ;;  %vm11926_vm13 = vcmp.eq.s32.totalorder %v7974_v38, %v9146_v8 }
 0x45d   : > { %v2730_v12 = vpop.f32.mrf.mxu3  ;;  %v3070_v60 = vpop.f32.mrf.mxu0 }
 0x45e   : > { %6345 = vset.pattern.permute.xlu2 %v12193_v33  ;;  %6347 = vset.pattern.permute.xlu1 %v12152_v25  ;;  %v2731_v27 = vadd.f32 %v2730_v12, %v2665_v16  ;;  %v3135_v28 = vpop.f32.mrf.mxu1 }
 0x45f   : > { %4609 = vperm.xlu2 %6345, %v8727_v32   ;;  %2806 = vperm.xlu1 %6347, %v2728_v30   ;;  %v9619_v41 = vadd.f32 %v3135_v28, %v3070_v60  ;;  %v9643_v32 = vpop.permute.xlu0 %4639  ;;  %v9655_v60 = vpop.permute.xlu1 %4195 }
 0x460   : > { %v9621_v15 = vadd.f32 %v2731_v27, %v2296_v19  ;;  %12202 = vst [vmem:[#allocation89_spill] sm:$0xff] %v9643_v32 }
 0x461   : > { %v9627_v0 = vadd.f32 %v9619_v41, %v9225_v49  ;;  %5864 = vmatmul.msk.f32.gmra.mxu0 %vm11926_vm13, %v12101_v42  ;;  %12203 = vst [vmem:[#allocation90_spill] sm:$0xff] %v9655_v60  ;;  %vm11931_vm13 = vcmp.eq.s32.totalorder %v7983_v39, %v9107_v45 }
 0x462   : > { %5880 = vmatmul.msk.f32.gmra.mxu1 %vm11923_vm4, %v12101_v42  ;;  %vm11928_vm4 = vcmp.eq.s32.totalorder %v7974_v38, %v9107_v45  ;;  %v6448_v45 = vld [vmem:[%s6601_s26 + $0x28] sm:$0xff] }
 0x463   : > { %5923 = vmatmul.msk.f32.vlgmr.msra.gmra.mxu2 %vm4215_vm8, %v12101_v42  ;;  %v9664_v8 = vpop.permute.xlu2 %2756 }
 0x464   : > { %5939 = vmatmul.msk.f32.vlgmr.msra.gmra.mxu3 %vm4216_vm11, %v12101_v42  ;;  %v3490_v49 = vpop.f32.mrf.mxu2  ;;  %12204 = vst [vmem:[#allocation91_spill] sm:$0xff] %v9664_v8 }
 0x465   : > { %v3555_v13 = vpop.f32.mrf.mxu3  ;;  %v3073_v16 = vpop.f32.mrf.mxu0 }
 0x466   : > { %v9653_v30 = vadd.f32 %v3555_v13, %v3490_v49  ;;  %v3138_v12 = vpop.f32.mrf.mxu1 }
 0x467   : > { %6348 = vset.pattern.permute.xlu2 %v12152_v25  ;;  %2376 = vperm.xlu1 %6347, %v2296_v19   ;;  %v3139_v28 = vadd.f32 %v3138_v12, %v3073_v16  ;;  %v9703_v46 = vpop.permute.xlu1 %2316 }
 0x468   : > { %v9660_v9 = vadd.f32 %v9653_v30, %v9425_v5  ;;  %2811 = vperm.xlu2 %6348, %v2731_v27   ;;  %v9691_v5 = vpop.permute.xlu0 %4645  ;;  %12206 = vst [vmem:[#allocation93_spill] sm:$0xff] %v9703_v46 }
 0x469   : > { %v9667_v49 = vadd.f32 %v3139_v28, %v9262_v6  ;;  %3201 = vperm.xlu0 %6363, %v3139_v28   ;;  %5865 = vmatmul.msk.f32.gmra.mxu0 %vm11928_vm4, %v12101_v42  ;;  %vm11932_vm4 = vcmp.eq.s32.totalorder %v7983_v39, %v9408_v44  ;;  %12205 = vst [vmem:[#allocation92_spill] sm:$0xff] %v9691_v5 }
 0x46a   : > { %5881 = vmatmul.msk.f32.gmra.mxu1 %vm11931_vm13, %v12101_v42  ;;  %vm11934_vm13 = vcmp.eq.s32.totalorder %v7974_v38, %v9260_v23 }
 0x46b   : > { %5924 = vmatmul.msk.f32.gmra.mxu2 %vm11933_vm6, %v12101_v42  ;;  %vm11942_vm6 = vcmp.eq.s32.totalorder %v7974_v38, %v9331_v56 }
 0x46c   : > { %5940 = vmatmul.msk.f32.gmra.mxu3 %vm11932_vm4, %v12101_v42  ;;  %v3493_v6 = vpop.f32.mrf.mxu2  ;;  %vm11940_vm4 = vcmp.eq.s32.totalorder %v7983_v39, %v9260_v23 }
 0x46d   : > { %v3558_v19 = vpop.f32.mrf.mxu3  ;;  %v3076_v13 = vpop.f32.mrf.mxu0 }
 0x46e   : > { %v3559_v27 = vadd.f32 %v3558_v19, %v3493_v6  ;;  %v3141_v16 = vpop.f32.mrf.mxu1 }
 0x46f   : > { %6350 = vset.pattern.permute.xlu1 %v12193_v33  ;;  %v9694_v12 = vadd.f32 %v3141_v16, %v3076_v13 }
 0x470   : > { %v9697_v28 = vadd.f32 %v3559_v27, %v9462_v18  ;;  %3171 = vperm.xlu2 %6348, %v9412_v31   ;;  %4618 = vperm.xlu1 %6350, %v6448_v45   ;;  %v9735_v5 = vpop.permute.xlu0 %2311 }
 0x471   : > { %v9707_v6 = vadd.f32 %v9694_v12, %v9301_v36  ;;  %5866 = vmatmul.msk.f32.gmra.mxu0 %vm11934_vm13, %v12101_v42  ;;  %v9715_v18 = vpop.permute.xlu2 %2766  ;;  %vm11941_vm13 = vcmp.eq.s32.totalorder %v7983_v39, %v9331_v56  ;;  %v9742_v8 = vpop.permute.xlu1 %2751 }
 0x472   : > { %5882 = vmatmul.msk.f32.gmra.mxu1 %vm11940_vm4, %v12101_v42  ;;  %12207 = vst [vmem:[#allocation94_spill] sm:$0xff] %v9742_v8  ;;  %vm11947_vm4 = vcmp.eq.s32.totalorder %v7974_v38, %v9188_v29 }
 0x473   : > { %5925 = vmatmul.msk.f32.gmra.mxu2 %vm11942_vm6, %v12101_v42  ;;  %vm11949_vm6 = vcmp.eq.s32.totalorder %v7974_v38, %v9453_v62 }
 0x474   : > { %5941 = vmatmul.msk.f32.gmra.mxu3 %vm11941_vm13, %v12101_v42  ;;  %v3496_v31 = vpop.f32.mrf.mxu2  ;;  %vm11946_vm13 = vcmp.eq.s32.totalorder %v7983_v39, %v9188_v29 }
 0x475   : > { %v3561_v45 = vpop.f32.mrf.mxu3  ;;  %v3079_v19 = vpop.f32.mrf.mxu0 }
 0x476   : > { %v3562_v36 = vadd.f32 %v3561_v45, %v3496_v31  ;;  %v3144_v13 = vpop.f32.mrf.mxu1  ;;  %v6449_v31 = vld [vmem:[%s6601_s26 + $0x20] sm:$0xff] }
 0x477   : > { %v9733_v16 = vadd.f32 %v3144_v13, %v3079_v19 }
 0x478   : > { %v9738_v23 = vadd.f32 %v3562_v36, %v9503_v14  ;;  %6349 = vset.pattern.permute.xlu2 %v12193_v33  ;;  %6351 = vset.pattern.permute.xlu1 %v12152_v25 }
 0x479   : > { %v9746_v52 = vadd.f32 %v9733_v16, %v9338_v24  ;;  %4615 = vperm.xlu2 %6349, %v6449_v31   ;;  %3611 = vperm.xlu1 %6351, %v3559_v27   ;;  %v9753_v14 = vpop.permute.xlu2 %2336 }
 0x47a   : > { %5867 = vmatmul.msk.f32.gmra.mxu0 %vm11947_vm4, %v12101_v42  ;;  %5883 = vmatmul.msk.f32.gmra.mxu1 %vm11946_vm13, %v12101_v42  ;;  %vm11955_vm13 = vcmp.eq.s32.totalorder %v7974_v38, %v9150_v47  ;;  %vm11954_vm4 = vcmp.eq.s32.totalorder %v7983_v39, %v9150_v47 }
 0x47b   : > { %5926 = vmatmul.msk.f32.gmra.mxu2 %vm11949_vm6, %v12101_v42  ;;  %vm11956_vm6 = vcmp.eq.s32.totalorder %v7983_v39, %v9376_v50 }
 0x47c   : > { %5942 = vmatmul.msk.f32.gmra.mxu3 %vm11948_vm9, %v12101_v42  ;;  %v3499_v24 = vpop.f32.mrf.mxu2  ;;  %vm11957_vm9 = vcmp.eq.s32.totalorder %v7974_v38, %v9376_v50  ;;  %v5596_v50 = vsel %vm2065_vm12, 1.0, %v12104_v63  ;;  %vm11965_vm12 = vcmp.eq.s32.totalorder %v7974_v38, %v9315_v2 }
 0x47d   : > { %v3564_v27 = vpop.f32.mrf.mxu3  ;;  %v3082_v19 = vpop.f32.mrf.mxu0 }
 0x47e   : > { %v3565_v45 = vadd.f32 %v3564_v27, %v3499_v24  ;;  %v3147_v13 = vpop.f32.mrf.mxu1  ;;  %v9789_v24 = vpop.permute.xlu0 %2326 }
 0x47f   : > { %v3148_v31 = vadd.f32 %v3147_v13, %v3082_v19  ;;  %12209 = vst [vmem:[#allocation96_spill] sm:$0xff] %v9789_v24 }
 0x480   : > { %v9776_v29 = vadd.f32 %v3565_v45, %v9544_v61  ;;  %v5659_v61 = vsel %vm2499_vm2, 1.0, %v12104_v63  ;;  %vm12211_vm2 = vcmp.eq.s32.totalorder %v7983_v39, %v8499_v53 }
 0x481   : > { %v9779_v46 = vadd.f32 %v3148_v31, %v9378_v21  ;;  %6352 = vset.pattern.permute.xlu2 %v12152_v25  ;;  %3181 = vperm.xlu1 %6351, %v9495_v55   ;;  %v9783_v7 = vpop.permute.xlu1 %2761 }
 0x482   : > { %12208 = vst [vmem:[#allocation95_spill] sm:$0xff] %v9783_v7  ;;  %3616 = vperm.xlu2 %6352, %v3562_v36   ;;  %3216 = vperm.xlu0 %6363, %v3148_v31   ;;  %v5595_v31 = vsel %vm2064_vm10, 1.0, %v12104_v63  ;;  %vm2298_vm10 = vcmp.eq.s32.totalorder %v7974_v38, 0 }
 0x483   : > { %5868 = vmatmul.msk.f32.gmra.mxu0 %vm11955_vm13, %v12101_v42  ;;  %5884 = vmatmul.msk.f32.gmra.mxu1 %vm11954_vm4, %v12101_v42  ;;  %v9803_v21 = vpop.permute.xlu2 %4207  ;;  %v2595_v35 = vadd.f32 %v5659_v61, %v5595_v31  ;;  %vm2733_vm4 = vcmp.eq.s32.totalorder %v7974_v38, 1  ;;  %vm11966_vm13 = vcmp.eq.s32.totalorder %v7983_v39, %v9335_v3 }
 0x484   : > { %12210 = vst [vmem:[#allocation97_spill] sm:$0xff] %v9803_v21  ;;  %5927 = vmatmul.msk.f32.gmra.mxu2 %vm11957_vm9, %v12101_v42  ;;  %5943 = vmatmul.msk.f32.gmra.mxu3 %vm11956_vm6, %v12101_v42  ;;  %v3502_v55 = vpop.f32.mrf.mxu2 }
 0x485   : > { %v3567_v36 = vpop.f32.mrf.mxu3  ;;  %v3085_v19 = vpop.f32.mrf.mxu0 }
 0x486   : > { %v3568_v27 = vadd.f32 %v3567_v36, %v3502_v55  ;;  %v3150_v13 = vpop.f32.mrf.mxu1  ;;  %v5660_v55 = vsel %vm12211_vm2, 1.0, %v12104_v63  ;;  %v9844_v53 = vpop.permute.xlu0 %2341  ;;  %vm11967_vm2 = vcmp.eq.s32.totalorder %v7974_v38, %v9335_v3 }
 0x487   : > { %v9821_v47 = vadd.f32 %v3150_v13, %v3085_v19  ;;  %v5723_v19 = vsel %vm2934_vm0, 1.0, %v12104_v63  ;;  %vm11964_vm0 = vcmp.eq.s32.totalorder %v7983_v39, %v9315_v2  ;;  %v5788_v13 = vsel %vm3370_vm5, 1.0, %v12104_v63 }
 0x488   : > { %v9832_v36 = vadd.f32 %v3568_v27, %v9586_v1  ;;  %v2820_v1 = vsel %vm2733_vm4, %v9715_v18, 0.0  ;;  %v2596_v18 = vadd.f32 %v5660_v55, %v5596_v50  ;;  %v5787_v50 = vsel %vm3369_vm7, 1.0, %v12104_v63 }
 0x489   : > { %v9842_v43 = vadd.f32 %v9821_v47, %v9416_v58  ;;  %3621 = vperm.xlu1 %6351, %v3565_v45   ;;  %v2332_v61 = vpop.permute.xlu1 %2331  ;;  %v12212_v45 = vld [vmem:[#allocation67_spill] sm:$0xff]  ;;  %vm11975_vm7 = vcmp.eq.s32.totalorder %v7974_v38, %v9643_v32  ;;  %vm11974_vm5 = vcmp.eq.s32.totalorder %v7983_v39, %v9643_v32 }
 0x48a   : > { %3186 = vperm.xlu2 %6352, %v9536_v57   ;;  %3606 = vperm.xlu0 %6363, %v9653_v30   ;;  %v2385_v58 = vsel %vm2298_vm10, %v2332_v61, 0.0  ;;  %v5724_v57 = vsel %vm2935_vm15, 1.0, %v12104_v63  ;;  %vm3804_vm6 = vcmp.eq.s32.totalorder %v7974_v38, %v12212_v45  ;;  %vm3805_vm9 = vcmp.eq.s32.totalorder %v7983_v39, %v12212_v45 }
 0x48b   : > { %5869 = vmatmul.msk.f32.gmra.mxu0 %vm11965_vm12, %v12101_v42  ;;  %5885 = vmatmul.msk.f32.gmra.mxu1 %vm11964_vm0, %v12101_v42  ;;  %v9873_v30 = vadd.f32 %v2820_v1, %v2385_v58  ;;  %v3030_v61 = vadd.f32 %v5723_v19, %v2595_v35  ;;  %v3031_v1 = vadd.f32 %v5724_v57, %v2596_v18  ;;  %v5851_v8 = vsel %vm3804_vm6, 1.0, %v12104_v63  ;;  %v12213_v19 = vld [vmem:[#allocation69_spill] sm:$0xff] }
 0x48c   : > { %5928 = vmatmul.msk.f32.gmra.mxu2 %vm11967_vm2, %v12101_v42  ;;  %5944 = vmatmul.msk.f32.gmra.mxu3 %vm11966_vm13, %v12101_v42  ;;  %v3505_v11 = vpop.f32.mrf.mxu2  ;;  %v5852_v62 = vsel %vm3805_vm9, 1.0, %v12104_v63  ;;  %vm11977_vm15 = vcmp.eq.s32.totalorder %v7974_v38, %v12213_v19  ;;  %vm11976_vm0 = vcmp.eq.s32.totalorder %v7983_v39, %v12213_v19  ;;  %vm12006_vm12 = vcmp.eq.s32.totalorder %v7974_v38, %v9511_v37 }
 0x48d   : > { %v9895_v31 = vpop.permute.xlu2 %2781  ;;  %v3570_v55 = vpop.f32.mrf.mxu3  ;;  %v3465_v24 = vadd.f32 %v5787_v50, %v3030_v61  ;;  %v3466_v7 = vadd.f32 %v5788_v13, %v3031_v1  ;;  %vm12005_vm13 = vcmp.eq.s32.totalorder %v7983_v39, %v9511_v37 }
 0x48e   : > { %v3571_v58 = vadd.f32 %v3570_v55, %v3505_v11  ;;  %v3088_v2 = vpop.f32.mrf.mxu0  ;;  %v3153_v3 = vpop.f32.mrf.mxu1 }
 0x48f   : > { %v9905_v48 = vadd.f32 %v3153_v3, %v3088_v2  ;;  %v9923_v3 = vpop.permute.xlu0 %2356  ;;  %v3901_v18 = vadd.f32 %v5852_v62, %v3466_v7 }
 0x490   : > { %v9908_v35 = vadd.f32 %v3571_v58, %v9627_v0  ;;  %v3900_v0 = vadd.f32 %v5851_v8, %v3465_v24  ;;  %v5980_v8 = vsel %vm11974_vm5, 1.0, %v12104_v63  ;;  %vm12002_vm5 = vcmp.eq.s32.totalorder %v7974_v38, %v9421_v40 }
 0x491   : > { %v9918_v57 = vadd.f32 %v9905_v48, %v9456_v22  ;;  %3191 = vperm.xlu1 %6351, %v9574_v59   ;;  %v5979_v22 = vsel %vm11975_vm7, 1.0, %v12104_v63  ;;  %vm12001_vm7 = vcmp.eq.s32.totalorder %v7983_v39, %v9421_v40 }
 0x492   : > { %3626 = vperm.xlu2 %6352, %v3568_v27   ;;  %3631 = vperm.xlu0 %6363, %v3571_v58   ;;  %v9927_v2 = vpop.permute.xlu1 %4204 }
 0x493   : > { %5870 = vmatmul.msk.f32.gmra.mxu0 %vm11977_vm15, %v12101_v42  ;;  %5886 = vmatmul.msk.f32.gmra.mxu1 %vm11976_vm0, %v12101_v42  ;;  %vm4239_vm2 = vcmp.eq.s32.totalorder %v7974_v38, %v9927_v2  ;;  %vm4240_vm14 = vcmp.eq.s32.totalorder %v7983_v39, %v9927_v2 }
 0x494   : > { %5929 = vmatmul.msk.f32.gmra.mxu2 %vm12006_vm12, %v12101_v42  ;;  %5945 = vmatmul.msk.f32.gmra.mxu3 %vm12005_vm13, %v12101_v42  ;;  %v5915_v62 = vsel %vm4239_vm2, 1.0, %v12104_v63  ;;  %v5916_v59 = vsel %vm4240_vm14, 1.0, %v12104_v63  ;;  %v3508_v7 = vpop.f32.mrf.mxu2 }
 0x495   : > { %v4335_v24 = vadd.f32 %v5915_v62, %v3900_v0  ;;  %v4336_v27 = vadd.f32 %v5916_v59, %v3901_v18  ;;  %v9967_v11 = vpop.permute.xlu2 %2351  ;;  %v3573_v50 = vpop.f32.mrf.mxu3  ;;  %v6450_v0 = vld [vmem:[%s6601_s26 + $0x38] sm:$0xff] }
 0x496   : > { %v3574_v13 = vadd.f32 %v3573_v50, %v3508_v7  ;;  %v3091_v55 = vpop.f32.mrf.mxu0  ;;  %v3156_v61 = vpop.f32.mrf.mxu1 }
 0x497   : > { %v3157_v1 = vadd.f32 %v3156_v61, %v3091_v55  ;;  %v9969_v58 = vadd.f32 %v5979_v22, %v4335_v24  ;;  %v9971_v32 = vadd.f32 %v5980_v8, %v4336_v27  ;;  %v2381_v61 = vsel %vm2298_vm10, %v9735_v5, 0.0 }
 0x498   : > { %v9974_v19 = vadd.f32 %v3574_v13, %v9667_v49  ;;  %v2387_v49 = vsel %vm2298_vm10, %v9844_v53, 0.0 }
 0x499   : > { %12214 = vst [vmem:[#allocation67_spill] sm:$0xff] %v9969_v58  ;;  %v9977_v37 = vadd.f32 %v3157_v1, %v9497_v26  ;;  %6354 = vset.pattern.permute.xlu1 %v12193_v33  ;;  %v12220_v58 = vld [vmem:[#allocation70_spill] sm:$0xff] }
 0x49a   : > { %12215 = vst [vmem:[#allocation98_spill] sm:$0xff] %v9971_v32  ;;  %3196 = vperm.xlu2 %6352, %v9619_v41   ;;  %4624 = vperm.xlu1 %6354, %v6450_v0   ;;  %v9982_v18 = vpop.permute.xlu0 %2371  ;;  %v5067_v32 = vld [vmem:[#allocation3 + $0x70] sm:$0xff] }
 0x49b   : > { %3231 = vperm.xlu0 %6363, %v3157_v1   ;;  %5871 = vmatmul.msk.f32.gmra.mxu0 %vm3804_vm6, %v12101_v42  ;;  %v6451_v1 = vld [vmem:[%s6601_s26 + $0x30] sm:$0xff]  ;;  %vm11978_vm6 = vcmp.eq.s32.totalorder %v7983_v39, %v9360_v51 }
 0x49c   : > { %5887 = vmatmul.msk.f32.gmra.mxu1 %vm3805_vm9, %v12101_v42  ;;  %5930 = vmatmul.msk.f32.gmra.mxu2 %vm12002_vm5, %v12101_v42  ;;  %v2777_v41 = vpop.permute.xlu1 %2776  ;;  %v3511_v26 = vpop.f32.mrf.mxu2  ;;  %vm11979_vm9 = vcmp.eq.s32.totalorder %v7974_v38, %v9360_v51  ;;  %vm12003_vm5 = vcmp.eq.s32.totalorder %v7983_v39, %v9803_v21 }
 0x49d   : > { %5946 = vmatmul.msk.f32.gmra.mxu3 %vm12001_vm7, %v12101_v42  ;;  %v2822_v45 = vsel %vm2733_vm4, %v2777_v41, 0.0  ;;  %v3576_v22 = vpop.f32.mrf.mxu3  ;;  %vm12004_vm7 = vcmp.eq.s32.totalorder %v7974_v38, %v9803_v21 }
 0x49e   : > { %v10009_v8 = vadd.f32 %v2822_v45, %v2387_v49  ;;  %v3577_v62 = vadd.f32 %v3576_v22, %v3511_v26  ;;  %v3094_v59 = vpop.f32.mrf.mxu0  ;;  %v3159_v7 = vpop.f32.mrf.mxu1  ;;  %v2823_v26 = vsel %vm2733_vm4, %v9895_v31, 0.0  ;;  %v5084_v31 = vld [vmem:[#allocation3 + $0xf8] sm:$0xff] }
 0x49f   : > { %v10011_v24 = vpop.permute.xlu2 %4603  ;;  %v10013_v27 = vadd.f32 %v3159_v7, %v3094_v59  ;;  %v5068_v7 = vld [vmem:[#allocation3 + $0x78] sm:$0xff]  ;;  %5150 = vmatpush.msrb.mxu3 %v5084_v31 }
 0x4a0   : > { %v10016_v53 = vadd.f32 %v3577_v62, %v9707_v6  ;;  %v12216_v6 = vld [vmem:[#allocation77_spill] sm:$0xff]  ;;  %5085 = vmatpush.msrb.mxu2 %v5068_v7  ;;  %v5081_v7 = vld [vmem:[#allocation3 + $0xe0] sm:$0xff] }
 0x4a1   : > { %v10020_v50 = vadd.f32 %v10013_v27, %v9538_v34  ;;  %vm11997_vm0 = vcmp.eq.s32.totalorder %v7974_v38, %v12216_v6  ;;  %vm11980_vm15 = vcmp.eq.s32.totalorder %v7983_v39, %v12216_v6 }
 0x4a2   : > { %6353 = vset.pattern.permute.xlu2 %v12193_v33  ;;  %6355 = vset.pattern.permute.xlu1 %v12152_v25  ;;  %v2747_v55 = vpop.permute.xlu0 %2746 }
 0x4a3   : > { %4621 = vperm.xlu2 %6353, %v6451_v1   ;;  %5872 = vmatmul.msk.f32.gmra.mxu0 %vm11979_vm9, %v12101_v42  ;;  %v2816_v34 = vsel %vm2733_vm4, %v2747_v55, 0.0 }
 0x4a4   : > { %5888 = vmatmul.msk.f32.gmra.mxu1 %vm11978_vm6, %v12101_v42  ;;  %3636 = vperm.xlu1 %6355, %v3574_v13   ;;  %v10046_v5 = vadd.f32 %v2816_v34, %v2381_v61  ;;  %v2347_v0 = vpop.permute.xlu1 %2346  ;;  %v3514_v41 = vpop.f32.mrf.mxu2 }
 0x4a5   : > { %5931 = vmatmul.msk.f32.gmra.mxu2 %vm11997_vm0, %v12101_v42  ;;  %5947 = vmatmul.msk.f32.gmra.mxu3 %vm11980_vm15, %v12101_v42  ;;  %v2388_v13 = vsel %vm2298_vm10, %v2347_v0, 0.0  ;;  %v3579_v49 = vpop.f32.mrf.mxu3  ;;  %v5083_v0 = vld [vmem:[#allocation3 + $0xf0] sm:$0xff]  ;;  %vm11987_vm15 = vcmp.eq.s32.totalorder %v7974_v38, %v9655_v60 }
 0x4a6   : > { %v10061_v45 = vadd.f32 %v2823_v26, %v2388_v13  ;;  %v3580_v22 = vadd.f32 %v3579_v49, %v3514_v41  ;;  %v3097_v59 = vpop.f32.mrf.mxu0  ;;  %5086 = vmatpush.msrb.mxu2 %v5067_v32  ;;  %5151 = vmatpush.msrb.mxu3 %v5083_v0  ;;  %v12217_v26 = vld [vmem:[#allocation72_spill] sm:$0xff] }
 0x4a7   : > { %v3162_v55 = vpop.f32.mrf.mxu1  ;;  %vm11981_vm6 = vcmp.eq.s32.totalorder %v7974_v38, %v12217_v26  ;;  %vm11983_vm9 = vcmp.eq.s32.totalorder %v7983_v39, %v12217_v26  ;;  %v5066_v32 = vld [vmem:[#allocation3 + $0x68] sm:$0xff] }
 0x4a8   : > { %v10064_v61 = vadd.f32 %v3580_v22, %v9746_v52  ;;  %v10066_v1 = vpop.permute.xlu2 %2796  ;;  %v10068_v34 = vadd.f32 %v3162_v55, %v3097_v59  ;;  %3646 = vperm.xlu0 %6363, %v3580_v22   ;;  %v2386_v52 = vsel %vm2298_vm10, %v9753_v14, 0.0  ;;  %v5082_v49 = vld [vmem:[#allocation3 + $0xe8] sm:$0xff]  ;;  %v5065_v22 = vld [vmem:[#allocation3 + $0x60] sm:$0xff]  ;;  %5087 = vmatpush.msrb.mxu2 %v5066_v32  ;;  %v5064_v55 = vld [vmem:[#allocation3 + $0x58] sm:$0xff] }
 0x4a9   : > { %5152 = vmatpush.msrb.mxu3 %v5082_v49  ;;  %v2389_v49 = vsel %vm2298_vm10, %v9967_v11, 0.0  ;;  %v5063_v11 = vld [vmem:[#allocation3 + $0x50] sm:$0xff] }
 0x4aa   : > { %v10072_v41 = vadd.f32 %v10068_v34, %v9577_v10  ;;  %v2772_v13 = vpop.permute.xlu0 %2771  ;;  %5088 = vmatpush.msrb.mxu2 %v5065_v22 }
 0x4ab   : > { %6357 = vset.pattern.permute.xlu2 %v12152_v25  ;;  %5873 = vmatmul.msk.f32.gmra.mxu0 %vm11981_vm6, %v12101_v42  ;;  %v2821_v10 = vsel %vm2733_vm4, %v2772_v13, 0.0  ;;  %vm11986_vm6 = vcmp.eq.s32.totalorder %v7983_v39, %v9655_v60 }
 0x4ac   : > { %5889 = vmatmul.msk.f32.gmra.mxu1 %vm11983_vm9, %v12101_v42  ;;  %3206 = vperm.xlu1 %6355, %v9694_v12   ;;  %v10095_v14 = vadd.f32 %v2821_v10, %v2386_v52  ;;  %v5080_v10 = vld [vmem:[#allocation3 + $0xd8] sm:$0xff]  ;;  %vm11988_vm9 = vcmp.eq.s32.totalorder %v7974_v38, %v12220_v58 }
 0x4ad   : > { %3641 = vperm.xlu2 %6357, %v3577_v62   ;;  %5932 = vmatmul.msk.f32.gmra.mxu2 %vm11987_vm15, %v12101_v42  ;;  %vm11996_vm15 = vcmp.eq.s32.totalorder %v7974_v38, %v9570_v4 }
 0x4ae   : > { %12218 = vst [vmem:[#allocation77_spill] sm:$0xff] %v10095_v14  ;;  %5948 = vmatmul.msk.f32.gmra.mxu3 %vm11986_vm6, %v12101_v42  ;;  %v10107_v12 = vpop.permute.xlu1 %4213  ;;  %v3517_v59 = vpop.f32.mrf.mxu2  ;;  %5089 = vmatpush.msrb.mxu2 %v5064_v55  ;;  %vm11994_vm6 = vcmp.eq.s32.totalorder %v7983_v39, %v12220_v58 }
 0x4af   : > { %12219 = vst [vmem:[#allocation99_spill] sm:$0xff] %v10107_v12  ;;  %v3582_v62 = vpop.f32.mrf.mxu3  ;;  %v3100_v31 = vpop.f32.mrf.mxu0  ;;  %5153 = vmatpush.msrb.mxu3 %v5081_v7 }
 0x4b0   : > { %v10109_v0 = vadd.f32 %v3582_v62, %v3517_v59  ;;  %v10111_v13 = vpop.permute.xlu2 %2366  ;;  %v3165_v52 = vpop.f32.mrf.mxu1  ;;  %v5079_v59 = vld [vmem:[#allocation3 + $0xd0] sm:$0xff]  ;;  %v5062_v62 = vld [vmem:[#allocation3 + $0x48] sm:$0xff]  ;;  %5090 = vmatpush.msrb.mxu2 %v5063_v11  ;;  %v5077_v11 = vld [vmem:[#allocation3 + $0xc0] sm:$0xff] }
 0x4b1   : > { %v10113_v26 = vadd.f32 %v3165_v52, %v3100_v31  ;;  %5154 = vmatpush.msrb.mxu3 %v5080_v10  ;;  %v5078_v31 = vld [vmem:[#allocation3 + $0xc8] sm:$0xff]  ;;  %v2390_v52 = vsel %vm2298_vm10, %v9923_v3, 0.0 }
 0x4b2   : > { %v10119_v32 = vadd.f32 %v10109_v0, %v9779_v46  ;;  %v2787_v51 = vpop.permute.xlu0 %2786  ;;  %5091 = vmatpush.msrb.mxu2 %v5062_v62 }
 0x4b3   : > { %v10128_v22 = vadd.f32 %v10113_v26, %v9621_v15  ;;  %5874 = vmatmul.msk.f32.gmra.mxu0 %vm11988_vm9, %v12101_v42  ;;  %v2824_v46 = vsel %vm2733_vm4, %v2787_v51, 0.0  ;;  %vm11995_vm9 = vcmp.eq.s32.totalorder %v7983_v39, %v9570_v4  ;;  %v6452_v51 = vld [vmem:[%s6601_s26 + $0x48] sm:$0xff]  ;;  %5155 = vmatpush.msrb.mxu3 %v5079_v59  ;;  %v12223_v59 = vld [vmem:[#allocation78_spill] sm:$0xff] }
 0x4b4   : > { %5890 = vmatmul.msk.f32.gmra.mxu1 %vm11994_vm6, %v12101_v42  ;;  %6356 = vset.pattern.permute.xlu1 %v12193_v33  ;;  %v10143_v15 = vadd.f32 %v2824_v46, %v2389_v49  ;;  %vm4650_vm6 = vcmp.eq.s32.totalorder %v7974_v38, %v10011_v24  ;;  %vm11999_vm0 = vcmp.eq.s32.totalorder %v7983_v39, %v12223_v59 }
 0x4b5   : > { %3211 = vperm.xlu2 %6357, %v9733_v16   ;;  %5933 = vmatmul.msk.f32.gmra.mxu2 %vm11996_vm15, %v12101_v42  ;;  %vm12000_vm15 = vcmp.eq.s32.totalorder %v7974_v38, %v12223_v59  ;;  %v5075_v59 = vld [vmem:[#allocation3 + $0xb0] sm:$0xff] }
 0x4b6   : > { %12221 = vst [vmem:[#allocation100_spill] sm:$0xff] %v10143_v15  ;;  %5949 = vmatmul.msk.f32.gmra.mxu3 %vm11995_vm9, %v12101_v42  ;;  %4630 = vperm.xlu1 %6356, %v6452_v51   ;;  %v3520_v7 = vpop.f32.mrf.mxu2  ;;  %v5061_v15 = vld [vmem:[#allocation3 + $0x40] sm:$0xff]  ;;  %vm4651_vm9 = vcmp.eq.s32.totalorder %v7983_v39, %v10011_v24 }
 0x4b7   : > { %v3585_v55 = vpop.f32.mrf.mxu3  ;;  %v2792_v16 = vpop.permute.xlu1 %2791  ;;  %5156 = vmatpush.msrb.mxu3 %v5078_v31  ;;  %5092 = vmatpush.msrb.mxu2 %v5061_v15 }
 0x4b8   : > { %v10160_v10 = vadd.f32 %v3585_v55, %v3520_v7  ;;  %v2825_v49 = vsel %vm2733_vm4, %v2792_v16, 0.0  ;;  %v3925_v46 = vpop.f32.mrf.mxu0  ;;  %v3990_v58 = vpop.f32.mrf.mxu1  ;;  %v6453_v7 = vld [vmem:[%s6601_s26 + $0x50] sm:$0xff]  ;;  %v2826_v16 = vsel %vm2733_vm4, %v10066_v1, 0.0 }
 0x4b9   : > { %v10164_v51 = vadd.f32 %v2825_v49, %v2390_v52  ;;  %v10166_v4 = vadd.f32 %v3990_v58, %v3925_v46  ;;  %v10168_v60 = vpop.permute.xlu2 %4609  ;;  %5157 = vmatpush.msrb.mxu3 %v5077_v11  ;;  %v5059_v55 = vld [vmem:[#allocation3 + $0x30] sm:$0xff] }
 0x4ba   : > { %v10174_v3 = vadd.f32 %v10160_v10, %v9842_v43  ;;  %v5076_v43 = vld [vmem:[#allocation3 + $0xb8] sm:$0xff] }
 0x4bb   : > { %12222 = vst [vmem:[#allocation101_spill] sm:$0xff] %v10164_v51  ;;  %v10180_v58 = vadd.f32 %v10166_v4, %v9660_v9  ;;  %5987 = vmatmul.msk.f32.vlgmr.msrb.gmra.mxu0 %vm4650_vm6, %v12101_v42  ;;  %v5060_v9 = vld [vmem:[#allocation3 + $0x38] sm:$0xff]  ;;  %5158 = vmatpush.msrb.mxu3 %v5076_v43 }
 0x4bc   : > { %6003 = vmatmul.msk.f32.vlgmr.msrb.gmra.mxu1 %vm4651_vm9, %v12101_v42  ;;  %5093 = vmatpush.msrb.mxu2 %v5060_v9  ;;  %v2392_v9 = vsel %vm2298_vm10, %v10111_v13, 0.0 }
 0x4bd   : > { %6358 = vset.pattern.permute.xlu2 %v12193_v33  ;;  %5934 = vmatmul.msk.f32.gmra.mxu2 %vm12000_vm15, %v12101_v42  ;;  %vm4653_vm15 = vcmp.eq.s32.totalorder %v7983_v39, %v9534_v54 }
 0x4be   : > { %5950 = vmatmul.msk.f32.gmra.mxu3 %vm11999_vm0, %v12101_v42  ;;  %6359 = vset.pattern.permute.xlu1 %v12152_v25  ;;  %v3523_v15 = vpop.f32.mrf.mxu2  ;;  %vm4652_vm0 = vcmp.eq.s32.totalorder %v7974_v38, %v9534_v54 }
 0x4bf   : > { %4633 = vperm.xlu2 %6358, %v6453_v7   ;;  %3651 = vperm.xlu1 %6359, %v10109_v0   ;;  %v3588_v62 = vpop.f32.mrf.mxu3  ;;  %v2362_v31 = vpop.permute.xlu1 %2361  ;;  %v5058_v0 = vld [vmem:[#allocation3 + $0x28] sm:$0xff] }
 0x4c0   : > { %v3589_v52 = vadd.f32 %v3588_v62, %v3523_v15  ;;  %v2391_v49 = vsel %vm2298_vm10, %v2362_v31, 0.0  ;;  %v3928_v46 = vpop.f32.mrf.mxu0  ;;  %v3993_v11 = vpop.f32.mrf.mxu1  ;;  %5094 = vmatpush.msrb.mxu2 %v5059_v55  ;;  %v5074_v62 = vld [vmem:[#allocation3 + $0xa8] sm:$0xff]  ;;  %5159 = vmatpush.msrb.mxu3 %v5075_v59  ;;  %v5057_v31 = vld [vmem:[#allocation3 + $0x20] sm:$0xff]  ;;  %v5056_v55 = vld [vmem:[#allocation3 + $0x18] sm:$0xff] }
 0x4c1   : > { %v10211_v51 = vadd.f32 %v2826_v16, %v2391_v49  ;;  %v10213_v7 = vadd.f32 %v3993_v11, %v3928_v46 }
 0x4c2   : > { %v10218_v14 = vadd.f32 %v3589_v52, %v9918_v57  ;;  %v10220_v1 = vpop.permute.xlu2 %2811  ;;  %3661 = vperm.xlu0 %6363, %v3589_v52   ;;  %v2802_v15 = vpop.permute.xlu0 %2801  ;;  %5095 = vmatpush.msrb.mxu2 %v5058_v0  ;;  %v5072_v52 = vld [vmem:[#allocation3 + $0x98] sm:$0xff]  ;;  %v5055_v0 = vld [vmem:[#allocation3 + $0x10] sm:$0xff] }
 0x4c3   : > { %v10229_v43 = vadd.f32 %v10213_v7, %v9697_v28  ;;  %5988 = vmatmul.msk.f32.gmra.mxu0 %vm4652_vm0, %v12101_v42  ;;  %v2827_v57 = vsel %vm2733_vm4, %v2802_v15, 0.0  ;;  %5160 = vmatpush.msrb.mxu3 %v5074_v62  ;;  %v5073_v28 = vld [vmem:[#allocation3 + $0xa0] sm:$0xff]  ;;  %v5071_v62 = vld [vmem:[#allocation3 + $0x90] sm:$0xff] }
 0x4c4   : > { %6004 = vmatmul.msk.f32.gmra.mxu1 %vm4653_vm15, %v12101_v42  ;;  %v10241_v13 = vadd.f32 %v2827_v57, %v2392_v9  ;;  %5096 = vmatpush.msrb.mxu2 %v5057_v31  ;;  %v5053_v57 = vld [vmem:[#allocation3] sm:$0xff] }
 0x4c5   : > { %5935 = vmatmul.msk.f32.gmra.mxu2 %vm4239_vm2, %v12101_v42  ;;  %5161 = vmatpush.msrb.mxu3 %v5073_v28  ;;  %vm4655_vm2 = vcmp.eq.s32.totalorder %v7983_v39, %v10168_v60  ;;  %v5069_v31 = vld [vmem:[#allocation3 + $0x80] sm:$0xff] }
 0x4c6   : > { %12224 = vst [vmem:[#allocation102_spill] sm:$0xff] %v10241_v13  ;;  %5951 = vmatmul.msk.f32.gmra.mxu3 %vm4240_vm14, %v12101_v42  ;;  %v3526_v59 = vpop.f32.mrf.mxu2  ;;  %5097 = vmatpush.msrb.mxu2 %v5056_v55  ;;  %vm4654_vm14 = vcmp.eq.s32.totalorder %v7974_v38, %v10168_v60 }
 0x4c7   : > { %6360 = vset.pattern.permute.xlu2 %v12152_v25  ;;  %3221 = vperm.xlu1 %6359, %v9821_v47   ;;  %v3591_v16 = vpop.f32.mrf.mxu3 }
 0x4c8   : > { %3656 = vperm.xlu2 %6360, %v10160_v10   ;;  %v10254_v49 = vadd.f32 %v3591_v16, %v3526_v59  ;;  %v3931_v46 = vpop.f32.mrf.mxu0  ;;  %v3996_v11 = vpop.f32.mrf.mxu1  ;;  %5162 = vmatpush.msrb.mxu3 %v5072_v52  ;;  %v6454_v59 = vld [vmem:[%s6601_s26 + $0x68] sm:$0xff] }
 0x4c9   : > { %v10256_v15 = vadd.f32 %v3996_v11, %v3931_v46  ;;  %v10258_v2 = vpop.permute.xlu1 %4612  ;;  %5098 = vmatpush.msrb.mxu2 %v5055_v0  ;;  %v2393_v0 = vsel %vm2298_vm10, %v9982_v18, 0.0 }
 0x4ca   : > { %v10264_v47 = vadd.f32 %v10254_v49, %v9977_v37  ;;  %v10266_v10 = vpop.permute.xlu2 %3171  ;;  %3246 = vperm.xlu0 %6363, %v10113_v26   ;;  %v5054_v37 = vld [vmem:[#allocation3 + $0x8] sm:$0xff]  ;;  %5163 = vmatpush.msrb.mxu3 %v5071_v62 }
 0x4cb   : > { %v10273_v9 = vadd.f32 %v10256_v15, %v9738_v23  ;;  %5989 = vmatmul.msk.f32.gmra.mxu0 %vm4654_vm14, %v12101_v42  ;;  %v5070_v26 = vld [vmem:[#allocation3 + $0x88] sm:$0xff]  ;;  %5099 = vmatpush.msrb.mxu2 %v5054_v37  ;;  %v10315_v37 = vpop.permute.xlu0 %3176 }
 0x4cc   : > { %6005 = vmatmul.msk.f32.gmra.mxu1 %vm4655_vm2, %v12101_v42  ;;  %5164 = vmatpush.msrb.mxu3 %v5070_v26 }
 0x4cd   : > { %5936 = vmatmul.msk.f32.gmra.mxu2 %vm12004_vm7, %v12101_v42  ;;  %vm12009_vm7 = vcmp.eq.s32.totalorder %v7983_v39, %v10258_v2 }
 0x4ce   : > { %5952 = vmatmul.msk.f32.gmra.mxu3 %vm12003_vm5, %v12101_v42  ;;  %v3529_v23 = vpop.f32.mrf.mxu2  ;;  %5100 = vmatpush.msrb.mxu2 %v5053_v57  ;;  %vm12010_vm5 = vcmp.eq.s32.totalorder %v7974_v38, %v10258_v2 }
 0x4cf   : > { %6362 = vset.pattern.permute.xlu1 %v12193_v33  ;;  %v3594_v28 = vpop.f32.mrf.mxu3  ;;  %5165 = vmatpush.msrb.mxu3 %v5069_v31 }
 0x4d0   : > { %3226 = vperm.xlu2 %6360, %v9905_v48   ;;  %4642 = vperm.xlu1 %6362, %v6454_v59   ;;  %v10298_v55 = vadd.f32 %v3594_v28, %v3529_v23  ;;  %v3934_v16 = vpop.f32.mrf.mxu0  ;;  %v3999_v52 = vpop.f32.mrf.mxu1 }
 0x4d1   : > { %v10300_v46 = vadd.f32 %v3999_v52, %v3934_v16  ;;  %v2807_v11 = vpop.permute.xlu1 %2806  ;;  %v6455_v16 = vld [vmem:[%s6601_s26 + $0x58] sm:$0xff] }
 0x4d2   : > { %v10309_v48 = vadd.f32 %v10298_v55, %v10020_v50  ;;  %v2828_v62 = vsel %vm2733_vm4, %v2807_v11, 0.0  ;;  %v12227_v50 = vld [vmem:[#allocation81_spill] sm:$0xff] }
 0x4d3   : > { %v10319_v26 = vadd.f32 %v10300_v46, %v9776_v29  ;;  %v10321_v18 = vadd.f32 %v2828_v62, %v2393_v0  ;;  %v10323_v23 = vpop.permute.xlu2 %4615  ;;  %5990 = vmatmul.msk.f32.gmra.mxu0 %vm12010_vm5, %v12101_v42  ;;  %vm12008_vm13 = vcmp.eq.s32.totalorder %v7974_v38, %v12227_v50  ;;  %vm12007_vm12 = vcmp.eq.s32.totalorder %v7983_v39, %v12227_v50 }
 0x4d4   : > { %12225 = vst [vmem:[#allocation103_spill] sm:$0xff] %v10309_v48  ;;  %6006 = vmatmul.msk.f32.gmra.mxu1 %vm12009_vm7, %v12101_v42  ;;  %v2829_v0 = vsel %vm2733_vm4, %v10220_v1, 0.0  ;;  %vm4659_vm7 = vcmp.eq.s32.totalorder %v7983_v39, %v10323_v23  ;;  %vm4245_vm5 = vcmp.eq.s32.totalorder %v7974_v38, %v10107_v12  ;;  %v5955_v50 = vsel %vm4650_vm6, 1.0, %v12104_v63 }
 0x4d5   : > { %12226 = vst [vmem:[#allocation104_spill] sm:$0xff] %v10321_v18  ;;  %5937 = vmatmul.msk.f32.gmra.mxu2 %vm12008_vm13, %v12101_v42  ;;  %vm3168_vm13 = vcmp.eq.s32.totalorder %v7974_v38, 2 }
 0x4d6   : > { %5953 = vmatmul.msk.f32.gmra.mxu3 %vm12007_vm12, %v12101_v42  ;;  %v3532_v29 = vpop.f32.mrf.mxu2  ;;  %vm4658_vm12 = vcmp.eq.s32.totalorder %v7974_v38, %v10323_v23 }
 0x4d7   : > { %v3597_v57 = vpop.f32.mrf.mxu3 }
 0x4d8   : > { %6361 = vset.pattern.permute.xlu2 %v12193_v33  ;;  %6364 = vset.pattern.permute.xlu1 %v12152_v25  ;;  %v3598_v31 = vadd.f32 %v3597_v57, %v3532_v29  ;;  %v3937_v28 = vpop.f32.mrf.mxu0  ;;  %v4002_v59 = vpop.f32.mrf.mxu1  ;;  %v5892_v57 = vsel %vm4216_vm11, 1.0, %v12104_v63 }
 0x4d9   : > { %4636 = vperm.xlu2 %6361, %v6455_v16   ;;  %3666 = vperm.xlu1 %6364, %v10254_v49   ;;  %v10349_v52 = vadd.f32 %v4002_v59, %v3937_v28  ;;  %v2377_v11 = vpop.permute.xlu1 %2376  ;;  %v5828_v59 = vsel %vm3781_vm3, 1.0, %v12104_v63 }
 0x4da   : > { %v10357_v62 = vadd.f32 %v3598_v31, %v10072_v41  ;;  %v2394_v29 = vsel %vm2298_vm10, %v2377_v11, 0.0  ;;  %3676 = vperm.xlu0 %6363, %v3598_v31   ;;  %v5827_v31 = vsel %vm3780_vm1, 1.0, %v12104_v63  ;;  %vm4246_vm1 = vcmp.eq.s32.totalorder %v7983_v39, %v10107_v12 }
 0x4db   : > { %v10366_v49 = vadd.f32 %v10349_v52, %v9832_v36  ;;  %v10368_v1 = vadd.f32 %v2829_v0, %v2394_v29  ;;  %5991 = vmatmul.msk.f32.gmra.mxu0 %vm4658_vm12, %v12101_v42  ;;  %v3202_v41 = vpop.permute.xlu0 %3201  ;;  %v5891_v11 = vsel %vm4215_vm8, 1.0, %v12104_v63  ;;  %v12231_v29 = vld [vmem:[#allocation44_spill] sm:$0xff] }
 0x4dc   : > { %12228 = vst [vmem:[#allocation105_spill] sm:$0xff] %v10357_v62  ;;  %6007 = vmatmul.msk.f32.gmra.mxu1 %vm4659_vm7, %v12101_v42  ;;  %v10384_v36 = vpop.permute.xlu2 %3616  ;;  %v3255_v28 = vsel %vm3168_vm13, %v3202_v41, 0.0  ;;  %v3876_v41 = vadd.f32 %v5827_v31, %v12231_v29  ;;  %v5956_v31 = vsel %vm4651_vm9, 1.0, %v12104_v63 }
 0x4dd   : > { %12229 = vst [vmem:[#allocation106_spill] sm:$0xff] %v10368_v1  ;;  %5938 = vmatmul.msk.f32.gmra.mxu2 %vm4245_vm5, %v12101_v42  ;;  %v10399_v16 = vadd.f32 %v3255_v28, %v9873_v30  ;;  %v12232_v28 = vld [vmem:[#allocation45_spill] sm:$0xff] }
 0x4de   : > { %5954 = vmatmul.msk.f32.gmra.mxu3 %vm4246_vm1, %v12101_v42  ;;  %v3535_v0 = vpop.f32.mrf.mxu2  ;;  %v3877_v13 = vadd.f32 %v5828_v59, %v12232_v28  ;;  %v4311_v1 = vadd.f32 %v5891_v11, %v3876_v41  ;;  %v12233_v59 = vld [vmem:[#allocation40_spill] sm:$0xff]  ;;  %v12241_v41 = vld [vmem:[#allocation33_spill] sm:$0xff] }
 0x4df   : > { %v3600_v30 = vpop.f32.mrf.mxu3  ;;  %vm12234_vm8 = vcmp.eq.s32.totalorder %v7974_v38, %v12233_v59  ;;  %vm12235_vm11 = vcmp.eq.s32.totalorder %v7983_v39, %v12233_v59 }
 0x4e0   : > { %v3601_v18 = vadd.f32 %v3600_v30, %v3535_v0  ;;  %v3940_v21 = vpop.f32.mrf.mxu0  ;;  %v4005_v12 = vpop.f32.mrf.mxu1  ;;  %v5765_v29 = vsel %vm12234_vm8, 1.0, %v12104_v63  ;;  %v5766_v11 = vsel %vm12235_vm11, 1.0, %v12104_v63  ;;  %v4312_v0 = vadd.f32 %v5892_v57, %v3877_v13  ;;  %v12242_v30 = vld [vmem:[#allocation83_spill] sm:$0xff] }
 0x4e1   : > { %6365 = vset.pattern.permute.xlu2 %v12152_v25  ;;  %3236 = vperm.xlu1 %6364, %v10013_v27   ;;  %v10425_v20 = vadd.f32 %v4005_v12, %v3940_v21  ;;  %v4746_v27 = vadd.f32 %v5955_v50, %v4311_v1  ;;  %v3444_v57 = vadd.f32 %v5766_v11, %v12241_v41  ;;  %v2815_v28 = vsel %vm2733_vm4, %v12242_v30, 0.0 }
 0x4e2   : > { %v10436_v24 = vadd.f32 %v3601_v18, %v10128_v22  ;;  %3671 = vperm.xlu2 %6365, %v10298_v55   ;;  %4051 = vperm.xlu0 %6363, %v10256_v15   ;;  %v10440_v21 = vpop.permute.xlu1 %4618  ;;  %v12237_v22 = vld [vmem:[#allocation59_spill] sm:$0xff]  ;;  %v4747_v55 = vadd.f32 %v5956_v31, %v4312_v0  ;;  %vm12243_vm11 = vcmp.eq.s32.totalorder %v7974_v38, %v9408_v44  ;;  %v5957_v41 = vsel %vm4652_vm0, 1.0, %v12104_v63 }
 0x4e3   : > { %v10444_v12 = vadd.f32 %v10425_v20, %v9908_v35  ;;  %vm4660_vm3 = vcmp.eq.s32.totalorder %v7974_v38, %v10440_v21  ;;  %vm4661_vm9 = vcmp.eq.s32.totalorder %v7983_v39, %v10440_v21  ;;  %vm12238_vm6 = vcmp.eq.s32.totalorder %v7974_v38, %v12237_v22  ;;  %v12240_v35 = vld [vmem:[#allocation10_spill] sm:$0xff] }
 0x4e4   : > { %12236 = vst [vmem:[#allocation58_spill] sm:$0xff] %v10436_v24  ;;  %v5829_v13 = vsel %vm12238_vm6, 1.0, %v12104_v63  ;;  %vm12239_vm8 = vcmp.eq.s32.totalorder %v7983_v39, %v12237_v22  ;;  %v10458_v50 = vpop.permute.xlu2 %3186  ;;  %5992 = vmatmul.msk.f32.gmra.mxu0 %vm4660_vm3, %v12101_v42  ;;  %6008 = vmatmul.msk.f32.gmra.mxu1 %vm4661_vm9, %v12101_v42  ;;  %v3443_v1 = vadd.f32 %v5765_v29, %v12240_v35  ;;  %v5893_v31 = vsel %vm12243_vm11, 1.0, %v12104_v63  ;;  %v12246_v24 = vld [vmem:[#allocation7_spill] sm:$0xff] }
 0x4e5   : > { %v5830_v15 = vsel %vm12239_vm8, 1.0, %v12104_v63  ;;  %5101 = vmatmul.f32.vlgmr.msrb.gmra.mxu2 %v4746_v27  ;;  %vm12244_vm6 = vcmp.eq.s32.totalorder %v7983_v39, %v9408_v44  ;;  %v12245_v27 = vld [vmem:[#allocation80_spill] sm:$0xff]  ;;  %v5958_v44 = vsel %vm4653_vm15, 1.0, %v12104_v63  ;;  %vm12247_vm0 = vcmp.eq.s32.totalorder %v7974_v38, %v12246_v24 }
 0x4e6   : > { %5166 = vmatmul.f32.vlgmr.msrb.gmra.mxu3 %v4747_v55  ;;  %v4360_v59 = vpop.f32.mrf.mxu2  ;;  %v3878_v0 = vadd.f32 %v5829_v13, %v3443_v1  ;;  %v3879_v22 = vadd.f32 %v5830_v15, %v3444_v57  ;;  %v5894_v29 = vsel %vm12244_vm6, 1.0, %v12104_v63  ;;  %v2380_v35 = vsel %vm2298_vm10, %v12245_v27, 0.0 }
 0x4e7   : > { %v4425_v11 = vpop.f32.mrf.mxu3  ;;  %v3250_v13 = vsel %vm3168_vm13, %v10315_v37, 0.0  ;;  %v2831_v57 = vadd.f32 %v2815_v28, %v2380_v35  ;;  %v5707_v62 = vsel %vm12247_vm0, 1.0, %v12104_v63  ;;  %vm3603_vm8 = vcmp.eq.s32.totalorder %v7974_v38, 3 }
 0x4e8   : > { %v4426_v15 = vadd.f32 %v4425_v11, %v4360_v59  ;;  %v3943_v55 = vpop.f32.mrf.mxu0  ;;  %v4008_v1 = vpop.f32.mrf.mxu1  ;;  %v4313_v30 = vadd.f32 %v5893_v31, %v3878_v0  ;;  %v4314_v48 = vadd.f32 %v5894_v29, %v3879_v22  ;;  %vm12249_vm15 = vcmp.eq.s32.totalorder %v7983_v39, %v12246_v24  ;;  %v12253_v24 = vld [vmem:[#allocation22_spill] sm:$0xff] }
 0x4e9   : > { %3681 = vperm.xlu1 %6364, %v3601_v18   ;;  %v10495_v27 = vadd.f32 %v4008_v1, %v3943_v55  ;;  %v3266_v59 = vadd.f32 %v3250_v13, %v2831_v57  ;;  %v5708_v31 = vsel %vm12249_vm15, 1.0, %v12104_v63  ;;  %v10529_v35 = vadd.f32 %v5707_v62, %v12253_v24  ;;  %v12255_v55 = vld [vmem:[#allocation23_spill] sm:$0xff]  ;;  %v12256_v1 = vld [vmem:[#allocation46_spill] sm:$0xff] }
 0x4ea   : > { %v10502_v37 = vadd.f32 %v4426_v15, %v10180_v58  ;;  %3241 = vperm.xlu2 %6365, %v10068_v34   ;;  %v4748_v28 = vadd.f32 %v5957_v41, %v4313_v30  ;;  %v12250_v58 = vld [vmem:[#allocation65_spill] sm:$0xff]  ;;  %v4749_v29 = vadd.f32 %v5958_v44, %v4314_v48  ;;  %vm12254_vm0 = vcmp.eq.s32.totalorder %v7974_v38, %v9331_v56  ;;  %v12261_v24 = vld [vmem:[#allocation95_spill] sm:$0xff] }
 0x4eb   : > { %v10508_v54 = vadd.f32 %v10495_v27, %v9974_v19  ;;  %v3612_v18 = vpop.permute.xlu1 %3611  ;;  %vm12251_vm11 = vcmp.eq.s32.totalorder %v7974_v38, %v12250_v58  ;;  %vm12252_vm6 = vcmp.eq.s32.totalorder %v7983_v39, %v12250_v58  ;;  %v5895_v41 = vsel %vm12254_vm0, 1.0, %v12104_v63 }
 0x4ec   : > { %12248 = vst [vmem:[#allocation44_spill] sm:$0xff] %v10502_v37  ;;  %v5831_v0 = vsel %vm12251_vm11, 1.0, %v12104_v63  ;;  %v3685_v34 = vsel %vm3603_vm8, %v3612_v18, 0.0  ;;  %v10520_v22 = vpop.permute.xlu2 %3626  ;;  %v5832_v19 = vsel %vm12252_vm6, 1.0, %v12104_v63  ;;  %v10536_v48 = vadd.f32 %v5708_v31, %v12255_v55  ;;  %v12262_v55 = vld [vmem:[#allocation43_spill] sm:$0xff] }
 0x4ed   : > { %v10526_v11 = vadd.f32 %v3685_v34, %v3266_v59  ;;  %5104 = vmatmul.f32.gmra.mxu2 %v4748_v28  ;;  %v3880_v44 = vadd.f32 %v5831_v0, %v12256_v1  ;;  %vm12257_vm15 = vcmp.eq.s32.totalorder %v7974_v38, %v9101_v17  ;;  %vm12258_vm11 = vcmp.eq.s32.totalorder %v7983_v39, %v9331_v56  ;;  %v12259_v59 = vld [vmem:[#allocation47_spill] sm:$0xff]  ;;  %v12264_v1 = vld [vmem:[#allocation16_spill] sm:$0xff] }
 0x4ee   : > { %5169 = vmatmul.f32.gmra.mxu3 %v4749_v29  ;;  %v4363_v13 = vpop.f32.mrf.mxu2  ;;  %v5833_v57 = vsel %vm12257_vm15, 1.0, %v12104_v63  ;;  %v5896_v62 = vsel %vm12258_vm11, 1.0, %v12104_v63  ;;  %v3881_v18 = vadd.f32 %v5832_v19, %v12259_v59  ;;  %vm12260_vm6 = vcmp.eq.s32.totalorder %v7983_v39, %v9101_v17  ;;  %v12265_v59 = vld [vmem:[#allocation49_spill] sm:$0xff] }
 0x4ef   : > { %v4428_v30 = vpop.f32.mrf.mxu3  ;;  %v5834_v28 = vsel %vm12260_vm6, 1.0, %v12104_v63  ;;  %v5959_v31 = vsel %vm4654_vm14, 1.0, %v12104_v63  ;;  %v4315_v29 = vadd.f32 %v5895_v41, %v3880_v44  ;;  %v2819_v56 = vsel %vm2733_vm4, %v12261_v24, 0.0  ;;  %v12266_v24 = vld [vmem:[#allocation96_spill] sm:$0xff] }
 0x4f0   : > { %v4429_v58 = vadd.f32 %v4428_v30, %v4363_v13  ;;  %v3946_v0 = vpop.f32.mrf.mxu0  ;;  %v4011_v34 = vpop.f32.mrf.mxu1  ;;  %v5960_v19 = vsel %vm4655_vm2, 1.0, %v12104_v63  ;;  %vm12263_vm14 = vcmp.eq.s32.totalorder %v7974_v38, %v12262_v55  ;;  %v3882_v41 = vadd.f32 %v5833_v57, %v12264_v1  ;;  %v12267_v57 = vld [vmem:[#allocation79_spill] sm:$0xff] }
 0x4f1   : > { %4041 = vperm.xlu1 %6364, %v10166_v4   ;;  %v10564_v17 = vadd.f32 %v4011_v34, %v3946_v0  ;;  %v5771_v13 = vsel %vm12263_vm14, 1.0, %v12104_v63  ;;  %v4316_v44 = vadd.f32 %v5896_v62, %v3881_v18  ;;  %v3883_v60 = vadd.f32 %v5834_v28, %v12265_v59 }
 0x4f2   : > { %v10572_v30 = vadd.f32 %v4429_v58, %v10229_v43  ;;  %4476 = vperm.xlu2 %6365, %v4426_v15   ;;  %4481 = vperm.xlu0 %6363, %v4429_v58   ;;  %v2384_v4 = vsel %vm2298_vm10, %v12266_v24, 0.0  ;;  %v4750_v0 = vadd.f32 %v5959_v31, %v4315_v29  ;;  %vm12268_vm2 = vcmp.eq.s32.totalorder %v7974_v38, %v12267_v57  ;;  %v12271_v24 = vld [vmem:[#allocation84_spill] sm:$0xff] }
 0x4f3   : > { %v10580_v34 = vadd.f32 %v10564_v17, %v10016_v53  ;;  %v3182_v37 = vpop.permute.xlu1 %3181  ;;  %v5897_v43 = vsel %vm12268_vm2, 1.0, %v12104_v63  ;;  %v2835_v62 = vadd.f32 %v2819_v56, %v2384_v4  ;;  %v4751_v15 = vadd.f32 %v5960_v19, %v4316_v44  ;;  %v12270_v19 = vld [vmem:[#allocation94_spill] sm:$0xff] }
 0x4f4   : > { %v3251_v18 = vsel %vm3168_vm13, %v3182_v37, 0.0  ;;  %v3197_v28 = vpop.permute.xlu2 %3196  ;;  %v3217_v58 = vpop.permute.xlu0 %3216  ;;  %vm12269_vm0 = vcmp.eq.s32.totalorder %v7983_v39, %v12267_v57  ;;  %v2817_v37 = vsel %vm2733_vm4, %v12270_v19, 0.0  ;;  %v3686_v1 = vsel %vm3603_vm8, %v10384_v36, 0.0  ;;  %v12273_v36 = vld [vmem:[#allocation93_spill] sm:$0xff] }
 0x4f5   : > { %v5898_v31 = vsel %vm12269_vm0, 1.0, %v12104_v63  ;;  %v3267_v53 = vadd.f32 %v3251_v18, %v10046_v5  ;;  %v3254_v29 = vsel %vm3168_vm13, %v3197_v28, 0.0  ;;  %5107 = vmatmul.f32.gmra.mxu2 %v4750_v0  ;;  %v3258_v56 = vsel %vm3168_vm13, %v3217_v58, 0.0  ;;  %v12272_v0 = vld [vmem:[#allocation87_spill] sm:$0xff] }
 0x4f6   : > { %v10603_v44 = vadd.f32 %v3254_v29, %v2835_v62  ;;  %5172 = vmatmul.f32.gmra.mxu3 %v4751_v15  ;;  %v10606_v5 = vadd.f32 %v3258_v56, %v10061_v45  ;;  %v4366_v59 = vpop.f32.mrf.mxu2  ;;  %v2379_v4 = vsel %vm2298_vm10, %v12271_v24, 0.0  ;;  %v2814_v57 = vsel %vm2733_vm4, %v12272_v0, 0.0 }
 0x4f7   : > { %v4317_v18 = vadd.f32 %v5897_v43, %v3882_v41  ;;  %v4431_v28 = vpop.f32.mrf.mxu3  ;;  %v10614_v58 = vadd.f32 %v3686_v1, %v3267_v53  ;;  %v2382_v62 = vsel %vm2298_vm10, %v12273_v36, 0.0  ;;  %vm12274_vm15 = vcmp.eq.s32.totalorder %v7974_v38, %v10258_v2 }
 0x4f8   : > { %v5961_v45 = vsel %vm12274_vm15, 1.0, %v12104_v63  ;;  %v3252_v15 = vsel %vm3168_vm13, %v10458_v50, 0.0  ;;  %v4432_v29 = vadd.f32 %v4431_v28, %v4366_v59  ;;  %v3949_v56 = vpop.f32.mrf.mxu0  ;;  %v4014_v41 = vpop.f32.mrf.mxu1  ;;  %v2833_v43 = vadd.f32 %v2817_v37, %v2382_v62  ;;  %v12280_v62 = vld [vmem:[#allocation76_spill] sm:$0xff] }
 0x4f9   : > { %vm12275_vm11 = vcmp.eq.s32.totalorder %v7983_v39, %v10258_v2  ;;  %v3249_v19 = vsel %vm3168_vm13, %v10266_v10, 0.0  ;;  %6366 = vset.pattern.permute.xlu1 %v12193_v33  ;;  %v10634_v1 = vadd.f32 %v4014_v41, %v3949_v56  ;;  %vm12276_vm6 = vcmp.eq.s32.totalorder %v7983_v39, %v12262_v55  ;;  %v6456_v2 = vld [vmem:[%s6601_s26 + $0x78] sm:$0xff]  ;;  %v12277_v55 = vld [vmem:[#allocation68_spill] sm:$0xff] }
 0x4fa   : > { %v5962_v53 = vsel %vm12275_vm11, 1.0, %v12104_v63  ;;  %v5772_v50 = vsel %vm12276_vm6, 1.0, %v12104_v63  ;;  %v2830_v59 = vadd.f32 %v2814_v57, %v2379_v4  ;;  %v4318_v37 = vadd.f32 %v5898_v31, %v3883_v60  ;;  %4046 = vperm.xlu2 %6365, %v10213_v7   ;;  %4648 = vperm.xlu1 %6366, %v6456_v2  }
 0x4fb   : > { %v10641_v24 = vadd.f32 %v4432_v29, %v10273_v9  ;;  %v3449_v10 = vadd.f32 %v5771_v13, %v10529_v35  ;;  %v4752_v0 = vadd.f32 %v5961_v45, %v4317_v18  ;;  %v3268_v33 = vadd.f32 %v3252_v15, %v2833_v43  ;;  %v3622_v36 = vpop.permute.xlu1 %3621 }
 0x4fc   : > { %v10648_v28 = vadd.f32 %v10634_v1, %v10064_v61  ;;  %vm12278_vm14 = vcmp.eq.s32.totalorder %v7974_v38, %v12277_v55  ;;  %v4753_v9 = vadd.f32 %v5962_v53, %v4318_v37  ;;  %v3265_v31 = vadd.f32 %v3249_v19, %v2830_v59  ;;  %v3607_v4 = vpop.permute.xlu0 %3606  ;;  %v12283_v19 = vld [vmem:[#allocation91_spill] sm:$0xff] }
 0x4fd   : > { %v5835_v60 = vsel %vm12278_vm14, 1.0, %v12104_v63  ;;  %v3687_v7 = vsel %vm3603_vm8, %v3622_v36, 0.0  ;;  %v3450_v35 = vadd.f32 %v5772_v50, %v10536_v48  ;;  %vm12279_vm2 = vcmp.eq.s32.totalorder %v7983_v39, %v12277_v55  ;;  %5110 = vmatmul.f32.gmra.mxu2 %v4752_v0  ;;  %v10663_v57 = vpop.permute.xlu2 %4621  ;;  %v12284_v0 = vld [vmem:[#allocation15_spill] sm:$0xff] }
 0x4fe   : > { %v5836_v61 = vsel %vm12279_vm2, 1.0, %v12104_v63  ;;  %v10661_v13 = vadd.f32 %v3687_v7, %v3268_v33  ;;  %v3684_v18 = vsel %vm3603_vm8, %v3607_v4, 0.0  ;;  %vm12281_vm0 = vcmp.eq.s32.totalorder %v7974_v38, %v12280_v62  ;;  %5175 = vmatmul.f32.gmra.mxu3 %v4753_v9  ;;  %v4369_v15 = vpop.f32.mrf.mxu2  ;;  %v12286_v9 = vld [vmem:[#allocation88_spill] sm:$0xff] }
 0x4ff   : > { %v5899_v45 = vsel %vm12281_vm0, 1.0, %v12104_v63  ;;  %vm4662_vm15 = vcmp.eq.s32.totalorder %v7974_v38, %v10663_v57  ;;  %vm4663_vm11 = vcmp.eq.s32.totalorder %v7983_v39, %v10663_v57  ;;  %v10675_v48 = vadd.f32 %v3684_v18, %v3265_v31  ;;  %v4434_v43 = vpop.f32.mrf.mxu3 }
 0x500   : > { %v3884_v56 = vadd.f32 %v5835_v60, %v3449_v10  ;;  %vm12282_vm6 = vcmp.eq.s32.totalorder %v7983_v39, %v12280_v62  ;;  %5993 = vmatmul.msk.f32.gmra.mxu0 %vm4662_vm15, %v12101_v42  ;;  %6009 = vmatmul.msk.f32.gmra.mxu1 %vm4663_vm11, %v12101_v42  ;;  %v3885_v53 = vadd.f32 %v5836_v61, %v3450_v35  ;;  %v2818_v50 = vsel %vm2733_vm4, %v12283_v19, 0.0  ;;  %v3952_v2 = vpop.f32.mrf.mxu0  ;;  %v4017_v10 = vpop.f32.mrf.mxu1  ;;  %v12287_v35 = vld [vmem:[#allocation50_spill] sm:$0xff] }
 0x501   : > { %v5900_v41 = vsel %vm12282_vm6, 1.0, %v12104_v63  ;;  %v5963_v59 = vsel %vm4658_vm12, 1.0, %v12104_v63  ;;  %v4435_v37 = vadd.f32 %v4434_v43, %v4369_v15  ;;  %vm12285_vm14 = vcmp.eq.s32.totalorder %v7983_v39, %v12284_v0  ;;  %v12289_v15 = vld [vmem:[#allocation18_spill] sm:$0xff]  ;;  %v12295_v0 = vld [vmem:[#allocation11_spill] sm:$0xff] }
 0x502   : > { %v5710_v33 = vsel %vm12285_vm14, 1.0, %v12104_v63  ;;  %v4319_v36 = vadd.f32 %v5899_v45, %v3884_v56  ;;  %v5964_v55 = vsel %vm4659_vm7, 1.0, %v12104_v63  ;;  %v10704_v60 = vadd.f32 %v4017_v10, %v3952_v2  ;;  %6367 = vset.pattern.permute.xlu1 %v12152_v25 }
 0x503   : > { %v2383_v31 = vsel %vm2298_vm10, %v12286_v9, 0.0  ;;  %v4320_v7 = vadd.f32 %v5900_v41, %v3885_v53  ;;  %v10710_v4 = vadd.f32 %v4435_v37, %v10319_v26  ;;  %4491 = vperm.xlu2 %6365, %v4435_v37   ;;  %vm12288_vm4 = vcmp.eq.s32.totalorder %v7983_v39, %v12287_v35  ;;  %4486 = vperm.xlu1 %6367, %v4432_v29   ;;  %v3192_v45 = vpop.permute.xlu1 %3191  ;;  %v12290_v26 = vld [vmem:[#allocation63_spill] sm:$0xff]  ;;  %v12300_v35 = vld [vmem:[#allocation14_spill] sm:$0xff] }
 0x504   : > { %v5774_v61 = vsel %vm12288_vm4, 1.0, %v12104_v63  ;;  %v2834_v23 = vadd.f32 %v2818_v50, %v2383_v31  ;;  %v4754_v18 = vadd.f32 %v5963_v59, %v4319_v36  ;;  %v10719_v62 = vadd.f32 %v10704_v60, %v10119_v32  ;;  %v3632_v53 = vpop.permute.xlu0 %3631  ;;  %v12293_v59 = vld [vmem:[#allocation74_spill] sm:$0xff] }
 0x505   : > { %v3017_v56 = vadd.f32 %v5710_v33, %v12289_v15  ;;  %vm12291_vm10 = vcmp.eq.s32.totalorder %v7974_v38, %v12290_v26  ;;  %v4755_v41 = vadd.f32 %v5964_v55, %v4320_v7  ;;  %v3253_v43 = vsel %vm3168_vm13, %v3192_v45, 0.0  ;;  %v12298_v55 = vld [vmem:[#allocation53_spill] sm:$0xff] }
 0x506   : > { %v5837_v25 = vsel %vm12291_vm10, 1.0, %v12104_v63  ;;  %vm12292_vm12 = vcmp.eq.s32.totalorder %v7983_v39, %v12290_v26  ;;  %v3269_v19 = vadd.f32 %v3253_v43, %v2834_v23  ;;  %5113 = vmatmul.f32.gmra.mxu2 %v4754_v18  ;;  %v3689_v29 = vsel %vm3603_vm8, %v3632_v53, 0.0  ;;  %v12303_v53 = vld [vmem:[#allocation20_spill] sm:$0xff] }
 0x507   : > { %v5838_v32 = vsel %vm12292_vm12, 1.0, %v12104_v63  ;;  %v3452_v50 = vadd.f32 %v5774_v61, %v3017_v56  ;;  %vm12294_vm7 = vcmp.eq.s32.totalorder %v7974_v38, %v12293_v59  ;;  %v3688_v2 = vsel %vm3603_vm8, %v10520_v22, 0.0  ;;  %5178 = vmatmul.f32.gmra.mxu3 %v4755_v41  ;;  %v10753_v31 = vpop.permute.xlu2 %3641  ;;  %v4372_v7 = vpop.f32.mrf.mxu2 }
 0x508   : > { %v5901_v37 = vsel %vm12294_vm7, 1.0, %v12104_v63  ;;  %v10742_v10 = vadd.f32 %v3689_v29, %v10603_v44  ;;  %vm12296_vm2 = vcmp.eq.s32.totalorder %v7974_v38, %v12295_v0  ;;  %vm12297_vm0 = vcmp.eq.s32.totalorder %v7983_v39, %v12293_v59  ;;  %v4437_v45 = vpop.f32.mrf.mxu3  ;;  %v3955_v15 = vpop.f32.mrf.mxu0 }
 0x509   : > { %v5587_v33 = vsel %vm12296_vm2, 1.0, %v12104_v63  ;;  %v5902_v36 = vsel %vm12297_vm0, 1.0, %v12104_v63  ;;  %v3886_v9 = vadd.f32 %v5837_v25, %v12298_v55  ;;  %v10755_v22 = vadd.f32 %v3688_v2, %v3269_v19  ;;  %v4020_v43 = vpop.f32.mrf.mxu1  ;;  %v12305_v19 = vld [vmem:[#allocation48_spill] sm:$0xff] }
 0x50a   : > { %vm12299_vm6 = vcmp.eq.s32.totalorder %v7983_v39, %v12295_v0  ;;  %vm12301_vm14 = vcmp.eq.s32.totalorder %v7974_v38, %v12300_v35  ;;  %v3887_v23 = vadd.f32 %v5838_v32, %v3452_v50  ;;  %v5965_v18 = vsel %vm4660_vm3, 1.0, %v12104_v63 }
 0x50b   : > { %v10761_v44 = vsel %vm12299_vm6, 1.0, %v12104_v63  ;;  %v5711_v61 = vsel %vm12301_vm14, 1.0, %v12104_v63  ;;  %vm12302_vm4 = vcmp.eq.s32.totalorder %v7983_v39, %v12300_v35  ;;  %v4321_v26 = vadd.f32 %v5901_v37, %v3886_v9  ;;  %4061 = vperm.xlu2 %6365, %v10349_v52   ;;  %v12307_v37 = vld [vmem:[#allocation26_spill] sm:$0xff]  ;;  %4056 = vperm.xlu1 %6367, %v10300_v46   ;;  %v12309_v9 = vld [vmem:[#allocation27_spill] sm:$0xff] }
 0x50c   : > { %v5712_v56 = vsel %vm12302_vm4, 1.0, %v12104_v63  ;;  %v5966_v25 = vsel %vm4661_vm9, 1.0, %v12104_v63  ;;  %v4438_v41 = vadd.f32 %v4437_v45, %v4372_v7  ;;  %vm12304_vm10 = vcmp.eq.s32.totalorder %v7974_v38, %v12303_v53 }
 0x50d   : > { %v5651_v32 = vsel %vm12304_vm10, 1.0, %v12104_v63  ;;  %vm12306_vm3 = vcmp.eq.s32.totalorder %v7974_v38, %v12305_v19  ;;  %v4322_v50 = vadd.f32 %v5902_v36, %v3887_v23  ;;  %v10787_v59 = vadd.f32 %v4020_v43, %v3955_v15  ;;  %v12310_v36 = vld [vmem:[#allocation61_spill] sm:$0xff]  ;;  %v10808_v23 = vpop.permute.xlu1 %4624 }
 0x50e   : > { %v5775_v29 = vsel %vm12306_vm3, 1.0, %v12104_v63  ;;  %v3018_v21 = vadd.f32 %v5711_v61, %v12307_v37  ;;  %vm12308_vm9 = vcmp.eq.s32.totalorder %v7983_v39, %v12305_v19  ;;  %v4756_v0 = vadd.f32 %v5965_v18, %v4321_v26 }
 0x50f   : > { %v5776_v2 = vsel %vm12308_vm9, 1.0, %v12104_v63  ;;  %v10796_v55 = vadd.f32 %v4438_v41, %v10366_v49  ;;  %v3019_v7 = vadd.f32 %v5712_v56, %v12309_v9  ;;  %vm12311_vm12 = vcmp.eq.s32.totalorder %v7974_v38, %v12310_v36  ;;  %v3232_v49 = vpop.permute.xlu0 %3231 }
 0x510   : > { %v5839_v52 = vsel %vm12311_vm12, 1.0, %v12104_v63  ;;  %v4757_v35 = vadd.f32 %v5966_v25, %v4322_v50  ;;  %v10806_v61 = vadd.f32 %v10787_v59, %v10174_v3  ;;  %v3453_v18 = vadd.f32 %v5775_v29, %v3018_v21  ;;  %5116 = vmatmul.f32.gmra.mxu2 %v4756_v0  ;;  %v12313_v3 = vld [vmem:[#allocation82_spill] sm:$0xff]  ;;  %v3212_v29 = vpop.permute.xlu2 %3211  ;;  %v4375_v50 = vpop.f32.mrf.mxu2 }
 0x511   : > { %vm12312_vm7 = vcmp.eq.s32.totalorder %v7983_v39, %v12310_v36  ;;  %vm4664_vm2 = vcmp.eq.s32.totalorder %v7974_v38, %v10808_v23  ;;  %vm4665_vm0 = vcmp.eq.s32.totalorder %v7983_v39, %v10808_v23  ;;  %v2587_v45 = vadd.f32 %v5651_v32, %v5587_v33  ;;  %v12315_v25 = vld [vmem:[#allocation34_spill] sm:$0xff]  ;;  %v4440_v0 = vpop.f32.mrf.mxu3  ;;  %v3958_v9 = vpop.f32.mrf.mxu0 }
 0x512   : > { %v5840_v46 = vsel %vm12312_vm7, 1.0, %v12104_v63  ;;  %v3454_v15 = vadd.f32 %v5776_v2, %v3019_v7  ;;  %vm12314_vm6 = vcmp.eq.s32.totalorder %v7974_v38, %v12313_v3  ;;  %5181 = vmatmul.f32.gmra.mxu3 %v4757_v35  ;;  %v3261_v26 = vsel %vm3168_vm13, %v3232_v49, 0.0  ;;  %5994 = vmatmul.msk.f32.gmra.mxu0 %vm4664_vm2, %v12101_v42  ;;  %v12320_v49 = vld [vmem:[#allocation52_spill] sm:$0xff] }
 0x513   : > { %v5903_v56 = vsel %vm12314_vm6, 1.0, %v12104_v63  ;;  %vm12316_vm14 = vcmp.eq.s32.totalorder %v7974_v38, %v12315_v25  ;;  %v3888_v43 = vadd.f32 %v5839_v52, %v3453_v18  ;;  %vm12317_vm4 = vcmp.eq.s32.totalorder %v7983_v39, %v12313_v3  ;;  %6010 = vmatmul.msk.f32.gmra.mxu1 %vm4665_vm0, %v12101_v42  ;;  %v4023_v18 = vpop.f32.mrf.mxu1  ;;  %4496 = vperm.xlu1 %6367, %v4438_v41   ;;  %v12329_v41 = vld [vmem:[#allocation37_spill] sm:$0xff] }
 0x514   : > { %v5713_v33 = vsel %vm12316_vm14, 1.0, %v12104_v63  ;;  %v5904_v32 = vsel %vm12317_vm4, 1.0, %v12104_v63  ;;  %v10837_v19 = vadd.f32 %v3261_v26, %v10211_v51  ;;  %vm12318_vm10 = vcmp.eq.s32.totalorder %v7983_v39, %v12315_v25  ;;  %v12322_v26 = vld [vmem:[#allocation25_spill] sm:$0xff] }
 0x515   : > { %v5714_v37 = vsel %vm12318_vm10, 1.0, %v12104_v63  ;;  %v3889_v21 = vadd.f32 %v5840_v46, %v3454_v15  ;;  %v5967_v2 = vsel %vm4662_vm15, 1.0, %v12104_v63  ;;  %v3257_v51 = vsel %vm3168_vm13, %v3212_v29, 0.0 }
 0x516   : > { %v4323_v7 = vadd.f32 %v5903_v56, %v3888_v43  ;;  %v5968_v36 = vsel %vm4663_vm11, 1.0, %v12104_v63  ;;  %v3273_v52 = vadd.f32 %v3257_v51, %v10009_v8  ;;  %v4441_v35 = vadd.f32 %v4440_v0, %v4375_v50  ;;  %v12327_v0 = vld [vmem:[#allocation86_spill] sm:$0xff] }
 0x517   : > { %vm12319_vm3 = vcmp.eq.s32.totalorder %v7983_v39, %v12303_v53  ;;  %vm12321_vm15 = vcmp.eq.s32.totalorder %v7974_v38, %v12320_v49  ;;  %v4324_v3 = vadd.f32 %v5904_v32, %v3889_v21  ;;  %v10866_v56 = vadd.f32 %v4023_v18, %v3958_v9  ;;  %v12324_v53 = vld [vmem:[#allocation28_spill] sm:$0xff]  ;;  %v12325_v32 = vld [vmem:[#allocation71_spill] sm:$0xff] }
 0x518   : > { %v5652_v46 = vsel %vm12319_vm3, 1.0, %v12104_v63  ;;  %v5777_v15 = vsel %vm12321_vm15, 1.0, %v12104_v63  ;;  %v3020_v57 = vadd.f32 %v5713_v33, %v12322_v26  ;;  %vm12323_vm11 = vcmp.eq.s32.totalorder %v7983_v39, %v12320_v49  ;;  %4501 = vperm.xlu2 %6365, %v4441_v35   ;;  %v12334_v49 = vld [vmem:[#allocation36_spill] sm:$0xff] }
 0x519   : > { %v5778_v8 = vsel %vm12323_vm11, 1.0, %v12104_v63  ;;  %v4758_v25 = vadd.f32 %v5967_v2, %v4323_v7  ;;  %v10874_v43 = vadd.f32 %v4441_v35, %v10444_v12  ;;  %v3021_v29 = vadd.f32 %v5714_v37, %v12324_v53 }
 0x51a   : > { %vm12326_vm9 = vcmp.eq.s32.totalorder %v7974_v38, %v12325_v32  ;;  %v4759_v21 = vadd.f32 %v5968_v36, %v4324_v3  ;;  %v10883_v33 = vadd.f32 %v10866_v56, %v10218_v14  ;;  %v2588_v51 = vadd.f32 %v5652_v46, %v10761_v44  ;;  %v3637_v44 = vpop.permute.xlu1 %3636  ;;  %v4378_v46 = vpop.f32.mrf.mxu2 }
 0x51b   : > { %v5841_v50 = vsel %vm12326_vm9, 1.0, %v12104_v63  ;;  %v3455_v2 = vadd.f32 %v5777_v15, %v3020_v57  ;;  %vm4666_vm12 = vcmp.eq.s32.totalorder %v7974_v38, %v12327_v0  ;;  %vm12328_vm7 = vcmp.eq.s32.totalorder %v7983_v39, %v12325_v32  ;;  %5119 = vmatmul.f32.gmra.mxu2 %v4758_v25  ;;  %v4443_v57 = vpop.f32.mrf.mxu3  ;;  %v10935_v32 = vpop.permute.xlu2 %4633  ;;  %4066 = vperm.xlu1 %6367, %v10425_v20  }
 0x51c   : > { %v5842_v12 = vsel %vm12328_vm7, 1.0, %v12104_v63  ;;  %vm12330_vm6 = vcmp.eq.s32.totalorder %v7974_v38, %v12329_v41  ;;  %v3456_v9 = vadd.f32 %v5778_v8, %v3021_v29  ;;  %vm4667_vm14 = vcmp.eq.s32.totalorder %v7983_v39, %v12327_v0  ;;  %5184 = vmatmul.f32.gmra.mxu3 %v4759_v21  ;;  %5995 = vmatmul.msk.f32.gmra.mxu0 %vm4666_vm12, %v12101_v42  ;;  %v3961_v8 = vpop.f32.mrf.mxu0  ;;  %v4026_v21 = vpop.f32.mrf.mxu1  ;;  %v12350_v0 = vld [vmem:[#allocation31_spill] sm:$0xff] }
 0x51d   : > { %v5715_v37 = vsel %vm12330_vm6, 1.0, %v12104_v63  ;;  %vm12331_vm4 = vcmp.eq.s32.totalorder %v7974_v38, %v9421_v40  ;;  %vm12332_vm10 = vcmp.eq.s32.totalorder %v7983_v39, %v12329_v41  ;;  %v3890_v36 = vadd.f32 %v5841_v50, %v3455_v2  ;;  %6011 = vmatmul.msk.f32.gmra.mxu1 %vm4667_vm14, %v12101_v42 }
 0x51e   : > { %v5905_v14 = vsel %vm12331_vm4, 1.0, %v12104_v63  ;;  %v5716_v7 = vsel %vm12332_vm10, 1.0, %v12104_v63  ;;  %vm12333_vm3 = vcmp.eq.s32.totalorder %v7983_v39, %v9421_v40  ;;  %v3690_v18 = vsel %vm3603_vm8, %v3637_v44, 0.0  ;;  %v12339_v44 = vld [vmem:[#allocation66_spill] sm:$0xff] }
 0x51f   : > { %v5906_v35 = vsel %vm12333_vm3, 1.0, %v12104_v63  ;;  %vm12335_vm15 = vcmp.eq.s32.totalorder %v7974_v38, %v12334_v49  ;;  %v3891_v3 = vadd.f32 %v5842_v12, %v3456_v9  ;;  %v5969_v40 = vsel %vm4664_vm2, 1.0, %v12104_v63  ;;  %v12336_v12 = vld [vmem:[#allocation57_spill] sm:$0xff] }
 0x520   : > { %v5717_v15 = vsel %vm12335_vm15, 1.0, %v12104_v63  ;;  %v10929_v26 = vadd.f32 %v3690_v18, %v10399_v16  ;;  %v3022_v25 = vadd.f32 %v5715_v37, %v2587_v45  ;;  %v4325_v53 = vadd.f32 %v5905_v14, %v3890_v36  ;;  %v3647_v45 = vpop.permute.xlu0 %3646  ;;  %4071 = vperm.xlu2 %6365, %v10495_v27  }
 0x521   : > { %v5970_v29 = vsel %vm4665_vm0, 1.0, %v12104_v63  ;;  %v4444_v50 = vadd.f32 %v4443_v57, %v4378_v46  ;;  %v3023_v2 = vadd.f32 %v5716_v7, %v2588_v51  ;;  %vm12337_vm2 = vcmp.eq.s32.totalorder %v7974_v38, %v12336_v12 }
 0x522   : > { %v5779_v16 = vsel %vm12337_vm2, 1.0, %v12104_v63  ;;  %v4326_v41 = vadd.f32 %v5906_v35, %v3891_v3  ;;  %v10941_v9 = vadd.f32 %v4026_v21, %v3961_v8  ;;  %vm12338_vm11 = vcmp.eq.s32.totalorder %v7983_v39, %v12336_v12  ;;  %v12344_v3 = vld [vmem:[#allocation30_spill] sm:$0xff]  ;;  %v12348_v21 = vld [vmem:[#allocation77_spill] sm:$0xff] }
 0x523   : > { %v5780_v23 = vsel %vm12338_vm11, 1.0, %v12104_v63  ;;  %v4760_v37 = vadd.f32 %v5969_v40, %v4325_v53  ;;  %v10948_v14 = vadd.f32 %v4444_v50, %v10508_v54  ;;  %v3692_v51 = vsel %vm3603_vm8, %v3647_v45, 0.0  ;;  %4506 = vperm.xlu0 %6363, %v4444_v50   ;;  %v12346_v53 = vld [vmem:[#allocation51_spill] sm:$0xff] }
 0x524   : > { %vm12340_vm0 = vcmp.eq.s32.totalorder %v7974_v38, %v12339_v44  ;;  %v4761_v36 = vadd.f32 %v5970_v29, %v4326_v41  ;;  %v10960_v35 = vadd.f32 %v10941_v9, %v10264_v47  ;;  %v10962_v54 = vadd.f32 %v3692_v51, %v3273_v52  ;;  %v3207_v52 = vpop.permute.xlu1 %3206  ;;  %v3964_v12 = vpop.f32.mrf.mxu0 }
 0x525   : > { %v5843_v7 = vsel %vm12340_vm0, 1.0, %v12104_v63  ;;  %v3457_v18 = vadd.f32 %v5779_v16, %v3022_v25  ;;  %vm12341_vm9 = vcmp.eq.s32.totalorder %v7983_v39, %v12339_v44  ;;  %5122 = vmatmul.f32.gmra.mxu2 %v4760_v37  ;;  %vm12342_vm7 = vcmp.eq.s32.totalorder %v7983_v39, %v12334_v49  ;;  %v4381_v25 = vpop.f32.mrf.mxu2  ;;  %v11003_v44 = vpop.permute.xlu2 %3656 }
 0x526   : > { %v5844_v20 = vsel %vm12341_vm9, 1.0, %v12104_v63  ;;  %v5718_v27 = vsel %vm12342_vm7, 1.0, %v12104_v63  ;;  %vm12343_vm6 = vcmp.eq.s32.totalorder %v7974_v38, %v12216_v6  ;;  %v3458_v46 = vadd.f32 %v5780_v23, %v3023_v2  ;;  %5187 = vmatmul.f32.gmra.mxu3 %v4761_v36  ;;  %v4029_v23 = vpop.f32.mrf.mxu1 }
 0x527   : > { %v5907_v47 = vsel %vm12343_vm6, 1.0, %v12104_v63  ;;  %v3024_v40 = vadd.f32 %v5717_v15, %v12344_v3  ;;  %vm12345_vm4 = vcmp.eq.s32.totalorder %v7983_v39, %v12216_v6  ;;  %v3892_v8 = vadd.f32 %v5843_v7, %v3457_v18  ;;  %v4446_v6 = vpop.f32.mrf.mxu3 }
 0x528   : > { %v5908_v57 = vsel %vm12345_vm4, 1.0, %v12104_v63  ;;  %v3256_v49 = vsel %vm3168_vm13, %v3207_v52, 0.0  ;;  %vm12347_vm10 = vcmp.eq.s32.totalorder %v7974_v38, %v12346_v53  ;;  %v5971_v15 = vsel %vm4666_vm12, 1.0, %v12104_v63  ;;  %4086 = vperm.xlu2 %6365, %v10704_v60   ;;  %v12355_v60 = vld [vmem:[#allocation35_spill] sm:$0xff] }
 0x529   : > { %v5781_v29 = vsel %vm12347_vm10, 1.0, %v12104_v63  ;;  %v3893_v50 = vadd.f32 %v5844_v20, %v3458_v46  ;;  %v3272_v2 = vadd.f32 %v3256_v49, %v12348_v21  ;;  %v5972_v16 = vsel %vm4667_vm14, 1.0, %v12104_v63 }
 0x52a   : > { %v3691_v41 = vsel %vm3603_vm8, %v10753_v31, 0.0  ;;  %v4447_v45 = vadd.f32 %v4446_v6, %v4381_v25  ;;  %v4327_v37 = vadd.f32 %v5907_v47, %v3892_v8  ;;  %vm12349_vm12 = vcmp.eq.s32.totalorder %v7983_v39, %v12346_v53  ;;  %v12351_v47 = vld [vmem:[#allocation64_spill] sm:$0xff] }
 0x52b   : > { %v5782_v51 = vsel %vm12349_vm12, 1.0, %v12104_v63  ;;  %v11005_v7 = vadd.f32 %v4029_v23, %v3964_v12  ;;  %v4328_v36 = vadd.f32 %v5908_v57, %v3893_v50  ;;  %v11007_v18 = vadd.f32 %v3691_v41, %v3272_v2  ;;  %v12354_v57 = vld [vmem:[#allocation103_spill] sm:$0xff]  ;;  %4076 = vperm.xlu0 %6363, %v10564_v17   ;;  %v12357_v53 = vld [vmem:[#allocation12_spill] sm:$0xff]  ;;  %v12359_v50 = vld [vmem:[#allocation90_spill] sm:$0xff] }
 0x52c   : > { %v3025_v20 = vadd.f32 %v5718_v27, %v12350_v0  ;;  %v11011_v46 = vadd.f32 %v4447_v45, %v10580_v34  ;;  %4511 = vperm.xlu1 %6367, %v4447_v45   ;;  %v4762_v31 = vadd.f32 %v5971_v15, %v4327_v37  ;;  %vm12352_vm14 = vcmp.eq.s32.totalorder %v7974_v38, %v12351_v47  ;;  %v12366_v41 = vld [vmem:[#allocation8_spill] sm:$0xff]  ;;  %v12368_v37 = vld [vmem:[#allocation54_spill] sm:$0xff] }
 0x52d   : > { %v5845_v52 = vsel %vm12352_vm14, 1.0, %v12104_v63  ;;  %vm12353_vm3 = vcmp.eq.s32.totalorder %v7983_v39, %v12351_v47  ;;  %v11024_v27 = vadd.f32 %v11005_v7, %v12354_v57  ;;  %v4763_v34 = vadd.f32 %v5972_v16, %v4328_v36  ;;  %v4631_v36 = vpop.permute.xlu1 %4630  ;;  %v4384_v0 = vpop.f32.mrf.mxu2 }
 0x52e   : > { %v5846_v3 = vsel %vm12353_vm3, 1.0, %v12104_v63  ;;  %vm12356_vm15 = vcmp.eq.s32.totalorder %v7974_v38, %v12355_v60  ;;  %v3459_v49 = vadd.f32 %v5781_v29, %v3024_v40  ;;  %v3460_v25 = vadd.f32 %v5782_v51, %v3025_v20  ;;  %5125 = vmatmul.f32.gmra.mxu2 %v4762_v31  ;;  %v12363_v29 = vld [vmem:[#allocation21_spill] sm:$0xff] }
 0x52f   : > { %v5719_v8 = vsel %vm12356_vm15, 1.0, %v12104_v63  ;;  %vm12358_vm2 = vcmp.eq.s32.totalorder %v7974_v38, %v12357_v53  ;;  %vm12360_vm11 = vcmp.eq.s32.totalorder %v7974_v38, %v12359_v50  ;;  %vm12361_vm0 = vcmp.eq.s32.totalorder %v7983_v39, %v12359_v50  ;;  %5190 = vmatmul.f32.gmra.mxu3 %v4763_v34  ;;  %v4449_v47 = vpop.f32.mrf.mxu3 }
 0x530   : > { %v5593_v15 = vsel %vm12358_vm2, 1.0, %v12104_v63  ;;  %v5909_v21 = vsel %vm12360_vm11, 1.0, %v12104_v63  ;;  %v5910_v17 = vsel %vm12361_vm0, 1.0, %v12104_v63  ;;  %vm12362_vm9 = vcmp.eq.s32.totalorder %v7983_v39, %v12357_v53 }
 0x531   : > { %v5594_v40 = vsel %vm12362_vm9, 1.0, %v12104_v63  ;;  %vm12364_vm7 = vcmp.eq.s32.totalorder %v7974_v38, %v12363_v29  ;;  %v3894_v6 = vadd.f32 %v5845_v52, %v3459_v49  ;;  %v3895_v12 = vadd.f32 %v5846_v3, %v3460_v25  ;;  %v3967_v52 = vpop.f32.mrf.mxu0  ;;  %v4032_v49 = vpop.f32.mrf.mxu1 }
 0x532   : > { %v5657_v2 = vsel %vm12364_vm7, 1.0, %v12104_v63  ;;  %vm12365_vm6 = vcmp.eq.s32.totalorder %v7983_v39, %v12363_v29  ;;  %v3026_v45 = vadd.f32 %v5719_v8, %v12366_v41  ;;  %vm12367_vm4 = vcmp.eq.s32.totalorder %v7983_v39, %v12355_v60  ;;  %v3227_v8 = vpop.permute.xlu2 %3226 }
 0x533   : > { %v5658_v16 = vsel %vm12365_vm6, 1.0, %v12104_v63  ;;  %v5720_v23 = vsel %vm12367_vm4, 1.0, %v12104_v63  ;;  %vm12369_vm10 = vcmp.eq.s32.totalorder %v7974_v38, %v12368_v37  ;;  %v4329_v20 = vadd.f32 %v5909_v21, %v3894_v6  ;;  %v12372_v6 = vld [vmem:[#allocation73_spill] sm:$0xff] }
 0x534   : > { %v5783_v51 = vsel %vm12369_vm10, 1.0, %v12104_v63  ;;  %v4330_v31 = vadd.f32 %v5910_v17, %v3895_v12  ;;  %vm4668_vm12 = vcmp.eq.s32.totalorder %v7974_v38, %v4631_v36  ;;  %vm4669_vm14 = vcmp.eq.s32.totalorder %v7983_v39, %v4631_v36  ;;  %4081 = vperm.xlu1 %6367, %v10634_v1   ;;  %v12371_v17 = vld [vmem:[#allocation29_spill] sm:$0xff] }
 0x535   : > { %vm12370_vm3 = vcmp.eq.s32.totalorder %v7983_v39, %v12368_v37  ;;  %v5973_v57 = vsel %vm4668_vm12, 1.0, %v12104_v63  ;;  %v5974_v34 = vsel %vm4669_vm14, 1.0, %v12104_v63  ;;  %v4450_v60 = vadd.f32 %v4449_v47, %v4384_v0  ;;  %5996 = vmatmul.msk.f32.gmra.mxu0 %vm4668_vm12, %v12101_v42  ;;  %6012 = vmatmul.msk.f32.gmra.mxu1 %vm4669_vm14, %v12101_v42  ;;  %v12374_v37 = vld [vmem:[#allocation101_spill] sm:$0xff] }
 0x536   : > { %v5784_v3 = vsel %vm12370_vm3, 1.0, %v12104_v63  ;;  %v4764_v25 = vadd.f32 %v5973_v57, %v4329_v20  ;;  %v4765_v53 = vadd.f32 %v5974_v34, %v4330_v31  ;;  %v3260_v50 = vsel %vm3168_vm13, %v3227_v8, 0.0  ;;  %v12376_v1 = vld [vmem:[#allocation105_spill] sm:$0xff] }
 0x537   : > { %v11076_v21 = vadd.f32 %v4032_v49, %v3967_v52  ;;  %v3027_v29 = vadd.f32 %v5720_v23, %v12371_v17  ;;  %vm12373_vm15 = vcmp.eq.s32.totalorder %v7974_v38, %v12372_v6  ;;  %v11085_v41 = vadd.f32 %v4450_v60, %v10648_v28  ;;  %v12377_v28 = vld [vmem:[#allocation39_spill] sm:$0xff] }
 0x538   : > { %v5847_v12 = vsel %vm12373_vm15, 1.0, %v12104_v63  ;;  %v3276_v36 = vadd.f32 %v3260_v50, %v12374_v37  ;;  %v3461_v0 = vadd.f32 %v5783_v51, %v3026_v45  ;;  %vm12375_vm2 = vcmp.eq.s32.totalorder %v7983_v39, %v12372_v6  ;;  %5128 = vmatmul.f32.gmra.mxu2 %v4764_v25  ;;  %v12379_v45 = vld [vmem:[#allocation85_spill] sm:$0xff]  ;;  %5193 = vmatmul.f32.gmra.mxu3 %v4765_v53  ;;  %v4387_v53 = vpop.f32.mrf.mxu2 }
 0x539   : > { %v5848_v20 = vsel %vm12375_vm2, 1.0, %v12104_v63  ;;  %vm4670_vm11 = vcmp.eq.s32.totalorder %v7974_v38, %v10935_v32  ;;  %v11096_v23 = vadd.f32 %v11076_v21, %v12376_v1  ;;  %vm12378_vm0 = vcmp.eq.s32.totalorder %v7974_v38, %v12377_v28  ;;  %v4035_v1 = vpop.f32.mrf.mxu1 }
 0x53a   : > { %v5721_v31 = vsel %vm12378_vm0, 1.0, %v12104_v63  ;;  %v3462_v47 = vadd.f32 %v5784_v3, %v3027_v29  ;;  %vm12380_vm9 = vcmp.eq.s32.totalorder %v7974_v38, %v12379_v45  ;;  %vm4671_vm7 = vcmp.eq.s32.totalorder %v7983_v39, %v10935_v32 }
 0x53b   : > { %v5911_v51 = vsel %vm12380_vm9, 1.0, %v12104_v63  ;;  %v2593_v52 = vadd.f32 %v5657_v2, %v5593_v15  ;;  %vm12381_vm6 = vcmp.eq.s32.totalorder %v7983_v39, %v12377_v28  ;;  %v3896_v34 = vadd.f32 %v5847_v12, %v3461_v0  ;;  %v12383_v2 = vld [vmem:[#allocation60_spill] sm:$0xff] }
 0x53c   : > { %v5722_v57 = vsel %vm12381_vm6, 1.0, %v12104_v63  ;;  %vm12382_vm4 = vcmp.eq.s32.totalorder %v7983_v39, %v12379_v45  ;;  %v2594_v8 = vadd.f32 %v5658_v16, %v5594_v40  ;;  %v3897_v49 = vadd.f32 %v5848_v20, %v3462_v47  ;;  %v4452_v40 = vpop.f32.mrf.mxu3  ;;  %v3652_v16 = vpop.permute.xlu1 %3651  ;;  %4516 = vperm.xlu1 %6367, %v4450_v60  }
 0x53d   : > { %v5912_v3 = vsel %vm12382_vm4, 1.0, %v12104_v63  ;;  %v5975_v25 = vsel %vm4670_vm11, 1.0, %v12104_v63  ;;  %v3028_v15 = vadd.f32 %v5721_v31, %v2593_v52  ;;  %vm12384_vm10 = vcmp.eq.s32.totalorder %v7974_v38, %v12383_v2  ;;  %v3970_v20 = vpop.f32.mrf.mxu0  ;;  %5997 = vmatmul.msk.f32.gmra.mxu0 %vm4670_vm11, %v12101_v42  ;;  %6013 = vmatmul.msk.f32.gmra.mxu1 %vm4671_vm7, %v12101_v42 }
 0x53e   : > { %v5785_v50 = vsel %vm12384_vm10, 1.0, %v12104_v63  ;;  %v4331_v17 = vadd.f32 %v5911_v51, %v3896_v34  ;;  %v5976_v29 = vsel %vm4671_vm7, 1.0, %v12104_v63  ;;  %v3029_v6 = vadd.f32 %v5722_v57, %v2594_v8  ;;  %v4637_v51 = vpop.permute.xlu2 %4636  ;;  %v12386_v57 = vld [vmem:[#allocation69_spill] sm:$0xff]  ;;  %v3662_v8 = vpop.permute.xlu0 %3661 }
 0x53f   : > { %v4332_v12 = vadd.f32 %v5912_v3, %v3897_v49  ;;  %v4453_v37 = vadd.f32 %v4452_v40, %v4387_v53  ;;  %v3693_v0 = vsel %vm3603_vm8, %v3652_v16, 0.0  ;;  %vm12385_vm12 = vcmp.eq.s32.totalorder %v7983_v39, %v12383_v2  ;;  %v12389_v49 = vld [vmem:[#allocation58_spill] sm:$0xff] }
 0x540   : > { %v5786_v28 = vsel %vm12385_vm12, 1.0, %v12104_v63  ;;  %v4766_v31 = vadd.f32 %v5975_v25, %v4331_v17  ;;  %v11143_v47 = vadd.f32 %v3693_v0, %v10606_v5  ;;  %v11145_v45 = vadd.f32 %v4035_v1, %v3970_v20  ;;  %v4390_v16 = vpop.f32.mrf.mxu2 }
 0x541   : > { %v3463_v52 = vadd.f32 %v5785_v50, %v3028_v15  ;;  %vm12387_vm14 = vcmp.eq.s32.totalorder %v7974_v38, %v12386_v57  ;;  %v4767_v34 = vadd.f32 %v5976_v29, %v4332_v12  ;;  %v11152_v3 = vadd.f32 %v4453_v37, %v10719_v62  ;;  %4521 = vperm.xlu0 %6363, %v4453_v37   ;;  %v12390_v62 = vld [vmem:[#allocation78_spill] sm:$0xff] }
 0x542   : > { %v5849_v32 = vsel %vm12387_vm14, 1.0, %v12104_v63  ;;  %vm12388_vm3 = vcmp.eq.s32.totalorder %v7983_v39, %v12386_v57  ;;  %v11160_v60 = vadd.f32 %v11145_v45, %v12389_v49  ;;  %vm4672_vm15 = vcmp.eq.s32.totalorder %v7974_v38, %v4637_v51  ;;  %5131 = vmatmul.f32.gmra.mxu2 %v4766_v31  ;;  %v12393_v31 = vld [vmem:[#allocation100_spill] sm:$0xff] }
 0x543   : > { %v5850_v5 = vsel %vm12388_vm3, 1.0, %v12104_v63  ;;  %v3695_v25 = vsel %vm3603_vm8, %v3662_v8, 0.0  ;;  %vm12391_vm2 = vcmp.eq.s32.totalorder %v7974_v38, %v12390_v62  ;;  %v3464_v15 = vadd.f32 %v5786_v28, %v3029_v6  ;;  %5196 = vmatmul.f32.gmra.mxu3 %v4767_v34 }
 0x544   : > { %v5913_v53 = vsel %vm12391_vm2, 1.0, %v12104_v63  ;;  %vm4673_vm11 = vcmp.eq.s32.totalorder %v7983_v39, %v4637_v51  ;;  %v11170_v2 = vadd.f32 %v3695_v25, %v3276_v36  ;;  %vm12392_vm0 = vcmp.eq.s32.totalorder %v7983_v39, %v12390_v62  ;;  %v4455_v37 = vpop.f32.mrf.mxu3  ;;  %v3222_v36 = vpop.permute.xlu1 %3221  ;;  %4096 = vperm.xlu1 %6367, %v10866_v56   ;;  %v12394_v56 = vld [vmem:[#allocation32_spill] sm:$0xff]  ;;  %v12398_v62 = vld [vmem:[#allocation17_spill] sm:$0xff] }
 0x545   : > { %v5914_v50 = vsel %vm12392_vm0, 1.0, %v12104_v63  ;;  %v3898_v17 = vadd.f32 %v5849_v32, %v3463_v52  ;;  %v3899_v29 = vadd.f32 %v5850_v5, %v3464_v15  ;;  %v5977_v40 = vsel %vm4672_vm15, 1.0, %v12104_v63  ;;  %5998 = vmatmul.msk.f32.gmra.mxu0 %vm4672_vm15, %v12101_v42  ;;  %6014 = vmatmul.msk.f32.gmra.mxu1 %vm4673_vm11, %v12101_v42  ;;  %v12400_v15 = vld [vmem:[#allocation38_spill] sm:$0xff] }
 0x546   : > { %v5978_v6 = vsel %vm4673_vm11, 1.0, %v12104_v63  ;;  %v4456_v20 = vadd.f32 %v4455_v37, %v4390_v16  ;;  %v3259_v1 = vsel %vm3168_vm13, %v3222_v36, 0.0  ;;  %v3694_v57 = vsel %vm3603_vm8, %v11003_v44, 0.0  ;;  %v11198_v8 = vpop.permute.xlu2 %3671  ;;  %v3247_v51 = vpop.permute.xlu0 %3246  ;;  %v12404_v36 = vld [vmem:[#allocation13_spill] sm:$0xff] }
 0x547   : > { %v4333_v12 = vadd.f32 %v5913_v53, %v3898_v17  ;;  %v4334_v0 = vadd.f32 %v5914_v50, %v3899_v29  ;;  %v3275_v52 = vadd.f32 %v3259_v1, %v12393_v31  ;;  %v3264_v5 = vsel %vm3168_vm13, %v3247_v51, 0.0  ;;  %v11224_v17 = vpop.f32.mrf.mxu0  ;;  %v12406_v1 = vld [vmem:[#allocation56_spill] sm:$0xff] }
 0x548   : > { %v11196_v34 = vadd.f32 %v4456_v20, %v10806_v61  ;;  %4526 = vperm.xlu2 %6365, %v4456_v20   ;;  %vm12395_vm9 = vcmp.eq.s32.totalorder %v7974_v38, %v12394_v56  ;;  %v12396_v61 = vld [vmem:[#allocation106_spill] sm:$0xff]  ;;  %vm12397_vm7 = vcmp.eq.s32.totalorder %v7983_v39, %v12394_v56  ;;  %vm12399_vm6 = vcmp.eq.s32.totalorder %v7974_v38, %v12398_v62  ;;  %v4393_v29 = vpop.f32.mrf.mxu2 }
 0x549   : > { %v4768_v28 = vadd.f32 %v5977_v40, %v4333_v12  ;;  %v4769_v32 = vadd.f32 %v5978_v6, %v4334_v0  ;;  %4091 = vperm.xlu0 %6363, %v10787_v59   ;;  %v11203_v49 = vadd.f32 %v3694_v57, %v3275_v52  ;;  %v5661_v44 = vsel %vm12395_vm9, 1.0, %v12104_v63  ;;  %v11234_v6 = vpop.f32.mrf.mxu1  ;;  %v12408_v52 = vld [vmem:[#allocation89_spill] sm:$0xff]  ;;  %v12411_v57 = vld [vmem:[#allocation24_spill] sm:$0xff] }
 0x54a   : > { %v11210_v25 = vadd.f32 %v3264_v5, %v12396_v61  ;;  %v5662_v59 = vsel %vm12397_vm7, 1.0, %v12104_v63  ;;  %v5597_v53 = vsel %vm12399_vm6, 1.0, %v12104_v63  ;;  %vm12401_vm4 = vcmp.eq.s32.totalorder %v7974_v38, %v12400_v15 }
 0x54b   : > { %5134 = vmatmul.f32.gmra.mxu2 %v4768_v28  ;;  %5199 = vmatmul.f32.gmra.mxu3 %v4769_v32  ;;  %v5725_v50 = vsel %vm12401_vm4, 1.0, %v12104_v63  ;;  %vm12402_vm10 = vcmp.eq.s32.totalorder %v7983_v39, %v12398_v62  ;;  %v2597_v16 = vadd.f32 %v5661_v44, %v5597_v53  ;;  %vm12403_vm12 = vcmp.eq.s32.totalorder %v7983_v39, %v12400_v15  ;;  %v12417_v53 = vld [vmem:[#allocation75_spill] sm:$0xff] }
 0x54c   : > { %v5598_v40 = vsel %vm12402_vm10, 1.0, %v12104_v63  ;;  %v5726_v12 = vsel %vm12403_vm12, 1.0, %v12104_v63  ;;  %v4458_v37 = vpop.f32.mrf.mxu3  ;;  %vm12405_vm14 = vcmp.eq.s32.totalorder %v7974_v38, %v12404_v36  ;;  %vm12407_vm3 = vcmp.eq.s32.totalorder %v7974_v38, %v12406_v1  ;;  %v4643_v44 = vpop.permute.xlu1 %4642 }
 0x54d   : > { %v5599_v0 = vsel %vm12405_vm14, 1.0, %v12104_v63  ;;  %v2598_v20 = vadd.f32 %v5662_v59, %v5598_v40  ;;  %v5789_v28 = vsel %vm12407_vm3, 1.0, %v12104_v63  ;;  %v4459_v31 = vadd.f32 %v4458_v37, %v4393_v29  ;;  %v12415_v59 = vld [vmem:[#allocation42_spill] sm:$0xff]  ;;  %v12420_v37 = vld [vmem:[#allocation67_spill] sm:$0xff] }
 0x54e   : > { %vm12409_vm15 = vcmp.eq.s32.totalorder %v7974_v38, %v12408_v52  ;;  %vm12410_vm2 = vcmp.eq.s32.totalorder %v7983_v39, %v12408_v52  ;;  %vm12412_vm11 = vcmp.eq.s32.totalorder %v7974_v38, %v12411_v57  ;;  %vm12413_vm0 = vcmp.eq.s32.totalorder %v7983_v39, %v12411_v57 }
 0x54f   : > { %5999 = vmatmul.msk.f32.gmra.mxu0 %vm12409_vm15, %v12101_v42  ;;  %6015 = vmatmul.msk.f32.gmra.mxu1 %vm12410_vm2, %v12101_v42  ;;  %v5663_v32 = vsel %vm12412_vm11, 1.0, %v12104_v63  ;;  %v5664_v51 = vsel %vm12413_vm0, 1.0, %v12104_v63  ;;  %v3032_v5 = vadd.f32 %v5725_v50, %v2597_v16  ;;  %vm12414_vm9 = vcmp.eq.s32.totalorder %v7983_v39, %v12406_v1  ;;  %v3242_v50 = vpop.permute.xlu2 %3241 }
 0x550   : > { %v5790_v56 = vsel %vm12414_vm9, 1.0, %v12104_v63  ;;  %v3033_v61 = vadd.f32 %v5726_v12, %v2598_v20  ;;  %vm12416_vm7 = vcmp.eq.s32.totalorder %v7974_v38, %v12415_v59  ;;  %vm12418_vm6 = vcmp.eq.s32.totalorder %v7974_v38, %v12417_v53  ;;  %4101 = vperm.xlu2 %6365, %v10941_v9   ;;  %4531 = vperm.xlu1 %6367, %v4459_v31   ;;  %v12423_v20 = vld [vmem:[#allocation104_spill] sm:$0xff] }
 0x551   : > { %v5727_v62 = vsel %vm12416_vm7, 1.0, %v12104_v63  ;;  %v5853_v15 = vsel %vm12418_vm6, 1.0, %v12104_v63  ;;  %v11273_v29 = vadd.f32 %v4459_v31, %v10883_v33  ;;  %4106 = vperm.xlu0 %6363, %v11005_v7   ;;  %v3467_v40 = vadd.f32 %v5789_v28, %v3032_v5  ;;  %v12421_v7 = vld [vmem:[#allocation97_spill] sm:$0xff]  ;;  %v12424_v28 = vld [vmem:[#allocation98_spill] sm:$0xff] }
 0x552   : > { %vm12419_vm4 = vcmp.eq.s32.totalorder %v7983_v39, %v12417_v53  ;;  %vm4676_vm10 = vcmp.eq.s32.totalorder %v7974_v38, %v4643_v44  ;;  %v3263_v12 = vsel %vm3168_vm13, %v3242_v50, 0.0  ;;  %v3468_v33 = vadd.f32 %v5790_v56, %v3033_v61  ;;  %v12428_v61 = vld [vmem:[#allocation62_spill] sm:$0xff] }
 0x553   : > { %v5854_v16 = vsel %vm12419_vm4, 1.0, %v12104_v63  ;;  %5137 = vmatmul.f32.gmra.mxu2 %v12420_v37  ;;  %vm12422_vm12 = vcmp.eq.s32.totalorder %v7974_v38, %v12421_v7  ;;  %vm4677_vm14 = vcmp.eq.s32.totalorder %v7983_v39, %v4643_v44  ;;  %v3279_v1 = vadd.f32 %v3263_v12, %v12423_v20  ;;  %5202 = vmatmul.f32.gmra.mxu3 %v12424_v28 }
 0x554   : > { %v5917_v9 = vsel %vm12422_vm12, 1.0, %v12104_v63  ;;  %vm12425_vm3 = vcmp.eq.s32.totalorder %v7983_v39, %v12404_v36  ;;  %v2599_v31 = vadd.f32 %v5663_v32, %v5599_v0  ;;  %vm12426_vm15 = vcmp.eq.s32.totalorder %v7983_v39, %v12421_v7  ;;  %v4396_v0 = vpop.f32.mrf.mxu2  ;;  %v3667_v28 = vpop.permute.xlu1 %3666 }
 0x555   : > { %v5600_v52 = vsel %vm12425_vm3, 1.0, %v12104_v63  ;;  %v5918_v57 = vsel %vm12426_vm15, 1.0, %v12104_v63  ;;  %v3902_v5 = vadd.f32 %v5853_v15, %v3467_v40  ;;  %vm12427_vm2 = vcmp.eq.s32.totalorder %v7983_v39, %v12415_v59  ;;  %v4461_v59 = vpop.f32.mrf.mxu3  ;;  %v11314_v40 = vpop.f32.mrf.mxu0 }
 0x556   : > { %v5728_v56 = vsel %vm12427_vm2, 1.0, %v12104_v63  ;;  %vm12429_vm11 = vcmp.eq.s32.totalorder %v7974_v38, %v12428_v61  ;;  %v3903_v50 = vadd.f32 %v5854_v16, %v3468_v33  ;;  %v5981_v36 = vsel %vm4676_vm10, 1.0, %v12104_v63  ;;  %v11326_v33 = vpop.f32.mrf.mxu1 }
 0x557   : > { %v5791_v53 = vsel %vm12429_vm11, 1.0, %v12104_v63  ;;  %v2600_v32 = vadd.f32 %v5664_v51, %v5600_v52  ;;  %v3034_v12 = vadd.f32 %v5727_v62, %v2599_v31  ;;  %v4337_v37 = vadd.f32 %v5917_v9, %v3902_v5  ;;  %6000 = vmatmul.msk.f32.gmra.mxu0 %vm4676_vm10, %v12101_v42  ;;  %6016 = vmatmul.msk.f32.gmra.mxu1 %vm4677_vm14, %v12101_v42  ;;  %v12431_v52 = vld [vmem:[#allocation72_spill] sm:$0xff] }
 0x558   : > { %v5982_v15 = vsel %vm4677_vm14, 1.0, %v12104_v63  ;;  %v4338_v7 = vadd.f32 %v5918_v57, %v3903_v50  ;;  %v4462_v20 = vadd.f32 %v4461_v59, %v4396_v0  ;;  %vm12430_vm0 = vcmp.eq.s32.totalorder %v7983_v39, %v12428_v61  ;;  %v3677_v61 = vpop.permute.xlu0 %3676  ;;  %4111 = vperm.xlu1 %6367, %v11076_v21   ;;  %v12435_v0 = vld [vmem:[#allocation81_spill] sm:$0xff] }
 0x559   : > { %v3035_v51 = vadd.f32 %v5728_v56, %v2600_v32  ;;  %v3469_v62 = vadd.f32 %v5791_v53, %v3034_v12  ;;  %v5792_v16 = vsel %vm12430_vm0, 1.0, %v12104_v63  ;;  %v4772_v9 = vadd.f32 %v5981_v36, %v4337_v37  ;;  %v11337_v56 = vpop.permute.xlu2 %4476  ;;  %v12433_v53 = vld [vmem:[#allocation92_spill] sm:$0xff] }
 0x55a   : > { %vm12432_vm9 = vcmp.eq.s32.totalorder %v7974_v38, %v12431_v52  ;;  %v4773_v57 = vadd.f32 %v5982_v15, %v4338_v7  ;;  %v11333_v44 = vadd.f32 %v4462_v20, %v10960_v35  ;;  %v3696_v5 = vsel %vm3603_vm8, %v3667_v28, 0.0  ;;  %4536 = vperm.xlu2 %6365, %v4462_v20  }
 0x55b   : > { %v5855_v31 = vsel %vm12432_vm9, 1.0, %v12104_v63  ;;  %vm4678_vm7 = vcmp.eq.s32.totalorder %v7974_v38, %v12433_v53  ;;  %vm12434_vm6 = vcmp.eq.s32.totalorder %v7983_v39, %v12431_v52  ;;  %v11346_v36 = vadd.f32 %v3696_v5, %v10837_v19  ;;  %5140 = vmatmul.f32.gmra.mxu2 %v4772_v9 }
 0x55c   : > { %v5856_v50 = vsel %vm12434_vm6, 1.0, %v12104_v63  ;;  %v3698_v35 = vsel %vm3603_vm8, %v3677_v61, 0.0  ;;  %vm12436_vm4 = vcmp.eq.s32.totalorder %v7974_v38, %v12435_v0  ;;  %vm4679_vm10 = vcmp.eq.s32.totalorder %v7983_v39, %v12433_v53  ;;  %5205 = vmatmul.f32.gmra.mxu3 %v4773_v57  ;;  %v4399_v7 = vpop.f32.mrf.mxu2 }
 0x55d   : > { %v5919_v32 = vsel %vm12436_vm4, 1.0, %v12104_v63  ;;  %v3470_v12 = vadd.f32 %v5792_v16, %v3035_v51  ;;  %v11357_v37 = vadd.f32 %v3698_v35, %v3279_v1  ;;  %vm12437_vm12 = vcmp.eq.s32.totalorder %v7983_v39, %v12435_v0  ;;  %v4464_v9 = vpop.f32.mrf.mxu3  ;;  %v4801_v61 = vpop.f32.mrf.mxu0 }
 0x55e   : > { %v5920_v19 = vsel %vm12437_vm12, 1.0, %v12104_v63  ;;  %v3904_v21 = vadd.f32 %v5855_v31, %v3469_v62  ;;  %v5983_v15 = vsel %vm4678_vm7, 1.0, %v12104_v63  ;;  %v5984_v20 = vsel %vm4679_vm10, 1.0, %v12104_v63  ;;  %v3237_v62 = vpop.permute.xlu1 %3236 }
 0x55f   : > { %v3905_v59 = vadd.f32 %v5856_v50, %v3470_v12  ;;  %v4465_v16 = vadd.f32 %v4464_v9, %v4399_v7  ;;  %6001 = vmatmul.msk.f32.gmra.mxu0 %vm4678_vm7, %v12101_v42  ;;  %6017 = vmatmul.msk.f32.gmra.mxu1 %vm4679_vm10, %v12101_v42  ;;  %vm4038_vm14 = vcmp.eq.s32.totalorder %v7974_v38, 4  ;;  %v3262_v31 = vsel %vm3168_vm13, %v3237_v62, 0.0  ;;  %v12438_v50 = vld [vmem:[#allocation102_spill] sm:$0xff] }
 0x560   : > { %v4339_v51 = vadd.f32 %v5919_v32, %v3904_v21  ;;  %v3278_v53 = vadd.f32 %v3262_v31, %v12438_v50  ;;  %v3697_v0 = vsel %vm3603_vm8, %v11198_v8, 0.0  ;;  %v4866_v32 = vpop.f32.mrf.mxu1  ;;  %vm4473_vm11 = vcmp.eq.s32.totalorder %v7974_v38, 5 }
 0x561   : > { %v4340_v1 = vadd.f32 %v5920_v19, %v3905_v59  ;;  %v11375_v52 = vadd.f32 %v4465_v16, %v11024_v27  ;;  %v4047_v57 = vpop.permute.xlu2 %4046  ;;  %v4867_v9 = vadd.f32 %v4866_v32, %v4801_v61  ;;  %v4861_v61 = vadd.f32 %v11234_v6, %v11224_v17 }
 0x562   : > { %v4774_v28 = vadd.f32 %v5983_v15, %v4339_v51  ;;  %4541 = vperm.xlu2 %6365, %v4465_v16   ;;  %v4120_v35 = vsel %vm4038_vm14, %v4047_v57, 0.0  ;;  %v11388_v12 = vadd.f32 %v3697_v0, %v3278_v53  ;;  %v12439_v51 = vld [vmem:[#allocation9_spill] sm:$0xff]  ;;  %vm5328_vm12 = vcmask 56320  }
 0x563   : > { %v4775_v5 = vadd.f32 %v5984_v20, %v4340_v1  ;;  %v11386_v27 = vadd.f32 %v4120_v35, %v10526_v11  ;;  %vm12440_vm13 = vcmp.eq.s32.totalorder %v7974_v38, %v12439_v51  ;;  %vm12441_vm3 = vcmp.eq.s32.totalorder %v7983_v39, %v12439_v51  ;;  %v12445_v0 = vld [vmem:[#allocation41_spill] sm:$0xff] }
 0x564   : > { %5143 = vmatmul.f32.gmra.mxu2 %v4774_v28  ;;  %v4402_v19 = vpop.f32.mrf.mxu2  ;;  %v5665_v16 = vsel %vm12440_vm13, 1.0, %v12104_v63  ;;  %v12442_v28 = vld [vmem:[#allocation19_spill] sm:$0xff]  ;;  %v5023_v50 = vadd.f32 %v4867_v9, %v10641_v24  ;;  %vm12446_vm2 = vcmp.eq.s32.totalorder %v7974_v38, %v12445_v0  ;;  %vm12447_vm0 = vcmp.eq.s32.totalorder %v7983_v39, %v12445_v0 }
 0x565   : > { %5208 = vmatmul.f32.gmra.mxu3 %v4775_v5  ;;  %v4467_v21 = vpop.f32.mrf.mxu3  ;;  %v4804_v1 = vpop.f32.mrf.mxu0  ;;  %vm12444_vm15 = vcmp.eq.s32.totalorder %v7983_v39, %v12442_v28  ;;  %v5729_v32 = vsel %vm12446_vm2, 1.0, %v12104_v63  ;;  %v4554_v24 = vsel %vm4473_vm11, %v11337_v56, 0.0  ;;  %vm5311_vm13 = vcmask 261120  }
 0x566   : > { %v4468_v15 = vadd.f32 %v4467_v21, %v4402_v19  ;;  %v3682_v59 = vpop.permute.xlu1 %3681  ;;  %v5602_v31 = vsel %vm12444_vm15, 1.0, %v12104_v63  ;;  %6368 = vrcp.f32 %v5023_v50  ;;  %v5921_v50 = vsel %vm4245_vm5, 1.0, %v12104_v63 }
 0x567   : > { %v3699_v20 = vsel %vm3603_vm8, %v3682_v59, 0.0  ;;  %vm12443_vm8 = vcmp.eq.s32.totalorder %v7974_v38, %v12442_v28 }
 0x568   : > { %v11391_v7 = vadd.f32 %v4468_v15, %v11096_v23  ;;  %4546 = vperm.xlu0 %6363, %v4468_v15   ;;  %v11399_v11 = vadd.f32 %v3699_v20, %v11210_v25  ;;  %v5666_v23 = vsel %vm12441_vm3, 1.0, %v12104_v63  ;;  %v4869_v62 = vpop.f32.mrf.mxu1  ;;  %v5601_v25 = vsel %vm12443_vm8, 1.0, %v12104_v63  ;;  %v12448_v20 = vld [vmem:[#allocation55_spill] sm:$0xff] }
 0x569   : > { %v11396_v8 = vpop.permute.xlu2 %4491  ;;  %v2601_v5 = vadd.f32 %v5665_v16, %v5601_v25  ;;  %v2602_v35 = vadd.f32 %v5666_v23, %v5602_v31  ;;  %v11425_v19 = vadd.f32 %v4869_v62, %v4804_v1  ;;  %v5730_v15 = vsel %vm12447_vm0, 1.0, %v12104_v63  ;;  %v12454_v31 = vld [vmem:[#allocation44_spill] sm:$0xff] }
 0x56a   : > { %4116 = vperm.xlu2 %6365, %v11145_v45   ;;  %vm12449_vm9 = vcmp.eq.s32.totalorder %v7974_v38, %v12448_v20  ;;  %v4864_v16 = vadd.f32 %v11326_v33, %v11314_v40  ;;  %vm12450_vm7 = vcmp.eq.s32.totalorder %v7983_v39, %v12448_v20  ;;  %v12451_v40 = vld [vmem:[#allocation70_spill] sm:$0xff] }
 0x56b   : > { %v5793_v51 = vsel %vm12449_vm9, 1.0, %v12104_v63  ;;  %v3036_v56 = vadd.f32 %v5729_v32, %v2601_v5  ;;  %v5794_v23 = vsel %vm12450_vm7, 1.0, %v12104_v63  ;;  %vm12452_vm6 = vcmp.eq.s32.totalorder %v7974_v38, %v12451_v40 }
 0x56c   : > { %v4405_v45 = vpop.f32.mrf.mxu2  ;;  %v3037_v33 = vadd.f32 %v5730_v15, %v2602_v35  ;;  %vm12453_vm4 = vcmp.eq.s32.totalorder %v7983_v39, %v12451_v40  ;;  %v5922_v35 = vsel %vm4246_vm1, 1.0, %v12104_v63  ;;  %v6369_v15 = vpop.eup %6368  ;;  %vm4908_vm1 = vcmp.eq.s32.totalorder %v7974_v38, 6 }
 0x56d   : > { %v4470_v57 = vpop.f32.mrf.mxu3  ;;  %v5858_v28 = vsel %vm12453_vm4, 1.0, %v12104_v63  ;;  %v3471_v25 = vadd.f32 %v5793_v51, %v3036_v56 }
 0x56e   : > { %v4471_v53 = vadd.f32 %v4470_v57, %v4405_v45  ;;  %v4042_v21 = vpop.permute.xlu1 %4041  ;;  %v5021_v57 = vadd.f32 %v4861_v61, %v12454_v31  ;;  %v3472_v5 = vadd.f32 %v5794_v23, %v3037_v33 }
 0x56f   : > { %v4119_v6 = vsel %vm4038_vm14, %v4042_v21, 0.0  ;;  %v4807_v21 = vpop.f32.mrf.mxu0 }
 0x570   : > { %v11435_v17 = vadd.f32 %v4471_v53, %v11160_v60  ;;  %4551 = vperm.xlu1 %6367, %v4471_v53   ;;  %v4135_v1 = vadd.f32 %v4119_v6, %v10675_v48  ;;  %4926 = vperm.xlu0 %6363, %v11425_v19   ;;  %v5857_v48 = vsel %vm12452_vm6, 1.0, %v12104_v63  ;;  %v5022_v53 = vadd.f32 %v4864_v16, %v10572_v30 }
 0x571   : > { %v4062_v59 = vpop.permute.xlu2 %4061  ;;  %v3906_v0 = vadd.f32 %v5857_v48, %v3471_v25  ;;  %v3907_v32 = vadd.f32 %v5858_v28, %v3472_v5  ;;  %6370 = vrcp.f32 %v5021_v57 }
 0x572   : > { %4911 = vperm.xlu2 %6365, %v4861_v61   ;;  %v4123_v60 = vsel %vm4038_vm14, %v4062_v59, 0.0  ;;  %v11460_v45 = vadd.f32 %v4554_v24, %v4135_v1  ;;  %v4872_v61 = vpop.f32.mrf.mxu1  ;;  %6372 = vrcp.f32 %v5022_v53 }
 0x573   : > { %v11454_v62 = vadd.f32 %v4123_v60, %v10755_v22  ;;  %v4341_v24 = vadd.f32 %v5921_v50, %v3906_v0  ;;  %v4342_v59 = vadd.f32 %v5922_v35, %v3907_v32  ;;  %v11491_v0 = vpop.permute.xlu0 %4051 }
 0x576   : > { %v4649_v6 = vpop.permute.xlu1 %4648 }
 0x577   : > { %vm4680_vm5 = vcmp.eq.s32.totalorder %v7974_v38, %v4649_v6  ;;  %vm4681_vm10 = vcmp.eq.s32.totalorder %v7983_v39, %v4649_v6  ;;  %v4810_v23 = vpop.f32.mrf.mxu0  ;;  %v4873_v39 = vadd.f32 %v4872_v61, %v4807_v21 }
 0x578   : > { %4916 = vperm.xlu1 %6367, %v4864_v16   ;;  %5227 = vperm.xlu0 %6363, %v6369_v15   ;;  %v5985_v20 = vsel %vm4680_vm5, 1.0, %v12104_v63  ;;  %v5986_v51 = vsel %vm4681_vm10, 1.0, %v12104_v63 }
 0x579   : > { %v4502_v30 = vpop.permute.xlu2 %4501  ;;  %6002 = vmatmul.msk.f32.gmra.mxu0 %vm4680_vm5, %v12101_v42  ;;  %6018 = vmatmul.msk.f32.gmra.mxu1 %vm4681_vm10, %v12101_v42  ;;  %v4776_v1 = vadd.f32 %v5985_v20, %v4341_v24  ;;  %v4777_v16 = vadd.f32 %v5986_v51, %v4342_v59  ;;  %v5024_v42 = vadd.f32 %v11425_v19, %v10710_v4  ;;  %v4557_v19 = vsel %vm4473_vm11, %v11396_v8, 0.0 }
 0x57a   : > { %4921 = vperm.xlu2 %6365, %v4867_v9   ;;  %v6371_v9 = vpop.eup %6370  ;;  %v4875_v56 = vpop.f32.mrf.mxu1  ;;  %v5025_v25 = vadd.f32 %v4873_v39, %v10796_v55 }
 0x57b   : > { %5146 = vmatmul.f32.gmra.mxu2 %v4776_v1  ;;  %5211 = vmatmul.f32.gmra.mxu3 %v4777_v16  ;;  %v6373_v60 = vpop.eup %6372  ;;  %v4876_v28 = vadd.f32 %v4875_v56, %v4810_v23  ;;  %6374 = vrcp.f32 %v5024_v42  ;;  %v11504_v61 = vpop.permute.xlu0 %4481 }
 0x57c   : > { %6376 = vrcp.f32 %v5025_v25 }
 0x57d   : > { %v5026_v31 = vadd.f32 %v4876_v28, %v10874_v43 }
 0x57e   : > { %v11482_v40 = vpop.permute.xlu1 %4486 }
 0x57f   : > { %v4813_v57 = vpop.f32.mrf.mxu0  ;;  %6378 = vrcp.f32 %v5026_v31 }
 0x580   : > { %5217 = vperm.xlu1 %6367, %v6371_v9  }
 0x581   : > { %v4072_v48 = vpop.permute.xlu2 %4071  ;;  %v6375_v32 = vpop.eup %6374 }
 0x582   : > { %5222 = vperm.xlu2 %6365, %v6373_v60   ;;  %v4125_v63 = vsel %vm4038_vm14, %v4072_v48, 0.0  ;;  %v4878_v5 = vpop.f32.mrf.mxu1  ;;  %v6377_v21 = vpop.eup %6376 }
 0x583   : > { %v4141_v33 = vadd.f32 %v4125_v63, %v10929_v26  ;;  %v4879_v53 = vadd.f32 %v4878_v5, %v4813_v57 }
 0x585   : > { %4941 = vperm.xlu0 %6363, %v4879_v53   ;;  %v6379_v24 = vpop.eup %6378  ;;  %v5027_v8 = vadd.f32 %v4879_v53, %v10948_v14 }
 0x586   : > { %v4057_v22 = vpop.permute.xlu1 %4056 }
 0x587   : > { %v4122_v26 = vsel %vm4038_vm14, %v4057_v22, 0.0  ;;  %6380 = vrcp.f32 %v5027_v8  ;;  %v11549_v8 = vpop.f32.mrf.mxu3 }
 0x588   : > { %4931 = vperm.xlu1 %6367, %v4873_v39   ;;  %v4138_v55 = vadd.f32 %v4122_v26, %v10661_v13 }
 0x589   : > { %v4087_v50 = vpop.permute.xlu2 %4086 }
 0x58a   : > { %4936 = vperm.xlu2 %6365, %v4876_v28   ;;  %v4128_v4 = vsel %vm4038_vm14, %v4087_v50, 0.0  ;;  %v11502_v35 = vadd.f32 %v4557_v19, %v4138_v55 }
 0x58b   : > { %v4144_v43 = vadd.f32 %v4128_v4, %v11143_v47 }
 0x58d   : > { %5242 = vperm.xlu0 %6363, %v6379_v24   ;;  %v6381_v28 = vpop.eup %6380 }
 0x58e   : > { %v4497_v15 = vpop.permute.xlu1 %4496 }
 0x58f   : > { %v4558_v13 = vsel %vm4473_vm11, %v4497_v15, 0.0  ;;  %v4816_v6 = vpop.f32.mrf.mxu0 }
 0x590   : > { %5232 = vperm.xlu1 %6367, %v6375_v32   ;;  %v11509_v47 = vadd.f32 %v4558_v13, %v11454_v62  ;;  %v4881_v59 = vpop.f32.mrf.mxu1  ;;  %v4559_v62 = vsel %vm4473_vm11, %v4502_v30, 0.0 }
 0x591   : > { %v4882_v51 = vadd.f32 %v4881_v59, %v4816_v6 }
 0x592   : > { %5237 = vperm.xlu2 %6365, %v6377_v21  }
 0x593   : > { %v5028_v39 = vadd.f32 %v4882_v51, %v11011_v46 }
 0x595   : > { %v4507_v16 = vpop.permute.xlu0 %4506  ;;  %6382 = vrcp.f32 %v5028_v39 }
 0x596   : > { %v4067_v20 = vpop.permute.xlu1 %4066  ;;  %v4560_v60 = vsel %vm4473_vm11, %v4507_v16, 0.0 }
 0x597   : > { %v4124_v1 = vsel %vm4038_vm14, %v4067_v20, 0.0  ;;  %v11519_v56 = vadd.f32 %v4560_v60, %v4141_v33 }
 0x598   : > { %v4140_v9 = vadd.f32 %v4124_v1, %v10742_v10  ;;  %4946 = vperm.xlu1 %6367, %v4882_v51  }
 0x599   : > { %v4819_v23 = vpop.f32.mrf.mxu0 }
 0x59a   : > { %v11521_v14 = vadd.f32 %v4559_v62, %v4140_v9  ;;  %v4884_v48 = vpop.f32.mrf.mxu1 }
 0x59b   : > { %v4885_v42 = vadd.f32 %v4884_v48, %v4819_v23  ;;  %v6383_v5 = vpop.eup %6382 }
 0x59d   : > { %v4077_v25 = vpop.permute.xlu0 %4076  ;;  %4951 = vperm.xlu2 %6365, %v4885_v42  }
 0x59e   : > { %v4512_v63 = vpop.permute.xlu1 %4511  ;;  %v4126_v31 = vsel %vm4038_vm14, %v4077_v25, 0.0 }
 0x59f   : > { %v4142_v30 = vadd.f32 %v4126_v31, %v11007_v18  ;;  %v4561_v33 = vsel %vm4473_vm11, %v4512_v63, 0.0  ;;  %v5029_v18 = vadd.f32 %v4885_v42, %v11085_v41  ;;  %v5170_v42 = vpop.f32.mrf.mxu3 }
 0x5a0   : > { %5247 = vperm.xlu1 %6367, %v6381_v28  }
 0x5a1   : > { %v11529_v57 = vadd.f32 %v4561_v33, %v4142_v30  ;;  %6384 = vrcp.f32 %v5029_v18 }
 0x5a2   : > { %v4527_v10 = vpop.permute.xlu2 %4526 }
 0x5a3   : > { %v4564_v48 = vsel %vm4473_vm11, %v4527_v10, 0.0 }
 0x5a5   : > { %5252 = vperm.xlu2 %6365, %v6383_v5  }
 0x5a6   : > { %v11531_v46 = vpop.permute.xlu1 %4081 }
 0x5a7   : > { %v6385_v39 = vpop.eup %6384 }
 0x5aa   : > { %v4102_v22 = vpop.permute.xlu2 %4101 }
 0x5ab   : > { %v4131_v50 = vsel %vm4038_vm14, %v4102_v22, 0.0 }
 0x5ac   : > { %v4147_v53 = vadd.f32 %v4131_v50, %v11346_v36  ;;  %v11547_v36 = vpop.f32.mrf.mxu2 }
 0x5ae   : > { %v11536_v26 = vpop.permute.xlu1 %4516 }
 0x5b2   : > { %v4822_v21 = vpop.f32.mrf.mxu0  ;;  %v4887_v15 = vpop.f32.mrf.mxu1 }
 0x5b3   : > { %v4522_v55 = vpop.permute.xlu0 %4521  ;;  %v4888_v6 = vadd.f32 %v4887_v15, %v4822_v21 }
 0x5b4   : > { %v4537_v4 = vpop.permute.xlu2 %4536  ;;  %v4563_v32 = vsel %vm4473_vm11, %v4522_v55, 0.0 }
 0x5b5   : > { %v4566_v19 = vsel %vm4473_vm11, %v4537_v4, 0.0  ;;  %v11545_v13 = vadd.f32 %v4563_v32, %v4144_v43  ;;  %4956 = vperm.xlu0 %6363, %v4888_v6   ;;  %v5030_v1 = vadd.f32 %v4888_v6, %v11152_v3  ;;  %v5105_v3 = vpop.f32.mrf.mxu2 }
 0x5b6   : > { %v11543_v24 = vadd.f32 %v4566_v19, %v4147_v53  ;;  %v4097_v41 = vpop.permute.xlu1 %4096 }
 0x5b7   : > { %v4130_v59 = vsel %vm4038_vm14, %v4097_v41, 0.0  ;;  %6386 = vrcp.f32 %v5030_v1 }
 0x5b8   : > { %v4146_v16 = vadd.f32 %v4130_v59, %v11170_v2  ;;  %v4121_v59 = vsel %vm4038_vm14, %v11491_v0, 0.0 }
 0x5ba   : > { %v4825_v9 = vpop.f32.mrf.mxu0  ;;  %v4890_v60 = vpop.f32.mrf.mxu1 }
 0x5bb   : > { %v4092_v51 = vpop.permute.xlu0 %4091  ;;  %v4891_v23 = vadd.f32 %v4890_v60, %v4825_v9 }
 0x5bc   : > { %v4542_v20 = vpop.permute.xlu2 %4541  ;;  %v4129_v43 = vsel %vm4038_vm14, %v4092_v51, 0.0  ;;  %v5173_v51 = vpop.f32.mrf.mxu3 }
 0x5bd   : > { %v4145_v62 = vadd.f32 %v4129_v43, %v11203_v49  ;;  %5257 = vperm.xlu0 %6363, %v6385_v39   ;;  %4961 = vperm.xlu1 %6367, %v4891_v23   ;;  %v5031_v33 = vadd.f32 %v4891_v23, %v11196_v34  ;;  %v6387_v53 = vpop.eup %6386  ;;  %v4567_v4 = vsel %vm4473_vm11, %v4542_v20, 0.0  ;;  %v5108_v20 = vpop.f32.mrf.mxu2 }
 0x5bf   : > { %v11560_v63 = vadd.f32 %v4564_v48, %v4145_v62  ;;  %6388 = vrcp.f32 %v5031_v33 }
 0x5c2   : > { %v4532_v25 = vpop.permute.xlu1 %4531  ;;  %v4828_v30 = vpop.f32.mrf.mxu0 }
 0x5c3   : > { %v4107_v28 = vpop.permute.xlu0 %4106  ;;  %v4565_v10 = vsel %vm4473_vm11, %v4532_v25, 0.0  ;;  %v4893_v50 = vpop.f32.mrf.mxu1 }
 0x5c4   : > { %v4117_v2 = vpop.permute.xlu2 %4116  ;;  %v4132_v49 = vsel %vm4038_vm14, %v4107_v28, 0.0  ;;  %v11575_v55 = vadd.f32 %v4565_v10, %v4146_v16  ;;  %v4894_v18 = vadd.f32 %v4893_v50, %v4828_v30 }
 0x5c5   : > { %v4134_v31 = vsel %vm4038_vm14, %v4117_v2, 0.0  ;;  %v4148_v22 = vadd.f32 %v4132_v49, %v11388_v12  ;;  %5262 = vperm.xlu1 %6367, %v6387_v53   ;;  %v6389_v43 = vpop.eup %6388  ;;  %v11603_v28 = vpop.f32.mrf.mxu2 }
 0x5c6   : > { %v11570_v5 = vadd.f32 %v4134_v31, %v11399_v11  ;;  %4966 = vperm.xlu2 %6365, %v4894_v18   ;;  %v5032_v21 = vadd.f32 %v4894_v18, %v11273_v29  ;;  %v4556_v29 = vsel %vm4473_vm11, %v11482_v40, 0.0  ;;  %v11601_v40 = vpop.f32.mrf.mxu3 }
 0x5c7   : > { %v11577_v19 = vadd.f32 %v4567_v4, %v4148_v22 }
 0x5c8   : > { %6390 = vrcp.f32 %v5032_v21 }
 0x5ca   : > { %v4112_v11 = vpop.permute.xlu1 %4111 }
 0x5cb   : > { %v4133_v15 = vsel %vm4038_vm14, %v4112_v11, 0.0 }
 0x5cc   : > { %v4912_v34 = vpop.permute.xlu2 %4911  ;;  %v4831_v32 = vpop.f32.mrf.mxu0  ;;  %v4149_v1 = vadd.f32 %v4133_v15, %v11357_v37 }
 0x5cd   : > { %v4989_v12 = vsel %vm4908_vm1, %v4912_v34, 0.0  ;;  %v4896_v41 = vpop.f32.mrf.mxu1 }
 0x5ce   : > { %v5005_v6 = vadd.f32 %v4989_v12, %v11460_v45  ;;  %v4897_v16 = vadd.f32 %v4896_v41, %v4831_v32  ;;  %5267 = vperm.xlu2 %6365, %v6389_v43   ;;  %v4137_v45 = vadd.f32 %v4121_v59, %v10614_v58  ;;  %v6391_v2 = vpop.eup %6390  ;;  %v5171_v58 = vadd.f32 %v5170_v42, %v5105_v3  ;;  %v5179_v3 = vpop.f32.mrf.mxu3 }
 0x5cf   : > { %v5114_v42 = vpop.f32.mrf.mxu2  ;;  %v4555_v41 = vsel %vm4473_vm11, %v11504_v61, 0.0  ;;  %v5174_v59 = vadd.f32 %v5173_v51, %v5108_v20 }
 0x5d0   : > { %5329 = vst.msk [vmem:[%s6611_s7] sm:$0xff] %vm5328_vm12, %v5005_v6  ;;  %4971 = vperm.xlu0 %6363, %v4897_v16   ;;  %v4572_v9 = vadd.f32 %v4556_v29, %v4137_v45  ;;  %v5033_v62 = vadd.f32 %v4897_v16, %v11333_v44 }
 0x5d2   : > { %6392 = vrcp.f32 %v5033_v62 }
 0x5d4   : > { %v4922_v0 = vpop.permute.xlu2 %4921  ;;  %v4834_v37 = vpop.f32.mrf.mxu0 }
 0x5d5   : > { %v4991_v60 = vsel %vm4908_vm1, %v4922_v0, 0.0  ;;  %v4899_v39 = vpop.f32.mrf.mxu1 }
 0x5d6   : > { %v5007_v23 = vadd.f32 %v4991_v60, %v4572_v9  ;;  %v4900_v48 = vadd.f32 %v4899_v39, %v4834_v37  ;;  %v5182_v45 = vpop.f32.mrf.mxu3 }
 0x5d7   : > { %v5117_v9 = vpop.f32.mrf.mxu2 }
 0x5d8   : > { %5331 = vst.msk [vmem:[%s6611_s7 + $0x10] sm:$0xff] %vm5328_vm12, %v5007_v23  ;;  %5272 = vperm.xlu0 %6363, %v6391_v2   ;;  %4976 = vperm.xlu1 %6367, %v4900_v48   ;;  %v5034_v33 = vadd.f32 %v4900_v48, %v11375_v52  ;;  %v6393_v53 = vpop.eup %6392  ;;  %v4127_v48 = vsel %vm4038_vm14, %v11531_v46, 0.0 }
 0x5da   : > { %v4547_v31 = vpop.permute.xlu0 %4546  ;;  %6394 = vrcp.f32 %v5034_v33 }
 0x5db   : > { %v4568_v44 = vsel %vm4473_vm11, %v4547_v31, 0.0 }
 0x5dc   : > { %v5223_v25 = vpop.permute.xlu2 %5222  ;;  %v4837_v30 = vpop.f32.mrf.mxu0  ;;  %v11608_v10 = vadd.f32 %v4568_v44, %v4149_v1 }
 0x5dd   : > { %v5296_v49 = vmul.f32 %v5223_v25, %v5171_v58  ;;  %v4902_v22 = vpop.f32.mrf.mxu1  ;;  %v4143_v25 = vadd.f32 %v4127_v48, %v10962_v54 }
 0x5de   : > { %v4903_v50 = vadd.f32 %v4902_v22, %v4837_v30  ;;  %v5185_v60 = vpop.f32.mrf.mxu3 }
 0x5df   : > { %5313 = vst.msk [vmem:[%s6606_s10 + $0x8] sm:$0xff] %vm5311_vm13, %v5296_v49  ;;  %v5120_v37 = vpop.f32.mrf.mxu2 }
 0x5e0   : > { %5277 = vperm.xlu1 %6367, %v6393_v53   ;;  %4981 = vperm.xlu2 %6365, %v4903_v50   ;;  %v6395_v6 = vpop.eup %6394  ;;  %v5035_v62 = vadd.f32 %v4903_v50, %v11391_v7 }
 0x5e2   : > { %v4552_v4 = vpop.permute.xlu1 %4551  ;;  %v4927_v11 = vpop.permute.xlu0 %4926  ;;  %6396 = vrcp.f32 %v5035_v62 }
 0x5e3   : > { %v4569_v34 = vsel %vm4473_vm11, %v4552_v4, 0.0  ;;  %v4992_v21 = vsel %vm4908_vm1, %v4927_v11, 0.0  ;;  %v5183_v4 = vadd.f32 %v5182_v45, %v5117_v9 }
 0x5e4   : > { %v4937_v18 = vpop.permute.xlu2 %4936  ;;  %v11617_v12 = vadd.f32 %v4569_v34, %v11570_v5  ;;  %v5008_v15 = vadd.f32 %v4992_v21, %v11502_v35  ;;  %v5180_v5 = vadd.f32 %v5179_v3, %v5114_v42 }
 0x5e5   : > { %v4994_v52 = vsel %vm4908_vm1, %v4937_v18, 0.0 }
 0x5e6   : > { %v5010_v32 = vadd.f32 %v4994_v52, %v11521_v14  ;;  %5332 = vst.msk [vmem:[%s6611_s7 + $0x18] sm:$0xff] %vm5328_vm12, %v5008_v15  ;;  %v4571_v14 = vadd.f32 %v4555_v41, %v11386_v27  ;;  %v5168_v27 = vadd.f32 %v11549_v8, %v11547_v36  ;;  %v4562_v36 = vsel %vm4473_vm11, %v11536_v26, 0.0  ;;  %v5188_v50 = vpop.f32.mrf.mxu3 }
 0x5e7   : > { %v4578_v31 = vadd.f32 %v4562_v36, %v4143_v25  ;;  %v5123_v33 = vpop.f32.mrf.mxu2 }
 0x5e8   : > { %5334 = vst.msk [vmem:[%s6611_s7 + $0x28] sm:$0xff] %vm5328_vm12, %v5010_v32  ;;  %5282 = vperm.xlu2 %6365, %v6395_v6   ;;  %v6397_v22 = vpop.eup %6396  ;;  %v5186_v6 = vadd.f32 %v5185_v60, %v5120_v37 }
 0x5ea   : > { %v4917_v1 = vpop.permute.xlu1 %4916  ;;  %v5228_v29 = vpop.permute.xlu0 %5227 }
 0x5eb   : > { %v4990_v16 = vsel %vm4908_vm1, %v4917_v1, 0.0  ;;  %v5297_v0 = vmul.f32 %v5228_v29, %v5174_v59 }
 0x5ec   : > { %v5238_v35 = vpop.permute.xlu2 %5237  ;;  %v5006_v61 = vadd.f32 %v4990_v16, %v4571_v14 }
 0x5ed   : > { %v5299_v43 = vmul.f32 %v5238_v35, %v5180_v5  ;;  %5314 = vst.msk [vmem:[%s6606_s10 + $0x10] sm:$0xff] %vm5311_vm13, %v5297_v0 }
 0x5ee   : > { %5330 = vst.msk [vmem:[%s6611_s7 + $0x8] sm:$0xff] %vm5328_vm12, %v5006_v61  ;;  %v5191_v11 = vpop.f32.mrf.mxu3 }
 0x5ef   : > { %5316 = vst.msk [vmem:[%s6606_s10 + $0x20] sm:$0xff] %vm5311_vm13, %v5299_v43  ;;  %v5126_v52 = vpop.f32.mrf.mxu2 }
 0x5f2   : > { %v5218_v20 = vpop.permute.xlu1 %5217 }
 0x5f3   : > { %v5295_v51 = vmul.f32 %v5218_v20, %v5168_v27 }
 0x5f5   : > { %5312 = vst.msk [vmem:[%s6606_s10] sm:$0xff] %vm5311_vm13, %v5295_v51 }
 0x5f6   : > { %v4840_v23 = vpop.f32.mrf.mxu0  ;;  %v4905_v39 = vpop.f32.mrf.mxu1 }
 0x5f7   : > { %v4906_v2 = vadd.f32 %v4905_v39, %v4840_v23  ;;  %v4952_v49 = vpop.permute.xlu2 %4951  ;;  %v4942_v44 = vpop.permute.xlu0 %4941 }
 0x5f8   : > { %v4995_v54 = vsel %vm4908_vm1, %v4942_v44, 0.0  ;;  %v5129_v41 = vpop.f32.mrf.mxu2  ;;  %v5194_v5 = vpop.f32.mrf.mxu3 }
 0x5f9   : > { %v5036_v8 = vadd.f32 %v4906_v2, %v11435_v17  ;;  %4986 = vperm.xlu0 %6363, %v4906_v2   ;;  %v4997_v17 = vsel %vm4908_vm1, %v4952_v49, 0.0  ;;  %v5011_v30 = vadd.f32 %v4995_v54, %v11519_v56  ;;  %v5189_v56 = vadd.f32 %v5188_v50, %v5123_v33 }
 0x5fa   : > { %v4932_v58 = vpop.permute.xlu1 %4931  ;;  %v5013_v26 = vadd.f32 %v4997_v17, %v4578_v31 }
 0x5fb   : > { %v4993_v7 = vsel %vm4908_vm1, %v4932_v58, 0.0  ;;  %6398 = vrcp.f32 %v5036_v8  ;;  %5335 = vst.msk [vmem:[%s6611_s7 + $0x30] sm:$0xff] %vm5328_vm12, %v5011_v30 }
 0x5fc   : > { %v5009_v46 = vadd.f32 %v4993_v7, %v11509_v47  ;;  %v5177_v47 = vadd.f32 %v11601_v40, %v11603_v28  ;;  %5337 = vst.msk [vmem:[%s6611_s7 + $0x40] sm:$0xff] %vm5328_vm12, %v5013_v26 }
 0x5fe   : > { %5333 = vst.msk [vmem:[%s6611_s7 + $0x20] sm:$0xff] %vm5328_vm12, %v5009_v46 }
 0x5ff   : > { %v5253_v18 = vpop.permute.xlu2 %5252  ;;  %v5243_v34 = vpop.permute.xlu0 %5242 }
 0x600   : > { %v5302_v40 = vmul.f32 %v5253_v18, %v5189_v56  ;;  %v5300_v28 = vmul.f32 %v5243_v34, %v5183_v4  ;;  %v5132_v1 = vpop.f32.mrf.mxu2  ;;  %v5197_v35 = vpop.f32.mrf.mxu3 }
 0x601   : > { %v6399_v53 = vpop.eup %6398  ;;  %5287 = vperm.xlu0 %6363, %v6397_v22  }
 0x602   : > { %v5233_v3 = vpop.permute.xlu1 %5232  ;;  %5292 = vperm.xlu1 %6367, %v6399_v53   ;;  %5319 = vst.msk [vmem:[%s6606_s10 + $0x38] sm:$0xff] %vm5311_vm13, %v5302_v40 }
 0x603   : > { %v5298_v42 = vmul.f32 %v5233_v3, %v5177_v47  ;;  %5317 = vst.msk [vmem:[%s6606_s10 + $0x28] sm:$0xff] %vm5311_vm13, %v5300_v28 }
 0x605   : > { %5315 = vst.msk [vmem:[%s6606_s10 + $0x18] sm:$0xff] %vm5311_vm13, %v5298_v42 }
 0x608   : > { %v5135_v45 = vpop.f32.mrf.mxu2  ;;  %v5200_v61 = vpop.f32.mrf.mxu3 }
 0x60a   : > { %v4947_v32 = vpop.permute.xlu1 %4946 }
 0x60b   : > { %v4996_v21 = vsel %vm4908_vm1, %v4947_v32, 0.0 }
 0x60c   : > { %v5012_v15 = vadd.f32 %v4996_v21, %v11529_v57  ;;  %v5198_v57 = vadd.f32 %v5197_v35, %v5132_v1 }
 0x60e   : > { %5336 = vst.msk [vmem:[%s6611_s7 + $0x38] sm:$0xff] %vm5328_vm12, %v5012_v15 }
 0x610   : > { %v5138_v48 = vpop.f32.mrf.mxu2  ;;  %v5203_v2 = vpop.f32.mrf.mxu3 }
 0x611   : > { %v5204_v53 = vadd.f32 %v5203_v2, %v5138_v48 }
 0x612   : > { %v5248_v14 = vpop.permute.xlu1 %5247 }
 0x613   : > { %v5301_v59 = vmul.f32 %v5248_v14, %v5186_v6 }
 0x615   : > { %5318 = vst.msk [vmem:[%s6606_s10 + $0x30] sm:$0xff] %vm5311_vm13, %v5301_v59 }
 0x618   : > { %v5206_v46 = vpop.f32.mrf.mxu3 }
 0x620   : > { %v4967_v16 = vpop.permute.xlu2 %4966  ;;  %v5209_v4 = vpop.f32.mrf.mxu3 }
 0x621   : > { %v5000_v43 = vsel %vm4908_vm1, %v4967_v16, 0.0 }
 0x622   : > { %v5016_v29 = vadd.f32 %v5000_v43, %v11575_v55  ;;  %v5192_v55 = vadd.f32 %v5191_v11, %v5126_v52 }
 0x624   : > { %5340 = vst.msk [vmem:[%s6611_s7 + $0x58] sm:$0xff] %vm5328_vm12, %v5016_v29 }
 0x627   : > { %v4957_v9 = vpop.permute.xlu0 %4956 }
 0x628   : > { %v5268_v0 = vpop.permute.xlu2 %5267  ;;  %v4998_v27 = vsel %vm4908_vm1, %v4957_v9, 0.0  ;;  %v5212_v40 = vpop.f32.mrf.mxu3 }
 0x629   : > { %v5305_v20 = vmul.f32 %v5268_v0, %v5198_v57  ;;  %v5014_v51 = vadd.f32 %v4998_v27, %v11545_v13  ;;  %v5195_v13 = vadd.f32 %v5194_v5, %v5129_v41 }
 0x62b   : > { %5322 = vst.msk [vmem:[%s6606_s10 + $0x50] sm:$0xff] %vm5311_vm13, %v5305_v20 }
 0x62c   : > { %5338 = vst.msk [vmem:[%s6611_s7 + $0x48] sm:$0xff] %vm5328_vm12, %v5014_v51 }
 0x62f   : > { %v4962_v60 = vpop.permute.xlu1 %4961  ;;  %v5258_v37 = vpop.permute.xlu0 %5257 }
 0x630   : > { %v4999_v62 = vsel %vm4908_vm1, %v4962_v60, 0.0  ;;  %v5303_v23 = vmul.f32 %v5258_v37, %v5192_v55 }
 0x631   : > { %v5015_v39 = vadd.f32 %v4999_v62, %v11560_v63  ;;  %v5141_v63 = vpop.f32.mrf.mxu2 }
 0x632   : > { %5320 = vst.msk [vmem:[%s6606_s10 + $0x40] sm:$0xff] %vm5311_vm13, %v5303_v23  ;;  %v5207_v31 = vadd.f32 %v5206_v46, %v5141_v63 }
 0x633   : > { %5339 = vst.msk [vmem:[%s6611_s7 + $0x50] sm:$0xff] %vm5328_vm12, %v5015_v39 }
 0x637   : > { %v5263_v36 = vpop.permute.xlu1 %5262 }
 0x638   : > { %v5304_v8 = vmul.f32 %v5263_v36, %v5195_v13 }
 0x639   : > { %v5144_v42 = vpop.f32.mrf.mxu2 }
 0x63a   : > { %v4982_v58 = vpop.permute.xlu2 %4981  ;;  %5321 = vst.msk [vmem:[%s6606_s10 + $0x48] sm:$0xff] %vm5311_vm13, %v5304_v8  ;;  %v5210_v28 = vadd.f32 %v5209_v4, %v5144_v42 }
 0x63b   : > { %v5003_v25 = vsel %vm4908_vm1, %v4982_v58, 0.0 }
 0x63c   : > { %v5019_v7 = vadd.f32 %v5003_v25, %v11608_v10  ;;  %v5201_v10 = vadd.f32 %v5200_v61, %v5135_v45 }
 0x63e   : > { %5343 = vst.msk [vmem:[%s6611_s7 + $0x70] sm:$0xff] %vm5328_vm12, %v5019_v7 }
 0x642   : > { %v5283_v49 = vpop.permute.xlu2 %5282  ;;  %v4972_v44 = vpop.permute.xlu0 %4971 }
 0x643   : > { %v5308_v17 = vmul.f32 %v5283_v49, %v5207_v31  ;;  %v5001_v54 = vsel %vm4908_vm1, %v4972_v44, 0.0 }
 0x644   : > { %v5017_v26 = vadd.f32 %v5001_v54, %v11543_v24 }
 0x645   : > { %5325 = vst.msk [vmem:[%s6606_s10 + $0x68] sm:$0xff] %vm5311_vm13, %v5308_v17 }
 0x646   : > { %5341 = vst.msk [vmem:[%s6611_s7 + $0x60] sm:$0xff] %vm5328_vm12, %v5017_v26 }
 0x64a   : > { %v4977_v30 = vpop.permute.xlu1 %4976  ;;  %v5273_v33 = vpop.permute.xlu0 %5272 }
 0x64b   : > { %v5002_v22 = vsel %vm4908_vm1, %v4977_v30, 0.0  ;;  %v5306_v47 = vmul.f32 %v5273_v33, %v5201_v10 }
 0x64c   : > { %v5018_v50 = vadd.f32 %v5002_v22, %v11577_v19  ;;  %v5147_v19 = vpop.f32.mrf.mxu2 }
 0x64d   : > { %5323 = vst.msk [vmem:[%s6606_s10 + $0x58] sm:$0xff] %vm5311_vm13, %v5306_v47  ;;  %v5213_v52 = vadd.f32 %v5212_v40, %v5147_v19 }
 0x64e   : > { %5342 = vst.msk [vmem:[%s6611_s7 + $0x68] sm:$0xff] %vm5328_vm12, %v5018_v50 }
 0x652   : > { %v5278_v24 = vpop.permute.xlu1 %5277 }
 0x653   : > { %v5307_v3 = vmul.f32 %v5278_v24, %v5204_v53 }
 0x655   : > { %5324 = vst.msk [vmem:[%s6606_s10 + $0x60] sm:$0xff] %vm5311_vm13, %v5307_v3 }
 0x66b   : > { %v4987_v56 = vpop.permute.xlu0 %4986 }
 0x66c   : > { %v5004_v18 = vsel %vm4908_vm1, %v4987_v56, 0.0 }
 0x66d   : > { %v5020_v34 = vadd.f32 %v5004_v18, %v11617_v12 }
 0x66f   : > { %5344 = vst.msk [vmem:[%s6611_s7 + $0x78] sm:$0xff] %vm5328_vm12, %v5020_v34 }
 0x673   : > { %v5288_v11 = vpop.permute.xlu0 %5287 }
 0x674   : > { %v5309_v32 = vmul.f32 %v5288_v11, %v5210_v28  ;;  %v5293_v21 = vpop.permute.xlu1 %5292 }
 0x675   : > { %v5310_v15 = vmul.f32 %v5293_v21, %v5213_v52 }
 0x676   : > { %5326 = vst.msk [vmem:[%s6606_s10 + $0x70] sm:$0xff] %vm5311_vm13, %v5309_v32 }
 0x677   : > { %5327 = vst.msk [vmem:[%s6606_s10 + $0x78] sm:$0xff] %vm5311_vm13, %v5310_v15 }
 0x678 PF: > { %s22_s15 = sadd.s32 1, %s6495_s15   ;;  %s12456_s22 = sld [smem:[#allocation5_spill]] }
 0x679   : > { %p19_p8 = scmp.ge.s32.totalorder %s22_s15, 6   ;;  %s12457_s7 = sld [smem:[#allocation6_spill]] }
 0x67a   : > { %s12458_s11 = smov %s6487_s13  ;;  %s12459_s12 = smov %s6491_s14 }
 0x67b   :  { %21 = sbr.rel (!%p19_p8) target bundleno = 3 (0x3), region = 101 }
 0x67e   : > { %s12460_s13 = smov %s12456_s22 }
 0x67f   : > { %s12461_s14 = smov %s12457_s7 }

</bundles_post_ra>
